<compile_context>
chip_gen: v5e
topology: v5e:2x2
jax: 0.10.0
libtpu: 0.0.40
codegen_flags: <defaults>
</compile_context>

<pallas_src>
import jax
import jax.numpy as jnp
from jax import lax
from jax.experimental import pallas as pl
from jax.experimental.pallas import tpu as pltpu


# -----------------------------------------------------------------------------
# Fused conv1 + conv2 (conv -> folded-BN -> ReLU -> 2x2 maxpool, twice).
# One program per batch block of BB images; everything between the im2col'd input
# and the pooled (7,7,128) output stays in VMEM.
# -----------------------------------------------------------------------------
def _fused_conv_kernel(p_ref, w1_ref, s1_ref, b1_ref, w2_ref, s2_ref, b2_ref,
                       o_ref, y1_scr, cat_scr, act2_scr):
    # p_ref:    (BB, 896, 9)   bf16 im2col patches, rows = h*32 + w (w in [0,28) valid)
    # w1_ref:   (9, 64)        bf16 conv1 weights, rows ordered kh*3+kw
    # s1_ref:   (1, 64)        f32 folded BN1 scale
    # b1_ref:   (1, 64)        f32 folded BN1 bias (includes conv bias)
    # w2_ref:   (3, 192, 128)  bf16 conv2 weights, [kh, kw*64+cin, cout]
    # s2_ref:   (1, 128)       f32 folded BN2 scale
    # b2_ref:   (1, 128)       f32 folded BN2 bias
    # o_ref:    (BB, 49, 128)  bf16 pooled conv2 output, rows = ph*7+pw (NHWC flatten)
    # y1_scr:   (BB*896, 64)   f32 conv1 post BN/ReLU
    # cat_scr:  (BB, 256, 192) bf16 tap-packed conv2 LHS, rows = r*16 + w
    # act2_scr: (BB*224, 128)  f32 conv2 post BN/ReLU, rows = h*16 + w
    f32 = jnp.float32
    bf16 = jnp.bfloat16
    BB = p_ref.shape[0]

    # ---- conv1: one (BB*896, 9) x (9, 64) bf16 MXU matmul + folded-BN + ReLU ----
    p = p_ref[...].reshape(BB * 896, 9)
    y1 = jnp.dot(p, w1_ref[...], preferred_element_type=f32)          # (BB*896, 64)
    y1 = jnp.maximum(y1 * s1_ref[...] + b1_ref[...], 0.0)
    y1_scr[...] = y1

    # ---- pool1 (2x2) fused with conv2-LHS tap packing ----
    # Zero the packed LHS every step: keeps pad rows/columns correct and stays
    # megacore-safe (each core has its own scratch instance).
    cat_scr[...] = jnp.zeros_like(cat_scr)

    # W-pool via stride-2 sublane loads (even/odd w interleave over the whole block).
    wp1 = jnp.maximum(y1_scr[pl.ds(0, BB * 448, 2), :],
                      y1_scr[pl.ds(1, BB * 448, 2), :])                # (BB*448, 64)
    wp1 = wp1.reshape(BB, 448, 64)                                     # rows = h*16+pw

    for ph in range(14):
        # H-pool: rows h=2*ph vs h=2*ph+1 (aligned 16-row blocks).
        pooled = jnp.maximum(wp1[:, 32 * ph:32 * ph + 16, :],
                             wp1[:, 32 * ph + 16:32 * ph + 32, :])     # (BB, 16, 64)
        pooled = pooled[:, 0:14, :].astype(bf16)                       # (BB, 14, 64)
        r = ph + 1                                                     # padded row idx
        # Three W-shifted writes = kw taps of the conv2 LHS (lane blocks of 64).
        cat_scr[:, 16 * r + 1:16 * r + 15, 0:64] = pooled      # kw = 0
        cat_scr[:, 16 * r:16 * r + 14, 64:128] = pooled        # kw = 1
        cat_scr[:, 16 * r - 1:16 * r + 13, 128:192] = pooled   # kw = 2

    # ---- conv2: 3 big bf16 MXU matmuls + aligned row-shifted adds + BN + ReLU ----
    cat = cat_scr[...].reshape(BB * 256, 192)                          # (BB*256, 192)
    pre = jnp.dot(cat, w2_ref[0],
                  preferred_element_type=f32).reshape(BB, 256, 128)[:, 0:224, :]
    pre = pre + jnp.dot(cat, w2_ref[1],
                        preferred_element_type=f32).reshape(BB, 256, 128)[:, 16:240, :]
    pre = pre + jnp.dot(cat, w2_ref[2],
                        preferred_element_type=f32).reshape(BB, 256, 128)[:, 32:256, :]
    act2 = jnp.maximum(pre * s2_ref[...] + b2_ref[...], 0.0)           # (BB, 224, 128)
    act2_scr[...] = act2.reshape(BB * 224, 128)

    # ---- pool2 (2x2) + NHWC-flattened store ----
    wp2 = jnp.maximum(act2_scr[pl.ds(0, BB * 112, 2), :],
                      act2_scr[pl.ds(1, BB * 112, 2), :])              # (BB*112, 128)
    wp2 = wp2.reshape(BB, 112, 128)                                    # rows = h*8+pw
    for ph in range(7):
        chunk = jnp.maximum(wp2[:, 16 * ph:16 * ph + 8, :],
                            wp2[:, 16 * ph + 8:16 * ph + 16, :])       # (BB, 8, 128)
        o_ref[:, 7 * ph:7 * ph + 7, :] = chunk[:, 0:7, :].astype(o_ref.dtype)


def fused_convs(patches, w1r, s1, b1, w2k, s2, b2, *, bb):
    """patches: (Npad, 896, 9) bf16. Returns pooled conv2 features (Npad, 49, 128) bf16."""
    n_pad = patches.shape[0]
    assert n_pad % bb == 0
    return pl.pallas_call(
        _fused_conv_kernel,
        out_shape=jax.ShapeDtypeStruct((n_pad, 49, 128), jnp.bfloat16),
        grid_spec=pltpu.PrefetchScalarGridSpec(
            num_scalar_prefetch=0,
            grid=(n_pad // bb,),
            in_specs=[
                pl.BlockSpec((bb, 896, 9), lambda i: (i, 0, 0)),
                pl.BlockSpec((9, 64), lambda i: (0, 0)),
                pl.BlockSpec((1, 64), lambda i: (0, 0)),
                pl.BlockSpec((1, 64), lambda i: (0, 0)),
                pl.BlockSpec((3, 192, 128), lambda i: (0, 0, 0)),
                pl.BlockSpec((1, 128), lambda i: (0, 0)),
                pl.BlockSpec((1, 128), lambda i: (0, 0)),
            ],
            out_specs=pl.BlockSpec((bb, 49, 128), lambda i: (i, 0, 0)),
            scratch_shapes=[
                pltpu.VMEM((bb * 896, 64), jnp.float32),    # conv1 post BN/ReLU
                pltpu.VMEM((bb, 256, 192), jnp.bfloat16),   # tap-packed conv2 LHS
                pltpu.VMEM((bb * 224, 128), jnp.float32),   # conv2 post BN/ReLU
            ],
        ),
        compiler_params=pltpu.CompilerParams(
            dimension_semantics=("parallel",),
            vmem_limit_bytes=32 * 1024 * 1024,
        ),
    )(patches, w1r, s1, b1, w2k, s2, b2)


# -----------------------------------------------------------------------------
# Dense head: Linear(6272 -> 1024) + ReLU + (Dropout = identity) + Linear(1024 -> 128pad)
# fc1 weight streamed in bf16, k-tiled with f32 VMEM accumulator; the hidden dim is
# split over a parallel grid axis (2 x 512) so both v7x cores work; each program
# emits a partial-logits block that the wrapper sums.
# -----------------------------------------------------------------------------
def _dense_kernel(x_ref, w1_ref, b1_ref, w2_ref, o_ref, h_acc):
    k = pl.program_id(1)

    @pl.when(k == 0)
    def _():
        h_acc[...] = jnp.zeros_like(h_acc)

    h_acc[...] += jnp.dot(x_ref[...], w1_ref[...],
                          preferred_element_type=jnp.float32)

    @pl.when(k == pl.num_programs(1) - 1)
    def _():
        # ReLU; Dropout is eval-mode identity.
        h = jnp.maximum(h_acc[...] + b1_ref[...], 0.0)
        o_ref[0, :, :] = jnp.dot(h, w2_ref[...], preferred_element_type=jnp.float32)


def dense_head(x_bf16, w1_bf16, b1_2d, w2_pad, *, tk=896, th=512):
    n, k1 = x_bf16.shape
    hid = w1_bf16.shape[1]
    assert k1 % tk == 0 and hid % th == 0 and tk % 128 == 0
    nj = hid // th
    return pl.pallas_call(
        _dense_kernel,
        out_shape=jax.ShapeDtypeStruct((nj, n, 128), jnp.float32),
        grid_spec=pltpu.PrefetchScalarGridSpec(
            num_scalar_prefetch=0,
            grid=(nj, k1 // tk),
            in_specs=[
                pl.BlockSpec((n, tk), lambda j, k: (0, k)),
                pl.BlockSpec((tk, th), lambda j, k: (k, j)),
                pl.BlockSpec((1, th), lambda j, k: (0, j)),
                pl.BlockSpec((th, 128), lambda j, k: (j, 0)),
            ],
            out_specs=pl.BlockSpec((1, n, 128), lambda j, k: (j, 0, 0)),
            scratch_shapes=[pltpu.VMEM((n, th), jnp.float32)],
        ),
        compiler_params=pltpu.CompilerParams(
            dimension_semantics=("parallel", "arbitrary"),
            vmem_limit_bytes=32 * 1024 * 1024,
        ),
    )(x_bf16, w1_bf16, b1_2d, w2_pad)


# -----------------------------------------------------------------------------
# Parameter preparation (one-time): BN folding, conv weight repacking (bf16),
# fc1 row permutation (NCHW-flatten -> NHWC-flatten) + bf16 cast, fc2 lane padding.
# -----------------------------------------------------------------------------
def _fold_bn(conv_bias, gamma, beta, mean, var, eps=1e-5):
    scale = gamma / jnp.sqrt(var + eps)
    bias = beta + (conv_bias - mean) * scale
    return scale.reshape(1, -1), bias.reshape(1, -1)


def prepare_params(p):
    s1, b1 = _fold_bn(p["conv1_b"], p["bn1_gamma"], p["bn1_beta"],
                      p["bn1_mean"], p["bn1_var"])
    s2, b2 = _fold_bn(p["conv2_b"], p["bn2_gamma"], p["bn2_beta"],
                      p["bn2_mean"], p["bn2_var"])
    w1r = p["conv1_w"].reshape(9, 64).astype(jnp.bfloat16)          # rows kh*3+kw
    w2k = p["conv2_w"].reshape(3, 192, 128).astype(jnp.bfloat16)    # [kh, kw*64+cin, cout]

    # Our flatten order is NHWC: f_ours = h*896 + w*128 + c.
    # Torch's x.view(-1, 7*7*128) is NCHW: f_torch = c*49 + h*7 + w.
    f = jnp.arange(7 * 7 * 128)
    h = f // (7 * 128)
    w = (f // 128) % 7
    c = f % 128
    perm = c * 49 + h * 7 + w
    fc1_w = jnp.take(p["fc1_w"], perm, axis=0).astype(jnp.bfloat16)

    fc2_w_pad = jnp.zeros((1024, 128), jnp.float32).at[:, :10].set(p["fc2_w"])

    return {
        "w1r": w1r, "s1": s1, "b1": b1,
        "w2k": w2k, "s2": s2, "b2": b2,
        "fc1_w": fc1_w, "fc1_b": p["fc1_b"].reshape(1, -1),
        "fc2_w_pad": fc2_w_pad, "fc2_b": p["fc2_b"],
    }


# -----------------------------------------------------------------------------
# Full forward pass.
# -----------------------------------------------------------------------------
@jax.jit
def cnn3_forward(x_nchw, prep):
    # x_nchw: (N, 1, 28, 28) float32
    n = x_nchw.shape[0]
    bb = min(8, n)
    n_pad = -(-n // bb) * bb

    x = x_nchw[:, 0]                                       # (N, 28, 28)
    if n_pad != n:
        x = jnp.pad(x, ((0, n_pad - n), (0, 0), (0, 0)))
    xp = jnp.pad(x, ((0, 0), (1, 1), (1, 1)))              # (Npad, 30, 30)
    # im2col for single-channel conv1: taps[n, h, w, kh*3+kw] = xp[n, h+kh, w+kw];
    # width padded 28 -> 32 so pooling / packing stays sublane-tile aligned in-kernel.
    taps = jnp.stack([xp[:, kh:kh + 28, kw:kw + 28]
                      for kh in range(3) for kw in range(3)], axis=-1)  # (Npad,28,28,9)
    taps = jnp.pad(taps, ((0, 0), (0, 0), (0, 4), (0, 0)))              # (Npad,28,32,9)
    patches = taps.reshape(n_pad, 28 * 32, 9).astype(jnp.bfloat16)

    h2 = fused_convs(patches, prep["w1r"], prep["s1"], prep["b1"],
                     prep["w2k"], prep["s2"], prep["b2"], bb=bb)   # (Npad,49,128) bf16

    flat = h2[:n].reshape(n, 49 * 128)                     # matches permuted fc1_w rows
    partial = dense_head(flat, prep["fc1_w"], prep["fc1_b"], prep["fc2_w_pad"])
    logits = partial.sum(axis=0)[:, :10] + prep["fc2_b"]
    return logits                                          # (N, 10)


# -----------------------------------------------------------------------------
# Pure-JAX f32 reference (mirrors the PyTorch module in eval mode) for validation.
# -----------------------------------------------------------------------------
def reference_forward(x, p):
    def bn(y, g, b, m, v, eps=1e-5):
        return ((y - m.reshape(1, -1, 1, 1)) / jnp.sqrt(v.reshape(1, -1, 1, 1) + eps)
                * g.reshape(1, -1, 1, 1) + b.reshape(1, -1, 1, 1))

    def pool(y):
        return lax.reduce_window(y, -jnp.inf, lax.max,
                                 (1, 1, 2, 2), (1, 1, 2, 2), "VALID")

    y = lax.conv_general_dilated(x, p["conv1_w"], (1, 1), "SAME",
                                 dimension_numbers=("NCHW", "HWIO", "NCHW"))
    y = y + p["conv1_b"].reshape(1, -1, 1, 1)
    y = pool(jnp.maximum(bn(y, p["bn1_gamma"], p["bn1_beta"],
                            p["bn1_mean"], p["bn1_var"]), 0.0))
    y = lax.conv_general_dilated(y, p["conv2_w"], (1, 1), "SAME",
                                 dimension_numbers=("NCHW", "HWIO", "NCHW"))
    y = y + p["conv2_b"].reshape(1, -1, 1, 1)
    y = pool(jnp.maximum(bn(y, p["bn2_gamma"], p["bn2_beta"],
                            p["bn2_mean"], p["bn2_var"]), 0.0))
    flat = y.reshape(y.shape[0], -1)                       # NCHW flatten (torch .view)
    h = jnp.maximum(flat @ p["fc1_w"] + p["fc1_b"], 0.0)
    return h @ p["fc2_w"] + p["fc2_b"]


def init_params(key):
    ks = jax.random.split(key, 12)
    f32 = jnp.float32
    return {
        "conv1_w": 0.1 * jax.random.normal(ks[0], (3, 3, 1, 64), f32),     # HWIO
        "conv1_b": 0.05 * jax.random.normal(ks[1], (64,), f32),
        "bn1_gamma": 1.0 + 0.05 * jax.random.normal(ks[2], (64,), f32),
        "bn1_beta": 0.05 * jax.random.normal(ks[3], (64,), f32),
        "bn1_mean": 0.05 * jax.random.normal(ks[4], (64,), f32),
        "bn1_var": 0.9 + 0.2 * jax.random.uniform(ks[5], (64,), f32),
        "conv2_w": 0.05 * jax.random.normal(ks[6], (3, 3, 64, 128), f32),  # HWIO
        "conv2_b": 0.05 * jax.random.normal(ks[7], (128,), f32),
        "bn2_gamma": 1.0 + 0.05 * jax.random.normal(ks[8], (128,), f32),
        "bn2_beta": 0.05 * jax.random.normal(ks[9], (128,), f32),
        "bn2_mean": 0.05 * jax.random.normal(ks[10], (128,), f32),
        "bn2_var": 0.9 + 0.2 * jax.random.uniform(ks[11], (128,), f32),
        # Linear weights stored as (in, out) == torch weight.T, rows in torch's
        # NCHW-flatten order (prepare_params permutes them to our NHWC order).
        "fc1_w": 0.02 * jax.random.normal(jax.random.fold_in(key, 101), (7 * 7 * 128, 1024), f32),
        "fc1_b": 0.02 * jax.random.normal(jax.random.fold_in(key, 102), (1024,), f32),
        "fc2_w": 0.05 * jax.random.normal(jax.random.fold_in(key, 103), (1024, 10), f32),
        "fc2_b": 0.05 * jax.random.normal(jax.random.fold_in(key, 104), (10,), f32),
    }


if __name__ == "__main__":
    key = jax.random.PRNGKey(0)
    kx, kp = jax.random.split(key)

    # MNIST-shaped input (the 7*7*128 flatten requires 28x28 spatial), batch=2, NCHW.
    x = jax.random.normal(kx, (2, 1, 28, 28), jnp.float32)
    params = init_params(kp)
    prep = prepare_params(params)          # one-time: BN fold, repack, bf16, fc2 pad

    logits = cnn3_forward(x, prep)
    logits = jax.block_until_ready(logits)

    assert logits.shape == (2, 10), logits.shape
    assert bool(jnp.all(jnp.isfinite(logits)))

    # Loose tolerance: kernel uses bf16 matmul operands (conv + fc1), reference is f32.
    ref = reference_forward(x, params)
    err = float(jnp.max(jnp.abs(logits - ref)))
    scale = float(jnp.max(jnp.abs(ref))) + 1e-6
    assert err <= 0.05 * scale + 0.05, (err, scale)

    print("KERNEL_OK")
</pallas_src>

<mosaic_0001>
module attributes {stable_mosaic.version = 11 : i64} {
  func.func @_fused_conv_kernel(%arg0: i32, %arg1: memref<2x896x9xbf16, #tpu.memory_space<vmem>>, %arg2: memref<9x64xbf16, #tpu.memory_space<vmem>>, %arg3: memref<1x64xf32, #tpu.memory_space<vmem>>, %arg4: memref<1x64xf32, #tpu.memory_space<vmem>>, %arg5: memref<3x192x128xbf16, #tpu.memory_space<vmem>>, %arg6: memref<1x128xf32, #tpu.memory_space<vmem>>, %arg7: memref<1x128xf32, #tpu.memory_space<vmem>>, %arg8: memref<2x49x128xbf16, #tpu.memory_space<vmem>>, %arg9: memref<1792x64xf32, #tpu.memory_space<vmem>>, %arg10: memref<2x256x192xbf16, #tpu.memory_space<vmem>>, %arg11: memref<448x128xf32, #tpu.memory_space<vmem>>) attributes {dimension_semantics = [#tpu.dimension_semantics<parallel>], iteration_bounds = array<i64: 1>, scalar_prefetch = 0 : i64, scratch_operands = 3 : i64, tpu.core_type = #tpu.core_type<tc>, window_params = [{transform_indices = @transform_0, window_bounds = array<i64: 2, 896, 9>}, {pipeline_mode = #tpu.pipeline_mode<synchronous>, transform_indices = @transform_1, window_bounds = array<i64: 9, 64>}, {pipeline_mode = #tpu.pipeline_mode<synchronous>, transform_indices = @transform_2, window_bounds = array<i64: 1, 64>}, {pipeline_mode = #tpu.pipeline_mode<synchronous>, transform_indices = @transform_3, window_bounds = array<i64: 1, 64>}, {pipeline_mode = #tpu.pipeline_mode<synchronous>, transform_indices = @transform_4, window_bounds = array<i64: 3, 192, 128>}, {pipeline_mode = #tpu.pipeline_mode<synchronous>, transform_indices = @transform_5, window_bounds = array<i64: 1, 128>}, {pipeline_mode = #tpu.pipeline_mode<synchronous>, transform_indices = @transform_6, window_bounds = array<i64: 1, 128>}, {transform_indices = @transform_7, window_bounds = array<i64: 2, 49, 128>}]} {
    %c0 = arith.constant 0 : index
    %c0_0 = arith.constant 0 : index
    %c0_1 = arith.constant 0 : index
    %0 = vector.load %arg1[%c0, %c0_0, %c0_1] : memref<2x896x9xbf16, #tpu.memory_space<vmem>>, vector<2x896x9xbf16>
    %1 = vector.shape_cast %0 : vector<2x896x9xbf16> to vector<1792x9xbf16>
    %c0_2 = arith.constant 0 : index
    %c0_3 = arith.constant 0 : index
    %2 = vector.load %arg2[%c0_2, %c0_3] : memref<9x64xbf16, #tpu.memory_space<vmem>>, vector<9x64xbf16>
    %cst = arith.constant dense<0.000000e+00> : vector<1792x64xf32>
    %3 = tpu.matmul %1, %2, %cst {dimension_numbers = #tpu.dot_dimension_numbers<[1], [0], [0], [1], [0, 0, 1, 1], [], []>} : vector<1792x9xbf16>, vector<9x64xbf16>, vector<1792x64xf32> -> vector<1792x64xf32>
    %c0_4 = arith.constant 0 : index
    %c0_5 = arith.constant 0 : index
    %4 = vector.load %arg3[%c0_4, %c0_5] : memref<1x64xf32, #tpu.memory_space<vmem>>, vector<1x64xf32>
    %5 = vector.broadcast %4 : vector<1x64xf32> to vector<1792x64xf32>
    %6 = arith.mulf %3, %5 : vector<1792x64xf32>
    %c0_6 = arith.constant 0 : index
    %c0_7 = arith.constant 0 : index
    %7 = vector.load %arg4[%c0_6, %c0_7] : memref<1x64xf32, #tpu.memory_space<vmem>>, vector<1x64xf32>
    %8 = vector.broadcast %7 : vector<1x64xf32> to vector<1792x64xf32>
    %9 = arith.addf %6, %8 : vector<1792x64xf32>
    %cst_8 = arith.constant 0.000000e+00 : f32
    %10 = vector.broadcast %cst_8 : f32 to vector<1792x64xf32>
    %11 = arith.maximumf %9, %10 : vector<1792x64xf32>
    %c0_9 = arith.constant 0 : index
    %c0_10 = arith.constant 0 : index
    %12 = vector.load %arg9[%c0_9, %c0_10] : memref<1792x64xf32, #tpu.memory_space<vmem>>, vector<1792x64xf32>
    tpu.vector_store %arg9[%c0_9, %c0_10], %11 {strides = array<i32>} : memref<1792x64xf32, #tpu.memory_space<vmem>>, vector<1792x64xf32>,
    %cst_11 = arith.constant 0.000000e+00 : bf16
    %13 = vector.broadcast %cst_11 : bf16 to vector<2x256x192xbf16>
    %c0_12 = arith.constant 0 : index
    %c0_13 = arith.constant 0 : index
    %c0_14 = arith.constant 0 : index
    %14 = vector.load %arg10[%c0_12, %c0_13, %c0_14] : memref<2x256x192xbf16, #tpu.memory_space<vmem>>, vector<2x256x192xbf16>
    tpu.vector_store %arg10[%c0_12, %c0_13, %c0_14], %13 {strides = array<i32>} : memref<2x256x192xbf16, #tpu.memory_space<vmem>>, vector<2x256x192xbf16>,
    %c0_15 = arith.constant 0 : index
    %c0_16 = arith.constant 0 : index
    %15 = tpu.strided_load %arg9[%c0_15, %c0_16] {strides = array<i32: 2, 1>} : memref<1792x64xf32, #tpu.memory_space<vmem>>, vector<896x64xf32>
    %c1 = arith.constant 1 : index
    %c0_17 = arith.constant 0 : index
    %16 = tpu.strided_load %arg9[%c1, %c0_17] {strides = array<i32: 2, 1>} : memref<1792x64xf32, #tpu.memory_space<vmem>>, vector<896x64xf32>
    %17 = arith.maximumf %15, %16 : vector<896x64xf32>
    %18 = vector.shape_cast %17 : vector<896x64xf32> to vector<2x448x64xf32>
    %19 = vector.extract_strided_slice %18 {offsets = [0, 0, 0], sizes = [2, 16, 64], strides = [1, 1, 1]} : vector<2x448x64xf32> to vector<2x16x64xf32>
    %20 = vector.extract_strided_slice %18 {offsets = [0, 16, 0], sizes = [2, 16, 64], strides = [1, 1, 1]} : vector<2x448x64xf32> to vector<2x16x64xf32>
    %21 = arith.maximumf %19, %20 : vector<2x16x64xf32>
    %22 = vector.extract_strided_slice %21 {offsets = [0, 0, 0], sizes = [2, 14, 64], strides = [1, 1, 1]} : vector<2x16x64xf32> to vector<2x14x64xf32>
    %23 = arith.truncf %22 : vector<2x14x64xf32> to vector<2x14x64xbf16>
    %c0_18 = arith.constant 0 : index
    %c17 = arith.constant 17 : index
    %c0_19 = arith.constant 0 : index
    %24 = vector.load %arg10[%c0_18, %c17, %c0_19] : memref<2x256x192xbf16, #tpu.memory_space<vmem>>, vector<2x14x64xbf16>
    tpu.vector_store %arg10[%c0_18, %c17, %c0_19], %23 {strides = array<i32>} : memref<2x256x192xbf16, #tpu.memory_space<vmem>>, vector<2x14x64xbf16>,
    %c0_20 = arith.constant 0 : index
    %c16 = arith.constant 16 : index
    %c64 = arith.constant 64 : index
    %25 = vector.load %arg10[%c0_20, %c16, %c64] : memref<2x256x192xbf16, #tpu.memory_space<vmem>>, vector<2x14x64xbf16>
    tpu.vector_store %arg10[%c0_20, %c16, %c64], %23 {strides = array<i32>} : memref<2x256x192xbf16, #tpu.memory_space<vmem>>, vector<2x14x64xbf16>,
    %c0_21 = arith.constant 0 : index
    %c15 = arith.constant 15 : index
    %c128 = arith.constant 128 : index
    %26 = vector.load %arg10[%c0_21, %c15, %c128] : memref<2x256x192xbf16, #tpu.memory_space<vmem>>, vector<2x14x64xbf16>
    tpu.vector_store %arg10[%c0_21, %c15, %c128], %23 {strides = array<i32>} : memref<2x256x192xbf16, #tpu.memory_space<vmem>>, vector<2x14x64xbf16>,
    %27 = vector.extract_strided_slice %18 {offsets = [0, 32, 0], sizes = [2, 16, 64], strides = [1, 1, 1]} : vector<2x448x64xf32> to vector<2x16x64xf32>
    %28 = vector.extract_strided_slice %18 {offsets = [0, 48, 0], sizes = [2, 16, 64], strides = [1, 1, 1]} : vector<2x448x64xf32> to vector<2x16x64xf32>
    %29 = arith.maximumf %27, %28 : vector<2x16x64xf32>
    %30 = vector.extract_strided_slice %29 {offsets = [0, 0, 0], sizes = [2, 14, 64], strides = [1, 1, 1]} : vector<2x16x64xf32> to vector<2x14x64xf32>
    %31 = arith.truncf %30 : vector<2x14x64xf32> to vector<2x14x64xbf16>
    %c0_22 = arith.constant 0 : index
    %c33 = arith.constant 33 : index
    %c0_23 = arith.constant 0 : index
    %32 = vector.load %arg10[%c0_22, %c33, %c0_23] : memref<2x256x192xbf16, #tpu.memory_space<vmem>>, vector<2x14x64xbf16>
    tpu.vector_store %arg10[%c0_22, %c33, %c0_23], %31 {strides = array<i32>} : memref<2x256x192xbf16, #tpu.memory_space<vmem>>, vector<2x14x64xbf16>,
    %c0_24 = arith.constant 0 : index
    %c32 = arith.constant 32 : index
    %c64_25 = arith.constant 64 : index
    %33 = vector.load %arg10[%c0_24, %c32, %c64_25] : memref<2x256x192xbf16, #tpu.memory_space<vmem>>, vector<2x14x64xbf16>
    tpu.vector_store %arg10[%c0_24, %c32, %c64_25], %31 {strides = array<i32>} : memref<2x256x192xbf16, #tpu.memory_space<vmem>>, vector<2x14x64xbf16>,
    %c0_26 = arith.constant 0 : index
    %c31 = arith.constant 31 : index
    %c128_27 = arith.constant 128 : index
    %34 = vector.load %arg10[%c0_26, %c31, %c128_27] : memref<2x256x192xbf16, #tpu.memory_space<vmem>>, vector<2x14x64xbf16>
    tpu.vector_store %arg10[%c0_26, %c31, %c128_27], %31 {strides = array<i32>} : memref<2x256x192xbf16, #tpu.memory_space<vmem>>, vector<2x14x64xbf16>,
    %35 = vector.extract_strided_slice %18 {offsets = [0, 64, 0], sizes = [2, 16, 64], strides = [1, 1, 1]} : vector<2x448x64xf32> to vector<2x16x64xf32>
    %36 = vector.extract_strided_slice %18 {offsets = [0, 80, 0], sizes = [2, 16, 64], strides = [1, 1, 1]} : vector<2x448x64xf32> to vector<2x16x64xf32>
    %37 = arith.maximumf %35, %36 : vector<2x16x64xf32>
    %38 = vector.extract_strided_slice %37 {offsets = [0, 0, 0], sizes = [2, 14, 64], strides = [1, 1, 1]} : vector<2x16x64xf32> to vector<2x14x64xf32>
    %39 = arith.truncf %38 : vector<2x14x64xf32> to vector<2x14x64xbf16>
    %c0_28 = arith.constant 0 : index
    %c49 = arith.constant 49 : index
    %c0_29 = arith.constant 0 : index
    %40 = vector.load %arg10[%c0_28, %c49, %c0_29] : memref<2x256x192xbf16, #tpu.memory_space<vmem>>, vector<2x14x64xbf16>
    tpu.vector_store %arg10[%c0_28, %c49, %c0_29], %39 {strides = array<i32>} : memref<2x256x192xbf16, #tpu.memory_space<vmem>>, vector<2x14x64xbf16>,
    %c0_30 = arith.constant 0 : index
    %c48 = arith.constant 48 : index
    %c64_31 = arith.constant 64 : index
    %41 = vector.load %arg10[%c0_30, %c48, %c64_31] : memref<2x256x192xbf16, #tpu.memory_space<vmem>>, vector<2x14x64xbf16>
    tpu.vector_store %arg10[%c0_30, %c48, %c64_31], %39 {strides = array<i32>} : memref<2x256x192xbf16, #tpu.memory_space<vmem>>, vector<2x14x64xbf16>,
    %c0_32 = arith.constant 0 : index
    %c47 = arith.constant 47 : index
    %c128_33 = arith.constant 128 : index
    %42 = vector.load %arg10[%c0_32, %c47, %c128_33] : memref<2x256x192xbf16, #tpu.memory_space<vmem>>, vector<2x14x64xbf16>
    tpu.vector_store %arg10[%c0_32, %c47, %c128_33], %39 {strides = array<i32>} : memref<2x256x192xbf16, #tpu.memory_space<vmem>>, vector<2x14x64xbf16>,
    %43 = vector.extract_strided_slice %18 {offsets = [0, 96, 0], sizes = [2, 16, 64], strides = [1, 1, 1]} : vector<2x448x64xf32> to vector<2x16x64xf32>
    %44 = vector.extract_strided_slice %18 {offsets = [0, 112, 0], sizes = [2, 16, 64], strides = [1, 1, 1]} : vector<2x448x64xf32> to vector<2x16x64xf32>
    %45 = arith.maximumf %43, %44 : vector<2x16x64xf32>
    %46 = vector.extract_strided_slice %45 {offsets = [0, 0, 0], sizes = [2, 14, 64], strides = [1, 1, 1]} : vector<2x16x64xf32> to vector<2x14x64xf32>
    %47 = arith.truncf %46 : vector<2x14x64xf32> to vector<2x14x64xbf16>
    %c0_34 = arith.constant 0 : index
    %c65 = arith.constant 65 : index
    %c0_35 = arith.constant 0 : index
    %48 = vector.load %arg10[%c0_34, %c65, %c0_35] : memref<2x256x192xbf16, #tpu.memory_space<vmem>>, vector<2x14x64xbf16>
    tpu.vector_store %arg10[%c0_34, %c65, %c0_35], %47 {strides = array<i32>} : memref<2x256x192xbf16, #tpu.memory_space<vmem>>, vector<2x14x64xbf16>,
    %c0_36 = arith.constant 0 : index
    %c64_37 = arith.constant 64 : index
    %c64_38 = arith.constant 64 : index
    %49 = vector.load %arg10[%c0_36, %c64_37, %c64_38] : memref<2x256x192xbf16, #tpu.memory_space<vmem>>, vector<2x14x64xbf16>
    tpu.vector_store %arg10[%c0_36, %c64_37, %c64_38], %47 {strides = array<i32>} : memref<2x256x192xbf16, #tpu.memory_space<vmem>>, vector<2x14x64xbf16>,
    %c0_39 = arith.constant 0 : index
    %c63 = arith.constant 63 : index
    %c128_40 = arith.constant 128 : index
    %50 = vector.load %arg10[%c0_39, %c63, %c128_40] : memref<2x256x192xbf16, #tpu.memory_space<vmem>>, vector<2x14x64xbf16>
    tpu.vector_store %arg10[%c0_39, %c63, %c128_40], %47 {strides = array<i32>} : memref<2x256x192xbf16, #tpu.memory_space<vmem>>, vector<2x14x64xbf16>,
    %51 = vector.extract_strided_slice %18 {offsets = [0, 128, 0], sizes = [2, 16, 64], strides = [1, 1, 1]} : vector<2x448x64xf32> to vector<2x16x64xf32>
    %52 = vector.extract_strided_slice %18 {offsets = [0, 144, 0], sizes = [2, 16, 64], strides = [1, 1, 1]} : vector<2x448x64xf32> to vector<2x16x64xf32>
    %53 = arith.maximumf %51, %52 : vector<2x16x64xf32>
    %54 = vector.extract_strided_slice %53 {offsets = [0, 0, 0], sizes = [2, 14, 64], strides = [1, 1, 1]} : vector<2x16x64xf32> to vector<2x14x64xf32>
    %55 = arith.truncf %54 : vector<2x14x64xf32> to vector<2x14x64xbf16>
    %c0_41 = arith.constant 0 : index
    %c81 = arith.constant 81 : index
    %c0_42 = arith.constant 0 : index
    %56 = vector.load %arg10[%c0_41, %c81, %c0_42] : memref<2x256x192xbf16, #tpu.memory_space<vmem>>, vector<2x14x64xbf16>
    tpu.vector_store %arg10[%c0_41, %c81, %c0_42], %55 {strides = array<i32>} : memref<2x256x192xbf16, #tpu.memory_space<vmem>>, vector<2x14x64xbf16>,
    %c0_43 = arith.constant 0 : index
    %c80 = arith.constant 80 : index
    %c64_44 = arith.constant 64 : index
    %57 = vector.load %arg10[%c0_43, %c80, %c64_44] : memref<2x256x192xbf16, #tpu.memory_space<vmem>>, vector<2x14x64xbf16>
    tpu.vector_store %arg10[%c0_43, %c80, %c64_44], %55 {strides = array<i32>} : memref<2x256x192xbf16, #tpu.memory_space<vmem>>, vector<2x14x64xbf16>,
    %c0_45 = arith.constant 0 : index
    %c79 = arith.constant 79 : index
    %c128_46 = arith.constant 128 : index
    %58 = vector.load %arg10[%c0_45, %c79, %c128_46] : memref<2x256x192xbf16, #tpu.memory_space<vmem>>, vector<2x14x64xbf16>
    tpu.vector_store %arg10[%c0_45, %c79, %c128_46], %55 {strides = array<i32>} : memref<2x256x192xbf16, #tpu.memory_space<vmem>>, vector<2x14x64xbf16>,
    %59 = vector.extract_strided_slice %18 {offsets = [0, 160, 0], sizes = [2, 16, 64], strides = [1, 1, 1]} : vector<2x448x64xf32> to vector<2x16x64xf32>
    %60 = vector.extract_strided_slice %18 {offsets = [0, 176, 0], sizes = [2, 16, 64], strides = [1, 1, 1]} : vector<2x448x64xf32> to vector<2x16x64xf32>
    %61 = arith.maximumf %59, %60 : vector<2x16x64xf32>
    %62 = vector.extract_strided_slice %61 {offsets = [0, 0, 0], sizes = [2, 14, 64], strides = [1, 1, 1]} : vector<2x16x64xf32> to vector<2x14x64xf32>
    %63 = arith.truncf %62 : vector<2x14x64xf32> to vector<2x14x64xbf16>
    %c0_47 = arith.constant 0 : index
    %c97 = arith.constant 97 : index
    %c0_48 = arith.constant 0 : index
    %64 = vector.load %arg10[%c0_47, %c97, %c0_48] : memref<2x256x192xbf16, #tpu.memory_space<vmem>>, vector<2x14x64xbf16>
    tpu.vector_store %arg10[%c0_47, %c97, %c0_48], %63 {strides = array<i32>} : memref<2x256x192xbf16, #tpu.memory_space<vmem>>, vector<2x14x64xbf16>,
    %c0_49 = arith.constant 0 : index
    %c96 = arith.constant 96 : index
    %c64_50 = arith.constant 64 : index
    %65 = vector.load %arg10[%c0_49, %c96, %c64_50] : memref<2x256x192xbf16, #tpu.memory_space<vmem>>, vector<2x14x64xbf16>
    tpu.vector_store %arg10[%c0_49, %c96, %c64_50], %63 {strides = array<i32>} : memref<2x256x192xbf16, #tpu.memory_space<vmem>>, vector<2x14x64xbf16>,
    %c0_51 = arith.constant 0 : index
    %c95 = arith.constant 95 : index
    %c128_52 = arith.constant 128 : index
    %66 = vector.load %arg10[%c0_51, %c95, %c128_52] : memref<2x256x192xbf16, #tpu.memory_space<vmem>>, vector<2x14x64xbf16>
    tpu.vector_store %arg10[%c0_51, %c95, %c128_52], %63 {strides = array<i32>} : memref<2x256x192xbf16, #tpu.memory_space<vmem>>, vector<2x14x64xbf16>,
    %67 = vector.extract_strided_slice %18 {offsets = [0, 192, 0], sizes = [2, 16, 64], strides = [1, 1, 1]} : vector<2x448x64xf32> to vector<2x16x64xf32>
    %68 = vector.extract_strided_slice %18 {offsets = [0, 208, 0], sizes = [2, 16, 64], strides = [1, 1, 1]} : vector<2x448x64xf32> to vector<2x16x64xf32>
    %69 = arith.maximumf %67, %68 : vector<2x16x64xf32>
    %70 = vector.extract_strided_slice %69 {offsets = [0, 0, 0], sizes = [2, 14, 64], strides = [1, 1, 1]} : vector<2x16x64xf32> to vector<2x14x64xf32>
    %71 = arith.truncf %70 : vector<2x14x64xf32> to vector<2x14x64xbf16>
    %c0_53 = arith.constant 0 : index
    %c113 = arith.constant 113 : index
    %c0_54 = arith.constant 0 : index
    %72 = vector.load %arg10[%c0_53, %c113, %c0_54] : memref<2x256x192xbf16, #tpu.memory_space<vmem>>, vector<2x14x64xbf16>
    tpu.vector_store %arg10[%c0_53, %c113, %c0_54], %71 {strides = array<i32>} : memref<2x256x192xbf16, #tpu.memory_space<vmem>>, vector<2x14x64xbf16>,
    %c0_55 = arith.constant 0 : index
    %c112 = arith.constant 112 : index
    %c64_56 = arith.constant 64 : index
    %73 = vector.load %arg10[%c0_55, %c112, %c64_56] : memref<2x256x192xbf16, #tpu.memory_space<vmem>>, vector<2x14x64xbf16>
    tpu.vector_store %arg10[%c0_55, %c112, %c64_56], %71 {strides = array<i32>} : memref<2x256x192xbf16, #tpu.memory_space<vmem>>, vector<2x14x64xbf16>,
    %c0_57 = arith.constant 0 : index
    %c111 = arith.constant 111 : index
    %c128_58 = arith.constant 128 : index
    %74 = vector.load %arg10[%c0_57, %c111, %c128_58] : memref<2x256x192xbf16, #tpu.memory_space<vmem>>, vector<2x14x64xbf16>
    tpu.vector_store %arg10[%c0_57, %c111, %c128_58], %71 {strides = array<i32>} : memref<2x256x192xbf16, #tpu.memory_space<vmem>>, vector<2x14x64xbf16>,
    %75 = vector.extract_strided_slice %18 {offsets = [0, 224, 0], sizes = [2, 16, 64], strides = [1, 1, 1]} : vector<2x448x64xf32> to vector<2x16x64xf32>
    %76 = vector.extract_strided_slice %18 {offsets = [0, 240, 0], sizes = [2, 16, 64], strides = [1, 1, 1]} : vector<2x448x64xf32> to vector<2x16x64xf32>
    %77 = arith.maximumf %75, %76 : vector<2x16x64xf32>
    %78 = vector.extract_strided_slice %77 {offsets = [0, 0, 0], sizes = [2, 14, 64], strides = [1, 1, 1]} : vector<2x16x64xf32> to vector<2x14x64xf32>
    %79 = arith.truncf %78 : vector<2x14x64xf32> to vector<2x14x64xbf16>
    %c0_59 = arith.constant 0 : index
    %c129 = arith.constant 129 : index
    %c0_60 = arith.constant 0 : index
    %80 = vector.load %arg10[%c0_59, %c129, %c0_60] : memref<2x256x192xbf16, #tpu.memory_space<vmem>>, vector<2x14x64xbf16>
    tpu.vector_store %arg10[%c0_59, %c129, %c0_60], %79 {strides = array<i32>} : memref<2x256x192xbf16, #tpu.memory_space<vmem>>, vector<2x14x64xbf16>,
    %c0_61 = arith.constant 0 : index
    %c128_62 = arith.constant 128 : index
    %c64_63 = arith.constant 64 : index
    %81 = vector.load %arg10[%c0_61, %c128_62, %c64_63] : memref<2x256x192xbf16, #tpu.memory_space<vmem>>, vector<2x14x64xbf16>
    tpu.vector_store %arg10[%c0_61, %c128_62, %c64_63], %79 {strides = array<i32>} : memref<2x256x192xbf16, #tpu.memory_space<vmem>>, vector<2x14x64xbf16>,
    %c0_64 = arith.constant 0 : index
    %c127 = arith.constant 127 : index
    %c128_65 = arith.constant 128 : index
    %82 = vector.load %arg10[%c0_64, %c127, %c128_65] : memref<2x256x192xbf16, #tpu.memory_space<vmem>>, vector<2x14x64xbf16>
    tpu.vector_store %arg10[%c0_64, %c127, %c128_65], %79 {strides = array<i32>} : memref<2x256x192xbf16, #tpu.memory_space<vmem>>, vector<2x14x64xbf16>,
    %83 = vector.extract_strided_slice %18 {offsets = [0, 256, 0], sizes = [2, 16, 64], strides = [1, 1, 1]} : vector<2x448x64xf32> to vector<2x16x64xf32>
    %84 = vector.extract_strided_slice %18 {offsets = [0, 272, 0], sizes = [2, 16, 64], strides = [1, 1, 1]} : vector<2x448x64xf32> to vector<2x16x64xf32>
    %85 = arith.maximumf %83, %84 : vector<2x16x64xf32>
    %86 = vector.extract_strided_slice %85 {offsets = [0, 0, 0], sizes = [2, 14, 64], strides = [1, 1, 1]} : vector<2x16x64xf32> to vector<2x14x64xf32>
    %87 = arith.truncf %86 : vector<2x14x64xf32> to vector<2x14x64xbf16>
    %c0_66 = arith.constant 0 : index
    %c145 = arith.constant 145 : index
    %c0_67 = arith.constant 0 : index
    %88 = vector.load %arg10[%c0_66, %c145, %c0_67] : memref<2x256x192xbf16, #tpu.memory_space<vmem>>, vector<2x14x64xbf16>
    tpu.vector_store %arg10[%c0_66, %c145, %c0_67], %87 {strides = array<i32>} : memref<2x256x192xbf16, #tpu.memory_space<vmem>>, vector<2x14x64xbf16>,
    %c0_68 = arith.constant 0 : index
    %c144 = arith.constant 144 : index
    %c64_69 = arith.constant 64 : index
    %89 = vector.load %arg10[%c0_68, %c144, %c64_69] : memref<2x256x192xbf16, #tpu.memory_space<vmem>>, vector<2x14x64xbf16>
    tpu.vector_store %arg10[%c0_68, %c144, %c64_69], %87 {strides = array<i32>} : memref<2x256x192xbf16, #tpu.memory_space<vmem>>, vector<2x14x64xbf16>,
    %c0_70 = arith.constant 0 : index
    %c143 = arith.constant 143 : index
    %c128_71 = arith.constant 128 : index
    %90 = vector.load %arg10[%c0_70, %c143, %c128_71] : memref<2x256x192xbf16, #tpu.memory_space<vmem>>, vector<2x14x64xbf16>
    tpu.vector_store %arg10[%c0_70, %c143, %c128_71], %87 {strides = array<i32>} : memref<2x256x192xbf16, #tpu.memory_space<vmem>>, vector<2x14x64xbf16>,
    %91 = vector.extract_strided_slice %18 {offsets = [0, 288, 0], sizes = [2, 16, 64], strides = [1, 1, 1]} : vector<2x448x64xf32> to vector<2x16x64xf32>
    %92 = vector.extract_strided_slice %18 {offsets = [0, 304, 0], sizes = [2, 16, 64], strides = [1, 1, 1]} : vector<2x448x64xf32> to vector<2x16x64xf32>
    %93 = arith.maximumf %91, %92 : vector<2x16x64xf32>
    %94 = vector.extract_strided_slice %93 {offsets = [0, 0, 0], sizes = [2, 14, 64], strides = [1, 1, 1]} : vector<2x16x64xf32> to vector<2x14x64xf32>
    %95 = arith.truncf %94 : vector<2x14x64xf32> to vector<2x14x64xbf16>
    %c0_72 = arith.constant 0 : index
    %c161 = arith.constant 161 : index
    %c0_73 = arith.constant 0 : index
    %96 = vector.load %arg10[%c0_72, %c161, %c0_73] : memref<2x256x192xbf16, #tpu.memory_space<vmem>>, vector<2x14x64xbf16>
    tpu.vector_store %arg10[%c0_72, %c161, %c0_73], %95 {strides = array<i32>} : memref<2x256x192xbf16, #tpu.memory_space<vmem>>, vector<2x14x64xbf16>,
    %c0_74 = arith.constant 0 : index
    %c160 = arith.constant 160 : index
    %c64_75 = arith.constant 64 : index
    %97 = vector.load %arg10[%c0_74, %c160, %c64_75] : memref<2x256x192xbf16, #tpu.memory_space<vmem>>, vector<2x14x64xbf16>
    tpu.vector_store %arg10[%c0_74, %c160, %c64_75], %95 {strides = array<i32>} : memref<2x256x192xbf16, #tpu.memory_space<vmem>>, vector<2x14x64xbf16>,
    %c0_76 = arith.constant 0 : index
    %c159 = arith.constant 159 : index
    %c128_77 = arith.constant 128 : index
    %98 = vector.load %arg10[%c0_76, %c159, %c128_77] : memref<2x256x192xbf16, #tpu.memory_space<vmem>>, vector<2x14x64xbf16>
    tpu.vector_store %arg10[%c0_76, %c159, %c128_77], %95 {strides = array<i32>} : memref<2x256x192xbf16, #tpu.memory_space<vmem>>, vector<2x14x64xbf16>,
    %99 = vector.extract_strided_slice %18 {offsets = [0, 320, 0], sizes = [2, 16, 64], strides = [1, 1, 1]} : vector<2x448x64xf32> to vector<2x16x64xf32>
    %100 = vector.extract_strided_slice %18 {offsets = [0, 336, 0], sizes = [2, 16, 64], strides = [1, 1, 1]} : vector<2x448x64xf32> to vector<2x16x64xf32>
    %101 = arith.maximumf %99, %100 : vector<2x16x64xf32>
    %102 = vector.extract_strided_slice %101 {offsets = [0, 0, 0], sizes = [2, 14, 64], strides = [1, 1, 1]} : vector<2x16x64xf32> to vector<2x14x64xf32>
    %103 = arith.truncf %102 : vector<2x14x64xf32> to vector<2x14x64xbf16>
    %c0_78 = arith.constant 0 : index
    %c177 = arith.constant 177 : index
    %c0_79 = arith.constant 0 : index
    %104 = vector.load %arg10[%c0_78, %c177, %c0_79] : memref<2x256x192xbf16, #tpu.memory_space<vmem>>, vector<2x14x64xbf16>
    tpu.vector_store %arg10[%c0_78, %c177, %c0_79], %103 {strides = array<i32>} : memref<2x256x192xbf16, #tpu.memory_space<vmem>>, vector<2x14x64xbf16>,
    %c0_80 = arith.constant 0 : index
    %c176 = arith.constant 176 : index
    %c64_81 = arith.constant 64 : index
    %105 = vector.load %arg10[%c0_80, %c176, %c64_81] : memref<2x256x192xbf16, #tpu.memory_space<vmem>>, vector<2x14x64xbf16>
    tpu.vector_store %arg10[%c0_80, %c176, %c64_81], %103 {strides = array<i32>} : memref<2x256x192xbf16, #tpu.memory_space<vmem>>, vector<2x14x64xbf16>,
    %c0_82 = arith.constant 0 : index
    %c175 = arith.constant 175 : index
    %c128_83 = arith.constant 128 : index
    %106 = vector.load %arg10[%c0_82, %c175, %c128_83] : memref<2x256x192xbf16, #tpu.memory_space<vmem>>, vector<2x14x64xbf16>
    tpu.vector_store %arg10[%c0_82, %c175, %c128_83], %103 {strides = array<i32>} : memref<2x256x192xbf16, #tpu.memory_space<vmem>>, vector<2x14x64xbf16>,
    %107 = vector.extract_strided_slice %18 {offsets = [0, 352, 0], sizes = [2, 16, 64], strides = [1, 1, 1]} : vector<2x448x64xf32> to vector<2x16x64xf32>
    %108 = vector.extract_strided_slice %18 {offsets = [0, 368, 0], sizes = [2, 16, 64], strides = [1, 1, 1]} : vector<2x448x64xf32> to vector<2x16x64xf32>
    %109 = arith.maximumf %107, %108 : vector<2x16x64xf32>
    %110 = vector.extract_strided_slice %109 {offsets = [0, 0, 0], sizes = [2, 14, 64], strides = [1, 1, 1]} : vector<2x16x64xf32> to vector<2x14x64xf32>
    %111 = arith.truncf %110 : vector<2x14x64xf32> to vector<2x14x64xbf16>
    %c0_84 = arith.constant 0 : index
    %c193 = arith.constant 193 : index
    %c0_85 = arith.constant 0 : index
    %112 = vector.load %arg10[%c0_84, %c193, %c0_85] : memref<2x256x192xbf16, #tpu.memory_space<vmem>>, vector<2x14x64xbf16>
    tpu.vector_store %arg10[%c0_84, %c193, %c0_85], %111 {strides = array<i32>} : memref<2x256x192xbf16, #tpu.memory_space<vmem>>, vector<2x14x64xbf16>,
    %c0_86 = arith.constant 0 : index
    %c192 = arith.constant 192 : index
    %c64_87 = arith.constant 64 : index
    %113 = vector.load %arg10[%c0_86, %c192, %c64_87] : memref<2x256x192xbf16, #tpu.memory_space<vmem>>, vector<2x14x64xbf16>
    tpu.vector_store %arg10[%c0_86, %c192, %c64_87], %111 {strides = array<i32>} : memref<2x256x192xbf16, #tpu.memory_space<vmem>>, vector<2x14x64xbf16>,
    %c0_88 = arith.constant 0 : index
    %c191 = arith.constant 191 : index
    %c128_89 = arith.constant 128 : index
    %114 = vector.load %arg10[%c0_88, %c191, %c128_89] : memref<2x256x192xbf16, #tpu.memory_space<vmem>>, vector<2x14x64xbf16>
    tpu.vector_store %arg10[%c0_88, %c191, %c128_89], %111 {strides = array<i32>} : memref<2x256x192xbf16, #tpu.memory_space<vmem>>, vector<2x14x64xbf16>,
    %115 = vector.extract_strided_slice %18 {offsets = [0, 384, 0], sizes = [2, 16, 64], strides = [1, 1, 1]} : vector<2x448x64xf32> to vector<2x16x64xf32>
    %116 = vector.extract_strided_slice %18 {offsets = [0, 400, 0], sizes = [2, 16, 64], strides = [1, 1, 1]} : vector<2x448x64xf32> to vector<2x16x64xf32>
    %117 = arith.maximumf %115, %116 : vector<2x16x64xf32>
    %118 = vector.extract_strided_slice %117 {offsets = [0, 0, 0], sizes = [2, 14, 64], strides = [1, 1, 1]} : vector<2x16x64xf32> to vector<2x14x64xf32>
    %119 = arith.truncf %118 : vector<2x14x64xf32> to vector<2x14x64xbf16>
    %c0_90 = arith.constant 0 : index
    %c209 = arith.constant 209 : index
    %c0_91 = arith.constant 0 : index
    %120 = vector.load %arg10[%c0_90, %c209, %c0_91] : memref<2x256x192xbf16, #tpu.memory_space<vmem>>, vector<2x14x64xbf16>
    tpu.vector_store %arg10[%c0_90, %c209, %c0_91], %119 {strides = array<i32>} : memref<2x256x192xbf16, #tpu.memory_space<vmem>>, vector<2x14x64xbf16>,
    %c0_92 = arith.constant 0 : index
    %c208 = arith.constant 208 : index
    %c64_93 = arith.constant 64 : index
    %121 = vector.load %arg10[%c0_92, %c208, %c64_93] : memref<2x256x192xbf16, #tpu.memory_space<vmem>>, vector<2x14x64xbf16>
    tpu.vector_store %arg10[%c0_92, %c208, %c64_93], %119 {strides = array<i32>} : memref<2x256x192xbf16, #tpu.memory_space<vmem>>, vector<2x14x64xbf16>,
    %c0_94 = arith.constant 0 : index
    %c207 = arith.constant 207 : index
    %c128_95 = arith.constant 128 : index
    %122 = vector.load %arg10[%c0_94, %c207, %c128_95] : memref<2x256x192xbf16, #tpu.memory_space<vmem>>, vector<2x14x64xbf16>
    tpu.vector_store %arg10[%c0_94, %c207, %c128_95], %119 {strides = array<i32>} : memref<2x256x192xbf16, #tpu.memory_space<vmem>>, vector<2x14x64xbf16>,
    %123 = vector.extract_strided_slice %18 {offsets = [0, 416, 0], sizes = [2, 16, 64], strides = [1, 1, 1]} : vector<2x448x64xf32> to vector<2x16x64xf32>
    %124 = vector.extract_strided_slice %18 {offsets = [0, 432, 0], sizes = [2, 16, 64], strides = [1, 1, 1]} : vector<2x448x64xf32> to vector<2x16x64xf32>
    %125 = arith.maximumf %123, %124 : vector<2x16x64xf32>
    %126 = vector.extract_strided_slice %125 {offsets = [0, 0, 0], sizes = [2, 14, 64], strides = [1, 1, 1]} : vector<2x16x64xf32> to vector<2x14x64xf32>
    %127 = arith.truncf %126 : vector<2x14x64xf32> to vector<2x14x64xbf16>
    %c0_96 = arith.constant 0 : index
    %c225 = arith.constant 225 : index
    %c0_97 = arith.constant 0 : index
    %128 = vector.load %arg10[%c0_96, %c225, %c0_97] : memref<2x256x192xbf16, #tpu.memory_space<vmem>>, vector<2x14x64xbf16>
    tpu.vector_store %arg10[%c0_96, %c225, %c0_97], %127 {strides = array<i32>} : memref<2x256x192xbf16, #tpu.memory_space<vmem>>, vector<2x14x64xbf16>,
    %c0_98 = arith.constant 0 : index
    %c224 = arith.constant 224 : index
    %c64_99 = arith.constant 64 : index
    %129 = vector.load %arg10[%c0_98, %c224, %c64_99] : memref<2x256x192xbf16, #tpu.memory_space<vmem>>, vector<2x14x64xbf16>
    tpu.vector_store %arg10[%c0_98, %c224, %c64_99], %127 {strides = array<i32>} : memref<2x256x192xbf16, #tpu.memory_space<vmem>>, vector<2x14x64xbf16>,
    %c0_100 = arith.constant 0 : index
    %c223 = arith.constant 223 : index
    %c128_101 = arith.constant 128 : index
    %130 = vector.load %arg10[%c0_100, %c223, %c128_101] : memref<2x256x192xbf16, #tpu.memory_space<vmem>>, vector<2x14x64xbf16>
    tpu.vector_store %arg10[%c0_100, %c223, %c128_101], %127 {strides = array<i32>} : memref<2x256x192xbf16, #tpu.memory_space<vmem>>, vector<2x14x64xbf16>,
    %c0_102 = arith.constant 0 : index
    %c0_103 = arith.constant 0 : index
    %c0_104 = arith.constant 0 : index
    %131 = vector.load %arg10[%c0_102, %c0_103, %c0_104] : memref<2x256x192xbf16, #tpu.memory_space<vmem>>, vector<2x256x192xbf16>
    %132 = vector.shape_cast %131 : vector<2x256x192xbf16> to vector<512x192xbf16>
    %c0_105 = arith.constant 0 : index
    %c0_106 = arith.constant 0 : index
    %c0_107 = arith.constant 0 : index
    %133 = vector.load %arg5[%c0_105, %c0_106, %c0_107] : memref<3x192x128xbf16, #tpu.memory_space<vmem>>, vector<1x192x128xbf16>
    %134 = vector.shape_cast %133 : vector<1x192x128xbf16> to vector<192x128xbf16>
    %cst_108 = arith.constant dense<0.000000e+00> : vector<512x128xf32>
    %135 = tpu.matmul %132, %134, %cst_108 {dimension_numbers = #tpu.dot_dimension_numbers<[1], [0], [0], [1], [0, 0, 1, 1], [], []>} : vector<512x192xbf16>, vector<192x128xbf16>, vector<512x128xf32> -> vector<512x128xf32>
    %136 = vector.shape_cast %135 : vector<512x128xf32> to vector<2x256x128xf32>
    %137 = vector.extract_strided_slice %136 {offsets = [0, 0, 0], sizes = [2, 224, 128], strides = [1, 1, 1]} : vector<2x256x128xf32> to vector<2x224x128xf32>
    %c1_109 = arith.constant 1 : index
    %c0_110 = arith.constant 0 : index
    %c0_111 = arith.constant 0 : index
    %138 = vector.load %arg5[%c1_109, %c0_110, %c0_111] : memref<3x192x128xbf16, #tpu.memory_space<vmem>>, vector<1x192x128xbf16>
    %139 = vector.shape_cast %138 : vector<1x192x128xbf16> to vector<192x128xbf16>
    %cst_112 = arith.constant dense<0.000000e+00> : vector<512x128xf32>
    %140 = tpu.matmul %132, %139, %cst_112 {dimension_numbers = #tpu.dot_dimension_numbers<[1], [0], [0], [1], [0, 0, 1, 1], [], []>} : vector<512x192xbf16>, vector<192x128xbf16>, vector<512x128xf32> -> vector<512x128xf32>
    %141 = vector.shape_cast %140 : vector<512x128xf32> to vector<2x256x128xf32>
    %142 = vector.extract_strided_slice %141 {offsets = [0, 16, 0], sizes = [2, 224, 128], strides = [1, 1, 1]} : vector<2x256x128xf32> to vector<2x224x128xf32>
    %143 = arith.addf %137, %142 : vector<2x224x128xf32>
    %c2 = arith.constant 2 : index
    %c0_113 = arith.constant 0 : index
    %c0_114 = arith.constant 0 : index
    %144 = vector.load %arg5[%c2, %c0_113, %c0_114] : memref<3x192x128xbf16, #tpu.memory_space<vmem>>, vector<1x192x128xbf16>
    %145 = vector.shape_cast %144 : vector<1x192x128xbf16> to vector<192x128xbf16>
    %cst_115 = arith.constant dense<0.000000e+00> : vector<512x128xf32>
    %146 = tpu.matmul %132, %145, %cst_115 {dimension_numbers = #tpu.dot_dimension_numbers<[1], [0], [0], [1], [0, 0, 1, 1], [], []>} : vector<512x192xbf16>, vector<192x128xbf16>, vector<512x128xf32> -> vector<512x128xf32>
    %147 = vector.shape_cast %146 : vector<512x128xf32> to vector<2x256x128xf32>
    %148 = vector.extract_strided_slice %147 {offsets = [0, 32, 0], sizes = [2, 224, 128], strides = [1, 1, 1]} : vector<2x256x128xf32> to vector<2x224x128xf32>
    %149 = arith.addf %143, %148 : vector<2x224x128xf32>
    %c0_116 = arith.constant 0 : index
    %c0_117 = arith.constant 0 : index
    %150 = vector.load %arg6[%c0_116, %c0_117] : memref<1x128xf32, #tpu.memory_space<vmem>>, vector<1x128xf32>
    %151 = vector.shape_cast %150 : vector<1x128xf32> to vector<1x1x128xf32>
    %152 = vector.broadcast %151 : vector<1x1x128xf32> to vector<2x224x128xf32>
    %153 = arith.mulf %149, %152 : vector<2x224x128xf32>
    %c0_118 = arith.constant 0 : index
    %c0_119 = arith.constant 0 : index
    %154 = vector.load %arg7[%c0_118, %c0_119] : memref<1x128xf32, #tpu.memory_space<vmem>>, vector<1x128xf32>
    %155 = vector.shape_cast %154 : vector<1x128xf32> to vector<1x1x128xf32>
    %156 = vector.broadcast %155 : vector<1x1x128xf32> to vector<2x224x128xf32>
    %157 = arith.addf %153, %156 : vector<2x224x128xf32>
    %cst_120 = arith.constant 0.000000e+00 : f32
    %158 = vector.broadcast %cst_120 : f32 to vector<2x224x128xf32>
    %159 = arith.maximumf %157, %158 : vector<2x224x128xf32>
    %160 = vector.shape_cast %159 : vector<2x224x128xf32> to vector<448x128xf32>
    %c0_121 = arith.constant 0 : index
    %c0_122 = arith.constant 0 : index
    %161 = vector.load %arg11[%c0_121, %c0_122] : memref<448x128xf32, #tpu.memory_space<vmem>>, vector<448x128xf32>
    tpu.vector_store %arg11[%c0_121, %c0_122], %160 {strides = array<i32>} : memref<448x128xf32, #tpu.memory_space<vmem>>, vector<448x128xf32>,
    %c0_123 = arith.constant 0 : index
    %c0_124 = arith.constant 0 : index
    %162 = tpu.strided_load %arg11[%c0_123, %c0_124] {strides = array<i32: 2, 1>} : memref<448x128xf32, #tpu.memory_space<vmem>>, vector<224x128xf32>
    %c1_125 = arith.constant 1 : index
    %c0_126 = arith.constant 0 : index
    %163 = tpu.strided_load %arg11[%c1_125, %c0_126] {strides = array<i32: 2, 1>} : memref<448x128xf32, #tpu.memory_space<vmem>>, vector<224x128xf32>
    %164 = arith.maximumf %162, %163 : vector<224x128xf32>
    %165 = vector.shape_cast %164 : vector<224x128xf32> to vector<2x112x128xf32>
    %166 = vector.extract_strided_slice %165 {offsets = [0, 0, 0], sizes = [2, 8, 128], strides = [1, 1, 1]} : vector<2x112x128xf32> to vector<2x8x128xf32>
    %167 = vector.extract_strided_slice %165 {offsets = [0, 8, 0], sizes = [2, 8, 128], strides = [1, 1, 1]} : vector<2x112x128xf32> to vector<2x8x128xf32>
    %168 = arith.maximumf %166, %167 : vector<2x8x128xf32>
    %169 = vector.extract_strided_slice %168 {offsets = [0, 0, 0], sizes = [2, 7, 128], strides = [1, 1, 1]} : vector<2x8x128xf32> to vector<2x7x128xf32>
    %170 = arith.truncf %169 : vector<2x7x128xf32> to vector<2x7x128xbf16>
    %c0_127 = arith.constant 0 : index
    %c0_128 = arith.constant 0 : index
    %c0_129 = arith.constant 0 : index
    %171 = vector.load %arg8[%c0_127, %c0_128, %c0_129] : memref<2x49x128xbf16, #tpu.memory_space<vmem>>, vector<2x7x128xbf16>
    tpu.vector_store %arg8[%c0_127, %c0_128, %c0_129], %170 {strides = array<i32>} : memref<2x49x128xbf16, #tpu.memory_space<vmem>>, vector<2x7x128xbf16>,
    %172 = vector.extract_strided_slice %165 {offsets = [0, 16, 0], sizes = [2, 8, 128], strides = [1, 1, 1]} : vector<2x112x128xf32> to vector<2x8x128xf32>
    %173 = vector.extract_strided_slice %165 {offsets = [0, 24, 0], sizes = [2, 8, 128], strides = [1, 1, 1]} : vector<2x112x128xf32> to vector<2x8x128xf32>
    %174 = arith.maximumf %172, %173 : vector<2x8x128xf32>
    %175 = vector.extract_strided_slice %174 {offsets = [0, 0, 0], sizes = [2, 7, 128], strides = [1, 1, 1]} : vector<2x8x128xf32> to vector<2x7x128xf32>
    %176 = arith.truncf %175 : vector<2x7x128xf32> to vector<2x7x128xbf16>
    %c0_130 = arith.constant 0 : index
    %c7 = arith.constant 7 : index
    %c0_131 = arith.constant 0 : index
    %177 = vector.load %arg8[%c0_130, %c7, %c0_131] : memref<2x49x128xbf16, #tpu.memory_space<vmem>>, vector<2x7x128xbf16>
    tpu.vector_store %arg8[%c0_130, %c7, %c0_131], %176 {strides = array<i32>} : memref<2x49x128xbf16, #tpu.memory_space<vmem>>, vector<2x7x128xbf16>,
    %178 = vector.extract_strided_slice %165 {offsets = [0, 32, 0], sizes = [2, 8, 128], strides = [1, 1, 1]} : vector<2x112x128xf32> to vector<2x8x128xf32>
    %179 = vector.extract_strided_slice %165 {offsets = [0, 40, 0], sizes = [2, 8, 128], strides = [1, 1, 1]} : vector<2x112x128xf32> to vector<2x8x128xf32>
    %180 = arith.maximumf %178, %179 : vector<2x8x128xf32>
    %181 = vector.extract_strided_slice %180 {offsets = [0, 0, 0], sizes = [2, 7, 128], strides = [1, 1, 1]} : vector<2x8x128xf32> to vector<2x7x128xf32>
    %182 = arith.truncf %181 : vector<2x7x128xf32> to vector<2x7x128xbf16>
    %c0_132 = arith.constant 0 : index
    %c14 = arith.constant 14 : index
    %c0_133 = arith.constant 0 : index
    %183 = vector.load %arg8[%c0_132, %c14, %c0_133] : memref<2x49x128xbf16, #tpu.memory_space<vmem>>, vector<2x7x128xbf16>
    tpu.vector_store %arg8[%c0_132, %c14, %c0_133], %182 {strides = array<i32>} : memref<2x49x128xbf16, #tpu.memory_space<vmem>>, vector<2x7x128xbf16>,
    %184 = vector.extract_strided_slice %165 {offsets = [0, 48, 0], sizes = [2, 8, 128], strides = [1, 1, 1]} : vector<2x112x128xf32> to vector<2x8x128xf32>
    %185 = vector.extract_strided_slice %165 {offsets = [0, 56, 0], sizes = [2, 8, 128], strides = [1, 1, 1]} : vector<2x112x128xf32> to vector<2x8x128xf32>
    %186 = arith.maximumf %184, %185 : vector<2x8x128xf32>
    %187 = vector.extract_strided_slice %186 {offsets = [0, 0, 0], sizes = [2, 7, 128], strides = [1, 1, 1]} : vector<2x8x128xf32> to vector<2x7x128xf32>
    %188 = arith.truncf %187 : vector<2x7x128xf32> to vector<2x7x128xbf16>
    %c0_134 = arith.constant 0 : index
    %c21 = arith.constant 21 : index
    %c0_135 = arith.constant 0 : index
    %189 = vector.load %arg8[%c0_134, %c21, %c0_135] : memref<2x49x128xbf16, #tpu.memory_space<vmem>>, vector<2x7x128xbf16>
    tpu.vector_store %arg8[%c0_134, %c21, %c0_135], %188 {strides = array<i32>} : memref<2x49x128xbf16, #tpu.memory_space<vmem>>, vector<2x7x128xbf16>,
    %190 = vector.extract_strided_slice %165 {offsets = [0, 64, 0], sizes = [2, 8, 128], strides = [1, 1, 1]} : vector<2x112x128xf32> to vector<2x8x128xf32>
    %191 = vector.extract_strided_slice %165 {offsets = [0, 72, 0], sizes = [2, 8, 128], strides = [1, 1, 1]} : vector<2x112x128xf32> to vector<2x8x128xf32>
    %192 = arith.maximumf %190, %191 : vector<2x8x128xf32>
    %193 = vector.extract_strided_slice %192 {offsets = [0, 0, 0], sizes = [2, 7, 128], strides = [1, 1, 1]} : vector<2x8x128xf32> to vector<2x7x128xf32>
    %194 = arith.truncf %193 : vector<2x7x128xf32> to vector<2x7x128xbf16>
    %c0_136 = arith.constant 0 : index
    %c28 = arith.constant 28 : index
    %c0_137 = arith.constant 0 : index
    %195 = vector.load %arg8[%c0_136, %c28, %c0_137] : memref<2x49x128xbf16, #tpu.memory_space<vmem>>, vector<2x7x128xbf16>
    tpu.vector_store %arg8[%c0_136, %c28, %c0_137], %194 {strides = array<i32>} : memref<2x49x128xbf16, #tpu.memory_space<vmem>>, vector<2x7x128xbf16>,
    %196 = vector.extract_strided_slice %165 {offsets = [0, 80, 0], sizes = [2, 8, 128], strides = [1, 1, 1]} : vector<2x112x128xf32> to vector<2x8x128xf32>
    %197 = vector.extract_strided_slice %165 {offsets = [0, 88, 0], sizes = [2, 8, 128], strides = [1, 1, 1]} : vector<2x112x128xf32> to vector<2x8x128xf32>
    %198 = arith.maximumf %196, %197 : vector<2x8x128xf32>
    %199 = vector.extract_strided_slice %198 {offsets = [0, 0, 0], sizes = [2, 7, 128], strides = [1, 1, 1]} : vector<2x8x128xf32> to vector<2x7x128xf32>
    %200 = arith.truncf %199 : vector<2x7x128xf32> to vector<2x7x128xbf16>
    %c0_138 = arith.constant 0 : index
    %c35 = arith.constant 35 : index
    %c0_139 = arith.constant 0 : index
    %201 = vector.load %arg8[%c0_138, %c35, %c0_139] : memref<2x49x128xbf16, #tpu.memory_space<vmem>>, vector<2x7x128xbf16>
    tpu.vector_store %arg8[%c0_138, %c35, %c0_139], %200 {strides = array<i32>} : memref<2x49x128xbf16, #tpu.memory_space<vmem>>, vector<2x7x128xbf16>,
    %202 = vector.extract_strided_slice %165 {offsets = [0, 96, 0], sizes = [2, 8, 128], strides = [1, 1, 1]} : vector<2x112x128xf32> to vector<2x8x128xf32>
    %203 = vector.extract_strided_slice %165 {offsets = [0, 104, 0], sizes = [2, 8, 128], strides = [1, 1, 1]} : vector<2x112x128xf32> to vector<2x8x128xf32>
    %204 = arith.maximumf %202, %203 : vector<2x8x128xf32>
    %205 = vector.extract_strided_slice %204 {offsets = [0, 0, 0], sizes = [2, 7, 128], strides = [1, 1, 1]} : vector<2x8x128xf32> to vector<2x7x128xf32>
    %206 = arith.truncf %205 : vector<2x7x128xf32> to vector<2x7x128xbf16>
    %c0_140 = arith.constant 0 : index
    %c42 = arith.constant 42 : index
    %c0_141 = arith.constant 0 : index
    %207 = vector.load %arg8[%c0_140, %c42, %c0_141] : memref<2x49x128xbf16, #tpu.memory_space<vmem>>, vector<2x7x128xbf16>
    tpu.vector_store %arg8[%c0_140, %c42, %c0_141], %206 {strides = array<i32>} : memref<2x49x128xbf16, #tpu.memory_space<vmem>>, vector<2x7x128xbf16>,
    return
  }
  func.func @transform_0(%arg0: i32) -> (i32, i32, i32) {
    %c0_i32 = arith.constant 0 : i32
    %c0_i32_0 = arith.constant 0 : i32
    %c0_i32_1 = arith.constant 0 : i32
    return %arg0, %c0_i32, %c0_i32_0 : i32, i32, i32
  }
  func.func @transform_1(%arg0: i32) -> (i32, i32) {
    %c0_i32 = arith.constant 0 : i32
    %c0_i32_0 = arith.constant 0 : i32
    %c0_i32_1 = arith.constant 0 : i32
    return %c0_i32, %c0_i32_0 : i32, i32
  }
  func.func @transform_2(%arg0: i32) -> (i32, i32) {
    %c0_i32 = arith.constant 0 : i32
    %c0_i32_0 = arith.constant 0 : i32
    %c0_i32_1 = arith.constant 0 : i32
    return %c0_i32, %c0_i32_0 : i32, i32
  }
  func.func @transform_3(%arg0: i32) -> (i32, i32) {
    %c0_i32 = arith.constant 0 : i32
    %c0_i32_0 = arith.constant 0 : i32
    %c0_i32_1 = arith.constant 0 : i32
    return %c0_i32, %c0_i32_0 : i32, i32
  }
  func.func @transform_4(%arg0: i32) -> (i32, i32, i32) {
    %c0_i32 = arith.constant 0 : i32
    %c0_i32_0 = arith.constant 0 : i32
    %c0_i32_1 = arith.constant 0 : i32
    %c0_i32_2 = arith.constant 0 : i32
    return %c0_i32, %c0_i32_0, %c0_i32_1 : i32, i32, i32
  }
  func.func @transform_5(%arg0: i32) -> (i32, i32) {
    %c0_i32 = arith.constant 0 : i32
    %c0_i32_0 = arith.constant 0 : i32
    %c0_i32_1 = arith.constant 0 : i32
    return %c0_i32, %c0_i32_0 : i32, i32
  }
  func.func @transform_6(%arg0: i32) -> (i32, i32) {
    %c0_i32 = arith.constant 0 : i32
    %c0_i32_0 = arith.constant 0 : i32
    %c0_i32_1 = arith.constant 0 : i32
    return %c0_i32, %c0_i32_0 : i32, i32
  }
  func.func @transform_7(%arg0: i32) -> (i32, i32, i32) {
    %c0_i32 = arith.constant 0 : i32
    %c0_i32_0 = arith.constant 0 : i32
    %c0_i32_1 = arith.constant 0 : i32
    return %arg0, %c0_i32, %c0_i32_0 : i32, i32, i32
  }
}

module attributes {stable_mosaic.version = 11 : i64} {
  func.func @_dense_kernel(%arg0: i32, %arg1: i32, %arg2: memref<2x896xbf16, #tpu.memory_space<vmem>>, %arg3: memref<896x512xbf16, #tpu.memory_space<vmem>>, %arg4: memref<1x512xf32, #tpu.memory_space<vmem>>, %arg5: memref<512x128xf32, #tpu.memory_space<vmem>>, %arg6: memref<1x2x128xf32, #tpu.memory_space<vmem>>, %arg7: memref<2x512xf32, #tpu.memory_space<vmem>>) attributes {dimension_semantics = [#tpu.dimension_semantics<parallel>, #tpu.dimension_semantics<arbitrary>], iteration_bounds = array<i64: 2, 7>, scalar_prefetch = 0 : i64, scratch_operands = 1 : i64, tpu.core_type = #tpu.core_type<tc>, window_params = [{transform_indices = @transform_0, window_bounds = array<i64: 2, 896>}, {transform_indices = @transform_1, window_bounds = array<i64: 896, 512>}, {transform_indices = @transform_2, window_bounds = array<i64: 1, 512>}, {transform_indices = @transform_3, window_bounds = array<i64: 512, 128>}, {transform_indices = @transform_4, window_bounds = array<i64: 1, 2, 128>}]} {
    %c0_i32 = arith.constant 0 : i32
    %0 = arith.cmpi eq, %arg1, %c0_i32 : i32
    %1 = arith.extui %0 : i1 to i32
    %c0_i32_0 = arith.constant 0 : i32
    %2 = arith.cmpi ne, %1, %c0_i32_0 : i32
    scf.if %2 {
      %cst_9 = arith.constant 0.000000e+00 : f32
      %12 = vector.broadcast %cst_9 : f32 to vector<2x512xf32>
      %c0_10 = arith.constant 0 : index
      %c0_11 = arith.constant 0 : index
      %13 = vector.load %arg7[%c0_10, %c0_11] : memref<2x512xf32, #tpu.memory_space<vmem>>, vector<2x512xf32>
      tpu.vector_store %arg7[%c0_10, %c0_11], %12 {strides = array<i32>} : memref<2x512xf32, #tpu.memory_space<vmem>>, vector<2x512xf32>,
    } else {
    }
    %c0 = arith.constant 0 : index
    %c0_1 = arith.constant 0 : index
    %3 = vector.load %arg7[%c0, %c0_1] : memref<2x512xf32, #tpu.memory_space<vmem>>, vector<2x512xf32>
    %c0_2 = arith.constant 0 : index
    %c0_3 = arith.constant 0 : index
    %4 = vector.load %arg2[%c0_2, %c0_3] : memref<2x896xbf16, #tpu.memory_space<vmem>>, vector<2x896xbf16>
    %c0_4 = arith.constant 0 : index
    %c0_5 = arith.constant 0 : index
    %5 = vector.load %arg3[%c0_4, %c0_5] : memref<896x512xbf16, #tpu.memory_space<vmem>>, vector<896x512xbf16>
    %cst = arith.constant dense<0.000000e+00> : vector<2x512xf32>
    %6 = tpu.matmul %4, %5, %cst {dimension_numbers = #tpu.dot_dimension_numbers<[1], [0], [0], [1], [0, 0, 1, 1], [], []>} : vector<2x896xbf16>, vector<896x512xbf16>, vector<2x512xf32> -> vector<2x512xf32>
    %7 = arith.addf %3, %6 : vector<2x512xf32>
    %c0_6 = arith.constant 0 : index
    %c0_7 = arith.constant 0 : index
    %8 = vector.load %arg7[%c0_6, %c0_7] : memref<2x512xf32, #tpu.memory_space<vmem>>, vector<2x512xf32>
    tpu.vector_store %arg7[%c0_6, %c0_7], %7 {strides = array<i32>} : memref<2x512xf32, #tpu.memory_space<vmem>>, vector<2x512xf32>,
    %c6_i32 = arith.constant 6 : i32
    %9 = arith.cmpi eq, %arg1, %c6_i32 : i32
    %10 = arith.extui %9 : i1 to i32
    %c0_i32_8 = arith.constant 0 : i32
    %11 = arith.cmpi ne, %10, %c0_i32_8 : i32
    scf.if %11 {
      %c0_9 = arith.constant 0 : index
      %c0_10 = arith.constant 0 : index
      %12 = vector.load %arg7[%c0_9, %c0_10] : memref<2x512xf32, #tpu.memory_space<vmem>>, vector<2x512xf32>
      %c0_11 = arith.constant 0 : index
      %c0_12 = arith.constant 0 : index
      %13 = vector.load %arg4[%c0_11, %c0_12] : memref<1x512xf32, #tpu.memory_space<vmem>>, vector<1x512xf32>
      %14 = vector.broadcast %13 : vector<1x512xf32> to vector<2x512xf32>
      %15 = arith.addf %12, %14 : vector<2x512xf32>
      %cst_13 = arith.constant 0.000000e+00 : f32
      %16 = vector.broadcast %cst_13 : f32 to vector<2x512xf32>
      %17 = arith.maximumf %15, %16 : vector<2x512xf32>
      %c0_14 = arith.constant 0 : index
      %c0_15 = arith.constant 0 : index
      %18 = vector.load %arg5[%c0_14, %c0_15] : memref<512x128xf32, #tpu.memory_space<vmem>>, vector<512x128xf32>
      %cst_16 = arith.constant dense<0.000000e+00> : vector<2x128xf32>
      %19 = tpu.matmul %17, %18, %cst_16 {dimension_numbers = #tpu.dot_dimension_numbers<[1], [0], [0], [1], [0, 0, 1, 1], [], []>} : vector<2x512xf32>, vector<512x128xf32>, vector<2x128xf32> -> vector<2x128xf32>
      %c0_17 = arith.constant 0 : index
      %c0_18 = arith.constant 0 : index
      %c0_19 = arith.constant 0 : index
      %20 = vector.load %arg6[%c0_17, %c0_18, %c0_19] : memref<1x2x128xf32, #tpu.memory_space<vmem>>, vector<1x2x128xf32>
      %21 = vector.shape_cast %20 : vector<1x2x128xf32> to vector<2x128xf32>
      %22 = vector.shape_cast %19 : vector<2x128xf32> to vector<1x2x128xf32>
      tpu.vector_store %arg6[%c0_17, %c0_18, %c0_19], %22 {strides = array<i32>} : memref<1x2x128xf32, #tpu.memory_space<vmem>>, vector<1x2x128xf32>,
    } else {
    }
    return
  }
  func.func @transform_0(%arg0: i32, %arg1: i32) -> (i32, i32) {
    %c0_i32 = arith.constant 0 : i32
    %c0_i32_0 = arith.constant 0 : i32
    return %c0_i32, %arg1 : i32, i32
  }
  func.func @transform_1(%arg0: i32, %arg1: i32) -> (i32, i32) {
    %c0_i32 = arith.constant 0 : i32
    return %arg1, %arg0 : i32, i32
  }
  func.func @transform_2(%arg0: i32, %arg1: i32) -> (i32, i32) {
    %c0_i32 = arith.constant 0 : i32
    %c0_i32_0 = arith.constant 0 : i32
    return %c0_i32, %arg0 : i32, i32
  }
  func.func @transform_3(%arg0: i32, %arg1: i32) -> (i32, i32) {
    %c0_i32 = arith.constant 0 : i32
    %c0_i32_0 = arith.constant 0 : i32
    return %arg0, %c0_i32 : i32, i32
  }
  func.func @transform_4(%arg0: i32, %arg1: i32) -> (i32, i32, i32) {
    %c0_i32 = arith.constant 0 : i32
    %c0_i32_0 = arith.constant 0 : i32
    %c0_i32_1 = arith.constant 0 : i32
    return %arg0, %c0_i32, %c0_i32_0 : i32, i32, i32
  }
}

</mosaic_0001>

<bundles_post_ra>
// kernel: cnn3_forward.3
= control target key start
LH: loop header
LB: loop body
LE: loop exit
PB: predicated region body
PF: predicated region fallthrough
CT: control target
= control target key end

     0   :  { %s4666_s0 = inlined_call_operand.vmem [shape: bf16[2,6272], index: 0, kind: input, shape index: {}]   ;;  %s4667_s1 = inlined_call_operand.hbm [shape: bf16[6272,1024], index: 1, kind: input, shape index: {}]   ;;  %s4668_s2 = inlined_call_operand.hbm [shape: f32[1,1024], index: 2, kind: input, shape index: {}]   ;;  %s4669_s3 = inlined_call_operand.hbm [shape: f32[1024,128], index: 3, kind: input, shape index: {}]   ;;  %s4670_s4 = inlined_call_operand.vmem [shape: f32[2,2,128], index: 4, kind: output, shape index: {}]  }
   0x1   :  { %4676 = sst [smem:[#allocation16_spill]] %s4666_s0 }
   0x2   :  { %4677 = sst [smem:[#allocation17_spill]] %s4667_s1 }
   0x3   :  { %4678 = sst [smem:[#allocation18_spill]] %s4668_s2 }
   0x4   :  { %4679 = sst [smem:[#allocation19_spill]] %s4670_s4 }
   0x5   :  { %9 = vsyncpa [#allocation4], 0 }
   0x6   :  { %11 = vsyncpa [#allocation4 + $0x1], 0 }
   0x7   :  { %12 = vsyncpa [#allocation6], 0 }
   0x8   :  { %14 = vsyncpa [#allocation6 + $0x1], 0  ;;  %s3868_s15 = smov 0   ;;  %s3870_s16 = smov 0  }
   0x9   :  { %s3872_s17 = smov 0   ;;  %s3874_s18 = smov 0  }
   0xa   :  { %s3876_s19 = smov 0   ;;  %s3878_s20 = smov 0  }
   0xb   :  { %s3880_s21 = smov 0   ;;  %s3882_s22 = smov 0  }
   0xc   :  { %s3884_s23 = smov 0   ;;  %s3886_s24 = smov 0  }
   0xd   :  { %s3888_s25 = smov 0  }
   0xe LB: > { %4680 = sst [smem:[#allocation10_spill]] %s3815_s20  ;;  %s4671_s26 = sadd.s32 4294967295, %s3835_s25   ;;  %s3835_s25 = sphi %s3888_s25, %s20_s25   ;;  %s3831_s24 = sphi %s3886_s24, %s4713_s24   ;;  %s3827_s23 = sphi %s3884_s23, %s4704_s23   ;;  %s3823_s22 = sphi %s3882_s22, %s4712_s22   ;;  %s3819_s21 = sphi %s3880_s21, %s4711_s21   ;;  %s3815_s20 = sphi %s3878_s20, %s4702_s20   ;;  %s3811_s19 = sphi %s3876_s19, %s4710_s19   ;;  %s3807_s18 = sphi %s3874_s18, %s4709_s18   ;;  %s3803_s17 = sphi %s3872_s17, %s4708_s17   ;;  %s3799_s16 = sphi %s3870_s16, %s4707_s16   ;;  %s3795_s15 = sphi %s3868_s15, %s4706_s15  }
   0xf   : > { %4681 = sst [smem:[#allocation11_spill]] %s3827_s23  ;;  %s29_s27 = sadd.s32 1, %s3827_s23 }
  0x10   : > { %p30_p0 = scmp.ge.s32.totalorder %s29_s27, 7  ;;  %s32_s28 = sadd.s32 1, %s3831_s24 }
  0x11   : > { %s67_s29 = sadd.s32 1, %s3815_s20  ;;  %p74_p1 = scmp.ne.s32.totalorder %s3815_s20, %s3811_s19 }
  0x12   : > { %s4715_s27 = smov (%p30_p0, %s29_s27), 0  ;;  %s4717_s28 = smov (!%p30_p0, %s32_s28), %s3831_s24 }
  0x13   : > { %4682 = sst [smem:[#allocation12_spill]] %s4715_s27  ;;  %s62_s30 = ssub.s32 %s3827_s23, %s4715_s27 }
  0x14   : > { %p75_p2 = scmp.eq.s32.totalorder %s3835_s25, 0  ;;  %p34_p3 = scmp.ge.s32.totalorder %s4717_s28, 2 }
  0x15   : > { %p80_p4 = scmp.ne.s32.totalorder %s3811_s19, %s3807_s18  ;;  %p3942_p6 = scmp.eq.s32.totalorder %s4671_s26, 0 }
  0x16   : > { %p3936_p5 = por %p75_p2, %p74_p1  ;;  %s4719_s28 = smov (%p34_p3, %s4717_s28), 0 }
  0x17   : > { %4685 = sst [smem:[#allocation13_spill]] %s4719_s28  ;;  %p3950_p7 = por %p3942_p6, %p80_p4 }
  0x18   : > { %s93_s8 = sadd.s32 1, %s3803_s17  ;;  %s63_s9 = ssub.s32 %s3831_s24, %s4719_s28 }
  0x19   : > { %p100_p8 = scmp.ne.s32.totalorder %s3803_s17, %s3799_s16  ;;  %s64_s10 = sor.u32 %s63_s9, %s62_s30 }
  0x1a   : > { %p91_p9 = scmp.eq.s32.totalorder %s63_s9, 0  ;;  %p65_p10 = scmp.eq.s32.totalorder %s64_s10, 0 }
  0x1b   : > { %p3961_p11 = por %p100_p8, %p75_p2  ;;  %p106_p12 = scmp.ne.s32.totalorder %s3799_s16, %s3795_s15 }
  0x1c   : > { %s3966_s12 = scalar_select %p91_p9, %s3803_s17, %s93_s8  }
  0x1d   : > { %s3969_s13 = scalar_select %p65_p10, %s3815_s20, %s67_s29  }
  0x1e   : > { %4688 = sst [smem:[#allocation14_spill]] %s3966_s12  ;;  %p3549_p13 = scmp.lt.s32.totalorder %s3835_s25, 14 }
  0x1f   : > { %4689 = sst [smem:[#allocation15_spill]] %s3969_s13  ;;  %s2393_s14 = sshll.u32 %s3831_s24, 2 }
  0x20   : > { %p3977_p0 = por %p106_p12, %p3942_p6  ;;  %s3305_s30 = smul.u32 896, %s3827_s23 }
  0x21   : > { %p3986_p1 = pnand %p3549_p13, %p3936_p5  ;;  %s215_s8 = sand.u32 1, %s3835_s25  }
  0x22   : > { %s200_s29 = sadd.s32 %s3305_s30, %s2393_s14  ;;  %s4692_s1 = sld [smem:[#allocation17_spill]] }
  0x23   : > { %s2395_s15 = sshll.u32 %s200_s29, 2  ;;  %s217_s28 = sand.u32 1, %s3803_s17  }
  0x24   : > { %s2396_s23 = sshll.u32 %s217_s28, 2  ;;  %s4693_s2 = sld [smem:[#allocation18_spill]] }
  0x25   : > { %s219_s4 = scalar_lea.vmem [#allocation5], %s2396_s23  ;;  %p4004_p2 = pnand %p3549_p13, %p3961_p11 }
  0x26   : > { %s227_s0 = sshll.u32 %s219_s4, 4  ;;  %s2398_s29 = sshll.u32 %s217_s28, 9  ;;  %s228_s0 = int_to_ptr.vmem [resolvable:$true] %s227_s0 }
  0x27   : > { %p2401_p3 = scmp.ge.s32.totalorder %s3835_s25, 1  ;;  %s238_s13 = scalar_lea.vmem [#allocation7], %s2398_s29 }
  0x28   : > { %s202_s6 = scalar_lea.hbm %s4692_s1, %s2395_s15  ;;  %s216_s15 = scalar_lea.sflag [#allocation6], %s215_s8 }
  0x29   : > { %s203_s27 = sshll.u32 %s202_s6, 4  ;;  %p254_p4 = scmp.lt.s32.totalorder %s3835_s25, 15  ;;  %s3995_s27 = int_to_ptr.hbm [resolvable:$true] %s203_s27 }
  0x2a   : > { %s223_s12 = scalar_lea.hbm %s4693_s2, %s2393_s14  ;;  %s246_s14 = sshll.u32 %s238_s13, 4  ;;  %s247_s14 = int_to_ptr.vmem [resolvable:$true] %s246_s14 }
  0x2b   : > { %s225_s30 = sshll.u32 %s223_s12, 4  ;;  %p4012_p5 = pnand %p2401_p3, %p254_p4  ;;  %s226_s30 = int_to_ptr.hbm [resolvable:$true] %s225_s30 }
  0x2c   : > { %3545 = dma.hbm_to_vmem [thread:$0]  (!%p4004_p2), %s226_s30, 64, %s228_s0, %s216_s15  }
  0x2d   : > { %s190_s23 = sand.u32 1, %s3815_s20   ;;  %s3306_s12 = sshll.u32 %s3831_s24, 9 }
  0x2e   : > { %s3531_s11 = smul.u32 1792, %s190_s23  ;;  %s243_s0 = scalar_lea.hbm %s4669_s3, %s3306_s12 }
  0x2f   : > { %s244_s5 = sshll.u32 %s243_s0, 4  ;;  %s191_s30 = scalar_lea.sflag [#allocation4], %s190_s23  ;;  %s245_s5 = int_to_ptr.hbm [resolvable:$true] %s244_s5 }
  0x30   : > { %s194_s10 = scalar_lea.vmem [#allocation3], %s3531_s11  ;;  %s3837_s29 = smov 512  }
  0x31   : > { %s205_s28 = sshll.u32 %s194_s10, 4  ;;  %s3838_s13 = smov 256   ;;  %s206_s28 = int_to_ptr.vmem [resolvable:$true] %s205_s28 }
  0x32   : > { %s3839_s1 = smov 16   ;;  %s3840_s2 = smov 128  }
  0x33   : > { %3542 = dma.hbm_to_vmem [thread:$0]  (!%p3986_p1), %s3995_s27, 28672, %s206_s28, %s191_s30, %s3837_s29, %s3838_s13, %s3839_s1  }
  0x34   : > { %s3841_s20 = smov 8   ;;  %258 = sbr.rel (%p4012_p5) target bundleno = 621 (0x26d), region = 36 }
  0x35   : > { %3548 = dma.hbm_to_vmem [thread:$0]  (!%p4004_p2), %s245_s5, 8192, %s247_s14, %s216_s15, %s3840_s2, %s3840_s2, %s3841_s20  }
  0x36   : > { %s260_s11 = sand.u32 (!%p4012_p5), 1, %s3811_s19  }
  0x37   : > { %s3532_s12 = smul.u32 (!%p4012_p5), 1792, %s260_s11  ;;  %s261_s10 = scalar_lea.sflag (!%p4012_p5), [#allocation4], %s260_s11 }
  0x39   : > { %s4029_s6 = scalar_lea.vmem [#allocation3], %s3532_s12 }
  0x3a   : > { %3786 = dma.done.wait (%p3950_p7), %s261_s10, 28672  }
  0x3b   : > { %3788 = vsyncadd (%p3950_p7), %s261_s10, 4294938624  ;;  %s4696_s1 = sadd.s32 4294967295, %s3835_s25   ;;  %s272_s20 = sand.u32 1, %s3799_s16  }
  0x3c   : > { %s270_s2 = sand.u32 1, %s4696_s1   ;;  %s4038_s27 = sshll.u32 %s272_s20, 2 }
  0x3d   : > { %s271_s9 = scalar_lea.sflag [#allocation6], %s270_s2  ;;  %s274_s26 = scalar_lea.vmem [#allocation5], %s4038_s27 }
  0x3e   : > { %3790 = dma.done.wait (%p3977_p0), %s271_s9, 8256  }
  0x3f   : > { %3792 = vsyncadd (%p3977_p0), %s271_s9, 4294959040  ;;  %s2403_s7 = sshll.u32 %s272_s20, 9  ;;  %s323_s15 = smul.u32 7, %s3819_s21 }
  0x40   : > { %p332_p6 = scmp.lt.s32.totalorder %s3823_s22, 1  ;;  %s4697_s28 = sld [smem:[#allocation16_spill]] }
  0x41   : > { %p324_p7 = scmp.lt.s32.totalorder %s323_s15, 48  ;;  %s4698_s18 = sld [smem:[#allocation19_spill]] }
  0x42   : > { %s4721_s22 = smov (!%p332_p6, %s3823_s22), 1  ;;  %s4059_s29 = scalar_lea.vmem [#allocation7], %s2403_s7 }
  0x43   : > { %s4723_s15 = smov (!%p324_p7, %s323_s15), 48  ;;  %s2404_s14 = sshll.u32 %s4721_s22, 1 }
  0x44   : > { %p2405_p8 = scmp.ne.s32.totalorder %s3819_s21, 0 }
  0x46   : > { %s326_s8 = scalar_lea.vmem %s4697_s28, %s4723_s15  ;;  %339 = sbr.rel (%p2405_p8) target bundleno = 77 (0x4d), region = 52 }
  0x47   : > { %s4057_s30 = scalar_lea.vmem %s4698_s18, %s2404_s14 }
  0x4b   : > { %v3842_v0 = vmov 0.0  }
  0x4c   : > { %340 = vst [vmem:[#allocation2] sm:$0xff] %v3842_v0 }
  0x4d PF: > { %v2520_v1 = vld [vmem:[%s4029_s6 + $0xe0] sm:$0xf]  ;;  %v3337_v2 = vld [vmem:[%s4029_s6 + $0xec] sm:$0xf0]  ;;  %vm2074_vm0 = vcmask 1041408   ;;  %vm2076_vm1 = vcmask 1045508  }
  0x4e   : > { %v2648_v3 = vld [vmem:[%s4029_s6 + $0x1e0] sm:$0xf]  ;;  %v2521_v4 = vor.u32 %v3337_v2, %v2520_v1  ;;  %v3369_v5 = vld [vmem:[%s4029_s6 + $0x1ec] sm:$0xf0]  ;;  %vm2078_vm2 = vcmask 1043456   ;;  %p3302_p9 = scmp.ne.s32.totalorder %s3819_s21, 6 }
  0x4f   : > { %v2776_v6 = vld [vmem:[%s4029_s6 + $0x2e0] sm:$0xf]  ;;  %v3401_v7 = vld [vmem:[%s4029_s6 + $0x2ec] sm:$0xf0]  ;;  %v2649_v8 = vor.u32 %v3369_v5, %v2648_v3 }
  0x50   : > { %v2777_v9 = vor.u32 %v3401_v7, %v2776_v6  ;;  %v2904_v10 = vld [vmem:[%s4029_s6 + $0x3e0] sm:$0xf]  ;;  %v3433_v11 = vld [vmem:[%s4029_s6 + $0x3ec] sm:$0xf0]  ;;  %1703 = vmatpush.bf16.msra.mxu0 %v2521_v4 }
  0x51   : > { %v2504_v12 = vld [vmem:[%s4029_s6 + $0xc0] sm:$0xf]  ;;  %v2905_v13 = vor.u32 %v3433_v11, %v2904_v10  ;;  %v3333_v14 = vld [vmem:[%s4029_s6 + $0xcc] sm:$0xf0]  ;;  %1716 = vmatpush.bf16.msra.mxu1 %v2649_v8 }
  0x52   : > { %v2632_v15 = vld [vmem:[%s4029_s6 + $0x1c0] sm:$0xf]  ;;  %v3365_v16 = vld [vmem:[%s4029_s6 + $0x1cc] sm:$0xf0]  ;;  %1729 = vmatpush.bf16.msra.mxu2 %v2777_v9  ;;  %v2505_v17 = vor.u32 %v3333_v14, %v2504_v12 }
  0x53   : > { %v2633_v18 = vor.u32 %v3365_v16, %v2632_v15  ;;  %v2760_v19 = vld [vmem:[%s4029_s6 + $0x2c0] sm:$0xf]  ;;  %v3397_v20 = vld [vmem:[%s4029_s6 + $0x2cc] sm:$0xf0]  ;;  %1742 = vmatpush.bf16.msra.mxu3 %v2905_v13 }
  0x54   : > { %v2888_v21 = vld [vmem:[%s4029_s6 + $0x3c0] sm:$0xf]  ;;  %v2761_v22 = vor.u32 %v3397_v20, %v2760_v19  ;;  %v3429_v23 = vld [vmem:[%s4029_s6 + $0x3cc] sm:$0xf0]  ;;  %1704 = vmatpush.bf16.msra.mxu0 %v2505_v17 }
  0x55   : > { %v2488_v24 = vld [vmem:[%s4029_s6 + $0xa0] sm:$0xf]  ;;  %v3329_v25 = vld [vmem:[%s4029_s6 + $0xac] sm:$0xf0]  ;;  %v2889_v26 = vor.u32 %v3429_v23, %v2888_v21  ;;  %1717 = vmatpush.bf16.msra.mxu1 %v2633_v18 }
  0x56   : > { %v2616_v27 = vld [vmem:[%s4029_s6 + $0x1a0] sm:$0xf]  ;;  %v3361_v28 = vld [vmem:[%s4029_s6 + $0x1ac] sm:$0xf0]  ;;  %v2489_v30 = vor.u32 %v3329_v25, %v2488_v24  ;;  %1730 = vmatpush.bf16.msra.mxu2 %v2761_v22 }
  0x57   : > { %v2744_v29 = vld [vmem:[%s4029_s6 + $0x2a0] sm:$0xf]  ;;  %v3393_v31 = vld [vmem:[%s4029_s6 + $0x2ac] sm:$0xf0]  ;;  %v2617_v34 = vor.u32 %v3361_v28, %v2616_v27  ;;  %1743 = vmatpush.bf16.msra.mxu3 %v2889_v26 }
  0x58   : > { %v2872_v32 = vld [vmem:[%s4029_s6 + $0x3a0] sm:$0xf]  ;;  %v3425_v33 = vld [vmem:[%s4029_s6 + $0x3ac] sm:$0xf0]  ;;  %v2745_v35 = vor.u32 %v3393_v31, %v2744_v29  ;;  %1705 = vmatpush.bf16.msra.mxu0 %v2489_v30 }
  0x59   : > { %v2472_v36 = vld [vmem:[%s4029_s6 + $0x80] sm:$0xf]  ;;  %v3325_v37 = vld [vmem:[%s4029_s6 + $0x8c] sm:$0xf0]  ;;  %v2873_v39 = vor.u32 %v3425_v33, %v2872_v32  ;;  %1718 = vmatpush.bf16.msra.mxu1 %v2617_v34 }
  0x5a   : > { %v2600_v38 = vld [vmem:[%s4029_s6 + $0x180] sm:$0xf]  ;;  %v3357_v40 = vld [vmem:[%s4029_s6 + $0x18c] sm:$0xf0]  ;;  %v2473_v45 = vor.u32 %v3325_v37, %v2472_v36  ;;  %1731 = vmatpush.bf16.msra.mxu2 %v2745_v35 }
  0x5b   : > { %v2728_v41 = vld [vmem:[%s4029_s6 + $0x280] sm:$0xf]  ;;  %v3389_v42 = vld [vmem:[%s4029_s6 + $0x28c] sm:$0xf0]  ;;  %v2601_v46 = vor.u32 %v3357_v40, %v2600_v38  ;;  %1744 = vmatpush.bf16.msra.mxu3 %v2873_v39  ;;  %v3335_v38 = vld [vmem:[%s4029_s6 + $0xe4] sm:$0xf] }
  0x5c   : > { %v2856_v43 = vld [vmem:[%s4029_s6 + $0x380] sm:$0xf]  ;;  %v3421_v44 = vld [vmem:[%s4029_s6 + $0x38c] sm:$0xf0]  ;;  %v2729_v47 = vor.u32 %v3389_v42, %v2728_v41  ;;  %1706 = vmatpush.bf16.msra.mxu0 %v2473_v45  ;;  %v2522_v39 = vld [vmem:[%s4029_s6 + $0xf0] sm:$0xf0] }
  0x5d   : > { %v2456_v48 = vld [vmem:[%s4029_s6 + $0x60] sm:$0xf]  ;;  %v3321_v49 = vld [vmem:[%s4029_s6 + $0x6c] sm:$0xf0]  ;;  %v2857_v51 = vor.u32 %v3421_v44, %v2856_v43  ;;  %1719 = vmatpush.bf16.msra.mxu1 %v2601_v46 }
  0x5e   : > { %v2584_v50 = vld [vmem:[%s4029_s6 + $0x160] sm:$0xf]  ;;  %v3353_v52 = vld [vmem:[%s4029_s6 + $0x16c] sm:$0xf0]  ;;  %v2457_v57 = vor.u32 %v3321_v49, %v2456_v48  ;;  %1732 = vmatpush.bf16.msra.mxu2 %v2729_v47  ;;  %v2525_v47 = vor.u32 %v3335_v38, %v2522_v39 }
  0x5f   : > { %v2712_v53 = vld [vmem:[%s4029_s6 + $0x260] sm:$0xf]  ;;  %v3385_v54 = vld [vmem:[%s4029_s6 + $0x26c] sm:$0xf0]  ;;  %v2585_v58 = vor.u32 %v3353_v52, %v2584_v50  ;;  %1745 = vmatpush.bf16.msra.mxu3 %v2857_v51  ;;  %v3331_v51 = vld [vmem:[%s4029_s6 + $0xc4] sm:$0xf] }
  0x60   : > { %v2840_v55 = vld [vmem:[%s4029_s6 + $0x360] sm:$0xf]  ;;  %v3417_v56 = vld [vmem:[%s4029_s6 + $0x36c] sm:$0xf0]  ;;  %v2713_v59 = vor.u32 %v3385_v54, %v2712_v53  ;;  %1707 = vmatpush.bf16.msra.mxu0 %v2457_v57  ;;  %v2506_v52 = vld [vmem:[%s4029_s6 + $0xd0] sm:$0xf0] }
  0x61   : > { %v2440_v60 = vld [vmem:[%s4029_s6 + $0x40] sm:$0xf]  ;;  %v3317_v61 = vld [vmem:[%s4029_s6 + $0x4c] sm:$0xf0]  ;;  %v2841_v63 = vor.u32 %v3417_v56, %v2840_v55  ;;  %1720 = vmatpush.bf16.msra.mxu1 %v2585_v58 }
  0x62   : > { %v2568_v62 = vld [vmem:[%s4029_s6 + $0x140] sm:$0xf]  ;;  %v3349_v0 = vld [vmem:[%s4029_s6 + $0x14c] sm:$0xf0]  ;;  %v2441_v5 = vor.u32 %v3317_v61, %v2440_v60  ;;  %1733 = vmatpush.bf16.msra.mxu2 %v2713_v59  ;;  %v2509_v61 = vor.u32 %v3331_v51, %v2506_v52  ;;  %v3311_v52 = vld [vmem:[%s4029_s6 + $0x24] sm:$0xf] }
  0x63   : > { %v2696_v1 = vld [vmem:[%s4029_s6 + $0x240] sm:$0xf]  ;;  %v3381_v2 = vld [vmem:[%s4029_s6 + $0x24c] sm:$0xf0]  ;;  %v2569_v6 = vor.u32 %v3349_v0, %v2568_v62  ;;  %1746 = vmatpush.bf16.msra.mxu3 %v2841_v63  ;;  %v3327_v0 = vld [vmem:[%s4029_s6 + $0xa4] sm:$0xf] }
  0x64   : > { %v2824_v3 = vld [vmem:[%s4029_s6 + $0x340] sm:$0xf]  ;;  %v3413_v4 = vld [vmem:[%s4029_s6 + $0x34c] sm:$0xf0]  ;;  %v2697_v7 = vor.u32 %v3381_v2, %v2696_v1  ;;  %1708 = vmatpush.bf16.msra.mxu0 %v2441_v5  ;;  %v2490_v1 = vld [vmem:[%s4029_s6 + $0xb0] sm:$0xf0] }
  0x65   : > { %v2424_v8 = vld [vmem:[%s4029_s6 + $0x20] sm:$0xf]  ;;  %v3313_v9 = vld [vmem:[%s4029_s6 + $0x2c] sm:$0xf0]  ;;  %v2825_v11 = vor.u32 %v3413_v4, %v2824_v3  ;;  %1721 = vmatpush.bf16.msra.mxu1 %v2569_v6 }
  0x66   : > { %v2552_v10 = vld [vmem:[%s4029_s6 + $0x120] sm:$0xf]  ;;  %v3345_v12 = vld [vmem:[%s4029_s6 + $0x12c] sm:$0xf0]  ;;  %v2425_v17 = vor.u32 %v3313_v9, %v2424_v8  ;;  %1734 = vmatpush.bf16.msra.mxu2 %v2697_v7  ;;  %v2493_v8 = vor.u32 %v3327_v0, %v2490_v1  ;;  %v3307_v0 = vld [vmem:[%s4029_s6 + $0x4] sm:$0xf] }
  0x67   : > { %v2680_v13 = vld [vmem:[%s4029_s6 + $0x220] sm:$0xf]  ;;  %v3377_v14 = vld [vmem:[%s4029_s6 + $0x22c] sm:$0xf0]  ;;  %v2553_v20 = vor.u32 %v3345_v12, %v2552_v10  ;;  %1747 = vmatpush.bf16.msra.mxu3 %v2825_v11  ;;  %v3323_v12 = vld [vmem:[%s4029_s6 + $0x84] sm:$0xf] }
  0x68   : > { %v2808_v15 = vld [vmem:[%s4029_s6 + $0x320] sm:$0xf]  ;;  %v3409_v16 = vld [vmem:[%s4029_s6 + $0x32c] sm:$0xf0]  ;;  %v2681_v21 = vor.u32 %v3377_v14, %v2680_v13  ;;  %1709 = vmatpush.bf16.msra.mxu0 %v2425_v17  ;;  %v2474_v13 = vld [vmem:[%s4029_s6 + $0x90] sm:$0xf0] }
  0x69   : > { %v2408_v18 = vld [vmem:[%s4029_s6] sm:$0xf]  ;;  %v3309_v19 = vld [vmem:[%s4029_s6 + $0xc] sm:$0xf0]  ;;  %v2809_v25 = vor.u32 %v3409_v16, %v2808_v15  ;;  %1722 = vmatpush.bf16.msra.mxu1 %v2553_v20  ;;  %v2410_v1 = vld [vmem:[%s4029_s6 + $0x10] sm:$0xf0] }
  0x6a   : > { %v2536_v22 = vld [vmem:[%s4029_s6 + $0x100] sm:$0xf]  ;;  %v3341_v23 = vld [vmem:[%s4029_s6 + $0x10c] sm:$0xf0]  ;;  %v2409_v32 = vor.u32 %v3309_v19, %v2408_v18  ;;  %1735 = vmatpush.bf16.msra.mxu2 %v2681_v21 }
  0x6b   : > { %v2664_v24 = vld [vmem:[%s4029_s6 + $0x200] sm:$0xf]  ;;  %v3373_v26 = vld [vmem:[%s4029_s6 + $0x20c] sm:$0xf0]  ;;  %v2537_v36 = vor.u32 %v3341_v23, %v2536_v22  ;;  %1748 = vmatpush.bf16.msra.mxu3 %v2809_v25 }
  0x6c   : > { %v2792_v27 = vld [vmem:[%s4029_s6 + $0x300] sm:$0xf]  ;;  %v3405_v28 = vld [vmem:[%s4029_s6 + $0x30c] sm:$0xf0]  ;;  %v2665_v37 = vor.u32 %v3373_v26, %v2664_v24  ;;  %1710 = vmatpush.bf16.msra.mxu0 %v2409_v32  ;;  %v2477_v24 = vor.u32 %v3323_v12, %v2474_v13  ;;  %v3034_v12 = vld [vmem:[%s4029_s6 + $0x4f0] sm:$0xf0]  ;;  %v2413_v13 = vor.u32 %v3307_v0, %v2410_v1 }
  0x6d   : > { %v3032_v29 = vld [vmem:[%s4029_s6 + $0x4e0] sm:$0xf]  ;;  %v3465_v30 = vld [vmem:[%s4029_s6 + $0x4ec] sm:$0xf0]  ;;  %v2793_v40 = vor.u32 %v3405_v28, %v2792_v27  ;;  %1723 = vmatpush.bf16.msra.mxu1 %v2537_v36  ;;  %v3319_v28 = vld [vmem:[%s4029_s6 + $0x64] sm:$0xf] }
  0x6e   : > { %v3160_v31 = vld [vmem:[%s4029_s6 + $0x5e0] sm:$0xf]  ;;  %v3497_v33 = vld [vmem:[%s4029_s6 + $0x5ec] sm:$0xf0]  ;;  %v3033_v41 = vor.u32 %v3465_v30, %v3032_v29  ;;  %1736 = vmatpush.bf16.msra.mxu2 %v2665_v37  ;;  %v2458_v29 = vld [vmem:[%s4029_s6 + $0x70] sm:$0xf0] }
  0x6f   : > { %v3288_v34 = vld [vmem:[%s4029_s6 + $0x6e0] sm:$0xf]  ;;  %v3529_v35 = vld [vmem:[%s4029_s6 + $0x6ec] sm:$0xf0]  ;;  %v3161_v42 = vor.u32 %v3497_v33, %v3160_v31  ;;  %1749 = vmatpush.bf16.msra.mxu3 %v2793_v40  ;;  %v2461_v36 = vor.u32 %v3319_v28, %v2458_v29  ;;  %v3315_v40 = vld [vmem:[%s4029_s6 + $0x44] sm:$0xf] }
  0x70   : > { %v3289_v43 = vor.u32 %v3529_v35, %v3288_v34  ;;  %v3016_v44 = vld [vmem:[%s4029_s6 + $0x4c0] sm:$0xf]  ;;  %v3461_v45 = vld [vmem:[%s4029_s6 + $0x4cc] sm:$0xf0]  ;;  %1755 = vmatpush.bf16.msrb.mxu0 %v3033_v41  ;;  %v2442_v41 = vld [vmem:[%s4029_s6 + $0x50] sm:$0xf0] }
  0x71   : > { %v3144_v46 = vld [vmem:[%s4029_s6 + $0x5c0] sm:$0xf]  ;;  %v3493_v48 = vld [vmem:[%s4029_s6 + $0x5cc] sm:$0xf0]  ;;  %v3017_v53 = vor.u32 %v3461_v45, %v3016_v44  ;;  %1768 = vmatpush.bf16.msrb.mxu1 %v3161_v42  ;;  %v3459_v28 = vld [vmem:[%s4029_s6 + $0x4c4] sm:$0xf] }
  0x72   : > { %v3272_v49 = vld [vmem:[%s4029_s6 + $0x6c0] sm:$0xf]  ;;  %v3525_v50 = vld [vmem:[%s4029_s6 + $0x6cc] sm:$0xf0]  ;;  %1781 = vmatpush.bf16.msrb.mxu2 %v3289_v43  ;;  %v3145_v56 = vor.u32 %v3493_v48, %v3144_v46  ;;  %v2445_v48 = vor.u32 %v3315_v40, %v2442_v41  ;;  %v3018_v29 = vld [vmem:[%s4029_s6 + $0x4d0] sm:$0xf0] }
  0x73   : > { %v3000_v54 = vld [vmem:[%s4029_s6 + $0x4a0] sm:$0xf]  ;;  %v3457_v55 = vld [vmem:[%s4029_s6 + $0x4ac] sm:$0xf0]  ;;  %v3273_v57 = vor.u32 %v3525_v50, %v3272_v49  ;;  %1794 = vmatpush.bf16.msrb.mxu3 %v2525_v47  ;;  %v2746_v40 = vld [vmem:[%s4029_s6 + $0x2b0] sm:$0xf0] }
  0x74   : > { %v3128_v58 = vld [vmem:[%s4029_s6 + $0x5a0] sm:$0xf]  ;;  %v3489_v59 = vld [vmem:[%s4029_s6 + $0x5ac] sm:$0xf0]  ;;  %1756 = vmatpush.bf16.msrb.mxu0 %v3017_v53  ;;  %v3001_v2 = vor.u32 %v3457_v55, %v3000_v54  ;;  %v2426_v53 = vld [vmem:[%s4029_s6 + $0x30] sm:$0xf0] }
  0x75   : > { %v342_v60 = vld [vmem:[%s326_s8] sm:$0x7f]  ;;  %v3256_v62 = vld [vmem:[%s4029_s6 + $0x6a0] sm:$0xf]  ;;  %1769 = vmatpush.bf16.msrb.mxu1 %v3145_v56  ;;  %v3129_v3 = vor.u32 %v3489_v59, %v3128_v58  ;;  %v3423_v41 = vld [vmem:[%s4029_s6 + $0x3a4] sm:$0xf] }
  0x76   : > { %v3521_v63 = vld [vmem:[%s4029_s6 + $0x6ac] sm:$0xf0]  ;;  %568 = vst [vmem:[#allocation1] ss:$9 sm:$0xff] %v342_v60  ;;  %1782 = vmatpush.bf16.msrb.mxu2 %v3273_v57  ;;  %v2984_v5 = vld [vmem:[%s4029_s6 + $0x480] sm:$0xf] }
  0x77   : > { %v3257_v4 = vor.u32 %v3521_v63, %v3256_v62  ;;  %v3453_v6 = vld [vmem:[%s4029_s6 + $0x48c] sm:$0xf0]  ;;  %v3112_v7 = vld [vmem:[%s4029_s6 + $0x580] sm:$0xf]  ;;  %1795 = vmatpush.bf16.msrb.mxu3 %v2509_v61  ;;  %v2429_v62 = vor.u32 %v3311_v52, %v2426_v53  ;;  %v2730_v52 = vld [vmem:[%s4029_s6 + $0x290] sm:$0xf0] }
  0x78   : > { %v3485_v9 = vld [vmem:[%s4029_s6 + $0x58c] sm:$0xf0]  ;;  %v3240_v10 = vld [vmem:[%s4029_s6 + $0x680] sm:$0xf]  ;;  %1757 = vmatpush.bf16.msrb.mxu0 %v3001_v2  ;;  %v2985_v15 = vor.u32 %v3453_v6, %v2984_v5  ;;  %v3367_v2 = vld [vmem:[%s4029_s6 + $0x1e4] sm:$0xf] }
  0x79   : > { %v3517_v11 = vld [vmem:[%s4029_s6 + $0x68c] sm:$0xf0]  ;;  %v2968_v14 = vld [vmem:[%s4029_s6 + $0x460] sm:$0xf]  ;;  %1770 = vmatpush.bf16.msrb.mxu1 %v3129_v3  ;;  %v3113_v19 = vor.u32 %v3485_v9, %v3112_v7  ;;  %v2650_v3 = vld [vmem:[%s4029_s6 + $0x1f0] sm:$0xf0] }
  0x7a   : > { %v3449_v16 = vld [vmem:[%s4029_s6 + $0x46c] sm:$0xf0]  ;;  %v3096_v17 = vld [vmem:[%s4029_s6 + $0x560] sm:$0xf]  ;;  %1783 = vmatpush.bf16.msrb.mxu2 %v3257_v4  ;;  %v3241_v20 = vor.u32 %v3517_v11, %v3240_v10  ;;  %v3399_v4 = vld [vmem:[%s4029_s6 + $0x2e4] sm:$0xf] }
  0x7b   : > { %v3481_v18 = vld [vmem:[%s4029_s6 + $0x56c] sm:$0xf0]  ;;  %1796 = vmatpush.bf16.msrb.mxu3 %v2493_v8  ;;  %v3224_v25 = vld [vmem:[%s4029_s6 + $0x660] sm:$0xf]  ;;  %v2969_v30 = vor.u32 %v3449_v16, %v2968_v14  ;;  %v2778_v6 = vld [vmem:[%s4029_s6 + $0x2f0] sm:$0xf0]  ;;  %v2653_v14 = vor.u32 %v3367_v2, %v2650_v3 }
  0x7c   : > { %v3513_v26 = vld [vmem:[%s4029_s6 + $0x66c] sm:$0xf0]  ;;  %1758 = vmatpush.bf16.msrb.mxu0 %v2985_v15  ;;  %v3097_v31 = vor.u32 %v3481_v18, %v3096_v17  ;;  %v2952_v33 = vld [vmem:[%s4029_s6 + $0x440] sm:$0xf]  ;;  %v3431_v7 = vld [vmem:[%s4029_s6 + $0x3e4] sm:$0xf]  ;;  %v2781_v15 = vor.u32 %v3399_v4, %v2778_v6 }
  0x7d   : > { %v4167_v21 = vld [vmem:[#allocation1 + $0x12] sm:$0xff]  ;;  %v4169_v22 = vld [vmem:[#allocation1] sm:$0xff]  ;;  %v4171_v23 = vld [vmem:[#allocation1 + $0x9] sm:$0xff]  ;;  %1771 = vmatpush.bf16.msrb.mxu1 %v3113_v19  ;;  %v3225_v32 = vor.u32 %v3513_v26, %v3224_v25 }
  0x7e   : > { %1737 = vmatmul.bf16.vlgmr.msra.gmra.mxu2 %v4167_v21  ;;  %v4176_v27 = vld [vmem:[#allocation1 + $0x1b] sm:$0xff]  ;;  %1711 = vmatmul.bf16.vlgmr.msra.gmra.mxu0 %v4169_v22  ;;  %v3080_v35 = vld [vmem:[%s4029_s6 + $0x540] sm:$0xf]  ;;  %v2906_v8 = vld [vmem:[%s4029_s6 + $0x3f0] sm:$0xf0] }
  0x7f   : > { %1724 = vmatmul.bf16.vlgmr.msra.gmra.mxu1 %v4171_v23  ;;  %1750 = vmatmul.bf16.vlgmr.msra.gmra.mxu3 %v4176_v27  ;;  %v3445_v34 = vld [vmem:[%s4029_s6 + $0x44c] sm:$0xf0]  ;;  %v3208_v38 = vld [vmem:[%s4029_s6 + $0x640] sm:$0xf]  ;;  %v3463_v11 = vld [vmem:[%s4029_s6 + $0x4e4] sm:$0xf]  ;;  %v2909_v16 = vor.u32 %v3431_v7, %v2906_v8 }
  0x80   : > { %1784 = vmatpush.bf16.msrb.mxu2 %v3241_v20  ;;  %1797 = vmatpush.bf16.msrb.mxu3 %v2477_v24  ;;  %v3477_v37 = vld [vmem:[%s4029_s6 + $0x54c] sm:$0xf0]  ;;  %v2953_v42 = vor.u32 %v3445_v34, %v2952_v33  ;;  %v2936_v45 = vld [vmem:[%s4029_s6 + $0x420] sm:$0xf]  ;;  %v3363_v17 = vld [vmem:[%s4029_s6 + $0x1c4] sm:$0xf]  ;;  %v3037_v20 = vor.u32 %v3463_v11, %v3034_v12 }
  0x81   : > { %v3509_v39 = vld [vmem:[%s4029_s6 + $0x64c] sm:$0xf0]  ;;  %1759 = vmatpush.bf16.msrb.mxu0 %v2969_v30  ;;  %1772 = vmatpush.bf16.msrb.mxu1 %v3097_v31  ;;  %v3081_v43 = vor.u32 %v3477_v37, %v3080_v35  ;;  %v3064_v47 = vld [vmem:[%s4029_s6 + $0x520] sm:$0xf]  ;;  %v2634_v18 = vld [vmem:[%s4029_s6 + $0x1d0] sm:$0xf0] }
  0x82   : > { %v3209_v44 = vor.u32 %v3509_v39, %v3208_v38  ;;  %v3441_v46 = vld [vmem:[%s4029_s6 + $0x42c] sm:$0xf0]  ;;  %v3192_v50 = vld [vmem:[%s4029_s6 + $0x620] sm:$0xf]  ;;  %v3395_v19 = vld [vmem:[%s4029_s6 + $0x2c4] sm:$0xf]  ;;  %v2637_v31 = vor.u32 %v3363_v17, %v2634_v18  ;;  %v3021_v39 = vor.u32 %v3459_v28, %v3018_v29 }
  0x83   : > { %v3473_v49 = vld [vmem:[%s4029_s6 + $0x52c] sm:$0xf0]  ;;  %v2937_v54 = vor.u32 %v3441_v46, %v2936_v45  ;;  %v2920_v55 = vld [vmem:[%s4029_s6 + $0x400] sm:$0xf]  ;;  %v2762_v24 = vld [vmem:[%s4029_s6 + $0x2d0] sm:$0xf0] }
  0x84   : > { %1785 = vmatpush.bf16.msrb.mxu2 %v3225_v32  ;;  %1798 = vmatpush.bf16.msrb.mxu3 %v2461_v36  ;;  %v3505_v51 = vld [vmem:[%s4029_s6 + $0x62c] sm:$0xf0]  ;;  %v3065_v57 = vor.u32 %v3473_v49, %v3064_v47  ;;  %v3048_v59 = vld [vmem:[%s4029_s6 + $0x500] sm:$0xf]  ;;  %v3427_v25 = vld [vmem:[%s4029_s6 + $0x3c4] sm:$0xf]  ;;  %v2765_v34 = vor.u32 %v3395_v19, %v2762_v24 }
  0x85   : > { %1760 = vmatpush.bf16.msrb.mxu0 %v2953_v42  ;;  %v3437_v56 = vld [vmem:[%s4029_s6 + $0x40c] sm:$0xf0]  ;;  %1773 = vmatpush.bf16.msrb.mxu1 %v3081_v43  ;;  %v3193_v58 = vor.u32 %v3505_v51, %v3192_v50  ;;  %v3176_v61 = vld [vmem:[%s4029_s6 + $0x600] sm:$0xf]  ;;  %v2890_v26 = vld [vmem:[%s4029_s6 + $0x3d0] sm:$0xf0] }
  0x86   : > { %v3469_v60 = vld [vmem:[%s4029_s6 + $0x50c] sm:$0xf0]  ;;  %v2921_v5 = vor.u32 %v3437_v56, %v2920_v55  ;;  %v4223_v30 = vld [vmem:[#allocation1 + $0x36] sm:$0xff]  ;;  %v4225_v32 = vld [vmem:[#allocation1 + $0x24] sm:$0xff]  ;;  %v2893_v35 = vor.u32 %v3427_v25, %v2890_v26 }
  0x87   : > { %v3501_v63 = vld [vmem:[%s4029_s6 + $0x60c] sm:$0xf0]  ;;  %v3049_v9 = vor.u32 %v3469_v60, %v3048_v59  ;;  %v4227_v33 = vld [vmem:[#allocation1 + $0x2d] sm:$0xff]  ;;  %v2618_v37 = vld [vmem:[%s4029_s6 + $0x1b0] sm:$0xf0] }
  0x88   : > { %1786 = vmatpush.bf16.msrb.mxu2 %v3209_v44  ;;  %1799 = vmatpush.bf16.msrb.mxu3 %v2445_v48  ;;  %v3177_v10 = vor.u32 %v3501_v63, %v3176_v61  ;;  %v3359_v36 = vld [vmem:[%s4029_s6 + $0x1a4] sm:$0xf]  ;;  %v2874_v42 = vld [vmem:[%s4029_s6 + $0x3b0] sm:$0xf0] }
  0x89   : > { %1761 = vmatpush.bf16.msrb.mxu0 %v2937_v54  ;;  %1774 = vmatpush.bf16.msrb.mxu1 %v3065_v57  ;;  %v3391_v38 = vld [vmem:[%s4029_s6 + $0x2a4] sm:$0xf]  ;;  %v3002_v44 = vld [vmem:[%s4029_s6 + $0x4b0] sm:$0xf0]  ;;  %v2621_v45 = vor.u32 %v3359_v36, %v2618_v37  ;;  %v2877_v47 = vor.u32 %v3423_v41, %v2874_v42 }
  0x8a   : > { %v3455_v43 = vld [vmem:[%s4029_s6 + $0x4a4] sm:$0xf]  ;;  %v2749_v46 = vor.u32 %v3391_v38, %v2746_v40  ;;  %v2602_v49 = vld [vmem:[%s4029_s6 + $0x190] sm:$0xf0] }
  0x8b   : > { %v3355_v48 = vld [vmem:[%s4029_s6 + $0x184] sm:$0xf]  ;;  %v3005_v51 = vor.u32 %v3455_v43, %v3002_v44  ;;  %v2858_v54 = vld [vmem:[%s4029_s6 + $0x390] sm:$0xf0] }
  0x8c   : > { %1787 = vmatpush.bf16.msrb.mxu2 %v3193_v58  ;;  %1800 = vmatpush.bf16.msrb.mxu3 %v2429_v62  ;;  %v3387_v50 = vld [vmem:[%s4029_s6 + $0x284] sm:$0xf]  ;;  %v2986_v56 = vld [vmem:[%s4029_s6 + $0x490] sm:$0xf0]  ;;  %v2605_v57 = vor.u32 %v3355_v48, %v2602_v49 }
  0x8d   : > { %1762 = vmatpush.bf16.msrb.mxu0 %v2921_v5  ;;  %1775 = vmatpush.bf16.msrb.mxu1 %v3049_v9  ;;  %v3419_v53 = vld [vmem:[%s4029_s6 + $0x384] sm:$0xf]  ;;  %v2733_v58 = vor.u32 %v3387_v50, %v2730_v52  ;;  %v2586_v61 = vld [vmem:[%s4029_s6 + $0x170] sm:$0xf0] }
  0x8e   : > { %v3451_v55 = vld [vmem:[%s4029_s6 + $0x484] sm:$0xf]  ;;  %v2861_v59 = vor.u32 %v3419_v53, %v2858_v54  ;;  %v2714_v0 = vld [vmem:[%s4029_s6 + $0x270] sm:$0xf0]  ;;  %v2528_v53 = vld [vmem:[%s4029_s6 + $0xe8] sm:$0xf] }
  0x8f   : > { %v3351_v60 = vld [vmem:[%s4029_s6 + $0x164] sm:$0xf]  ;;  %v2989_v63 = vor.u32 %v3451_v55, %v2986_v56  ;;  %v2842_v2 = vld [vmem:[%s4029_s6 + $0x370] sm:$0xf0]  ;;  %v3338_v54 = vld [vmem:[%s4029_s6 + $0xf4] sm:$0xf0] }
  0x90   : > { %1788 = vmatpush.bf16.msrb.mxu2 %v3177_v10  ;;  %1801 = vmatpush.bf16.msrb.mxu3 %v2413_v13  ;;  %v3383_v62 = vld [vmem:[%s4029_s6 + $0x264] sm:$0xf]  ;;  %v2970_v4 = vld [vmem:[%s4029_s6 + $0x470] sm:$0xf0]  ;;  %v2589_v5 = vor.u32 %v3351_v60, %v2586_v61 }
  0x91   : > { %1807 = vmatpush.bf16.msra.mxu0 %v2653_v14  ;;  %1820 = vmatpush.bf16.msra.mxu1 %v2781_v15  ;;  %v3415_v1 = vld [vmem:[%s4029_s6 + $0x364] sm:$0xf]  ;;  %v2717_v6 = vor.u32 %v3383_v62, %v2714_v0  ;;  %v2570_v9 = vld [vmem:[%s4029_s6 + $0x150] sm:$0xf0]  ;;  %v2529_v62 = vor.u32 %v3338_v54, %v2528_v53 }
  0x92   : > { %1763 = vmatmul.bf16.vlgmr.msrb.gmra.mxu0 %v4225_v32  ;;  %1776 = vmatmul.bf16.vlgmr.msrb.gmra.mxu1 %v4227_v33  ;;  %v3447_v3 = vld [vmem:[%s4029_s6 + $0x464] sm:$0xf]  ;;  %v2845_v7 = vor.u32 %v3415_v1, %v2842_v2  ;;  %v2698_v12 = vld [vmem:[%s4029_s6 + $0x250] sm:$0xf0] }
  0x93   : > { %1789 = vmatmul.bf16.vlgmr.msrb.gmra.mxu2 %v4223_v30  ;;  %1802 = vmatmul.bf16.vlgmr.msrb.gmra.mxu3 %v4169_v22  ;;  %v3347_v8 = vld [vmem:[%s4029_s6 + $0x144] sm:$0xf]  ;;  %v2973_v11 = vor.u32 %v3447_v3, %v2970_v4  ;;  %v2826_v14 = vld [vmem:[%s4029_s6 + $0x350] sm:$0xf0]  ;;  %v2512_v4 = vld [vmem:[%s4029_s6 + $0xc8] sm:$0xf] }
  0x94   : > { %1833 = vmatpush.bf16.msra.mxu2 %v2909_v16  ;;  %1846 = vmatpush.bf16.msra.mxu3 %v3037_v20  ;;  %v3379_v10 = vld [vmem:[%s4029_s6 + $0x244] sm:$0xf]  ;;  %v2954_v16 = vld [vmem:[%s4029_s6 + $0x450] sm:$0xf0]  ;;  %v2573_v17 = vor.u32 %v3347_v8, %v2570_v9 }
  0x95   : > { %1808 = vmatpush.bf16.msra.mxu0 %v2637_v31  ;;  %1821 = vmatpush.bf16.msra.mxu1 %v2765_v34  ;;  %v3411_v13 = vld [vmem:[%s4029_s6 + $0x344] sm:$0xf]  ;;  %v2701_v18 = vor.u32 %v3379_v10, %v2698_v12  ;;  %v2554_v24 = vld [vmem:[%s4029_s6 + $0x130] sm:$0xf0] }
  0x96   : > { %v3443_v15 = vld [vmem:[%s4029_s6 + $0x444] sm:$0xf]  ;;  %v2829_v19 = vor.u32 %v3411_v13, %v2826_v14  ;;  %v2682_v28 = vld [vmem:[%s4029_s6 + $0x230] sm:$0xf0] }
  0x97   : > { %v3343_v20 = vld [vmem:[%s4029_s6 + $0x124] sm:$0xf]  ;;  %v2957_v26 = vor.u32 %v3443_v15, %v2954_v16  ;;  %v2810_v31 = vld [vmem:[%s4029_s6 + $0x330] sm:$0xf0]  ;;  %v2496_v16 = vld [vmem:[%s4029_s6 + $0xa8] sm:$0xf] }
  0x98   : > { %1834 = vmatpush.bf16.msra.mxu2 %v2893_v35  ;;  %1847 = vmatpush.bf16.msra.mxu3 %v3021_v39  ;;  %v3375_v25 = vld [vmem:[%s4029_s6 + $0x224] sm:$0xf]  ;;  %v2938_v35 = vld [vmem:[%s4029_s6 + $0x430] sm:$0xf0]  ;;  %v2557_v36 = vor.u32 %v3343_v20, %v2554_v24 }
  0x99   : > { %1809 = vmatpush.bf16.msra.mxu0 %v2621_v45  ;;  %1822 = vmatpush.bf16.msra.mxu1 %v2749_v46  ;;  %v3407_v29 = vld [vmem:[%s4029_s6 + $0x324] sm:$0xf]  ;;  %v2538_v38 = vld [vmem:[%s4029_s6 + $0x110] sm:$0xf0]  ;;  %v2685_v39 = vor.u32 %v3375_v25, %v2682_v28 }
  0x9a   : > { %v3439_v34 = vld [vmem:[%s4029_s6 + $0x424] sm:$0xf]  ;;  %v2813_v40 = vor.u32 %v3407_v29, %v2810_v31  ;;  %v2666_v42 = vld [vmem:[%s4029_s6 + $0x210] sm:$0xf0] }
  0x9b   : > { %v3339_v37 = vld [vmem:[%s4029_s6 + $0x104] sm:$0xf]  ;;  %v2941_v44 = vor.u32 %v3439_v34, %v2938_v35  ;;  %v2794_v45 = vld [vmem:[%s4029_s6 + $0x310] sm:$0xf0]  ;;  %v2480_v35 = vld [vmem:[%s4029_s6 + $0x88] sm:$0xf] }
  0x9c   : > { %1835 = vmatpush.bf16.msra.mxu2 %v2877_v47  ;;  %1848 = vmatpush.bf16.msra.mxu3 %v3005_v51  ;;  %v3371_v41 = vld [vmem:[%s4029_s6 + $0x204] sm:$0xf]  ;;  %v2922_v47 = vld [vmem:[%s4029_s6 + $0x410] sm:$0xf0]  ;;  %v2541_v51 = vor.u32 %v3339_v37, %v2538_v38  ;;  %v2608_v37 = vld [vmem:[%s4029_s6 + $0x188] sm:$0xf] }
  0x9d   : > { %1810 = vmatpush.bf16.msra.mxu0 %v2605_v57  ;;  %1823 = vmatpush.bf16.msra.mxu1 %v2733_v58  ;;  %v3403_v43 = vld [vmem:[%s4029_s6 + $0x304] sm:$0xf]  ;;  %v3162_v49 = vld [vmem:[%s4029_s6 + $0x5f0] sm:$0xf0]  ;;  %v2669_v55 = vor.u32 %v3371_v41, %v2666_v42  ;;  %v2656_v57 = vld [vmem:[%s4029_s6 + $0x1e8] sm:$0xf] }
  0x9e   : > { %v3435_v46 = vld [vmem:[%s4029_s6 + $0x404] sm:$0xf]  ;;  %v3290_v52 = vld [vmem:[%s4029_s6 + $0x6f0] sm:$0xf0]  ;;  %v2797_v56 = vor.u32 %v3403_v43, %v2794_v45  ;;  %v3370_v58 = vld [vmem:[%s4029_s6 + $0x1f4] sm:$0xf0] }
  0x9f   : > { %v3495_v48 = vld [vmem:[%s4029_s6 + $0x5e4] sm:$0xf]  ;;  %v3146_v0 = vld [vmem:[%s4029_s6 + $0x5d0] sm:$0xf0]  ;;  %v2657_v2 = vor.u32 %v3370_v58, %v2656_v57  ;;  %v3358_v38 = vld [vmem:[%s4029_s6 + $0x194] sm:$0xf0] }
  0xa0   : > { %1836 = vmatpush.bf16.msra.mxu2 %v2861_v59  ;;  %1849 = vmatpush.bf16.msra.mxu3 %v2989_v63  ;;  %v3527_v50 = vld [vmem:[%s4029_s6 + $0x6e4] sm:$0xf]  ;;  %v2925_v59 = vor.u32 %v3435_v46, %v2922_v47  ;;  %v3165_v60 = vor.u32 %v3495_v48, %v3162_v49  ;;  %v3274_v3 = vld [vmem:[%s4029_s6 + $0x6d0] sm:$0xf0]  ;;  %v2609_v45 = vor.u32 %v3358_v38, %v2608_v37  ;;  %v2464_v47 = vld [vmem:[%s4029_s6 + $0x68] sm:$0xf] }
  0xa1   : > { %1811 = vmatpush.bf16.msra.mxu0 %v2589_v5  ;;  %1824 = vmatpush.bf16.msra.mxu1 %v2717_v6  ;;  %v3293_v61 = vor.u32 %v3527_v50, %v3290_v52  ;;  %v3491_v63 = vld [vmem:[%s4029_s6 + $0x5c4] sm:$0xf]  ;;  %v3334_v5 = vld [vmem:[%s4029_s6 + $0xd4] sm:$0xf0]  ;;  %v2640_v6 = vld [vmem:[%s4029_s6 + $0x1c8] sm:$0xf] }
  0xa2   : > { %v3523_v1 = vld [vmem:[%s4029_s6 + $0x6c4] sm:$0xf]  ;;  %v3149_v8 = vor.u32 %v3491_v63, %v3146_v0  ;;  %v2513_v10 = vor.u32 %v3334_v5, %v2512_v4  ;;  %v3130_v12 = vld [vmem:[%s4029_s6 + $0x5b0] sm:$0xf0]  ;;  %v3322_v48 = vld [vmem:[%s4029_s6 + $0x74] sm:$0xf0] }
  0xa3   : > { %v3277_v9 = vor.u32 %v3523_v1, %v3274_v3  ;;  %v3519_v13 = vld [vmem:[%s4029_s6 + $0x6a4] sm:$0xf]  ;;  %v3258_v15 = vld [vmem:[%s4029_s6 + $0x6b0] sm:$0xf0]  ;;  %v2592_v49 = vld [vmem:[%s4029_s6 + $0x168] sm:$0xf]  ;;  %v2465_v53 = vor.u32 %v3322_v48, %v2464_v47 }
  0xa4   : > { %1837 = vmatpush.bf16.msra.mxu2 %v2845_v7  ;;  %1850 = vmatpush.bf16.msra.mxu3 %v2973_v11  ;;  %v3366_v7 = vld [vmem:[%s4029_s6 + $0x1d4] sm:$0xf0]  ;;  %v3487_v11 = vld [vmem:[%s4029_s6 + $0x5a4] sm:$0xf]  ;;  %v3261_v24 = vor.u32 %v3519_v13, %v3258_v15  ;;  %v3114_v28 = vld [vmem:[%s4029_s6 + $0x590] sm:$0xf0] }
  0xa5   : > { %1812 = vmatpush.bf16.msra.mxu0 %v2573_v17  ;;  %1825 = vmatpush.bf16.msra.mxu1 %v2701_v18  ;;  %v2641_v14 = vor.u32 %v3366_v7, %v2640_v6  ;;  %v3330_v17 = vld [vmem:[%s4029_s6 + $0xb4] sm:$0xf0]  ;;  %v2624_v18 = vld [vmem:[%s4029_s6 + $0x1a8] sm:$0xf]  ;;  %v3133_v20 = vor.u32 %v3487_v11, %v3130_v12  ;;  %v3515_v29 = vld [vmem:[%s4029_s6 + $0x684] sm:$0xf] }
  0xa6   : > { %v2497_v25 = vor.u32 %v3330_v17, %v2496_v16  ;;  %v3242_v34 = vld [vmem:[%s4029_s6 + $0x690] sm:$0xf0]  ;;  %v3479_v42 = vld [vmem:[%s4029_s6 + $0x564] sm:$0xf]  ;;  %v3354_v50 = vld [vmem:[%s4029_s6 + $0x174] sm:$0xf0] }
  0xa7   : > { %v3098_v43 = vld [vmem:[%s4029_s6 + $0x570] sm:$0xf0]  ;;  %v3475_v54 = vld [vmem:[%s4029_s6 + $0x544] sm:$0xf]  ;;  %v2593_v57 = vor.u32 %v3354_v50, %v2592_v49  ;;  %v2432_v7 = vld [vmem:[%s4029_s6 + $0x28] sm:$0xf] }
  0xa8   : > { %1838 = vmatpush.bf16.msra.mxu2 %v2829_v19  ;;  %1851 = vmatpush.bf16.msra.mxu3 %v2957_v26  ;;  %v3362_v19 = vld [vmem:[%s4029_s6 + $0x1b4] sm:$0xf0]  ;;  %v3483_v26 = vld [vmem:[%s4029_s6 + $0x584] sm:$0xf]  ;;  %v3226_v46 = vld [vmem:[%s4029_s6 + $0x670] sm:$0xf0] }
  0xa9   : > { %1813 = vmatpush.bf16.msra.mxu0 %v2557_v36  ;;  %1826 = vmatpush.bf16.msra.mxu1 %v2685_v39  ;;  %v2625_v31 = vor.u32 %v3362_v19, %v2624_v18  ;;  %v3326_v36 = vld [vmem:[%s4029_s6 + $0x94] sm:$0xf0]  ;;  %v3117_v39 = vor.u32 %v3483_v26, %v3114_v28  ;;  %v3210_v58 = vld [vmem:[%s4029_s6 + $0x650] sm:$0xf0]  ;;  %v3503_v4 = vld [vmem:[%s4029_s6 + $0x624] sm:$0xf] }
  0xaa   : > { %v2481_v41 = vor.u32 %v3326_v36, %v2480_v35  ;;  %v3066_v3 = vld [vmem:[%s4029_s6 + $0x530] sm:$0xf0]  ;;  %v3467_v12 = vld [vmem:[%s4029_s6 + $0x504] sm:$0xf]  ;;  %v2416_v18 = vld [vmem:[%s4029_s6 + $0x8] sm:$0xf] }
  0xab   : > { %v3194_v6 = vld [vmem:[%s4029_s6 + $0x630] sm:$0xf0]  ;;  %v3499_v16 = vld [vmem:[%s4029_s6 + $0x604] sm:$0xf]  ;;  %v2784_v26 = vld [vmem:[%s4029_s6 + $0x2e8] sm:$0xf] }
  0xac   : > { %1839 = vmatpush.bf16.msra.mxu2 %v2813_v40  ;;  %1852 = vmatpush.bf16.msra.mxu3 %v2941_v44  ;;  %v3245_v40 = vor.u32 %v3515_v29, %v3242_v34  ;;  %v3511_v44 = vld [vmem:[%s4029_s6 + $0x664] sm:$0xf]  ;;  %v3050_v13 = vld [vmem:[%s4029_s6 + $0x510] sm:$0xf0]  ;;  %v3402_v28 = vld [vmem:[%s4029_s6 + $0x2f4] sm:$0xf0] }
  0xad   : > { %1814 = vmatpush.bf16.msra.mxu0 %v2541_v51  ;;  %1827 = vmatpush.bf16.msra.mxu1 %v2669_v55  ;;  %v3101_v51 = vor.u32 %v3479_v42, %v3098_v43  ;;  %v3229_v52 = vor.u32 %v3511_v44, %v3226_v46  ;;  %v3082_v55 = vld [vmem:[%s4029_s6 + $0x550] sm:$0xf0]  ;;  %v2912_v29 = vld [vmem:[%s4029_s6 + $0x3e8] sm:$0xf]  ;;  %v3434_v34 = vld [vmem:[%s4029_s6 + $0x3f4] sm:$0xf0]  ;;  %v2785_v42 = vor.u32 %v3402_v28, %v2784_v26 }
  0xae   : > { %v3085_v63 = vor.u32 %v3475_v54, %v3082_v55  ;;  %v3178_v17 = vld [vmem:[%s4029_s6 + $0x610] sm:$0xf0]  ;;  %v3040_v35 = vld [vmem:[%s4029_s6 + $0x4e8] sm:$0xf]  ;;  %v3466_v36 = vld [vmem:[%s4029_s6 + $0x4f4] sm:$0xf0]  ;;  %v2913_v43 = vor.u32 %v3434_v34, %v2912_v29 }
  0xaf   : > { %v3181_v37 = vor.u32 %v3499_v16, %v3178_v17  ;;  %v3041_v44 = vor.u32 %v3466_v36, %v3040_v35  ;;  %v3398_v46 = vld [vmem:[%s4029_s6 + $0x2d4] sm:$0xf0]  ;;  %v2896_v47 = vld [vmem:[%s4029_s6 + $0x3c8] sm:$0xf] }
  0xb0   : > { %1840 = vmatpush.bf16.msra.mxu2 %v2797_v56  ;;  %1853 = vmatpush.bf16.msra.mxu3 %v2925_v59  ;;  %v3507_v56 = vld [vmem:[%s4029_s6 + $0x644] sm:$0xf]  ;;  %v2448_v59 = vld [vmem:[%s4029_s6 + $0x48] sm:$0xf]  ;;  %v3430_v49 = vld [vmem:[%s4029_s6 + $0x3d4] sm:$0xf0] }
  0xb1   : > { %1859 = vmatpush.bf16.msrb.mxu0 %v3165_v60  ;;  %1872 = vmatpush.bf16.msrb.mxu1 %v3293_v61  ;;  %v3318_v60 = vld [vmem:[%s4029_s6 + $0x54] sm:$0xf0]  ;;  %v2576_v61 = vld [vmem:[%s4029_s6 + $0x148] sm:$0xf]  ;;  %v3213_v0 = vor.u32 %v3507_v56, %v3210_v58  ;;  %v2897_v55 = vor.u32 %v3430_v49, %v2896_v47 }
  0xb2   : > { %1815 = vmatmul.bf16.vlgmr.msra.gmra.mxu0 %v4171_v23  ;;  %1828 = vmatmul.bf16.vlgmr.msra.gmra.mxu1 %v4167_v21  ;;  %v2449_v1 = vor.u32 %v3318_v60, %v2448_v59  ;;  %v3024_v50 = vld [vmem:[%s4029_s6 + $0x4c8] sm:$0xf]  ;;  %v3394_v58 = vld [vmem:[%s4029_s6 + $0x2b4] sm:$0xf0] }
  0xb3   : > { %1841 = vmatmul.bf16.vlgmr.msra.gmra.mxu2 %v4176_v27  ;;  %1854 = vmatmul.bf16.vlgmr.msra.gmra.mxu3 %v4225_v32  ;;  %v2880_v59 = vld [vmem:[%s4029_s6 + $0x3a8] sm:$0xf]  ;;  %v3382_v34 = vld [vmem:[%s4029_s6 + $0x254] sm:$0xf0] }
  0xb4   : > { %1885 = vmatpush.bf16.msrb.mxu2 %v2529_v62  ;;  %1898 = vmatpush.bf16.msrb.mxu3 %v2657_v2  ;;  %v3350_v62 = vld [vmem:[%s4029_s6 + $0x154] sm:$0xf0]  ;;  %v3471_v2 = vld [vmem:[%s4029_s6 + $0x524] sm:$0xf]  ;;  %v2848_v16 = vld [vmem:[%s4029_s6 + $0x368] sm:$0xf] }
  0xb5   : > { %1860 = vmatpush.bf16.msrb.mxu0 %v3149_v8  ;;  %1873 = vmatpush.bf16.msrb.mxu1 %v3277_v9  ;;  %v2577_v5 = vor.u32 %v3350_v62, %v2576_v61  ;;  %v3314_v8 = vld [vmem:[%s4029_s6 + $0x34] sm:$0xf0]  ;;  %v2560_v9 = vld [vmem:[%s4029_s6 + $0x128] sm:$0xf]  ;;  %v3069_v11 = vor.u32 %v3471_v2, %v3066_v3 }
  0xb6   : > { %v2433_v15 = vor.u32 %v3314_v8, %v2432_v7  ;;  %v3426_v61 = vld [vmem:[%s4029_s6 + $0x3b4] sm:$0xf0]  ;;  %v3008_v62 = vld [vmem:[%s4029_s6 + $0x4a8] sm:$0xf] }
  0xb7   : > { %v2881_v3 = vor.u32 %v3426_v61, %v2880_v59  ;;  %v3422_v8 = vld [vmem:[%s4029_s6 + $0x394] sm:$0xf0]  ;;  %v2832_v35 = vld [vmem:[%s4029_s6 + $0x348] sm:$0xf] }
  0xb8   : > { %1886 = vmatpush.bf16.msrb.mxu2 %v2513_v10  ;;  %1899 = vmatpush.bf16.msrb.mxu3 %v2641_v14  ;;  %v3346_v10 = vld [vmem:[%s4029_s6 + $0x134] sm:$0xf0]  ;;  %v3197_v14 = vor.u32 %v3503_v4, %v3194_v6  ;;  %v2864_v6 = vld [vmem:[%s4029_s6 + $0x388] sm:$0xf] }
  0xb9   : > { %1861 = vmatpush.bf16.msrb.mxu0 %v3133_v20  ;;  %1874 = vmatpush.bf16.msrb.mxu1 %v3261_v24  ;;  %v2561_v19 = vor.u32 %v3346_v10, %v2560_v9  ;;  %v3310_v20 = vld [vmem:[%s4029_s6 + $0x14] sm:$0xf0]  ;;  %v2544_v24 = vld [vmem:[%s4029_s6 + $0x108] sm:$0xf] }
  0xba   : > { %v2417_v38 = vor.u32 %v3310_v20, %v2416_v18  ;;  %v3454_v9 = vld [vmem:[%s4029_s6 + $0x494] sm:$0xf0]  ;;  %v3120_v10 = vld [vmem:[%s4029_s6 + $0x588] sm:$0xf] }
  0xbb   : > { %v3418_v18 = vld [vmem:[%s4029_s6 + $0x374] sm:$0xf0]  ;;  %v2816_v47 = vld [vmem:[%s4029_s6 + $0x328] sm:$0xf] }
  0xbc   : > { %1887 = vmatpush.bf16.msrb.mxu2 %v2497_v25  ;;  %1900 = vmatpush.bf16.msrb.mxu3 %v2625_v31  ;;  %v3342_v25 = vld [vmem:[%s4029_s6 + $0x114] sm:$0xf0]  ;;  %v3053_v31 = vor.u32 %v3467_v12, %v3050_v13  ;;  %v2865_v12 = vor.u32 %v3422_v8, %v2864_v6  ;;  %v2849_v28 = vor.u32 %v3418_v18, %v2848_v16  ;;  %v2800_v59 = vld [vmem:[%s4029_s6 + $0x308] sm:$0xf]  ;;  %v3368_v6 = vld [vmem:[%s4029_s6 + $0x1ec] sm:$0xf] }
  0xbd   : > { %1862 = vmatpush.bf16.msrb.mxu0 %v3117_v39  ;;  %1875 = vmatpush.bf16.msrb.mxu1 %v3245_v40  ;;  %v3168_v39 = vld [vmem:[%s4029_s6 + $0x5e8] sm:$0xf]  ;;  %v3498_v40 = vld [vmem:[%s4029_s6 + $0x5f4] sm:$0xf0]  ;;  %v3332_v16 = vld [vmem:[%s4029_s6 + $0xcc] sm:$0xf] }
  0xbe   : > { %v3169_v48 = vor.u32 %v3498_v40, %v3168_v39  ;;  %v3450_v20 = vld [vmem:[%s4029_s6 + $0x474] sm:$0xf0]  ;;  %v3088_v40 = vld [vmem:[%s4029_s6 + $0x548] sm:$0xf]  ;;  %v2514_v18 = vld [vmem:[%s4029_s6 + $0xd8] sm:$0xf0] }
  0xbf   : > { %v3446_v39 = vld [vmem:[%s4029_s6 + $0x454] sm:$0xf0]  ;;  %v2928_v61 = vld [vmem:[%s4029_s6 + $0x408] sm:$0xf] }
  0xc0   : > { %1888 = vmatpush.bf16.msrb.mxu2 %v2481_v41  ;;  %1901 = vmatpush.bf16.msrb.mxu3 %v2609_v45  ;;  %v2545_v41 = vor.u32 %v3342_v25, %v2544_v24  ;;  %v2768_v45 = vld [vmem:[%s4029_s6 + $0x2c8] sm:$0xf]  ;;  %v3482_v25 = vld [vmem:[%s4029_s6 + $0x574] sm:$0xf0] }
  0xc1   : > { %1863 = vmatpush.bf16.msrb.mxu0 %v3101_v51  ;;  %1876 = vmatpush.bf16.msrb.mxu1 %v3229_v52  ;;  %v3462_v51 = vld [vmem:[%s4029_s6 + $0x4d4] sm:$0xf0]  ;;  %v3152_v52 = vld [vmem:[%s4029_s6 + $0x5c8] sm:$0xf]  ;;  %v2769_v54 = vor.u32 %v3398_v46, %v2768_v45 }
  0xc2   : > { %v3025_v56 = vor.u32 %v3462_v51, %v3024_v50  ;;  %v3104_v24 = vld [vmem:[%s4029_s6 + $0x568] sm:$0xf]  ;;  %v3378_v46 = vld [vmem:[%s4029_s6 + $0x234] sm:$0xf0] }
  0xc3   : > { %v3105_v36 = vor.u32 %v3482_v25, %v3104_v24  ;;  %v2688_v45 = vld [vmem:[%s4029_s6 + $0x228] sm:$0xf]  ;;  %v3410_v49 = vld [vmem:[%s4029_s6 + $0x334] sm:$0xf0]  ;;  %v3396_v24 = vld [vmem:[%s4029_s6 + $0x2cc] sm:$0xf] }
  0xc4   : > { %1889 = vmatpush.bf16.msrb.mxu2 %v2465_v53  ;;  %1902 = vmatpush.bf16.msrb.mxu3 %v2593_v57  ;;  %v3494_v53 = vld [vmem:[%s4029_s6 + $0x5d4] sm:$0xf0]  ;;  %v2752_v57 = vld [vmem:[%s4029_s6 + $0x2a8] sm:$0xf]  ;;  %v2770_v25 = vld [vmem:[%s4029_s6 + $0x2d8] sm:$0xf0] }
  0xc5   : > { %1864 = vmatpush.bf16.msrb.mxu0 %v3085_v63  ;;  %1877 = vmatpush.bf16.msrb.mxu1 %v3213_v0  ;;  %v3153_v60 = vor.u32 %v3494_v53, %v3152_v52  ;;  %v3458_v63 = vld [vmem:[%s4029_s6 + $0x4b4] sm:$0xf0]  ;;  %v3136_v0 = vld [vmem:[%s4029_s6 + $0x5a8] sm:$0xf]  ;;  %v2753_v2 = vor.u32 %v3394_v58, %v2752_v57  ;;  %v2817_v57 = vor.u32 %v3410_v49, %v2816_v47  ;;  %v3356_v47 = vld [vmem:[%s4029_s6 + $0x18c] sm:$0xf] }
  0xc6   : > { %v3009_v4 = vor.u32 %v3458_v63, %v3008_v62  ;;  %v2944_v50 = vld [vmem:[%s4029_s6 + $0x428] sm:$0xf]  ;;  %v3442_v51 = vld [vmem:[%s4029_s6 + $0x434] sm:$0xf0]  ;;  %v3388_v49 = vld [vmem:[%s4029_s6 + $0x28c] sm:$0xf] }
  0xc7   : > { %v3072_v52 = vld [vmem:[%s4029_s6 + $0x528] sm:$0xf]  ;;  %v3474_v53 = vld [vmem:[%s4029_s6 + $0x534] sm:$0xf0]  ;;  %v2945_v58 = vor.u32 %v3442_v51, %v2944_v50 }
  0xc8   : > { %1890 = vmatpush.bf16.msrb.mxu2 %v2449_v1  ;;  %1903 = vmatpush.bf16.msrb.mxu3 %v2577_v5  ;;  %v3490_v1 = vld [vmem:[%s4029_s6 + $0x5b4] sm:$0xf0]  ;;  %v2736_v5 = vld [vmem:[%s4029_s6 + $0x288] sm:$0xf]  ;;  %v3073_v62 = vor.u32 %v3474_v53, %v3072_v52 }
  0xc9   : > { %1865 = vmatpush.bf16.msrb.mxu0 %v3069_v11  ;;  %1878 = vmatpush.bf16.msrb.mxu1 %v3197_v14  ;;  %v3137_v7 = vor.u32 %v3490_v1, %v3136_v0  ;;  %v2720_v14 = vld [vmem:[%s4029_s6 + $0x268] sm:$0xf]  ;;  %v3438_v63 = vld [vmem:[%s4029_s6 + $0x414] sm:$0xf0] }
  0xca   : > { %v3056_v0 = vld [vmem:[%s4029_s6 + $0x508] sm:$0xf]  ;;  %v3470_v1 = vld [vmem:[%s4029_s6 + $0x514] sm:$0xf0] }
  0xcb   : > { %v3232_v53 = vld [vmem:[%s4029_s6 + $0x668] sm:$0xf] }
  0xcc   : > { %1891 = vmatpush.bf16.msrb.mxu2 %v2433_v15  ;;  %1904 = vmatpush.bf16.msrb.mxu3 %v2561_v19  ;;  %v3386_v15 = vld [vmem:[%s4029_s6 + $0x274] sm:$0xf0]  ;;  %v2976_v19 = vld [vmem:[%s4029_s6 + $0x468] sm:$0xf] }
  0xcd   : > { %1866 = vmatpush.bf16.msrb.mxu0 %v3053_v31  ;;  %1879 = vmatpush.bf16.msrb.mxu1 %v3181_v37  ;;  %v2721_v26 = vor.u32 %v3386_v15, %v2720_v14  ;;  %v2977_v29 = vor.u32 %v3450_v20, %v2976_v19  ;;  %v2704_v31 = vld [vmem:[%s4029_s6 + $0x248] sm:$0xf]  ;;  %v3414_v37 = vld [vmem:[%s4029_s6 + $0x354] sm:$0xf0]  ;;  %v3364_v19 = vld [vmem:[%s4029_s6 + $0x1cc] sm:$0xf] }
  0xce   : > { %v3280_v14 = vld [vmem:[%s4029_s6 + $0x6c8] sm:$0xf]  ;;  %v3526_v15 = vld [vmem:[%s4029_s6 + $0x6d4] sm:$0xf0]  ;;  %v2642_v20 = vld [vmem:[%s4029_s6 + $0x1d8] sm:$0xf0] }
  0xd0   : > { %1892 = vmatpush.bf16.msrb.mxu2 %v2417_v38  ;;  %1905 = vmatpush.bf16.msrb.mxu3 %v2545_v41  ;;  %v2960_v38 = vld [vmem:[%s4029_s6 + $0x448] sm:$0xf]  ;;  %v3478_v41 = vld [vmem:[%s4029_s6 + $0x554] sm:$0xf0] }
  0xd1   : > { %1911 = vmatpush.bf16.msra.mxu0 %v2785_v42  ;;  %1924 = vmatpush.bf16.msra.mxu1 %v2913_v43  ;;  %v2705_v42 = vor.u32 %v3382_v34, %v2704_v31  ;;  %v2833_v43 = vor.u32 %v3414_v37, %v2832_v35  ;;  %v3264_v31 = vld [vmem:[%s4029_s6 + $0x6a8] sm:$0xf]  ;;  %v3522_v34 = vld [vmem:[%s4029_s6 + $0x6b4] sm:$0xf0]  ;;  %v3328_v35 = vld [vmem:[%s4029_s6 + $0xac] sm:$0xf] }
  0xd2   : > { %1867 = vmatmul.bf16.vlgmr.msrb.gmra.mxu0 %v4227_v33  ;;  %1880 = vmatmul.bf16.vlgmr.msrb.gmra.mxu1 %v4223_v30  ;;  %v3390_v30 = vld [vmem:[%s4029_s6 + $0x294] sm:$0xf0]  ;;  %v2498_v37 = vld [vmem:[%s4029_s6 + $0xb8] sm:$0xf0] }
  0xd3   : > { %1893 = vmatmul.bf16.vlgmr.msrb.gmra.mxu2 %v4169_v22  ;;  %1906 = vmatmul.bf16.vlgmr.msrb.gmra.mxu3 %v4171_v23  ;;  %v2992_v22 = vld [vmem:[%s4029_s6 + $0x488] sm:$0xf]  ;;  %v3486_v23 = vld [vmem:[%s4029_s6 + $0x594] sm:$0xf0]  ;;  %v2737_v11 = vor.u32 %v3390_v30, %v2736_v5  ;;  %v2530_v30 = vld [vmem:[%s4029_s6 + $0xf8] sm:$0xf0] }
  0xd4   : > { %1937 = vmatpush.bf16.msra.mxu2 %v3041_v44  ;;  %1950 = vmatpush.bf16.msra.mxu3 %v3169_v48  ;;  %v2993_v13 = vor.u32 %v3454_v9, %v2992_v22  ;;  %v3121_v17 = vor.u32 %v3486_v23, %v3120_v10  ;;  %v2961_v44 = vor.u32 %v3446_v39, %v2960_v38  ;;  %v3400_v9 = vld [vmem:[%s4029_s6 + $0x2ec] sm:$0xf]  ;;  %v2786_v10 = vld [vmem:[%s4029_s6 + $0x2f8] sm:$0xf0] }
  0xd5   : > { %1912 = vmatpush.bf16.msra.mxu0 %v2769_v54  ;;  %1925 = vmatpush.bf16.msra.mxu1 %v2897_v55  ;;  %v3089_v48 = vor.u32 %v3478_v41, %v3088_v40  ;;  %v2689_v54 = vor.u32 %v3378_v46, %v2688_v45  ;;  %v2672_v55 = vld [vmem:[%s4029_s6 + $0x208] sm:$0xf]  ;;  %v2929_v22 = vor.u32 %v3438_v63, %v2928_v61  ;;  %v3360_v38 = vld [vmem:[%s4029_s6 + $0x1ac] sm:$0xf]  ;;  %v2626_v39 = vld [vmem:[%s4029_s6 + $0x1b8] sm:$0xf0] }
  0xd6   : > { %v3057_v23 = vor.u32 %v3470_v1, %v3056_v0  ;;  %v3392_v40 = vld [vmem:[%s4029_s6 + $0x2ac] sm:$0xf]  ;;  %v2754_v41 = vld [vmem:[%s4029_s6 + $0x2b8] sm:$0xf0]  ;;  %v3216_v1 = vld [vmem:[%s4029_s6 + $0x648] sm:$0xf] }
  0xd7   : > { %v3324_v45 = vld [vmem:[%s4029_s6 + $0x8c] sm:$0xf]  ;;  %v2482_v46 = vld [vmem:[%s4029_s6 + $0x98] sm:$0xf0] }
  0xd8   : > { %1938 = vmatpush.bf16.msra.mxu2 %v3025_v56  ;;  %1951 = vmatpush.bf16.msra.mxu3 %v3153_v60  ;;  %v3374_v56 = vld [vmem:[%s4029_s6 + $0x214] sm:$0xf0]  ;;  %v2485_v51 = vor.u32 %v3324_v45, %v2482_v46  ;;  %v2722_v61 = vld [vmem:[%s4029_s6 + $0x278] sm:$0xf0]  ;;  %v3496_v46 = vld [vmem:[%s4029_s6 + $0x5ec] sm:$0xf] }
  0xd9   : > { %1913 = vmatpush.bf16.msra.mxu0 %v2753_v2  ;;  %1926 = vmatpush.bf16.msra.mxu1 %v2881_v3  ;;  %v3406_v60 = vld [vmem:[%s4029_s6 + $0x314] sm:$0xf0]  ;;  %v3296_v2 = vld [vmem:[%s4029_s6 + $0x6e8] sm:$0xf]  ;;  %v2673_v5 = vor.u32 %v3374_v56, %v2672_v55  ;;  %v3320_v55 = vld [vmem:[%s4029_s6 + $0x6c] sm:$0xf] }
  0xda   : > { %v3530_v3 = vld [vmem:[%s4029_s6 + $0x6f4] sm:$0xf0]  ;;  %v2801_v8 = vor.u32 %v3406_v60, %v2800_v59  ;;  %v2594_v59 = vld [vmem:[%s4029_s6 + $0x178] sm:$0xf0]  ;;  %v3384_v60 = vld [vmem:[%s4029_s6 + $0x26c] sm:$0xf] }
  0xdc   : > { %1939 = vmatpush.bf16.msra.mxu2 %v3009_v4  ;;  %1952 = vmatpush.bf16.msra.mxu3 %v3137_v7  ;;  %v3336_v4 = vld [vmem:[%s4029_s6 + $0xec] sm:$0xf]  ;;  %v2658_v7 = vld [vmem:[%s4029_s6 + $0x1f8] sm:$0xf0] }
  0xdd   : > { %1914 = vmatpush.bf16.msra.mxu0 %v2737_v11  ;;  %1927 = vmatpush.bf16.msra.mxu1 %v2865_v12  ;;  %v3297_v11 = vor.u32 %v3530_v3, %v3296_v2  ;;  %v2533_v12 = vor.u32 %v3336_v4, %v2530_v30  ;;  %v3510_v2 = vld [vmem:[%s4029_s6 + $0x654] sm:$0xf0]  ;;  %v3316_v3 = vld [vmem:[%s4029_s6 + $0x4c] sm:$0xf]  ;;  %v2725_v4 = vor.u32 %v3384_v60, %v2722_v61 }
  0xde   : > { %v3348_v30 = vld [vmem:[%s4029_s6 + $0x14c] sm:$0xf] }
  0xdf   : > { %v3460_v60 = vld [vmem:[%s4029_s6 + $0x4cc] sm:$0xf] }
  0xe0   : > { %1940 = vmatpush.bf16.msra.mxu2 %v2993_v13  ;;  %1953 = vmatpush.bf16.msra.mxu3 %v3121_v17  ;;  %v2661_v13 = vor.u32 %v3368_v6, %v2658_v7  ;;  %v2789_v17 = vor.u32 %v3400_v9, %v2786_v10  ;;  %v2578_v6 = vld [vmem:[%s4029_s6 + $0x158] sm:$0xf0]  ;;  %v3380_v7 = vld [vmem:[%s4029_s6 + $0x24c] sm:$0xf] }
  0xe1   : > { %1915 = vmatpush.bf16.msra.mxu0 %v2721_v26  ;;  %1928 = vmatpush.bf16.msra.mxu1 %v2849_v28  ;;  %v3281_v26 = vor.u32 %v3526_v15, %v3280_v14  ;;  %v2517_v28 = vor.u32 %v3332_v16, %v2514_v18  ;;  %v3312_v14 = vld [vmem:[%s4029_s6 + $0x2c] sm:$0xf] }
  0xe2   : > { %v3344_v18 = vld [vmem:[%s4029_s6 + $0x12c] sm:$0xf] }
  0xe4   : > { %1941 = vmatpush.bf16.msra.mxu2 %v2977_v29  ;;  %1954 = vmatpush.bf16.msra.mxu3 %v3105_v36  ;;  %v2645_v29 = vor.u32 %v3364_v19, %v2642_v20  ;;  %v2773_v36 = vor.u32 %v3396_v24, %v2770_v25  ;;  %v2562_v19 = vld [vmem:[%s4029_s6 + $0x138] sm:$0xf0]  ;;  %v3376_v20 = vld [vmem:[%s4029_s6 + $0x22c] sm:$0xf] }
  0xe5   : > { %1916 = vmatpush.bf16.msra.mxu0 %v2705_v42  ;;  %1929 = vmatpush.bf16.msra.mxu1 %v2833_v43  ;;  %v3265_v42 = vor.u32 %v3522_v34, %v3264_v31  ;;  %v2629_v43 = vor.u32 %v3360_v38, %v2626_v39  ;;  %v2690_v24 = vld [vmem:[%s4029_s6 + $0x238] sm:$0xf0]  ;;  %v2565_v31 = vor.u32 %v3344_v18, %v2562_v19  ;;  %v3308_v34 = vld [vmem:[%s4029_s6 + $0xc] sm:$0xf]  ;;  %v3647_v18 = vld [vmem:[#allocation1] sm:$0xff] }
  0xe6   : > { %v2693_v38 = vor.u32 %v3376_v20, %v2690_v24  ;;  %v2546_v39 = vld [vmem:[%s4029_s6 + $0x118] sm:$0xf0]  ;;  %v3420_v24 = vld [vmem:[%s4029_s6 + $0x38c] sm:$0xf] }
  0xe8   : > { %1942 = vmatpush.bf16.msra.mxu2 %v2961_v44  ;;  %1955 = vmatpush.bf16.msra.mxu3 %v3089_v48  ;;  %v3248_v44 = vld [vmem:[%s4029_s6 + $0x688] sm:$0xf]  ;;  %v2610_v48 = vld [vmem:[%s4029_s6 + $0x198] sm:$0xf0] }
  0xe9   : > { %1917 = vmatpush.bf16.msra.mxu0 %v2689_v54  ;;  %1930 = vmatpush.bf16.msra.mxu1 %v2817_v57  ;;  %v2613_v52 = vor.u32 %v3356_v47, %v2610_v48  ;;  %v3514_v54 = vld [vmem:[%s4029_s6 + $0x674] sm:$0xf0]  ;;  %v2466_v57 = vld [vmem:[%s4029_s6 + $0x78] sm:$0xf0] }
  0xea   : > { %v2469_v63 = vor.u32 %v3320_v55, %v2466_v57  ;;  %v3170_v47 = vld [vmem:[%s4029_s6 + $0x5f8] sm:$0xf0] }
  0xeb   : > { %v3173_v57 = vor.u32 %v3496_v46, %v3170_v47  ;;  %v3106_v46 = vld [vmem:[%s4029_s6 + $0x578] sm:$0xf0]  ;;  %v3512_v47 = vld [vmem:[%s4029_s6 + $0x66c] sm:$0xf] }
  0xec   : > { %1943 = vmatpush.bf16.msra.mxu2 %v2945_v58  ;;  %1956 = vmatpush.bf16.msra.mxu3 %v3073_v62  ;;  %v3352_v58 = vld [vmem:[%s4029_s6 + $0x16c] sm:$0xf]  ;;  %v3233_v62 = vor.u32 %v3514_v54, %v3232_v53  ;;  %v3298_v53 = vld [vmem:[%s4029_s6 + $0x6f8] sm:$0xf0] }
  0xed   : > { %1918 = vmatpush.bf16.msra.mxu0 %v2673_v5  ;;  %1931 = vmatpush.bf16.msra.mxu1 %v2801_v8  ;;  %v2597_v0 = vor.u32 %v3352_v58, %v2594_v59  ;;  %v2450_v5 = vld [vmem:[%s4029_s6 + $0x58] sm:$0xf0]  ;;  %v3428_v58 = vld [vmem:[%s4029_s6 + $0x3cc] sm:$0xf] }
  0xee   : > { %v2706_v8 = vld [vmem:[%s4029_s6 + $0x258] sm:$0xf0] }
  0xef   : > { %v2709_v16 = vor.u32 %v3380_v7, %v2706_v8  ;;  %v2898_v59 = vld [vmem:[%s4029_s6 + $0x3d8] sm:$0xf0]  ;;  %v3456_v8 = vld [vmem:[%s4029_s6 + $0x4ac] sm:$0xf] }
  0xf0   : > { %1944 = vmatpush.bf16.msra.mxu2 %v2929_v22  ;;  %1957 = vmatpush.bf16.msra.mxu3 %v3057_v23  ;;  %v3217_v22 = vor.u32 %v3510_v2, %v3216_v1  ;;  %v2453_v23 = vor.u32 %v3316_v3, %v2450_v5  ;;  %v3524_v1 = vld [vmem:[%s4029_s6 + $0x6cc] sm:$0xf]  ;;  %v3282_v2 = vld [vmem:[%s4029_s6 + $0x6d8] sm:$0xf0] }
  0xf1   : > { %1963 = vmatpush.bf16.msrb.mxu0 %v3297_v11  ;;  %1976 = vmatpush.bf16.msrb.mxu1 %v2533_v12  ;;  %v2581_v11 = vor.u32 %v3348_v30, %v2578_v6  ;;  %v3200_v12 = vld [vmem:[%s4029_s6 + $0x628] sm:$0xf]  ;;  %v3424_v6 = vld [vmem:[%s4029_s6 + $0x3ac] sm:$0xf]  ;;  %v2882_v7 = vld [vmem:[%s4029_s6 + $0x3b8] sm:$0xf0] }
  0xf2   : > { %1919 = vmatmul.bf16.vlgmr.msra.gmra.mxu0 %v4167_v21  ;;  %1932 = vmatmul.bf16.vlgmr.msra.gmra.mxu1 %v4176_v27  ;;  %v3518_v21 = vld [vmem:[%s4029_s6 + $0x694] sm:$0xf0]  ;;  %v2738_v27 = vld [vmem:[%s4029_s6 + $0x298] sm:$0xf0] }
  0xf3   : > { %1945 = vmatmul.bf16.vlgmr.msra.gmra.mxu2 %v4225_v32  ;;  %1958 = vmatmul.bf16.vlgmr.msra.gmra.mxu3 %v4227_v33  ;;  %v2501_v32 = vor.u32 %v3328_v35, %v2498_v37  ;;  %v2757_v33 = vor.u32 %v3392_v40, %v2754_v41  ;;  %v3249_v50 = vor.u32 %v3518_v21, %v3248_v44  ;;  %v2418_v35 = vld [vmem:[%s4029_s6 + $0x18] sm:$0xf0]  ;;  %v3372_v40 = vld [vmem:[%s4029_s6 + $0x20c] sm:$0xf] }
  0xf4   : > { %1989 = vmatpush.bf16.msrb.mxu2 %v2661_v13  ;;  %2002 = vmatpush.bf16.msrb.mxu3 %v2789_v17  ;;  %v2741_v56 = vor.u32 %v3388_v49, %v2738_v27  ;;  %v3506_v13 = vld [vmem:[%s4029_s6 + $0x634] sm:$0xf0]  ;;  %v2434_v17 = vld [vmem:[%s4029_s6 + $0x38] sm:$0xf0]  ;;  %v3464_v44 = vld [vmem:[%s4029_s6 + $0x4ec] sm:$0xf] }
  0xf5   : > { %1964 = vmatpush.bf16.msrb.mxu0 %v3281_v26  ;;  %1977 = vmatpush.bf16.msrb.mxu1 %v2517_v28  ;;  %v3201_v25 = vor.u32 %v3506_v13, %v3200_v12  ;;  %v3184_v26 = vld [vmem:[%s4029_s6 + $0x608] sm:$0xf]  ;;  %v3502_v28 = vld [vmem:[%s4029_s6 + $0x614] sm:$0xf0]  ;;  %v2674_v41 = vld [vmem:[%s4029_s6 + $0x218] sm:$0xf0] }
  0xf6   : > { %v3185_v45 = vor.u32 %v3502_v28, %v3184_v26  ;;  %v2677_v54 = vor.u32 %v3372_v40, %v2674_v41  ;;  %v3138_v12 = vld [vmem:[%s4029_s6 + $0x5b8] sm:$0xf0]  ;;  %v3452_v26 = vld [vmem:[%s4029_s6 + $0x48c] sm:$0xf] }
  0xf7   : > { %v3645_v13 = vld [vmem:[#allocation1 + $0x9] sm:$0xff] }
  0xf8   : > { %1990 = vmatpush.bf16.msrb.mxu2 %v2645_v29  ;;  %2003 = vmatpush.bf16.msrb.mxu3 %v2773_v36  ;;  %v2437_v29 = vor.u32 %v3312_v14, %v2434_v17  ;;  %v3340_v36 = vld [vmem:[%s4029_s6 + $0x10c] sm:$0xf]  ;;  %v2885_v17 = vor.u32 %v3424_v6, %v2882_v7 }
  0xf9   : > { %1965 = vmatpush.bf16.msrb.mxu0 %v3265_v42  ;;  %1978 = vmatpush.bf16.msrb.mxu1 %v2501_v32  ;;  %v3432_v32 = vld [vmem:[%s4029_s6 + $0x3ec] sm:$0xf] }
  0xfa   : > { %v3520_v14 = vld [vmem:[%s4029_s6 + $0x6ac] sm:$0xf] }
  0xfb   : > { %v1712_v9 = vpop.f32.mrf.mxu0  ;;  %v3440_v6 = vld [vmem:[%s4029_s6 + $0x42c] sm:$0xf] }
  0xfc   : > { %1991 = vmatpush.bf16.msrb.mxu2 %v2629_v43  ;;  %2004 = vmatpush.bf16.msrb.mxu3 %v2757_v33  ;;  %v1725_v10 = vpop.f32.mrf.mxu1  ;;  %v2914_v43 = vld [vmem:[%s4029_s6 + $0x3f8] sm:$0xf0] }
  0xfd   : > { %1966 = vmatpush.bf16.msrb.mxu0 %v3249_v50  ;;  %1979 = vmatpush.bf16.msrb.mxu1 %v2485_v51  ;;  %v1726_v15 = vadd.f32 %v1725_v10, %v1712_v9  ;;  %v3042_v33 = vld [vmem:[%s4029_s6 + $0x4f8] sm:$0xf0]  ;;  %v2421_v50 = vor.u32 %v3308_v34, %v2418_v35  ;;  %v2549_v51 = vor.u32 %v3340_v36, %v2546_v39  ;;  %v4506_v9 = vld [vmem:[#allocation1 + $0x36] sm:$0xff] }
  0xfe   : > { %v2917_v55 = vor.u32 %v3432_v32, %v2914_v43  ;;  %v3285_v10 = vor.u32 %v3524_v1, %v3282_v2  ;;  %v3122_v34 = vld [vmem:[%s4029_s6 + $0x598] sm:$0xf0]  ;;  %v3516_v35 = vld [vmem:[%s4029_s6 + $0x68c] sm:$0xf] }
  0xff   : > { %v3250_v36 = vld [vmem:[%s4029_s6 + $0x698] sm:$0xf0]  ;;  %v3448_v43 = vld [vmem:[%s4029_s6 + $0x46c] sm:$0xf] }
 0x100   : > { %1992 = vmatpush.bf16.msrb.mxu2 %v2613_v52  ;;  %2005 = vmatpush.bf16.msrb.mxu3 %v2741_v56  ;;  %v3528_v52 = vld [vmem:[%s4029_s6 + $0x6ec] sm:$0xf]  ;;  %v3045_v56 = vor.u32 %v3464_v44, %v3042_v33  ;;  %v2850_v32 = vld [vmem:[%s4029_s6 + $0x378] sm:$0xf0] }
 0x101   : > { %1967 = vmatpush.bf16.msrb.mxu0 %v3233_v62  ;;  %1980 = vmatpush.bf16.msrb.mxu1 %v2469_v63  ;;  %v1738_v37 = vpop.f32.mrf.mxu2  ;;  %v3301_v61 = vor.u32 %v3528_v52, %v3298_v53  ;;  %v3026_v62 = vld [vmem:[%s4029_s6 + $0x4d8] sm:$0xf0]  ;;  %v3492_v63 = vld [vmem:[%s4029_s6 + $0x5cc] sm:$0xf] }
 0x102   : > { %v1739_v42 = vadd.f32 %v1738_v37, %v1726_v15  ;;  %v1751_v21 = vpop.f32.mrf.mxu3  ;;  %v3029_v5 = vor.u32 %v3460_v60, %v3026_v62  ;;  %v3266_v15 = vld [vmem:[%s4029_s6 + $0x6b8] sm:$0xf0]  ;;  %v3480_v33 = vld [vmem:[%s4029_s6 + $0x56c] sm:$0xf] }
 0x103   : > { %v1714_v48 = vpop.f32.mrf.mxu0  ;;  %v3269_v28 = vor.u32 %v3520_v14, %v3266_v15  ;;  %v3412_v52 = vld [vmem:[%s4029_s6 + $0x34c] sm:$0xf]  ;;  %v2834_v53 = vld [vmem:[%s4029_s6 + $0x358] sm:$0xf0] }
 0x104   : > { %1993 = vmatpush.bf16.msrb.mxu2 %v2597_v0  ;;  %2006 = vmatpush.bf16.msrb.mxu3 %v2725_v4  ;;  %v4491_v49 = vadd.f32 %v1751_v21, %v1739_v42  ;;  %v1727_v27 = vpop.f32.mrf.mxu1  ;;  %v3154_v0 = vld [vmem:[%s4029_s6 + $0x5d8] sm:$0xf0]  ;;  %v2901_v4 = vor.u32 %v3428_v58, %v2898_v59  ;;  %v3416_v42 = vld [vmem:[%s4029_s6 + $0x36c] sm:$0xf]  ;;  %v3253_v21 = vor.u32 %v3516_v35, %v3250_v36 }
 0x105   : > { %1968 = vmatpush.bf16.msrb.mxu0 %v3217_v22  ;;  %1981 = vmatpush.bf16.msrb.mxu1 %v2453_v23  ;;  %v3157_v30 = vor.u32 %v3492_v63, %v3154_v0  ;;  %v3010_v23 = vld [vmem:[%s4029_s6 + $0x4b8] sm:$0xf0]  ;;  %v3476_v58 = vld [vmem:[%s4029_s6 + $0x54c] sm:$0xf]  ;;  %v2837_v0 = vor.u32 %v3412_v52, %v2834_v53 }
 0x106   : > { %v3013_v19 = vor.u32 %v3456_v8, %v3010_v23  ;;  %v3234_v48 = vld [vmem:[%s4029_s6 + $0x678] sm:$0xf0]  ;;  %v3504_v23 = vld [vmem:[%s4029_s6 + $0x62c] sm:$0xf] }
 0x107   : > { %v3090_v59 = vld [vmem:[%s4029_s6 + $0x558] sm:$0xf0]  ;;  %v3404_v15 = vld [vmem:[%s4029_s6 + $0x30c] sm:$0xf] }
 0x108   : > { %1994 = vmatpush.bf16.msrb.mxu2 %v2581_v11  ;;  %2007 = vmatpush.bf16.msrb.mxu3 %v2709_v16  ;;  %v3488_v11 = vld [vmem:[%s4029_s6 + $0x5ac] sm:$0xf]  ;;  %v3646_v16 = vld [vmem:[#allocation1 + $0x12] sm:$0xff]  ;;  %v3218_v62 = vld [vmem:[%s4029_s6 + $0x658] sm:$0xf0] }
 0x109   : > { %1969 = vmatpush.bf16.msrb.mxu0 %v3201_v25  ;;  %1982 = vmatpush.bf16.msrb.mxu1 %v2437_v29  ;;  %v1740_v3 = vpop.f32.mrf.mxu2  ;;  %v3141_v20 = vor.u32 %v3488_v11, %v3138_v12  ;;  %v2866_v25 = vld [vmem:[%s4029_s6 + $0x398] sm:$0xf0] }
 0x10a   : > { %v1753_v22 = vpop.f32.mrf.mxu3  ;;  %v2994_v29 = vld [vmem:[%s4029_s6 + $0x498] sm:$0xf0]  ;;  %v2869_v37 = vor.u32 %v3420_v24, %v2866_v25  ;;  %v3468_v24 = vld [vmem:[%s4029_s6 + $0x50c] sm:$0xf] }
 0x10b   : > { %v2997_v40 = vor.u32 %v3452_v26, %v2994_v29  ;;  %v2946_v8 = vld [vmem:[%s4029_s6 + $0x438] sm:$0xf0]  ;;  %v3472_v22 = vld [vmem:[%s4029_s6 + $0x52c] sm:$0xf] }
 0x10c   : > { %1995 = vmatpush.bf16.msrb.mxu2 %v2565_v31  ;;  %2008 = vmatpush.bf16.msrb.mxu3 %v2693_v38  ;;  %v3484_v31 = vld [vmem:[%s4029_s6 + $0x58c] sm:$0xf]  ;;  %v3202_v11 = vld [vmem:[%s4029_s6 + $0x638] sm:$0xf0] }
 0x10d   : > { %1970 = vmatpush.bf16.msrb.mxu0 %v3185_v45  ;;  %1983 = vmatpush.bf16.msrb.mxu1 %v2421_v50  ;;  %v3125_v41 = vor.u32 %v3484_v31, %v3122_v34  ;;  %v2978_v45 = vld [vmem:[%s4029_s6 + $0x478] sm:$0xf0]  ;;  %v2853_v50 = vor.u32 %v3416_v42, %v2850_v32  ;;  %v3500_v26 = vld [vmem:[%s4029_s6 + $0x60c] sm:$0xf] }
 0x10e   : > { %v3058_v25 = vld [vmem:[%s4029_s6 + $0x518] sm:$0xf0] }
 0x10f   : > { %v1764_v38 = vpop.f32.mrf.mxu0  ;;  %v1777_v39 = vpop.f32.mrf.mxu1  ;;  %v3061_v35 = vor.u32 %v3468_v24, %v3058_v25 }
 0x110   : > { %1996 = vmatpush.bf16.msrb.mxu2 %v2549_v51  ;;  %2009 = vmatpush.bf16.msrb.mxu3 %v2677_v54  ;;  %v1765_v44 = vadd.f32 %v1764_v38, %v4491_v49  ;;  %v2981_v49 = vor.u32 %v3448_v43, %v2978_v45  ;;  %v3109_v51 = vor.u32 %v3480_v33, %v3106_v46  ;;  %v3444_v54 = vld [vmem:[%s4029_s6 + $0x44c] sm:$0xf]  ;;  %v3649_v38 = vld [vmem:[#allocation1 + $0x24] sm:$0xff] }
 0x111   : > { %2015 = vmatpush.bf16.msra.mxu0 %v2917_v55  ;;  %2028 = vmatpush.bf16.msra.mxu1 %v3045_v56  ;;  %v3237_v56 = vor.u32 %v3512_v47, %v3234_v48 }
 0x112   : > { %1971 = vmatmul.bf16.vlgmr.msrb.gmra.mxu0 %v4506_v9  ;;  %1984 = vmatmul.bf16.vlgmr.msrb.gmra.mxu1 %v3647_v18  ;;  %v1778_v27 = vadd.f32 %v1777_v39, %v1765_v44  ;;  %v3650_v39 = vld [vmem:[#allocation1 + $0x2d] sm:$0xff] }
 0x113   : > { %1997 = vmatmul.bf16.vlgmr.msrb.gmra.mxu2 %v3645_v13  ;;  %2010 = vmatmul.bf16.vlgmr.msrb.gmra.mxu3 %v3646_v16  ;;  %v2949_v13 = vor.u32 %v3440_v6, %v2946_v8  ;;  %v2802_v16 = vld [vmem:[%s4029_s6 + $0x318] sm:$0xf0] }
 0x114   : > { %2041 = vmatpush.bf16.msra.mxu2 %v3173_v57  ;;  %2054 = vmatpush.bf16.msra.mxu3 %v3301_v61  ;;  %v2962_v57 = vld [vmem:[%s4029_s6 + $0x458] sm:$0xf0]  ;;  %v3508_v61 = vld [vmem:[%s4029_s6 + $0x64c] sm:$0xf]  ;;  %v2805_v31 = vor.u32 %v3404_v15, %v2802_v16 }
 0x115   : > { %2016 = vmatpush.bf16.msra.mxu0 %v2901_v4  ;;  %2029 = vmatpush.bf16.msra.mxu1 %v3029_v5  ;;  %v2965_v3 = vor.u32 %v3444_v54, %v2962_v57  ;;  %v3093_v4 = vor.u32 %v3476_v58, %v3090_v59  ;;  %v3408_v5 = vld [vmem:[%s4029_s6 + $0x32c] sm:$0xf]  ;;  %v3221_v7 = vor.u32 %v3508_v61, %v3218_v62 }
 0x116   : > { %v1790_v55 = vpop.f32.mrf.mxu2  ;;  %v1803_v63 = vpop.f32.mrf.mxu3 }
 0x117   : > { %v4537_v60 = vadd.f32 %v1790_v55, %v1778_v27  ;;  %v1766_v1 = vpop.f32.mrf.mxu0  ;;  %v1779_v2 = vpop.f32.mrf.mxu1 }
 0x118   : > { %2042 = vmatpush.bf16.msra.mxu2 %v3157_v30  ;;  %2055 = vmatpush.bf16.msra.mxu3 %v3285_v10  ;;  %v2818_v30 = vld [vmem:[%s4029_s6 + $0x338] sm:$0xf0] }
 0x119   : > { %2017 = vmatpush.bf16.msra.mxu0 %v2885_v17  ;;  %2030 = vmatpush.bf16.msra.mxu1 %v3013_v19  ;;  %v3074_v10 = vld [vmem:[%s4029_s6 + $0x538] sm:$0xf0]  ;;  %v2821_v12 = vor.u32 %v3408_v5, %v2818_v30  ;;  %v3436_v17 = vld [vmem:[%s4029_s6 + $0x40c] sm:$0xf]  ;;  %v3205_v19 = vor.u32 %v3504_v23, %v3202_v11 }
 0x11a   : > { %v3077_v14 = vor.u32 %v3472_v22, %v3074_v10 }
 0x11c   : > { %2043 = vmatpush.bf16.msra.mxu2 %v3141_v20  ;;  %2056 = vmatpush.bf16.msra.mxu3 %v3269_v28  ;;  %v2930_v20 = vld [vmem:[%s4029_s6 + $0x418] sm:$0xf0] }
 0x11d   : > { %2018 = vmatpush.bf16.msra.mxu0 %v2869_v37  ;;  %2031 = vmatpush.bf16.msra.mxu1 %v2997_v40  ;;  %v3186_v28 = vld [vmem:[%s4029_s6 + $0x618] sm:$0xf0]  ;;  %v2933_v34 = vor.u32 %v3436_v17, %v2930_v20  ;;  %v3648_v37 = vld [vmem:[#allocation1 + $0x1b] sm:$0xff] }
 0x11e   : > { %v1792_v18 = vpop.f32.mrf.mxu2  ;;  %v1805_v29 = vpop.f32.mrf.mxu3  ;;  %v3189_v36 = vor.u32 %v3500_v26, %v3186_v28 }
 0x120   : > { %2044 = vmatpush.bf16.msra.mxu2 %v3125_v41  ;;  %2057 = vmatpush.bf16.msra.mxu3 %v3253_v21 }
 0x121   : > { %2019 = vmatpush.bf16.msra.mxu0 %v2853_v50  ;;  %2032 = vmatpush.bf16.msra.mxu1 %v2981_v49 }
 0x124   : > { %2045 = vmatpush.bf16.msra.mxu2 %v3109_v51  ;;  %2058 = vmatpush.bf16.msra.mxu3 %v3237_v56 }
 0x125   : > { %2020 = vmatpush.bf16.msra.mxu0 %v2837_v0  ;;  %2033 = vmatpush.bf16.msra.mxu1 %v2965_v3 }
 0x128   : > { %2046 = vmatpush.bf16.msra.mxu2 %v3093_v4  ;;  %2059 = vmatpush.bf16.msra.mxu3 %v3221_v7 }
 0x129   : > { %2021 = vmatpush.bf16.msra.mxu0 %v2821_v12  ;;  %2034 = vmatpush.bf16.msra.mxu1 %v2949_v13 }
 0x12c   : > { %2047 = vmatpush.bf16.msra.mxu2 %v3077_v14  ;;  %2060 = vmatpush.bf16.msra.mxu3 %v3205_v19 }
 0x12d   : > { %2022 = vmatpush.bf16.msra.mxu0 %v2805_v31  ;;  %2035 = vmatpush.bf16.msra.mxu1 %v2933_v34 }
 0x12f   : > { %v1816_v40 = vpop.f32.mrf.mxu0  ;;  %v1829_v42 = vpop.f32.mrf.mxu1 }
 0x130   : > { %2048 = vmatpush.bf16.msra.mxu2 %v3061_v35  ;;  %2061 = vmatpush.bf16.msra.mxu3 %v3189_v36  ;;  %v1817_v41 = vadd.f32 %v1816_v40, %v1803_v63  ;;  %v341_v36 = vld [vmem:[#allocation2] sm:$0xff] }
 0x131   : > { %2023 = vmatmul.bf16.vlgmr.msra.gmra.mxu0 %v3648_v37  ;;  %2036 = vmatmul.bf16.vlgmr.msra.gmra.mxu1 %v3649_v38 }
 0x132   : > { %v1830_v32 = vadd.f32 %v1829_v42, %v1817_v41 }
 0x133   : > { %2049 = vmatmul.bf16.vlgmr.msra.gmra.mxu2 %v3650_v39  ;;  %2062 = vmatmul.bf16.vlgmr.msra.gmra.mxu3 %v4506_v9 }
 0x136   : > { %v1842_v43 = vpop.f32.mrf.mxu2  ;;  %v1855_v21 = vpop.f32.mrf.mxu3 }
 0x137   : > { %v1843_v44 = vadd.f32 %v1842_v43, %v1830_v32  ;;  %v1818_v33 = vpop.f32.mrf.mxu0  ;;  %v1831_v46 = vpop.f32.mrf.mxu1 }
 0x139   : > { %v1856_v45 = vadd.f32 %v1855_v21, %v1843_v44 }
 0x13e   : > { %v1844_v47 = vpop.f32.mrf.mxu2  ;;  %v1857_v48 = vpop.f32.mrf.mxu3 }
 0x14f   : > { %v1868_v27 = vpop.f32.mrf.mxu0  ;;  %v1881_v49 = vpop.f32.mrf.mxu1 }
 0x150   : > { %v1869_v50 = vadd.f32 %v1868_v27, %v1856_v45 }
 0x152   : > { %v1882_v51 = vadd.f32 %v1881_v49, %v1869_v50 }
 0x154   : > { %v2071_v52 = vrot.slane %v1882_v51, 6 }
 0x156   : > { %v2075_v9 = vsel %vm2074_vm0, %v4537_v60, %v2071_v52  ;;  %v1894_v53 = vpop.f32.mrf.mxu2  ;;  %v1907_v54 = vpop.f32.mrf.mxu3 }
 0x157   : > { %v1870_v55 = vpop.f32.mrf.mxu0  ;;  %v1908_v56 = vadd.f32 %v1907_v54, %v1894_v53  ;;  %v1883_v57 = vpop.f32.mrf.mxu1 }
 0x15e   : > { %v1896_v58 = vpop.f32.mrf.mxu2  ;;  %v1909_v59 = vpop.f32.mrf.mxu3 }
 0x16f   : > { %v1920_v61 = vpop.f32.mrf.mxu0  ;;  %v1933_v62 = vpop.f32.mrf.mxu1 }
 0x170   : > { %v1921_v23 = vadd.f32 %v1920_v61, %v1908_v56 }
 0x172   : > { %v1934_v12 = vadd.f32 %v1933_v62, %v1921_v23 }
 0x176   : > { %v1946_v63 = vpop.f32.mrf.mxu2  ;;  %v1959_v0 = vpop.f32.mrf.mxu3 }
 0x177   : > { %v1922_v1 = vpop.f32.mrf.mxu0  ;;  %v1935_v2 = vpop.f32.mrf.mxu1  ;;  %v1947_v16 = vadd.f32 %v1946_v63, %v1934_v12 }
 0x179   : > { %v1960_v18 = vadd.f32 %v1959_v0, %v1947_v16 }
 0x17e   : > { %v1948_v3 = vpop.f32.mrf.mxu2  ;;  %v1961_v4 = vpop.f32.mrf.mxu3 }
 0x18f   : > { %v1972_v5 = vpop.f32.mrf.mxu0  ;;  %v1985_v30 = vpop.f32.mrf.mxu1 }
 0x190   : > { %v1973_v24 = vadd.f32 %v1972_v5, %v1960_v18 }
 0x192   : > { %v2072_v34 = vrot.slane %v1973_v24, 4 }
 0x196   : > { %v1998_v6 = vpop.f32.mrf.mxu2  ;;  %v2011_v7 = vpop.f32.mrf.mxu3 }
 0x197   : > { %v1974_v60 = vpop.f32.mrf.mxu0  ;;  %v1987_v8 = vpop.f32.mrf.mxu1  ;;  %v1999_v11 = vadd.f32 %v1998_v6, %v1985_v30 }
 0x199   : > { %v2012_v13 = vadd.f32 %v2011_v7, %v1999_v11 }
 0x19e   : > { %v2000_v22 = vpop.f32.mrf.mxu2  ;;  %v2013_v10 = vpop.f32.mrf.mxu3 }
 0x1ae   : > { %v2024_v14 = vpop.f32.mrf.mxu0  ;;  %v2037_v15 = vpop.f32.mrf.mxu1 }
 0x1af   : > { %v2025_v17 = vadd.f32 %v2024_v14, %v2012_v13 }
 0x1b1   : > { %v2038_v19 = vadd.f32 %v2037_v15, %v2025_v17 }
 0x1b6   : > { %v2050_v20 = vpop.f32.mrf.mxu2  ;;  %v2063_v26 = vpop.f32.mrf.mxu3 }
 0x1b7   : > { %v2051_v25 = vadd.f32 %v2050_v20, %v2038_v19  ;;  %v2026_v28 = vpop.f32.mrf.mxu0  ;;  %v2039_v29 = vpop.f32.mrf.mxu1 }
 0x1b9   : > { %v2064_v31 = vadd.f32 %v2063_v26, %v2051_v25 }
 0x1bb   : > { %v2073_v35 = vrot.slane %v2064_v31, 2 }
 0x1bd   : > { %v2077_v37 = vsel %vm2076_vm1, %v2072_v34, %v2073_v35  ;;  %2086 = sbr.rel (%p3302_p9) target bundleno = 621 (0x26d), region = 56 }
 0x1be   : > { %v2079_v38 = vsel %vm2078_vm2, %v2075_v9, %v2077_v37  ;;  %v2052_v39 = vpop.f32.mrf.mxu2  ;;  %v2065_v41 = vpop.f32.mrf.mxu3 }
 0x1bf   : > { %v2081_v40 = vadd.f32 %v2079_v38, %v341_v36 }
 0x1c1   : > { %2082 = vst [vmem:[#allocation2] sm:$0xff] %v2081_v40 }
 0x1c2   : > { %v2150_v42 = vld [vmem:[%s4059_s29 + $0x178] sm:$0xff]  ;;  %v2149_v32 = vld [vmem:[%s4059_s29 + $0x170] sm:$0xff]  ;;  %v2148_v45 = vld [vmem:[%s4059_s29 + $0x168] sm:$0xff] }
 0x1c3   : > { %v2166_v43 = vld [vmem:[%s4059_s29 + $0x1f8] sm:$0xff]  ;;  %2217 = vmatpush.msra.mxu2 %v2150_v42  ;;  %v2165_v33 = vld [vmem:[%s4059_s29 + $0x1f0] sm:$0xff]  ;;  %v2164_v48 = vld [vmem:[%s4059_s29 + $0x1e8] sm:$0xff] }
 0x1c4   : > { %2237 = vmatpush.msra.mxu3 %v2166_v43  ;;  %v2118_v44 = vld [vmem:[%s4059_s29 + $0x78] sm:$0xff]  ;;  %v2117_v46 = vld [vmem:[%s4059_s29 + $0x70] sm:$0xff]  ;;  %v2116_v27 = vld [vmem:[%s4059_s29 + $0x68] sm:$0xff] }
 0x1c5   : > { %v2134_v21 = vld [vmem:[%s4059_s29 + $0xf8] sm:$0xff]  ;;  %2177 = vmatpush.msra.mxu0 %v2118_v44  ;;  %v2133_v47 = vld [vmem:[%s4059_s29 + $0xf0] sm:$0xff]  ;;  %2218 = vmatpush.msra.mxu2 %v2149_v32  ;;  %v2147_v50 = vld [vmem:[%s4059_s29 + $0x160] sm:$0xff] }
 0x1c6   : > { %2197 = vmatpush.msra.mxu1 %v2134_v21  ;;  %2238 = vmatpush.msra.mxu3 %v2165_v33  ;;  %v2132_v49 = vld [vmem:[%s4059_s29 + $0xe8] sm:$0xff]  ;;  %v2163_v51 = vld [vmem:[%s4059_s29 + $0x1e0] sm:$0xff]  ;;  %v2146_v53 = vld [vmem:[%s4059_s29 + $0x158] sm:$0xff] }
 0x1c7   : > { %2178 = vmatpush.msra.mxu0 %v2117_v46  ;;  %2219 = vmatpush.msra.mxu2 %v2148_v45  ;;  %v2115_v52 = vld [vmem:[%s4059_s29 + $0x60] sm:$0xff]  ;;  %v2162_v54 = vld [vmem:[%s4059_s29 + $0x1d8] sm:$0xff]  ;;  %v2145_v57 = vld [vmem:[%s4059_s29 + $0x150] sm:$0xff] }
 0x1c8   : > { %2198 = vmatpush.msra.mxu1 %v2133_v47  ;;  %2239 = vmatpush.msra.mxu3 %v2164_v48  ;;  %v2131_v9 = vld [vmem:[%s4059_s29 + $0xe0] sm:$0xff]  ;;  %v2114_v55 = vld [vmem:[%s4059_s29 + $0x58] sm:$0xff]  ;;  %v2161_v58 = vld [vmem:[%s4059_s29 + $0x1d0] sm:$0xff] }
 0x1c9   : > { %2179 = vmatpush.msra.mxu0 %v2116_v27  ;;  %2220 = vmatpush.msra.mxu2 %v2147_v50  ;;  %v2130_v56 = vld [vmem:[%s4059_s29 + $0xd8] sm:$0xff]  ;;  %v2113_v59 = vld [vmem:[%s4059_s29 + $0x50] sm:$0xff]  ;;  %v2144_v62 = vld [vmem:[%s4059_s29 + $0x148] sm:$0xff] }
 0x1ca   : > { %2199 = vmatpush.msra.mxu1 %v2132_v49  ;;  %2240 = vmatpush.msra.mxu3 %v2163_v51  ;;  %v2129_v61 = vld [vmem:[%s4059_s29 + $0xd0] sm:$0xff]  ;;  %v2160_v63 = vld [vmem:[%s4059_s29 + $0x1c8] sm:$0xff]  ;;  %v2143_v2 = vld [vmem:[%s4059_s29 + $0x140] sm:$0xff] }
 0x1cb   : > { %2180 = vmatpush.msra.mxu0 %v2115_v52  ;;  %2221 = vmatpush.msra.mxu2 %v2146_v53  ;;  %v2112_v0 = vld [vmem:[%s4059_s29 + $0x48] sm:$0xff]  ;;  %v2159_v3 = vld [vmem:[%s4059_s29 + $0x1c0] sm:$0xff]  ;;  %v2142_v30 = vld [vmem:[%s4059_s29 + $0x138] sm:$0xff] }
 0x1cc   : > { %2200 = vmatpush.msra.mxu1 %v2131_v9  ;;  %2241 = vmatpush.msra.mxu3 %v2162_v54  ;;  %v2128_v1 = vld [vmem:[%s4059_s29 + $0xc8] sm:$0xff]  ;;  %v2111_v4 = vld [vmem:[%s4059_s29 + $0x40] sm:$0xff]  ;;  %v2158_v6 = vld [vmem:[%s4059_s29 + $0x1b8] sm:$0xff] }
 0x1cd   : > { %2181 = vmatpush.msra.mxu0 %v2114_v55  ;;  %2222 = vmatpush.msra.mxu2 %v2145_v57  ;;  %v2127_v5 = vld [vmem:[%s4059_s29 + $0xc0] sm:$0xff]  ;;  %v2110_v7 = vld [vmem:[%s4059_s29 + $0x38] sm:$0xff]  ;;  %v2141_v8 = vld [vmem:[%s4059_s29 + $0x130] sm:$0xff] }
 0x1ce   : > { %2201 = vmatpush.msra.mxu1 %v2130_v56  ;;  %2242 = vmatpush.msra.mxu3 %v2161_v58  ;;  %v2126_v60 = vld [vmem:[%s4059_s29 + $0xb8] sm:$0xff]  ;;  %v2157_v22 = vld [vmem:[%s4059_s29 + $0x1b0] sm:$0xff]  ;;  %v2140_v11 = vld [vmem:[%s4059_s29 + $0x128] sm:$0xff] }
 0x1cf   : > { %2182 = vmatpush.msra.mxu0 %v2113_v59  ;;  %2223 = vmatpush.msra.mxu2 %v2144_v62  ;;  %v2109_v10 = vld [vmem:[%s4059_s29 + $0x30] sm:$0xff]  ;;  %v2156_v12 = vld [vmem:[%s4059_s29 + $0x1a8] sm:$0xff]  ;;  %v2139_v15 = vld [vmem:[%s4059_s29 + $0x120] sm:$0xff] }
 0x1d0   : > { %2202 = vmatpush.msra.mxu1 %v2129_v61  ;;  %2243 = vmatpush.msra.mxu3 %v2160_v63  ;;  %v2125_v23 = vld [vmem:[%s4059_s29 + $0xb0] sm:$0xff]  ;;  %v2108_v13 = vld [vmem:[%s4059_s29 + $0x28] sm:$0xff]  ;;  %v2155_v16 = vld [vmem:[%s4059_s29 + $0x1a0] sm:$0xff] }
 0x1d1   : > { %2183 = vmatpush.msra.mxu0 %v2112_v0  ;;  %2224 = vmatpush.msra.mxu2 %v2143_v2  ;;  %v2124_v14 = vld [vmem:[%s4059_s29 + $0xa8] sm:$0xff]  ;;  %v2088_v17 = vld [vmem:[%s274_s26] sm:$0xf]  ;;  %v2107_v18 = vld [vmem:[%s4059_s29 + $0x20] sm:$0xff] }
 0x1d2   : > { %2203 = vmatpush.msra.mxu1 %v2128_v1  ;;  %2244 = vmatpush.msra.mxu3 %v2159_v3  ;;  %v2123_v19 = vld [vmem:[%s4059_s29 + $0xa0] sm:$0xff]  ;;  %v2090_v20 = vperm.slane %v2088_v17, 0  ;;  %v2091_v24 = vperm.slane %v2088_v17, 1  ;;  %v2092_v25 = vperm.slane %v2088_v17, 2  ;;  %v2093_v26 = vperm.slane %v2088_v17, 3  ;;  %v2138_v28 = vld [vmem:[%s4059_s29 + $0x118] sm:$0xff] }
 0x1d3   : > { %2184 = vmatpush.msra.mxu0 %v2111_v4  ;;  %2225 = vmatpush.msra.mxu2 %v2142_v30  ;;  %v2154_v29 = vld [vmem:[%s4059_s29 + $0x198] sm:$0xff]  ;;  %v2137_v38 = vld [vmem:[%s4059_s29 + $0x110] sm:$0xff]  ;;  %v2136_v44 = vld [vmem:[%s4059_s29 + $0x108] sm:$0xff] }
 0x1d4   : > { %2204 = vmatpush.msra.mxu1 %v2127_v5  ;;  %2245 = vmatpush.msra.mxu3 %v2158_v6  ;;  %v2106_v31 = vld [vmem:[%s4059_s29 + $0x18] sm:$0xff]  ;;  %v2094_v35 = vrot.slane %v2091_v24, 6  ;;  %v2095_v36 = vrot.slane %v2092_v25, 4  ;;  %v2096_v37 = vrot.slane %v2093_v26, 2  ;;  %v2153_v39 = vld [vmem:[%s4059_s29 + $0x190] sm:$0xff]  ;;  %v2152_v21 = vld [vmem:[%s4059_s29 + $0x188] sm:$0xff] }
 0x1d5   : > { %2185 = vmatpush.msra.mxu0 %v2110_v7  ;;  %2226 = vmatpush.msra.mxu2 %v2141_v8  ;;  %v2122_v34 = vld [vmem:[%s4059_s29 + $0x98] sm:$0xff]  ;;  %v2087_v40 = vld [vmem:[#allocation2] sm:$0xff]  ;;  %v2104_v46 = vld [vmem:[%s4059_s29 + $0x8] sm:$0xff] }
 0x1d6   : > { %2205 = vmatpush.msra.mxu1 %v2126_v60  ;;  %2246 = vmatpush.msra.mxu3 %v2157_v22  ;;  %v2105_v41 = vld [vmem:[%s4059_s29 + $0x10] sm:$0xff]  ;;  %v2097_v32 = vsel %vm2074_vm0, %v2090_v20, %v2094_v35  ;;  %v2098_v43 = vsel %vm2076_vm1, %v2095_v36, %v2096_v37  ;;  %v2120_v47 = vld [vmem:[%s4059_s29 + $0x88] sm:$0xff]  ;;  %v2135_v48 = vld [vmem:[%s4059_s29 + $0x100] sm:$0xff] }
 0x1d7   : > { %2186 = vmatpush.msra.mxu0 %v2109_v10  ;;  %2227 = vmatpush.msra.mxu2 %v2140_v11  ;;  %v2121_v42 = vld [vmem:[%s4059_s29 + $0x90] sm:$0xff]  ;;  %v2099_v45 = vsel %vm2078_vm2, %v2097_v32, %v2098_v43  ;;  %v2151_v27 = vld [vmem:[%s4059_s29 + $0x180] sm:$0xff] }
 0x1d8   : > { %2206 = vmatpush.msra.mxu1 %v2125_v23  ;;  %2247 = vmatpush.msra.mxu3 %v2156_v12  ;;  %v2101_v33 = vadd.f32 %v2099_v45, %v2087_v40  ;;  %v2103_v49 = vld [vmem:[%s4059_s29] sm:$0xff] }
 0x1d9   : > { %2187 = vmatpush.msra.mxu0 %v2108_v13  ;;  %2228 = vmatpush.msra.mxu2 %v2139_v15  ;;  %v2119_v51 = vld [vmem:[%s4059_s29 + $0x80] sm:$0xff] }
 0x1da   : > { %2207 = vmatpush.msra.mxu1 %v2124_v14  ;;  %2248 = vmatpush.msra.mxu3 %v2155_v16  ;;  %v2102_v50 = vmax.f32 %v2101_v33, 0.0 }
 0x1db   : > { %2188 = vmatpush.msra.mxu0 %v2107_v18  ;;  %2229 = vmatpush.msra.mxu2 %v2138_v28 }
 0x1dc   : > { %2208 = vmatpush.msra.mxu1 %v2123_v19  ;;  %2249 = vmatpush.msra.mxu3 %v2154_v29  ;;  %2168 = vst [vmem:[#allocation1] ss:$4 sm:$0xff] %v2102_v50 }
 0x1dd   : > { %2189 = vmatpush.msra.mxu0 %v2106_v31  ;;  %2230 = vmatpush.msra.mxu2 %v2137_v38 }
 0x1de   : > { %2209 = vmatpush.msra.mxu1 %v2122_v34  ;;  %2250 = vmatpush.msra.mxu3 %v2153_v39 }
 0x1df   : > { %2190 = vmatpush.msra.mxu0 %v2105_v41  ;;  %2231 = vmatpush.msra.mxu2 %v2136_v44 }
 0x1e0   : > { %2210 = vmatpush.msra.mxu1 %v2121_v42  ;;  %2251 = vmatpush.msra.mxu3 %v2152_v21 }
 0x1e1   : > { %2191 = vmatpush.msra.mxu0 %v2104_v46  ;;  %2232 = vmatpush.msra.mxu2 %v2135_v48 }
 0x1e2   : > { %2211 = vmatpush.msra.mxu1 %v2120_v47  ;;  %2252 = vmatpush.msra.mxu3 %v2151_v27 }
 0x1e3   : > { %2192 = vmatpush.msra.mxu0 %v2103_v49  ;;  %v2171_v52 = vld.sshfl [vmem:[#allocation1 + $0x10] sm:$0xff pattern:$0x73625140]  ;;  %v2172_v9 = vld.sshfl [vmem:[#allocation1 + $0x18] sm:$0xff pattern:$0x73625140] }
 0x1e4   : > { %2212 = vmatpush.msra.mxu1 %v2119_v51  ;;  %2233 = vmatmul.f32.vlgmr.msra.gmra.mxu2 %v2171_v52  ;;  %v2169_v53 = vld.sshfl [vmem:[#allocation1] sm:$0xff pattern:$0x73625140]  ;;  %v2170_v54 = vld.sshfl [vmem:[#allocation1 + $0x8] sm:$0xff pattern:$0x73625140] }
 0x1e5   : > { %2253 = vmatmul.f32.vlgmr.msra.gmra.mxu3 %v2172_v9  ;;  %2193 = vmatmul.f32.vlgmr.msra.gmra.mxu0 %v2169_v53 }
 0x1e6   : > { %2213 = vmatmul.f32.vlgmr.msra.gmra.mxu1 %v2170_v54 }
 0x262   : > { %v2194_v55 = vpop.f32.mrf.mxu0 }
 0x263   : > { %v2214_v56 = vpop.f32.mrf.mxu1 }
 0x264   : > { %v2215_v57 = vadd.f32 %v2214_v56, %v2194_v55 }
 0x267   : > { %v2234_v58 = vpop.f32.mrf.mxu2 }
 0x268   : > { %v2254_v59 = vpop.f32.mrf.mxu3  ;;  %v2235_v61 = vadd.f32 %v2234_v58, %v2215_v57 }
 0x26a   : > { %v2255_v62 = vadd.f32 %v2254_v59, %v2235_v61 }
 0x26c   : > { %2257 = vst [vmem:[%s4057_s30] sm:$0x3] %v2255_v62 }
 0x26d PF: > { %s20_s25 = sadd.s32 1, %s3835_s25   ;;  %s4700_s21 = sld [smem:[#allocation14_spill]] }
 0x26e   : > { %p17_p10 = scmp.ge.s32.totalorder %s20_s25, 16   ;;  %s4701_s12 = sld [smem:[#allocation10_spill]] }
 0x26f   : > { %s4702_s20 = sld [smem:[#allocation15_spill]]  ;;  %s4706_s15 = smov %s3799_s16 }
 0x270   : > { %s4703_s10 = sld [smem:[#allocation11_spill]]  ;;  %s4707_s16 = smov %s3803_s17 }
 0x271   : > { %s4704_s23 = sld [smem:[#allocation12_spill]]  ;;  %s4709_s18 = smov %s3811_s19 }
 0x272   : > { %s4705_s6 = sld [smem:[#allocation13_spill]]  ;;  %s4712_s22 = smov %s3831_s24 }
 0x273   : > { %s4708_s17 = smov %s4700_s21 }
 0x274   : > { %s4710_s19 = smov %s4701_s12  ;;  %19 = sbr.rel (!%p17_p10) target bundleno = 14 (0xe), region = 111 }
 0x276   : > { %s4711_s21 = smov %s4703_s10 }
 0x278   : > { %s4713_s24 = smov %s4705_s6 }
 0x279   :  { %2277 = vsyncpa [#allocation4], 1 }
 0x27a   :  { %2279 = vsyncpa [#allocation4 + $0x1], 1 }
 0x27b   :  { %2280 = vsyncpa [#allocation6], 1 }
 0x27c   :  { %2282 = vsyncpa [#allocation6 + $0x1], 1 }

// kernel: cnn3_forward.2
= control target key start
LH: loop header
LB: loop body
LE: loop exit
PB: predicated region body
PF: predicated region fallthrough
CT: control target
= control target key end

     0   :  { %12 = vsyncpa [#allocation6], 0  ;;  %s12598_s0 = inlined_call_operand.vmem [shape: bf16[2,896,9], index: 0, kind: input, shape index: {}]   ;;  %s12599_s1 = inlined_call_operand.hbm [shape: bf16[9,64], index: 1, kind: input, shape index: {}]   ;;  %s12600_s2 = inlined_call_operand.hbm [shape: f32[1,64], index: 2, kind: input, shape index: {}]   ;;  %s12601_s3 = inlined_call_operand.hbm [shape: f32[1,64], index: 3, kind: input, shape index: {}]   ;;  %s12602_s4 = inlined_call_operand.hbm [shape: bf16[3,192,128], index: 4, kind: input, shape index: {}]   ;;  %s12603_s5 = inlined_call_operand.hbm [shape: f32[1,128], index: 5, kind: input, shape index: {}]   ;;  %s12604_s6 = inlined_call_operand.hbm [shape: f32[1,128], index: 6, kind: input, shape index: {}]   ;;  %s12605_s7 = inlined_call_operand.vmem [shape: bf16[2,49,128], index: 7, kind: output, shape index: {}]  }
   0x1   :  { %13 = vsyncpa [#allocation8], 0 }
   0x2   :  { %14 = vsyncpa [#allocation11], 0  ;;  %s36_s26 = sshll.u32 %s12600_s2, 4  ;;  %s37_s26 = int_to_ptr.hbm [resolvable:$true] %s36_s26 }
   0x3   :  { %15 = vsyncpa [#allocation14], 0  ;;  %s8806_s27 = smov [#allocation7]   ;;  %s57_s8 = sshll.u32 %s12602_s4, 4  ;;  %s58_s8 = int_to_ptr.hbm [resolvable:$true] %s57_s8 }
   0x4   :  { %s38_s28 = sshll.u32 %s8806_s27, 4  ;;  %s8807_s9 = smov [#allocation10]   ;;  %s39_s28 = int_to_ptr.vmem [resolvable:$true] %s38_s28 }
   0x5   :  { %41 = dma.hbm_to_vmem [thread:$0]  %s37_s26, 16, %s39_s28, [#allocation8]  }
   0x6   :  { %s59_s10 = sshll.u32 %s8807_s9, 4  ;;  %s22_s13 = sshll.u32 %s12599_s1, 4  ;;  %s60_s10 = int_to_ptr.vmem [resolvable:$true] %s59_s10  ;;  %s23_s13 = int_to_ptr.hbm [resolvable:$true] %s22_s13 }
   0x7   :  { %s8808_s2 = smov 64   ;;  %s8809_s14 = smov 4  }
   0x8   :  { %65 = dma.hbm_to_vmem [thread:$0]  %s58_s8, 4608, %s60_s10, [#allocation11], %s8808_s2, %s8808_s2, %s8809_s14  }
   0x9   :  { %s47_s17 = sshll.u32 %s12601_s3, 4  ;;  %s8810_s18 = smov [#allocation5]   ;;  %s48_s17 = int_to_ptr.hbm [resolvable:$true] %s47_s17 }
   0xa   :  { %s24_s4 = sshll.u32 %s8810_s18, 4  ;;  %s8811_s19 = smov [#allocation9]   ;;  %s25_s4 = int_to_ptr.vmem [resolvable:$true] %s24_s4 }
   0xb   :  { %30 = dma.hbm_to_vmem [thread:$0]  %s23_s13, 128, %s25_s4, [#allocation6], %s8808_s2, %s8808_s2, %s8809_s14  }
   0xc   :  { %s49_s1 = sshll.u32 %s8811_s19, 4  ;;  %s71_s22 = sshll.u32 %s12603_s5, 4  ;;  %s50_s1 = int_to_ptr.vmem [resolvable:$true] %s49_s1  ;;  %s72_s22 = int_to_ptr.hbm [resolvable:$true] %s71_s22 }
   0xd   :  { %52 = dma.hbm_to_vmem [thread:$0]  %s48_s17, 16, %s50_s1, [#allocation8]  }
   0xe   :  { %s82_s3 = sshll.u32 %s12604_s6, 4  ;;  %s8812_s25 = smov [#allocation12]   ;;  %s83_s3 = int_to_ptr.hbm [resolvable:$true] %s82_s3 }
   0xf   :  { %s73_s26 = sshll.u32 %s8812_s25, 4  ;;  %s8813_s27 = smov [#allocation13]   ;;  %s74_s26 = int_to_ptr.vmem [resolvable:$true] %s73_s26 }
  0x10   :  { %76 = dma.hbm_to_vmem [thread:$0]  %s72_s22, 16, %s74_s26, [#allocation11]  }
  0x11   :  { %s84_s28 = sshll.u32 %s8813_s27, 4  ;;  %s85_s28 = int_to_ptr.vmem [resolvable:$true] %s84_s28 }
  0x12   :  { %87 = dma.hbm_to_vmem [thread:$0]  %s83_s3, 16, %s85_s28, [#allocation14]  }
  0x13   :  { %8798 = dma.done.wait [#allocation6], 128  }
  0x14   :  { %8799 = vsyncadd [#allocation6], 4294967168 }
  0x15   :  { %8800 = dma.done.wait [#allocation8], 32  }
  0x16   :  { %8801 = vsyncadd [#allocation8], 4294967264 }
  0x17   :  { %8802 = dma.done.wait [#allocation11], 4624  }
  0x18   :  { %8803 = vsyncadd [#allocation11], 4294962672 }
  0x19   :  { %8804 = dma.done.wait [#allocation14], 16  }
  0x1a   :  { %8805 = vsyncadd [#allocation14], 4294967280  ;;  %vm1241_vm0 = vcmask 1043456   ;;  %vm3400_vm1 = vsmask.f32 3328  ;;  %vm1242_vm2 = vcmask 1044480  }
  0x1b   :  { %v8814_v0 = vmov 65535   ;;  %vm8881_vm3 = vmand %vm1241_vm0, %vm3400_vm1  ;;  %v12705_v2 = vmov 0  ;;  %v7802_v3 = vld [vmem:[#allocation5] sm:$0xf]  ;;  %v8524_v4 = vld [vmem:[#allocation5] sm:$0x10] }
  0x1c   :  { %v1243_v1 = vsel %vm1241_vm0, 4294967295, %v8814_v0  ;;  %v12706_v2 = vsel %vm8881_vm3, 4294967295, %v12705_v2  ;;  %v7803_v6 = vor.u32 %v8524_v4, %v7802_v3  ;;  %v8412_v8 = vld [vmem:[%s12598_s0] sm:$0xff]  ;;  %v8501_v9 = vld [vmem:[%s12598_s0 + $0x2c8] sm:$0xff]  ;;  %vm904_vm4 = vcmask 72704   ;;  %v8502_v12 = vld [vmem:[%s12598_s0 + $0x2d0] sm:$0xff] }
  0x1d   :  { %12707 = vst [vmem:[#allocation19_spill] sm:$0xff] %v12706_v2  ;;  %v1244_v5 = vsel %vm1242_vm2, %v1243_v1, 0  ;;  %v8489_v10 = vld [vmem:[%s12598_s0 + $0x268] sm:$0xff]  ;;  %v8490_v13 = vld [vmem:[%s12598_s0 + $0x270] sm:$0xff]  ;;  %v8503_v15 = vld [vmem:[%s12598_s0 + $0x2d8] sm:$0xff]  ;;  %vm2497_vm5 = vcmask 523264  }
  0x1e   :  { %v1246_v7 = vand.u32 %v7803_v6, %v1244_v5  ;;  %v8413_v11 = vld [vmem:[%s12598_s0 + $0x8] sm:$0xff]  ;;  %v8414_v14 = vld [vmem:[%s12598_s0 + $0x10] sm:$0xff]  ;;  %v8491_v16 = vld [vmem:[%s12598_s0 + $0x278] sm:$0xff]  ;;  %vm2722_vm6 = vcmask 523268   ;;  %vm3459_vm8 = vcmask 519171   ;;  %vm3467_vm12 = vcmask 518144  }
  0x1f   :  { %v8415_v17 = vld [vmem:[%s12598_s0 + $0x18] sm:$0xff]  ;;  %v8504_v18 = vld [vmem:[%s12598_s0 + $0x2e0] sm:$0xff]  ;;  %v8505_v21 = vld [vmem:[%s12598_s0 + $0x2e8] sm:$0xff]  ;;  %vm3460_vm9 = vsmask.f32 7950 }
  0x20   :  { %1255 = vmatpush.bf16.msra.mxu0 %v1246_v7  ;;  %8626 = vmatpush.bf16.msra.mxu2 %v1246_v7  ;;  %v8492_v19 = vld [vmem:[%s12598_s0 + $0x280] sm:$0xff]  ;;  %v8493_v22 = vld [vmem:[%s12598_s0 + $0x288] sm:$0xff]  ;;  %v8506_v24 = vld [vmem:[%s12598_s0 + $0x2f0] sm:$0xff]  ;;  %vm3433_vm11 = vsmask.f32 7440 }
  0x21   :  { %8625 = vmatpush.bf16.msra.mxu1 %v1246_v7  ;;  %8627 = vmatpush.bf16.msra.mxu3 %v1246_v7  ;;  %v8416_v20 = vld [vmem:[%s12598_s0 + $0x20] sm:$0xff]  ;;  %v8417_v23 = vld [vmem:[%s12598_s0 + $0x28] sm:$0xff]  ;;  %v8494_v25 = vld [vmem:[%s12598_s0 + $0x290] sm:$0xff]  ;;  %vm3468_vm13 = vsmask.f32 2304 }
  0x22   :  { %v8418_v26 = vld [vmem:[%s12598_s0 + $0x30] sm:$0xff]  ;;  %v8507_v27 = vld [vmem:[%s12598_s0 + $0x2f8] sm:$0xff]  ;;  %v8508_v30 = vld [vmem:[%s12598_s0 + $0x300] sm:$0xff]  ;;  %vm3395_vm2 = vsmask.f32 7938 }
  0x23   :  { %7804 = vmatmul.msk.bf16.vlgmr.msra.gmra.mxu0 %vm904_vm4, %v8412_v8  ;;  %7893 = vmatmul.msk.bf16.vlgmr.msra.gmra.mxu2 %vm904_vm4, %v8501_v9  ;;  %v8495_v28 = vld [vmem:[%s12598_s0 + $0x298] sm:$0xff]  ;;  %v8496_v31 = vld [vmem:[%s12598_s0 + $0x2a0] sm:$0xff]  ;;  %v8514_v32 = vld [vmem:[%s12598_s0 + $0x330] sm:$0xff] }
  0x24   :  { %7881 = vmatmul.msk.bf16.vlgmr.msra.gmra.mxu1 %vm904_vm4, %v8489_v10  ;;  %v8419_v29 = vld [vmem:[%s12598_s0 + $0x38] sm:$0xff]  ;;  %7906 = vmatmul.msk.bf16.vlgmr.msra.gmra.mxu3 %vm904_vm4, %v8514_v32  ;;  %v8985_v33 = vld [vmem:[#allocation7] ss:$0 sm:$0xff]  ;;  %v8987_v34 = vld [vmem:[#allocation9] ss:$0 sm:$0xff] }
  0x25   :  { %v8420_v35 = vld [vmem:[%s12598_s0 + $0x40] sm:$0xff]  ;;  %v8509_v36 = vld [vmem:[%s12598_s0 + $0x308] sm:$0xff]  ;;  %v8515_v49 = vld [vmem:[%s12598_s0 + $0x338] sm:$0xff] }
  0x26   :  { %v8497_v38 = vld [vmem:[%s12598_s0 + $0x2a8] sm:$0xff]  ;;  %v8510_v62 = vld [vmem:[%s12598_s0 + $0x310] sm:$0xff]  ;;  %vm9040_vm7 = vmor %vm2722_vm6, %vm1241_vm0  ;;  %vm3394_vm0 = vcmask 519168   ;;  %vm3355_vm6 = vsmask.f32 256 }
  0x27   :  { %v8421_v61 = vld [vmem:[%s12598_s0 + $0x48] sm:$0xff]  ;;  %v8498_v0 = vld [vmem:[%s12598_s0 + $0x2b0] sm:$0xff]  ;;  %vm9191_vm10 = vmand %vm3459_vm8, %vm3460_vm9 }
  0x28   :  { %vm9414_vm14 = vmor %vm3400_vm1, %vm3433_vm11 }
  0x29   :  { %vm9424_vm15 = vmand %vm3467_vm12, %vm3468_vm13 }
  0x2a   :  { %vm9493_vm8 = vmand %vm3394_vm0, %vm3395_vm2  ;;  %vm3429_vm2 = vcmask 1042944  }
  0x2b   :  { %vm9514_vm12 = vmand %vm3394_vm0, %vm3400_vm1  ;;  %vm3427_vm1 = vcmask 1043968  }
  0x33   :  { %7805 = vmatmul.msk.bf16.gmra.mxu0 %vm904_vm4, %v8413_v11  ;;  %7894 = vmatmul.msk.bf16.gmra.mxu2 %vm904_vm4, %v8502_v12 }
  0x34   :  { %7882 = vmatmul.msk.bf16.gmra.mxu1 %vm904_vm4, %v8490_v13  ;;  %7907 = vmatmul.msk.bf16.gmra.mxu3 %vm904_vm4, %v8515_v49 }
  0x43   :  { %7806 = vmatmul.msk.bf16.gmra.mxu0 %vm904_vm4, %v8414_v14  ;;  %7895 = vmatmul.msk.bf16.gmra.mxu2 %vm904_vm4, %v8503_v15  ;;  %v8516_v15 = vld [vmem:[%s12598_s0 + $0x340] sm:$0xff] }
  0x44   :  { %7883 = vmatmul.msk.bf16.gmra.mxu1 %vm904_vm4, %v8491_v16  ;;  %v8596_v16 = vld [vmem:[#allocation10 + $0x38] sm:$0xff]  ;;  %7908 = vmatmul.msk.bf16.gmra.mxu3 %vm904_vm4, %v8516_v15 }
  0x45   :  { %5506 = vmatpush.bf16.msrb.mxu1 %v8596_v16 }
  0x53   :  { %7807 = vmatmul.msk.bf16.gmra.mxu0 %vm904_vm4, %v8415_v17  ;;  %7896 = vmatmul.msk.bf16.gmra.mxu2 %vm904_vm4, %v8504_v18 }
  0x54   :  { %7884 = vmatmul.msk.bf16.gmra.mxu1 %vm904_vm4, %v8492_v19 }
  0x63   :  { %7808 = vmatmul.msk.bf16.gmra.mxu0 %vm904_vm4, %v8416_v20  ;;  %7897 = vmatmul.msk.bf16.gmra.mxu2 %vm904_vm4, %v8505_v21  ;;  %v8815_v20 = vmov 0  }
  0x64   :  { %7885 = vmatmul.msk.bf16.gmra.mxu1 %vm904_vm4, %v8493_v22  ;;  %2725 = vst.msk [vmem:[#allocation3 + $0x8] sm:$0xff] %vm9040_vm7, %v8815_v20 }
  0x65   :  { %2724 = vst.msk [vmem:[#allocation3] sm:$0xff] %vm9040_vm7, %v8815_v20 }
  0x66   :  { %2726 = vst.msk [vmem:[#allocation3 + $0x10] sm:$0xff] %vm9040_vm7, %v8815_v20 }
  0x67   :  { %2727 = vst.msk [vmem:[#allocation3 + $0x18] sm:$0xff] %vm9040_vm7, %v8815_v20 }
  0x68   :  { %2728 = vst.msk [vmem:[#allocation3 + $0x20] sm:$0xff] %vm9040_vm7, %v8815_v20 }
  0x69   :  { %2729 = vst.msk [vmem:[#allocation3 + $0x28] sm:$0xff] %vm9040_vm7, %v8815_v20 }
  0x6a   :  { %2730 = vst.msk [vmem:[#allocation3 + $0x30] sm:$0xff] %vm9040_vm7, %v8815_v20 }
  0x6b   :  { %2731 = vst.msk [vmem:[#allocation3 + $0x38] sm:$0xff] %vm9040_vm7, %v8815_v20 }
  0x6c   :  { %2732 = vst.msk [vmem:[#allocation3 + $0x40] sm:$0xff] %vm9040_vm7, %v8815_v20 }
  0x6d   :  { %2733 = vst.msk [vmem:[#allocation3 + $0x48] sm:$0xff] %vm9040_vm7, %v8815_v20 }
  0x6e   :  { %2734 = vst.msk [vmem:[#allocation3 + $0x50] sm:$0xff] %vm9040_vm7, %v8815_v20 }
  0x6f   :  { %2735 = vst.msk [vmem:[#allocation3 + $0x58] sm:$0xff] %vm9040_vm7, %v8815_v20 }
  0x70   :  { %2736 = vst.msk [vmem:[#allocation3 + $0x60] sm:$0xff] %vm9040_vm7, %v8815_v20 }
  0x71   :  { %2737 = vst.msk [vmem:[#allocation3 + $0x68] sm:$0xff] %vm9040_vm7, %v8815_v20 }
  0x72   :  { %2738 = vst.msk [vmem:[#allocation3 + $0x70] sm:$0xff] %vm9040_vm7, %v8815_v20 }
  0x73   :  { %7809 = vmatmul.msk.bf16.gmra.mxu0 %vm904_vm4, %v8417_v23  ;;  %7898 = vmatmul.msk.bf16.gmra.mxu2 %vm904_vm4, %v8506_v24  ;;  %2739 = vst.msk [vmem:[#allocation3 + $0x78] sm:$0xff] %vm9040_vm7, %v8815_v20 }
  0x74   :  { %7886 = vmatmul.msk.bf16.gmra.mxu1 %vm904_vm4, %v8494_v25  ;;  %v8595_v25 = vld [vmem:[#allocation10 + $0x30] sm:$0xff]  ;;  %2740 = vst.msk [vmem:[#allocation3 + $0x80] sm:$0xff] %vm9040_vm7, %v8815_v20 }
  0x75   :  { %5507 = vmatpush.bf16.msrb.mxu1 %v8595_v25  ;;  %2741 = vst.msk [vmem:[#allocation3 + $0x88] sm:$0xff] %vm9040_vm7, %v8815_v20 }
  0x76   :  { %2742 = vst.msk [vmem:[#allocation3 + $0x90] sm:$0xff] %vm9040_vm7, %v8815_v20 }
  0x77   :  { %2743 = vst.msk [vmem:[#allocation3 + $0x98] sm:$0xff] %vm9040_vm7, %v8815_v20 }
  0x78   :  { %2744 = vst.msk [vmem:[#allocation3 + $0xa0] sm:$0xff] %vm9040_vm7, %v8815_v20 }
  0x79   :  { %2745 = vst.msk [vmem:[#allocation3 + $0xa8] sm:$0xff] %vm9040_vm7, %v8815_v20 }
  0x7a   :  { %2746 = vst.msk [vmem:[#allocation3 + $0xb0] sm:$0xff] %vm9040_vm7, %v8815_v20 }
  0x7b   :  { %2747 = vst.msk [vmem:[#allocation3 + $0xb8] sm:$0xff] %vm9040_vm7, %v8815_v20 }
  0x7c   :  { %2748 = vst.msk [vmem:[#allocation3 + $0xc0] sm:$0xff] %vm9040_vm7, %v8815_v20 }
  0x7d   :  { %2749 = vst.msk [vmem:[#allocation3 + $0xc8] sm:$0xff] %vm9040_vm7, %v8815_v20 }
  0x7e   :  { %2750 = vst.msk [vmem:[#allocation3 + $0xd0] sm:$0xff] %vm9040_vm7, %v8815_v20 }
  0x7f   :  { %2751 = vst.msk [vmem:[#allocation3 + $0xd8] sm:$0xff] %vm9040_vm7, %v8815_v20 }
  0x80   :  { %2752 = vst.msk [vmem:[#allocation3 + $0xe0] sm:$0xff] %vm9040_vm7, %v8815_v20 }
  0x81   :  { %2753 = vst.msk [vmem:[#allocation3 + $0xe8] sm:$0xff] %vm9040_vm7, %v8815_v20 }
  0x82   :  { %2754 = vst.msk [vmem:[#allocation3 + $0xf0] sm:$0xff] %vm9040_vm7, %v8815_v20 }
  0x83   :  { %7810 = vmatmul.msk.bf16.gmra.mxu0 %vm904_vm4, %v8418_v26  ;;  %7899 = vmatmul.msk.bf16.gmra.mxu2 %vm904_vm4, %v8507_v27  ;;  %2755 = vst.msk [vmem:[#allocation3 + $0xf8] sm:$0xff] %vm9040_vm7, %v8815_v20 }
  0x84   :  { %7887 = vmatmul.msk.bf16.gmra.mxu1 %vm904_vm4, %v8495_v28  ;;  %2756 = vst.msk [vmem:[#allocation3 + $0x100] sm:$0xff] %vm9040_vm7, %v8815_v20 }
  0x85   :  { %2757 = vst.msk [vmem:[#allocation3 + $0x108] sm:$0xff] %vm9040_vm7, %v8815_v20 }
  0x86   :  { %2758 = vst.msk [vmem:[#allocation3 + $0x110] sm:$0xff] %vm9040_vm7, %v8815_v20 }
  0x87   :  { %2759 = vst.msk [vmem:[#allocation3 + $0x118] sm:$0xff] %vm9040_vm7, %v8815_v20 }
  0x88   :  { %2760 = vst.msk [vmem:[#allocation3 + $0x120] sm:$0xff] %vm9040_vm7, %v8815_v20 }
  0x89   :  { %2761 = vst.msk [vmem:[#allocation3 + $0x128] sm:$0xff] %vm9040_vm7, %v8815_v20 }
  0x8a   :  { %2762 = vst.msk [vmem:[#allocation3 + $0x130] sm:$0xff] %vm9040_vm7, %v8815_v20 }
  0x8b   :  { %2763 = vst.msk [vmem:[#allocation3 + $0x138] sm:$0xff] %vm9040_vm7, %v8815_v20 }
  0x8c   :  { %2764 = vst.msk [vmem:[#allocation3 + $0x140] sm:$0xff] %vm9040_vm7, %v8815_v20 }
  0x8d   :  { %2765 = vst.msk [vmem:[#allocation3 + $0x148] sm:$0xff] %vm9040_vm7, %v8815_v20 }
  0x8e   :  { %2766 = vst.msk [vmem:[#allocation3 + $0x150] sm:$0xff] %vm9040_vm7, %v8815_v20 }
  0x8f   :  { %2767 = vst.msk [vmem:[#allocation3 + $0x158] sm:$0xff] %vm9040_vm7, %v8815_v20 }
  0x90   :  { %2768 = vst.msk [vmem:[#allocation3 + $0x160] sm:$0xff] %vm9040_vm7, %v8815_v20 }
  0x91   :  { %2769 = vst.msk [vmem:[#allocation3 + $0x168] sm:$0xff] %vm9040_vm7, %v8815_v20 }
  0x92   :  { %2770 = vst.msk [vmem:[#allocation3 + $0x170] sm:$0xff] %vm9040_vm7, %v8815_v20 }
  0x93   :  { %7811 = vmatmul.msk.bf16.gmra.mxu0 %vm904_vm4, %v8419_v29  ;;  %7900 = vmatmul.msk.bf16.gmra.mxu2 %vm904_vm4, %v8508_v30  ;;  %v8422_v30 = vld [vmem:[%s12598_s0 + $0x50] sm:$0xff]  ;;  %2771 = vst.msk [vmem:[#allocation3 + $0x178] sm:$0xff] %vm9040_vm7, %v8815_v20 }
  0x94   :  { %7888 = vmatmul.msk.bf16.gmra.mxu1 %vm904_vm4, %v8496_v31  ;;  %v8511_v31 = vld [vmem:[%s12598_s0 + $0x318] sm:$0xff]  ;;  %2772 = vst.msk [vmem:[#allocation3 + $0x180] sm:$0xff] %vm9040_vm7, %v8815_v20 }
  0x95   :  { %2773 = vst.msk [vmem:[#allocation3 + $0x188] sm:$0xff] %vm9040_vm7, %v8815_v20 }
  0x96   :  { %2774 = vst.msk [vmem:[#allocation3 + $0x190] sm:$0xff] %vm9040_vm7, %v8815_v20 }
  0x97   :  { %2775 = vst.msk [vmem:[#allocation3 + $0x198] sm:$0xff] %vm9040_vm7, %v8815_v20 }
  0x98   :  { %2776 = vst.msk [vmem:[#allocation3 + $0x1a0] sm:$0xff] %vm9040_vm7, %v8815_v20 }
  0x99   :  { %2777 = vst.msk [vmem:[#allocation3 + $0x1a8] sm:$0xff] %vm9040_vm7, %v8815_v20 }
  0x9a   :  { %2778 = vst.msk [vmem:[#allocation3 + $0x1b0] sm:$0xff] %vm9040_vm7, %v8815_v20 }
  0x9b   :  { %2779 = vst.msk [vmem:[#allocation3 + $0x1b8] sm:$0xff] %vm9040_vm7, %v8815_v20 }
  0x9c   :  { %2780 = vst.msk [vmem:[#allocation3 + $0x1c0] sm:$0xff] %vm9040_vm7, %v8815_v20 }
  0x9d   :  { %2781 = vst.msk [vmem:[#allocation3 + $0x1c8] sm:$0xff] %vm9040_vm7, %v8815_v20 }
  0x9e   :  { %2782 = vst.msk [vmem:[#allocation3 + $0x1d0] sm:$0xff] %vm9040_vm7, %v8815_v20 }
  0x9f   :  { %2783 = vst.msk [vmem:[#allocation3 + $0x1d8] sm:$0xff] %vm9040_vm7, %v8815_v20 }
  0xa0   :  { %v1257_v37 = vpop.f32.mrf.mxu0  ;;  %2784 = vst.msk [vmem:[#allocation3 + $0x1e0] sm:$0xff] %vm9040_vm7, %v8815_v20 }
  0xa1   :  { %v1821_v39 = vmul.f32 %v8985_v33, %v1257_v37  ;;  %v1642_v40 = vpop.f32.mrf.mxu1  ;;  %2785 = vst.msk [vmem:[#allocation3 + $0x1e8] sm:$0xff] %vm9040_vm7, %v8815_v20 }
  0xa2   :  { %v1975_v41 = vmul.f32 %v8985_v33, %v1642_v40  ;;  %2786 = vst.msk [vmem:[#allocation3 + $0x1f0] sm:$0xff] %vm9040_vm7, %v8815_v20 }
  0xa3   :  { %v2049_v42 = vadd.f32 %v8987_v34, %v1821_v39  ;;  %7812 = vmatmul.msk.bf16.gmra.mxu0 %vm904_vm4, %v8420_v35  ;;  %7901 = vmatmul.msk.bf16.gmra.mxu2 %vm904_vm4, %v8509_v36  ;;  %v8499_v35 = vld [vmem:[%s12598_s0 + $0x2b8] sm:$0xff]  ;;  %2787 = vst.msk [vmem:[#allocation3 + $0x1f8] sm:$0xff] %vm9040_vm7, %v8815_v20  ;;  %vm3356_vm7 = vsmask.f32 4368 }
  0xa4   :  { %v2203_v43 = vadd.f32 %v8987_v34, %v1975_v41  ;;  %7889 = vmatmul.msk.bf16.gmra.mxu1 %vm904_vm4, %v8497_v38  ;;  %vm9498_vm11 = vmor %vm3355_vm6, %vm3356_vm7  ;;  %vm7273_vm7 = vcmask 1041408  }
  0xa5   :  { %v2273_v44 = vmax.f32 %v2049_v42, 0.0 }
  0xa6   :  { %v1702_v45 = vpop.f32.mrf.mxu2  ;;  %v2427_v46 = vmax.f32 %v2203_v43, 0.0 }
  0xa7   :  { %2498 = vst.msk [vmem:[#allocation2] sm:$0xff] %vm2497_vm5, %v2273_v44  ;;  %v1999_v47 = vmul.f32 %v8985_v33, %v1702_v45 }
  0xa8   :  { %v1259_v48 = vpop.f32.mrf.mxu0  ;;  %2652 = vst.msk [vmem:[#allocation2 + $0x4d0] sm:$0xff] %vm2497_vm5, %v2427_v46 }
  0xa9   :  { %v2227_v50 = vadd.f32 %v8987_v34, %v1999_v47  ;;  %v1822_v51 = vmul.f32 %v8985_v33, %v1259_v48  ;;  %v1644_v52 = vpop.f32.mrf.mxu1 }
  0xaa   :  { %v1976_v53 = vmul.f32 %v8985_v33, %v1644_v52 }
  0xab   :  { %v2451_v54 = vmax.f32 %v2227_v50, 0.0  ;;  %v2050_v55 = vadd.f32 %v8987_v34, %v1822_v51 }
  0xac   :  { %v2204_v56 = vadd.f32 %v8987_v34, %v1976_v53 }
  0xad   :  { %2676 = vst.msk [vmem:[#allocation2 + $0x590] sm:$0xff] %vm2497_vm5, %v2451_v54  ;;  %v2274_v57 = vmax.f32 %v2050_v55, 0.0  ;;  %v8423_v55 = vld [vmem:[%s12598_s0 + $0x58] sm:$0xff] }
  0xae   :  { %v1704_v58 = vpop.f32.mrf.mxu2  ;;  %v2428_v59 = vmax.f32 %v2204_v56, 0.0  ;;  %v8512_v56 = vld [vmem:[%s12598_s0 + $0x320] sm:$0xff] }
  0xaf   :  { %2499 = vst.msk [vmem:[#allocation2 + $0x8] sm:$0xff] %vm2497_vm5, %v2274_v57  ;;  %v2000_v60 = vmul.f32 %v8985_v33, %v1704_v58 }
  0xb0   :  { %v1262_v63 = vpop.f32.mrf.mxu0  ;;  %2653 = vst.msk [vmem:[#allocation2 + $0x4d8] sm:$0xff] %vm2497_vm5, %v2428_v59 }
  0xb1   :  { %v2228_v1 = vadd.f32 %v8987_v34, %v2000_v60  ;;  %v1823_v3 = vmul.f32 %v8985_v33, %v1262_v63  ;;  %v1647_v4 = vpop.f32.mrf.mxu1 }
  0xb2   :  { %v1977_v5 = vmul.f32 %v8985_v33, %v1647_v4 }
  0xb3   :  { %v2452_v6 = vmax.f32 %v2228_v1, 0.0  ;;  %v2051_v7 = vadd.f32 %v8987_v34, %v1823_v3  ;;  %7813 = vmatmul.msk.bf16.gmra.mxu0 %vm904_vm4, %v8421_v61  ;;  %7902 = vmatmul.msk.bf16.gmra.mxu2 %vm904_vm4, %v8510_v62 }
  0xb4   :  { %v2205_v8 = vadd.f32 %v8987_v34, %v1977_v5  ;;  %7890 = vmatmul.msk.bf16.gmra.mxu1 %vm904_vm4, %v8498_v0 }
  0xb5   :  { %2677 = vst.msk [vmem:[#allocation2 + $0x598] sm:$0xff] %vm2497_vm5, %v2452_v6  ;;  %v2275_v9 = vmax.f32 %v2051_v7, 0.0 }
  0xb6   :  { %v1707_v11 = vpop.f32.mrf.mxu2  ;;  %v2429_v12 = vmax.f32 %v2205_v8, 0.0  ;;  %v2788_v62 = vld [vmem:[#allocation2] ss:$2 sm:$0xff]  ;;  %v3012_v63 = vld [vmem:[#allocation2 + $0x1] ss:$2 sm:$0xff] }
  0xb7   :  { %2500 = vst.msk [vmem:[#allocation2 + $0x10] sm:$0xff] %vm2497_vm5, %v2275_v9  ;;  %v2001_v13 = vmul.f32 %v8985_v33, %v1707_v11  ;;  %v3235_v6 = vmax.f32 %v2788_v62, %v3012_v63 }
  0xb8   :  { %v1264_v14 = vpop.f32.mrf.mxu0  ;;  %2654 = vst.msk [vmem:[#allocation2 + $0x4e0] sm:$0xff] %vm2497_vm5, %v2429_v12 }
  0xb9   :  { %v2229_v17 = vadd.f32 %v8987_v34, %v2001_v13  ;;  %v1824_v18 = vmul.f32 %v8985_v33, %v1264_v14  ;;  %v1649_v19 = vpop.f32.mrf.mxu1 }
  0xba   :  { %v1978_v21 = vmul.f32 %v8985_v33, %v1649_v19 }
  0xbb   :  { %v2453_v22 = vmax.f32 %v2229_v17, 0.0  ;;  %v2052_v23 = vadd.f32 %v8987_v34, %v1824_v18 }
  0xbc   :  { %v2206_v24 = vadd.f32 %v8987_v34, %v1978_v21  ;;  %v3462_v21 = vld [vmem:[#allocation3 + $0xc] sm:$0x8] }
  0xbd   :  { %2678 = vst.msk [vmem:[#allocation2 + $0x5a0] sm:$0xff] %vm2497_vm5, %v2453_v22  ;;  %v2276_v26 = vmax.f32 %v2052_v23, 0.0 }
  0xbe   :  { %v1709_v27 = vpop.f32.mrf.mxu2  ;;  %v2430_v28 = vmax.f32 %v2206_v24, 0.0 }
  0xbf   :  { %2501 = vst.msk [vmem:[#allocation2 + $0x18] sm:$0xff] %vm2497_vm5, %v2276_v26  ;;  %v2002_v29 = vmul.f32 %v8985_v33, %v1709_v27  ;;  %v8594_v26 = vld [vmem:[#allocation10 + $0x28] sm:$0xff]  ;;  %v8424_v27 = vld [vmem:[%s12598_s0 + $0x60] sm:$0xff] }
  0xc0   :  { %v1267_v32 = vpop.f32.mrf.mxu0  ;;  %2655 = vst.msk [vmem:[#allocation2 + $0x4e8] sm:$0xff] %vm2497_vm5, %v2430_v28  ;;  %v8513_v28 = vld [vmem:[%s12598_s0 + $0x328] sm:$0xff]  ;;  %5508 = vmatpush.bf16.msrb.mxu1 %v8594_v26 }
  0xc1   :  { %v2230_v36 = vadd.f32 %v8987_v34, %v2002_v29  ;;  %v1825_v37 = vmul.f32 %v8985_v33, %v1267_v32  ;;  %v1652_v38 = vpop.f32.mrf.mxu1  ;;  %v8600_v29 = vld [vmem:[#allocation10 + $0x58] sm:$0xff] }
  0xc2   :  { %v1979_v39 = vmul.f32 %v8985_v33, %v1652_v38  ;;  %5671 = vmatpush.bf16.msrb.mxu2 %v8600_v29 }
  0xc3   :  { %v2454_v40 = vmax.f32 %v2230_v36, 0.0  ;;  %v2053_v41 = vadd.f32 %v8987_v34, %v1825_v37  ;;  %7814 = vmatmul.msk.bf16.gmra.mxu0 %vm904_vm4, %v8422_v30  ;;  %7903 = vmatmul.msk.bf16.gmra.mxu2 %vm904_vm4, %v8511_v31  ;;  %v8593_v30 = vld [vmem:[#allocation10 + $0x20] sm:$0xff]  ;;  %v8599_v37 = vld [vmem:[#allocation10 + $0x50] sm:$0xff] }
  0xc4   :  { %v2207_v42 = vadd.f32 %v8987_v34, %v1979_v39  ;;  %7891 = vmatmul.msk.bf16.gmra.mxu1 %vm904_vm4, %v8499_v35 }
  0xc5   :  { %2679 = vst.msk [vmem:[#allocation2 + $0x5a8] sm:$0xff] %vm2497_vm5, %v2454_v40  ;;  %v2277_v43 = vmax.f32 %v2053_v41, 0.0  ;;  %5509 = vmatpush.bf16.msrb.mxu1 %v8593_v30  ;;  %v8500_v40 = vld [vmem:[%s12598_s0 + $0x2c0] sm:$0xff] }
  0xc6   :  { %v1712_v44 = vpop.f32.mrf.mxu2  ;;  %v2431_v45 = vmax.f32 %v2207_v42, 0.0  ;;  %v2790_v31 = vld [vmem:[#allocation2 + $0x10] ss:$2 sm:$0xff]  ;;  %v3014_v32 = vld [vmem:[#allocation2 + $0x11] ss:$2 sm:$0xff]  ;;  %5672 = vmatpush.bf16.msrb.mxu2 %v8599_v37 }
  0xc7   :  { %2502 = vst.msk [vmem:[#allocation2 + $0x20] sm:$0xff] %vm2497_vm5, %v2277_v43  ;;  %v2003_v46 = vmul.f32 %v8985_v33, %v1712_v44  ;;  %v3236_v41 = vmax.f32 %v2790_v31, %v3014_v32  ;;  %v8517_v44 = vld [vmem:[%s12598_s0 + $0x348] sm:$0xff] }
  0xc8   :  { %v1269_v47 = vpop.f32.mrf.mxu0  ;;  %2656 = vst.msk [vmem:[#allocation2 + $0x4f0] sm:$0xff] %vm2497_vm5, %v2431_v45  ;;  %v8592_v45 = vld [vmem:[#allocation10 + $0x18] sm:$0xff]  ;;  %7909 = vmatmul.msk.bf16.gmra.mxu3 %vm904_vm4, %v8517_v44 }
  0xc9   :  { %v2231_v48 = vadd.f32 %v8987_v34, %v2003_v46  ;;  %v1826_v49 = vmul.f32 %v8985_v33, %v1269_v47  ;;  %v9188_v18 = vpop.f32.mrf.mxu1  ;;  %5510 = vmatpush.bf16.msrb.mxu1 %v8592_v45  ;;  %v8598_v47 = vld [vmem:[#allocation10 + $0x48] sm:$0xff] }
  0xca   :  { %5673 = vmatpush.bf16.msrb.mxu2 %v8598_v47 }
  0xcb   :  { %v2455_v50 = vmax.f32 %v2231_v48, 0.0  ;;  %v2054_v51 = vadd.f32 %v8987_v34, %v1826_v49  ;;  %v8591_v49 = vld [vmem:[#allocation10 + $0x10] sm:$0xff] }
  0xcd   :  { %2680 = vst.msk [vmem:[#allocation2 + $0x5b0] sm:$0xff] %vm2497_vm5, %v2455_v50  ;;  %v2278_v52 = vmax.f32 %v2054_v51, 0.0  ;;  %5511 = vmatpush.bf16.msrb.mxu1 %v8591_v49 }
  0xce   :  { %v1714_v53 = vpop.f32.mrf.mxu2 }
  0xcf   :  { %2503 = vst.msk [vmem:[#allocation2 + $0x28] sm:$0xff] %vm2497_vm5, %v2278_v52  ;;  %v2004_v54 = vmul.f32 %v8985_v33, %v1714_v53  ;;  %v8597_v52 = vld [vmem:[#allocation10 + $0x40] sm:$0xff]  ;;  %v8525_v53 = vld [vmem:[#allocation3 + $0x4] sm:$0xf] }
  0xd0   :  { %v1272_v57 = vpop.f32.mrf.mxu0  ;;  %5674 = vmatpush.bf16.msrb.mxu2 %v8597_v52 }
  0xd1   :  { %v2232_v58 = vadd.f32 %v8987_v34, %v2004_v54  ;;  %v1827_v59 = vmul.f32 %v8985_v33, %v1272_v57  ;;  %v9239_v35 = vpop.f32.mrf.mxu1 }
  0xd3   :  { %v2456_v60 = vmax.f32 %v2232_v58, 0.0  ;;  %v2055_v61 = vadd.f32 %v8987_v34, %v1827_v59  ;;  %7815 = vmatmul.msk.bf16.gmra.mxu0 %vm904_vm4, %v8423_v55  ;;  %7904 = vmatmul.msk.bf16.gmra.mxu2 %vm904_vm4, %v8512_v56  ;;  %v8590_v55 = vld [vmem:[#allocation10 + $0x8] sm:$0xff]  ;;  %v8425_v56 = vld [vmem:[%s12598_s0 + $0x68] sm:$0xff] }
  0xd4   :  { %7892 = vmatmul.msk.bf16.gmra.mxu1 %vm904_vm4, %v8500_v40  ;;  %v8589_v59 = vld [vmem:[#allocation10] sm:$0xff] }
  0xd5   :  { %2681 = vst.msk [vmem:[#allocation2 + $0x5b8] sm:$0xff] %vm2497_vm5, %v2456_v60  ;;  %v2279_v0 = vmax.f32 %v2055_v61, 0.0  ;;  %5512 = vmatpush.bf16.msrb.mxu1 %v8590_v55  ;;  %v7918_v60 = vld [vmem:[#allocation3] sm:$0xf]  ;;  %v8526_v61 = vld [vmem:[#allocation3 + $0x4] sm:$0xf0] }
  0xd6   :  { %v1717_v1 = vpop.f32.mrf.mxu2  ;;  %v2792_v3 = vld [vmem:[#allocation2 + $0x20] ss:$2 sm:$0xff]  ;;  %v3016_v4 = vld [vmem:[#allocation2 + $0x21] ss:$2 sm:$0xff]  ;;  %v9316_v62 = vor.u32 %v8526_v61, %v7918_v60  ;;  %v8519_v55 = vld [vmem:[%s12598_s0 + $0x358] sm:$0xff] }
  0xd7   :  { %2504 = vst.msk [vmem:[#allocation2 + $0x30] sm:$0xff] %vm2497_vm5, %v2279_v0  ;;  %v2005_v5 = vmul.f32 %v8985_v33, %v1717_v1  ;;  %v3237_v7 = vmax.f32 %v2792_v3, %v3016_v4  ;;  %v8518_v1 = vld [vmem:[%s12598_s0 + $0x350] sm:$0xff]  ;;  %v1980_v4 = vmul.f32 %v8985_v33, %v9188_v18 }
  0xd8   :  { %v1274_v8 = vpop.f32.mrf.mxu0  ;;  %12712 = vst [vmem:[#allocation20_spill] sm:$0xff] %v9316_v62  ;;  %7910 = vmatmul.msk.bf16.gmra.mxu3 %vm904_vm4, %v8518_v1 }
  0xd9   :  { %v2233_v9 = vadd.f32 %v8987_v34, %v2005_v5  ;;  %v1828_v11 = vmul.f32 %v8985_v33, %v1274_v8  ;;  %v3347_v12 = vmax.f32 %v3235_v6, %v3237_v7  ;;  %v9281_v50 = vpop.f32.mrf.mxu1  ;;  %5513 = vmatpush.bf16.msrb.mxu1 %v8589_v59 }
  0xdb   :  { %v2457_v13 = vmax.f32 %v2233_v9, 0.0  ;;  %v2056_v14 = vadd.f32 %v8987_v34, %v1828_v11  ;;  %v9176_v15 = vpack.c.bf16 %v3347_v12, %v3347_v12  ;;  %v1981_v11 = vmul.f32 %v8985_v33, %v9239_v35 }
  0xdc   :  { %v2208_v12 = vadd.f32 %v8987_v34, %v1980_v4  ;;  %v1982_v35 = vmul.f32 %v8985_v33, %v9281_v50  ;;  %v3470_v50 = vld [vmem:[#allocation3 + $0x1c] sm:$0x7] }
  0xdd   :  { %2682 = vst.msk [vmem:[#allocation2 + $0x5c0] sm:$0xff] %vm2497_vm5, %v2457_v13  ;;  %v2280_v16 = vmax.f32 %v2056_v14, 0.0  ;;  %3415 = vrot.lane.b32.xlu0 %v9176_v15, %s8808_s2  ;;  %v3362_v17 = vshll.u32 %v9176_v15, 16  ;;  %v3359_v7 = vshrl.u32 %v9176_v15, 16  ;;  %v3397_v15 = vld [vmem:[#allocation3 + $0x10] sm:$0xf] }
  0xde   :  { %v9198_v22 = vpop.f32.mrf.mxu2  ;;  %v2432_v30 = vmax.f32 %v2208_v12, 0.0 }
  0xdf   :  { %2505 = vst.msk [vmem:[#allocation2 + $0x38] sm:$0xff] %vm2497_vm5, %v2280_v16  ;;  %v9203_v23 = vrot.slane %v3362_v17, 5  ;;  %v2006_v8 = vmul.f32 %v8985_v33, %v9198_v22  ;;  %v3436_v18 = vrot.slane %v3359_v7, 4 }
  0xe0   :  { %v9208_v24 = vpop.f32.mrf.mxu0  ;;  %2657 = vst.msk [vmem:[#allocation2 + $0x4f8] sm:$0xff] %vm2497_vm5, %v2432_v30 }
  0xe1   :  { %v3463_v25 = vsel %vm9191_vm10, %v9203_v23, %v3462_v21  ;;  %v1662_v63 = vpop.f32.mrf.mxu1  ;;  %v1829_v9 = vmul.f32 %v8985_v33, %v9208_v24  ;;  %v2234_v21 = vadd.f32 %v8987_v34, %v2006_v8 }
  0xe2   :  { %3464 = vst [vmem:[#allocation3 + $0xc] sm:$0x8] %v3463_v25 }
  0xe3   :  { %7816 = vmatmul.msk.bf16.gmra.mxu0 %vm904_vm4, %v8424_v27  ;;  %7905 = vmatmul.msk.bf16.gmra.mxu2 %vm904_vm4, %v8513_v28  ;;  %v2057_v26 = vadd.f32 %v8987_v34, %v1829_v9  ;;  %v8426_v27 = vld [vmem:[%s12598_s0 + $0x70] sm:$0xff]  ;;  %v2209_v28 = vadd.f32 %v8987_v34, %v1981_v11  ;;  %v2458_v37 = vmax.f32 %v2234_v21, 0.0 }
  0xe4   :  { %5514 = vmatmul.bf16.vlgmr.msrb.gmra.mxu1 %v9316_v62 }
  0xe5   :  { %v2281_v40 = vmax.f32 %v2057_v26, 0.0  ;;  %2683 = vst.msk [vmem:[#allocation2 + $0x5c8] sm:$0xff] %vm2497_vm5, %v2458_v37 }
  0xe6   :  { %v9241_v36 = vpop.f32.mrf.mxu2  ;;  %v2794_v38 = vld [vmem:[#allocation2 + $0x30] ss:$2 sm:$0xff]  ;;  %v3018_v39 = vld [vmem:[#allocation2 + $0x31] ss:$2 sm:$0xff] }
  0xe7   :  { %v3238_v42 = vmax.f32 %v2794_v38, %v3018_v39  ;;  %v2007_v13 = vmul.f32 %v8985_v33, %v9241_v36  ;;  %v3437_v36 = vor.u32 %v3436_v18, %v9203_v23  ;;  %2506 = vst.msk [vmem:[#allocation2 + $0x40] sm:$0xff] %vm2497_vm5, %v2281_v40 }
  0xe8   :  { %v9252_v43 = vpop.f32.mrf.mxu0  ;;  %7911 = vmatmul.msk.bf16.gmra.mxu3 %vm904_vm4, %v8519_v55 }
  0xe9   :  { %v3348_v46 = vmax.f32 %v3236_v41, %v3238_v42  ;;  %v7920_v54 = vld [vmem:[#allocation3 + $0x8] sm:$0xf0]  ;;  %v1830_v22 = vmul.f32 %v8985_v33, %v9252_v43  ;;  %v1664_v24 = vpop.f32.mrf.mxu1  ;;  %v2235_v31 = vadd.f32 %v8987_v34, %v2007_v13  ;;  %v2433_v41 = vmax.f32 %v2209_v28, 0.0 }
  0xea   :  { %v9299_v58 = vor.u32 %v8525_v53, %v7920_v54  ;;  %v1983_v42 = vmul.f32 %v8985_v33, %v1662_v63  ;;  %v3438_v49 = vrot.slane %v3437_v36, 4 }
  0xeb   :  { %v9268_v48 = vpack.c.bf16 %v3348_v46, %v3348_v46  ;;  %v2058_v38 = vadd.f32 %v8987_v34, %v1830_v22  ;;  %v2459_v44 = vmax.f32 %v2235_v31, 0.0  ;;  %v2210_v46 = vadd.f32 %v8987_v34, %v1982_v35  ;;  %2658 = vst.msk [vmem:[#allocation2 + $0x500] sm:$0xff] %vm2497_vm5, %v2433_v41  ;;  %v8427_v35 = vld [vmem:[%s12598_s0 + $0x78] sm:$0xff] }
  0xec   :  { %v2211_v60 = vadd.f32 %v8987_v34, %v1983_v42 }
  0xed   :  { %3417 = vrot.lane.b32.xlu0 %v9268_v48, %s8808_s2  ;;  %v3367_v5 = vshrl.u32 %v9268_v48, 16  ;;  %v3370_v6 = vshll.u32 %v9268_v48, 16  ;;  %v2282_v10 = vmax.f32 %v2058_v38, 0.0  ;;  %2684 = vst.msk [vmem:[#allocation2 + $0x5d0] sm:$0xff] %vm2497_vm5, %v2459_v44  ;;  %v2434_v1 = vmax.f32 %v2210_v46, 0.0 }
  0xee   :  { %v9283_v51 = vpop.f32.mrf.mxu2 }
  0xef   :  { %v9365_v14 = vrot.slane %v3370_v6, 5  ;;  %v3441_v16 = vrot.slane %v3367_v5, 4  ;;  %v2008_v39 = vmul.f32 %v8985_v33, %v9283_v51  ;;  %2507 = vst.msk [vmem:[#allocation2 + $0x48] sm:$0xff] %vm2497_vm5, %v2282_v10  ;;  %v3369_v42 = vrot.slane %v3367_v5, 7 }
  0xf0   :  { %v9294_v57 = vpop.f32.mrf.mxu0  ;;  %2659 = vst.msk [vmem:[#allocation2 + $0x508] sm:$0xff] %vm2497_vm5, %v2434_v1 }
  0xf1   :  { %v3442_v32 = vor.u32 %v3441_v16, %v9365_v14  ;;  %v1831_v23 = vmul.f32 %v8985_v33, %v9294_v57  ;;  %v2236_v51 = vadd.f32 %v8987_v34, %v2008_v39  ;;  %v1667_v53 = vpop.f32.mrf.mxu1  ;;  %v1984_v57 = vmul.f32 %v8985_v33, %v1664_v24 }
  0xf2   :  { %v3440_v59 = vsel %vm9414_vm14, %v3438_v49, %v9365_v14  ;;  %v1985_v11 = vmul.f32 %v8985_v33, %v1667_v53  ;;  %v2435_v16 = vmax.f32 %v2211_v60, 0.0  ;;  %v3361_v39 = vrot.slane %v3359_v7, 7  ;;  %v8520_v53 = vld [vmem:[%s12598_s0 + $0x360] sm:$0xff] }
  0xf3   :  { %7817 = vmatmul.msk.bf16.gmra.mxu0 %vm904_vm4, %v8425_v56  ;;  %8220 = vmatmul.msk.bf16.vlgmr.msrb.gmra.mxu2 %vm2497_vm5, %v9299_v58  ;;  %v3443_v45 = vrot.slane %v3442_v32, 4  ;;  %v2059_v56 = vadd.f32 %v8987_v34, %v1831_v23  ;;  %v2460_v8 = vmax.f32 %v2236_v51, 0.0  ;;  %3466 = vst.msk [vmem:[#allocation3 + $0x14] sm:$0xf] %vm3394_vm0, %v3440_v59  ;;  %v2212_v13 = vadd.f32 %v8987_v34, %v1984_v57 }
  0xf4   :  { %v2213_v26 = vadd.f32 %v8987_v34, %v1985_v11  ;;  %2660 = vst.msk [vmem:[#allocation2 + $0x510] sm:$0xff] %vm2497_vm5, %v2435_v16  ;;  %v3364_v5 = vor.u32 %v3362_v17, %v3361_v39  ;;  %v3372_v10 = vor.u32 %v3370_v6, %v3369_v42 }
  0xf5   :  { %v2283_v12 = vmax.f32 %v2059_v56, 0.0  ;;  %2685 = vst.msk [vmem:[#allocation2 + $0x5d8] sm:$0xff] %vm2497_vm5, %v2460_v8  ;;  %v3365_v56 = vrot.slane %v3361_v39, 4 }
  0xf6   :  { %v1727_v0 = vpop.f32.mrf.mxu2  ;;  %v2437_v44 = vmax.f32 %v2213_v26, 0.0  ;;  %v8428_v26 = vld [vmem:[%s12598_s0 + $0x80] sm:$0xff] }
  0xf7   :  { %v2009_v47 = vmul.f32 %v8985_v33, %v1727_v0  ;;  %v3471_v0 = vsel %vm9424_vm15, %v3443_v45, %v3470_v50  ;;  %2508 = vst.msk [vmem:[#allocation2 + $0x50] sm:$0xff] %vm2497_vm5, %v2283_v12  ;;  %v3373_v1 = vsel %vm9498_vm11, %v3365_v56, %v3372_v10  ;;  %v2796_v12 = vld [vmem:[#allocation2 + $0x40] ss:$2 sm:$0xff] }
  0xf8   :  { %v9330_v3 = vpop.f32.mrf.mxu0  ;;  %3472 = vst [vmem:[#allocation3 + $0x1c] sm:$0x7] %v3471_v0  ;;  %7912 = vmatmul.msk.bf16.gmra.mxu3 %vm904_vm4, %v8520_v53  ;;  %v3580_v53 = vld [vmem:[#allocation3 + $0x1c] sm:$0x8] }
  0xf9   :  { %v1832_v52 = vmul.f32 %v8985_v33, %v9330_v3  ;;  %v2237_v3 = vadd.f32 %v8987_v34, %v2009_v47  ;;  %2662 = vst.msk [vmem:[#allocation2 + $0x520] sm:$0xff] %vm2497_vm5, %v2437_v44  ;;  %v8521_v44 = vld [vmem:[%s12598_s0 + $0x368] sm:$0xff] }
  0xfb   :  { %v2060_v9 = vadd.f32 %v8987_v34, %v1832_v52  ;;  %v2461_v22 = vmax.f32 %v2237_v3, 0.0  ;;  %v3402_v3 = vld [vmem:[#allocation3 + $0x18] sm:$0xf] }
  0xfd   :  { %2686 = vst.msk [vmem:[#allocation2 + $0x5e0] sm:$0xff] %vm2497_vm5, %v2461_v22 }
  0xfe   :  { %v1729_v25 = vpop.f32.mrf.mxu2 }
  0xff   :  { %v2010_v61 = vmul.f32 %v8985_v33, %v1729_v25  ;;  %v2284_v25 = vmax.f32 %v2060_v9, 0.0 }
 0x100   :  { %v1287_v29 = vpop.f32.mrf.mxu0 }
 0x101   :  { %v1833_v4 = vmul.f32 %v8985_v33, %v1287_v29  ;;  %v2238_v18 = vadd.f32 %v8987_v34, %v2010_v61  ;;  %v2436_v29 = vmax.f32 %v2212_v13, 0.0  ;;  %2509 = vst.msk [vmem:[#allocation2 + $0x58] sm:$0xff] %vm2497_vm5, %v2284_v25  ;;  %v3020_v13 = vld [vmem:[#allocation2 + $0x41] ss:$2 sm:$0xff] }
 0x103   :  { %7818 = vmatmul.msk.bf16.gmra.mxu0 %vm904_vm4, %v8426_v27  ;;  %v2061_v24 = vadd.f32 %v8987_v34, %v1833_v4  ;;  %v1669_v27 = vpop.f32.mrf.mxu1  ;;  %v2462_v36 = vmax.f32 %v2238_v18, 0.0  ;;  %2661 = vst.msk [vmem:[#allocation2 + $0x518] sm:$0xff] %vm2497_vm5, %v2436_v29 }
 0x104   :  { %v1986_v31 = vmul.f32 %v8985_v33, %v1669_v27  ;;  %v1767_v27 = vpop.f32.mrf.mxu3 }
 0x105   :  { %v2285_v40 = vmax.f32 %v2061_v24, 0.0  ;;  %2687 = vst.msk [vmem:[#allocation2 + $0x5e8] sm:$0xff] %vm2497_vm5, %v2462_v36 }
 0x106   :  { %v1732_v54 = vpop.f32.mrf.mxu2  ;;  %v2214_v23 = vadd.f32 %v8987_v34, %v1986_v31  ;;  %v8608_v31 = vld [vmem:[#allocation10 + $0x98] sm:$0xff] }
 0x107   :  { %v2011_v14 = vmul.f32 %v8985_v33, %v1732_v54  ;;  %2510 = vst.msk [vmem:[#allocation2 + $0x60] sm:$0xff] %vm2497_vm5, %v2285_v40  ;;  %5925 = vmatpush.bf16.msrb.mxu3 %v8608_v31  ;;  %v8429_v31 = vld [vmem:[%s12598_s0 + $0x88] sm:$0xff] }
 0x108   :  { %v1289_v63 = vpop.f32.mrf.mxu0  ;;  %v2438_v49 = vmax.f32 %v2214_v23, 0.0  ;;  %7913 = vmatmul.msk.bf16.gmra.mxu3 %vm904_vm4, %v8521_v44  ;;  %v8527_v44 = vld [vmem:[#allocation3 + $0x14] sm:$0xf] }
 0x109   :  { %v1834_v21 = vmul.f32 %v8985_v33, %v1289_v63  ;;  %v2239_v30 = vadd.f32 %v8987_v34, %v2011_v14  ;;  %v3398_v63 = vsel %vm9493_vm8, %v3364_v5, %v3397_v15  ;;  %v3403_v14 = vsel %vm9514_vm12, %v3373_v1, %v3402_v3 }
 0x10a   :  { %2663 = vst.msk [vmem:[#allocation2 + $0x528] sm:$0xff] %vm2497_vm5, %v2438_v49 }
 0x10b   :  { %v2062_v37 = vadd.f32 %v8987_v34, %v1834_v21  ;;  %v2463_v46 = vmax.f32 %v2239_v30, 0.0  ;;  %v1672_v51 = vpop.f32.mrf.mxu1  ;;  %3399 = vst [vmem:[#allocation3 + $0x10] sm:$0xf] %v3398_v63  ;;  %v8606_v63 = vld [vmem:[#allocation10 + $0x88] sm:$0xff] }
 0x10c   :  { %v1987_v6 = vmul.f32 %v8985_v33, %v1672_v51  ;;  %3404 = vst [vmem:[#allocation3 + $0x18] sm:$0xf] %v3403_v14 }
 0x10d   :  { %v2286_v47 = vmax.f32 %v2062_v37, 0.0  ;;  %2688 = vst.msk [vmem:[#allocation2 + $0x5f0] sm:$0xff] %vm2497_vm5, %v2463_v46 }
 0x10e   :  { %v1734_v28 = vpop.f32.mrf.mxu2  ;;  %v2215_v59 = vadd.f32 %v8987_v34, %v1987_v6 }
 0x10f   :  { %v2012_v32 = vmul.f32 %v8985_v33, %v1734_v28  ;;  %2511 = vst.msk [vmem:[#allocation2 + $0x68] sm:$0xff] %vm2497_vm5, %v2286_v47  ;;  %v3239_v28 = vmax.f32 %v2796_v12, %v3020_v13  ;;  %v3022_v47 = vld [vmem:[#allocation2 + $0x51] ss:$2 sm:$0xff] }
 0x110   :  { %v1292_v38 = vpop.f32.mrf.mxu0  ;;  %v2439_v4 = vmax.f32 %v2215_v59, 0.0 }
 0x111   :  { %v1835_v41 = vmul.f32 %v8985_v33, %v1292_v38  ;;  %v2240_v45 = vadd.f32 %v8987_v34, %v2012_v32  ;;  %v2025_v32 = vmul.f32 %v8985_v33, %v1767_v27 }
 0x112   :  { %2664 = vst.msk [vmem:[#allocation2 + $0x530] sm:$0xff] %vm2497_vm5, %v2439_v4 }
 0x113   :  { %v2063_v7 = vadd.f32 %v8987_v34, %v1835_v41  ;;  %7819 = vmatmul.msk.bf16.gmra.mxu0 %vm904_vm4, %v8427_v35  ;;  %v2464_v50 = vmax.f32 %v2240_v45, 0.0  ;;  %v1674_v16 = vpop.f32.mrf.mxu1  ;;  %v2253_v39 = vadd.f32 %v8987_v34, %v2025_v32 }
 0x114   :  { %v1988_v24 = vmul.f32 %v8985_v33, %v1674_v16 }
 0x115   :  { %v2287_v48 = vmax.f32 %v2063_v7, 0.0  ;;  %2689 = vst.msk [vmem:[#allocation2 + $0x5f8] sm:$0xff] %vm2497_vm5, %v2464_v50  ;;  %v2477_v45 = vmax.f32 %v2253_v39, 0.0  ;;  %v2798_v7 = vld [vmem:[#allocation2 + $0x50] ss:$2 sm:$0xff] }
 0x116   :  { %v1737_v52 = vpop.f32.mrf.mxu2  ;;  %v2800_v21 = vld [vmem:[#allocation2 + $0x60] ss:$2 sm:$0xff]  ;;  %v3024_v22 = vld [vmem:[#allocation2 + $0x61] ss:$2 sm:$0xff]  ;;  %v2216_v35 = vadd.f32 %v8987_v34, %v1988_v24 }
 0x117   :  { %v2013_v55 = vmul.f32 %v8985_v33, %v1737_v52  ;;  %2512 = vst.msk [vmem:[#allocation2 + $0x70] sm:$0xff] %vm2497_vm5, %v2287_v48  ;;  %v3241_v29 = vmax.f32 %v2800_v21, %v3024_v22  ;;  %v8607_v52 = vld [vmem:[#allocation10 + $0x90] sm:$0xff] }
 0x118   :  { %v1294_v57 = vpop.f32.mrf.mxu0  ;;  %v2440_v40 = vmax.f32 %v2216_v35, 0.0  ;;  %2702 = vst.msk [vmem:[#allocation2 + $0x660] sm:$0xff] %vm2497_vm5, %v2477_v45  ;;  %5926 = vmatpush.bf16.msrb.mxu3 %v8607_v52 }
 0x119   :  { %v2241_v60 = vadd.f32 %v8987_v34, %v2013_v55  ;;  %v1836_v61 = vmul.f32 %v8985_v33, %v1294_v57  ;;  %v3480_v38 = vmax.f32 %v3239_v28, %v3241_v29  ;;  %v1769_v55 = vpop.f32.mrf.mxu3  ;;  %v9578_v28 = vld [vmem:[#allocation7] ss:$0 sm:$0xff] }
 0x11a   :  { %2665 = vst.msk [vmem:[#allocation2 + $0x538] sm:$0xff] %vm2497_vm5, %v2440_v40 }
 0x11b   :  { %v2465_v8 = vmax.f32 %v2241_v60, 0.0  ;;  %v2064_v9 = vadd.f32 %v8987_v34, %v1836_v61  ;;  %v9541_v42 = vpack.c.bf16 %v3480_v38, %v3480_v38  ;;  %v1677_v10 = vpop.f32.mrf.mxu1  ;;  %v3240_v60 = vmax.f32 %v2798_v7, %v3022_v47 }
 0x11c   :  { %v1989_v15 = vmul.f32 %v8985_v33, %v1677_v10  ;;  %5927 = vmatpush.bf16.msrb.mxu3 %v8606_v63 }
 0x11d   :  { %v2288_v11 = vmax.f32 %v2064_v9, 0.0  ;;  %2690 = vst.msk [vmem:[#allocation2 + $0x600] sm:$0xff] %vm2497_vm5, %v2465_v8  ;;  %3540 = vrot.lane.b32.xlu1 %v9541_v42, %s8808_s2  ;;  %v3489_v5 = vshrl.u32 %v9541_v42, 16  ;;  %v3492_v49 = vshll.u32 %v9541_v42, 16  ;;  %v2026_v8 = vmul.f32 %v8985_v33, %v1769_v55 }
 0x11e   :  { %v1739_v18 = vpop.f32.mrf.mxu2  ;;  %v2217_v1 = vadd.f32 %v8987_v34, %v1989_v15 }
 0x11f   :  { %2513 = vst.msk [vmem:[#allocation2 + $0x78] sm:$0xff] %vm2497_vm5, %v2288_v11  ;;  %v2014_v25 = vmul.f32 %v8985_v33, %v1739_v18  ;;  %v3556_v56 = vrot.slane %v3492_v49, 5  ;;  %v3557_v57 = vrot.slane %v3489_v5, 4  ;;  %v2254_v16 = vadd.f32 %v8987_v34, %v2026_v8 }
 0x120   :  { %v1297_v30 = vpop.f32.mrf.mxu0  ;;  %v2441_v11 = vmax.f32 %v2217_v1, 0.0  ;;  %v9599_v10 = vrot.slane %v3489_v5, 7 }
 0x121   :  { %v2242_v36 = vadd.f32 %v8987_v34, %v2014_v25  ;;  %v1837_v37 = vmul.f32 %v8985_v33, %v1297_v30  ;;  %v3581_v9 = vsel %vm9191_vm10, %v3556_v56, %v3580_v53  ;;  %v3558_v18 = vor.u32 %v3557_v57, %v3556_v56  ;;  %v1772_v32 = vpop.f32.mrf.mxu3  ;;  %v3584_v53 = vld [vmem:[#allocation3 + $0x2c] sm:$0x7] }
 0x122   :  { %3582 = vst [vmem:[#allocation3 + $0x1c] sm:$0x8] %v3581_v9  ;;  %v2478_v25 = vmax.f32 %v2254_v16, 0.0  ;;  %v3494_v63 = vor.u32 %v3492_v49, %v9599_v10  ;;  %v3524_v16 = vld [vmem:[#allocation3 + $0x20] sm:$0xf] }
 0x123   :  { %v2466_v23 = vmax.f32 %v2242_v36, 0.0  ;;  %v2065_v41 = vadd.f32 %v8987_v34, %v1837_v37  ;;  %7820 = vmatmul.msk.bf16.gmra.mxu0 %vm904_vm4, %v8428_v26  ;;  %2666 = vst.msk [vmem:[#allocation2 + $0x540] sm:$0xff] %vm2497_vm5, %v2441_v11  ;;  %v8605_v26 = vld [vmem:[#allocation10 + $0x80] sm:$0xff]  ;;  %v8604_v36 = vld [vmem:[#allocation10 + $0x78] sm:$0xff]  ;;  %v2027_v37 = vmul.f32 %v9578_v28, %v1772_v32  ;;  %v3559_v38 = vrot.slane %v3558_v18, 4  ;;  %v8602_v11 = vld [vmem:[#allocation10 + $0x68] sm:$0xff] }
 0x124   :  { %2703 = vst.msk [vmem:[#allocation2 + $0x668] sm:$0xff] %vm2497_vm5, %v2478_v25  ;;  %5928 = vmatpush.bf16.msrb.mxu3 %v8605_v26 }
 0x125   :  { %v2289_v46 = vmax.f32 %v2065_v41, 0.0  ;;  %2691 = vst.msk [vmem:[#allocation2 + $0x608] sm:$0xff] %vm2497_vm5, %v2466_v23  ;;  %v9591_v23 = vld [vmem:[#allocation9] ss:$0 sm:$0xff] }
 0x126   :  { %v1742_v50 = vpop.f32.mrf.mxu2  ;;  %v2802_v51 = vld [vmem:[#allocation2 + $0x70] ss:$2 sm:$0xff]  ;;  %v3026_v6 = vld [vmem:[#allocation2 + $0x71] ss:$2 sm:$0xff]  ;;  %v2255_v47 = vadd.f32 %v9591_v23, %v2027_v37 }
 0x127   :  { %2514 = vst.msk [vmem:[#allocation2 + $0x80] sm:$0xff] %vm2497_vm5, %v2289_v46  ;;  %v2015_v48 = vmul.f32 %v8985_v33, %v1742_v50  ;;  %v3242_v61 = vmax.f32 %v2802_v51, %v3026_v6 }
 0x128   :  { %v1299_v59 = vpop.f32.mrf.mxu0  ;;  %5929 = vmatpush.bf16.msrb.mxu3 %v8604_v36  ;;  %v8430_v36 = vld [vmem:[%s12598_s0 + $0x90] sm:$0xff] }
 0x129   :  { %v2243_v3 = vadd.f32 %v8987_v34, %v2015_v48  ;;  %v1838_v4 = vmul.f32 %v8985_v33, %v1299_v59  ;;  %v3481_v14 = vmax.f32 %v3240_v60, %v3242_v61  ;;  %v1679_v33 = vpop.f32.mrf.mxu1  ;;  %v7928_v45 = vld [vmem:[#allocation3 + $0x18] sm:$0xf0]  ;;  %v8522_v59 = vld [vmem:[%s12598_s0 + $0x370] sm:$0xff]  ;;  %v2479_v60 = vmax.f32 %v2255_v47, 0.0  ;;  %v1774_v8 = vpop.f32.mrf.mxu3 }
 0x12a   :  { %v1990_v29 = vmul.f32 %v9578_v28, %v1679_v33  ;;  %v9601_v50 = vor.u32 %v8527_v44, %v7928_v45  ;;  %v8603_v61 = vld [vmem:[#allocation10 + $0x70] sm:$0xff]  ;;  %7914 = vmatmul.msk.bf16.gmra.mxu3 %vm904_vm4, %v8522_v59 }
 0x12b   :  { %v2467_v12 = vmax.f32 %v2243_v3, 0.0  ;;  %v2066_v13 = vadd.f32 %v8987_v34, %v1838_v4  ;;  %v9570_v22 = vpack.c.bf16 %v3481_v14, %v3481_v14  ;;  %2704 = vst.msk [vmem:[#allocation2 + $0x670] sm:$0xff] %vm2497_vm5, %v2479_v60 }
 0x12c   :  { %v2218_v41 = vadd.f32 %v9591_v23, %v1990_v29  ;;  %8221 = vmatmul.msk.bf16.gmra.mxu2 %vm2497_vm5, %v9601_v50  ;;  %5930 = vmatpush.bf16.msrb.mxu3 %v8603_v61 }
 0x12d   :  { %v2290_v21 = vmax.f32 %v2066_v13, 0.0  ;;  %2692 = vst.msk [vmem:[#allocation2 + $0x610] sm:$0xff] %vm2497_vm5, %v2467_v12  ;;  %3542 = vrot.lane.b32.xlu1 %v9570_v22, %s8808_s2  ;;  %v3497_v27 = vshrl.u32 %v9570_v22, 16  ;;  %v3500_v34 = vshll.u32 %v9570_v22, 16  ;;  %v2028_v12 = vmul.f32 %v9578_v28, %v1774_v8 }
 0x12e   :  { %v1744_v24 = vpop.f32.mrf.mxu2  ;;  %v2442_v15 = vmax.f32 %v2218_v41, 0.0 }
 0x12f   :  { %2515 = vst.msk [vmem:[#allocation2 + $0x88] sm:$0xff] %vm2497_vm5, %v2290_v21  ;;  %v2016_v30 = vmul.f32 %v9578_v28, %v1744_v24  ;;  %v3560_v39 = vrot.slane %v3500_v34, 5  ;;  %v3562_v40 = vrot.slane %v3497_v27, 4  ;;  %v2256_v14 = vadd.f32 %v9591_v23, %v2028_v12 }
 0x130   :  { %v1302_v35 = vpop.f32.mrf.mxu0  ;;  %2667 = vst.msk [vmem:[#allocation2 + $0x548] sm:$0xff] %vm2497_vm5, %v2442_v15  ;;  %v3525_v24 = vsel %vm9493_vm8, %v3494_v63, %v3524_v16  ;;  %5931 = vmatpush.bf16.msrb.mxu3 %v8602_v11  ;;  %v8431_v16 = vld [vmem:[%s12598_s0 + $0x98] sm:$0xff] }
 0x131   :  { %v2244_v46 = vadd.f32 %v9591_v23, %v2016_v30  ;;  %v1839_v7 = vmul.f32 %v9578_v28, %v1302_v35  ;;  %v3561_v51 = vsel %vm9414_vm14, %v3559_v38, %v3560_v39  ;;  %v3563_v52 = vor.u32 %v3562_v40, %v3560_v39  ;;  %v1682_v56 = vpop.f32.mrf.mxu1  ;;  %3526 = vst [vmem:[#allocation3 + $0x20] sm:$0xf] %v3525_v24  ;;  %v1777_v37 = vpop.f32.mrf.mxu3 }
 0x132   :  { %3583 = vst.msk [vmem:[#allocation3 + $0x24] sm:$0xf] %vm3394_vm0, %v3561_v51  ;;  %v1991_v3 = vmul.f32 %v9578_v28, %v1682_v56  ;;  %v2480_v25 = vmax.f32 %v2256_v14, 0.0  ;;  %v2029_v39 = vmul.f32 %v9578_v28, %v1777_v37  ;;  %v3499_v51 = vrot.slane %v3497_v27, 7 }
 0x133   :  { %7821 = vmatmul.msk.bf16.gmra.mxu0 %vm904_vm4, %v8429_v31  ;;  %v2468_v48 = vmax.f32 %v2244_v46, 0.0  ;;  %v2067_v6 = vadd.f32 %v9591_v23, %v1839_v7  ;;  %v3564_v5 = vrot.slane %v3563_v52, 4  ;;  %v8601_v31 = vld [vmem:[#allocation10 + $0x60] sm:$0xff] }
 0x134   :  { %v2219_v42 = vadd.f32 %v9591_v23, %v1991_v3  ;;  %2705 = vst.msk [vmem:[#allocation2 + $0x678] sm:$0xff] %vm2497_vm5, %v2480_v25  ;;  %5932 = vmatpush.bf16.msrb.mxu3 %v8601_v31  ;;  %v2257_v45 = vadd.f32 %v9591_v23, %v2029_v39  ;;  %v3502_v27 = vor.u32 %v3500_v34, %v3499_v51 }
 0x135   :  { %v2291_v55 = vmax.f32 %v2067_v6, 0.0  ;;  %v3585_v1 = vsel %vm9424_vm15, %v3564_v5, %v3584_v53  ;;  %2693 = vst.msk [vmem:[#allocation2 + $0x618] sm:$0xff] %vm2497_vm5, %v2468_v48  ;;  %v8523_v6 = vld [vmem:[%s12598_s0 + $0x378] sm:$0xff] }
 0x136   :  { %v1747_v57 = vpop.f32.mrf.mxu2  ;;  %3586 = vst [vmem:[#allocation3 + $0x2c] sm:$0x7] %v3585_v1  ;;  %v2443_v18 = vmax.f32 %v2219_v42, 0.0  ;;  %v2481_v52 = vmax.f32 %v2257_v45, 0.0  ;;  %v3495_v1 = vrot.slane %v9599_v10, 4 }
 0x137   :  { %v2017_v4 = vmul.f32 %v9578_v28, %v1747_v57  ;;  %2516 = vst.msk [vmem:[#allocation2 + $0x90] sm:$0xff] %vm2497_vm5, %v2291_v55  ;;  %v2804_v31 = vld [vmem:[#allocation2 + $0x80] ss:$2 sm:$0xff] }
 0x138   :  { %v1304_v9 = vpop.f32.mrf.mxu0  ;;  %2668 = vst.msk [vmem:[#allocation2 + $0x550] sm:$0xff] %vm2497_vm5, %v2443_v18  ;;  %v3503_v8 = vsel %vm9498_vm11, %v3495_v1, %v3502_v27  ;;  %v3694_v27 = vld [vmem:[#allocation3 + $0x2c] sm:$0x8] }
 0x139   :  { %v2245_v49 = vadd.f32 %v9591_v23, %v2017_v4  ;;  %v1840_v13 = vmul.f32 %v9578_v28, %v1304_v9  ;;  %v1684_v29 = vpop.f32.mrf.mxu1  ;;  %2706 = vst.msk [vmem:[#allocation2 + $0x680] sm:$0xff] %vm2497_vm5, %v2481_v52  ;;  %v1779_v57 = vpop.f32.mrf.mxu3  ;;  %v3527_v9 = vld [vmem:[#allocation3 + $0x28] sm:$0xf] }
 0x13a   :  { %v1992_v32 = vmul.f32 %v9578_v28, %v1684_v29  ;;  %v2030_v63 = vmul.f32 %v9578_v28, %v1779_v57  ;;  %7915 = vmatmul.msk.bf16.gmra.mxu3 %vm904_vm4, %v8523_v6  ;;  %v3528_v18 = vsel %vm9514_vm12, %v3503_v8, %v3527_v9 }
 0x13b   :  { %v2469_v21 = vmax.f32 %v2245_v49, 0.0  ;;  %v2068_v33 = vadd.f32 %v9591_v23, %v1840_v13  ;;  %3529 = vst [vmem:[#allocation3 + $0x28] sm:$0xf] %v3528_v18 }
 0x13c   :  { %v2220_v40 = vadd.f32 %v9591_v23, %v1992_v32  ;;  %v2258_v34 = vadd.f32 %v9591_v23, %v2030_v63  ;;  %v3028_v32 = vld [vmem:[#allocation2 + $0x81] ss:$2 sm:$0xff] }
 0x13d   :  { %v2292_v26 = vmax.f32 %v2068_v33, 0.0  ;;  %2694 = vst.msk [vmem:[#allocation2 + $0x620] sm:$0xff] %vm2497_vm5, %v2469_v21  ;;  %v8432_v63 = vld [vmem:[%s12598_s0 + $0xa0] sm:$0xff] }
 0x13e   :  { %v1749_v30 = vpop.f32.mrf.mxu2  ;;  %v2444_v46 = vmax.f32 %v2220_v40, 0.0  ;;  %v2482_v12 = vmax.f32 %v2258_v34, 0.0 }
 0x13f   :  { %2517 = vst.msk [vmem:[#allocation2 + $0x98] sm:$0xff] %vm2497_vm5, %v2292_v26  ;;  %v2018_v35 = vmul.f32 %v9578_v28, %v1749_v30 }
 0x140   :  { %v1307_v38 = vpop.f32.mrf.mxu0  ;;  %2669 = vst.msk [vmem:[#allocation2 + $0x558] sm:$0xff] %vm2497_vm5, %v2444_v46 }
 0x141   :  { %v2246_v41 = vadd.f32 %v9591_v23, %v2018_v35  ;;  %v1841_v44 = vmul.f32 %v9578_v28, %v1307_v38  ;;  %v1687_v15 = vpop.f32.mrf.mxu1  ;;  %2707 = vst.msk [vmem:[#allocation2 + $0x688] sm:$0xff] %vm2497_vm5, %v2482_v12 }
 0x142   :  { %v1993_v5 = vmul.f32 %v9578_v28, %v1687_v15 }
 0x143   :  { %v2470_v7 = vmax.f32 %v2246_v41, 0.0  ;;  %v2069_v47 = vadd.f32 %v9591_v23, %v1841_v44  ;;  %7822 = vmatmul.msk.bf16.gmra.mxu0 %vm904_vm4, %v8430_v36  ;;  %v3243_v44 = vmax.f32 %v2804_v31, %v3028_v32 }
 0x144   :  { %v2221_v59 = vadd.f32 %v9591_v23, %v1993_v5 }
 0x145   :  { %v2293_v53 = vmax.f32 %v2069_v47, 0.0  ;;  %2695 = vst.msk [vmem:[#allocation2 + $0x628] sm:$0xff] %vm2497_vm5, %v2470_v7 }
 0x146   :  { %v1752_v48 = vpop.f32.mrf.mxu2  ;;  %v2445_v3 = vmax.f32 %v2221_v59, 0.0 }
 0x147   :  { %2518 = vst.msk [vmem:[#allocation2 + $0xa0] sm:$0xff] %vm2497_vm5, %v2293_v53  ;;  %v2019_v55 = vmul.f32 %v9578_v28, %v1752_v48 }
 0x148   :  { %v1309_v56 = vpop.f32.mrf.mxu0  ;;  %2670 = vst.msk [vmem:[#allocation2 + $0x560] sm:$0xff] %vm2497_vm5, %v2445_v3 }
 0x149   :  { %v2247_v60 = vadd.f32 %v9591_v23, %v2019_v55  ;;  %v1842_v61 = vmul.f32 %v9578_v28, %v1309_v56  ;;  %v1689_v10 = vpop.f32.mrf.mxu1 }
 0x14a   :  { %v1994_v49 = vmul.f32 %v9578_v28, %v1689_v10  ;;  %5933 = vmatmul.bf16.vlgmr.msrb.gmra.mxu3 %v9316_v62 }
 0x14b   :  { %v2471_v4 = vmax.f32 %v2247_v60, 0.0  ;;  %v2070_v22 = vadd.f32 %v9591_v23, %v1842_v61 }
 0x14c   :  { %v2222_v33 = vadd.f32 %v9591_v23, %v1994_v49  ;;  %v3030_v49 = vld [vmem:[#allocation2 + $0x91] ss:$2 sm:$0xff] }
 0x14d   :  { %v2294_v11 = vmax.f32 %v2070_v22, 0.0  ;;  %2696 = vst.msk [vmem:[#allocation2 + $0x630] sm:$0xff] %vm2497_vm5, %v2471_v4 }
 0x14e   :  { %v1754_v42 = vpop.f32.mrf.mxu2  ;;  %v2446_v26 = vmax.f32 %v2222_v33, 0.0 }
 0x14f   :  { %2519 = vst.msk [vmem:[#allocation2 + $0xa8] sm:$0xff] %vm2497_vm5, %v2294_v11  ;;  %v2020_v13 = vmul.f32 %v9578_v28, %v1754_v42  ;;  %v3416_v14 = vpop.permute.xlu0 %3415  ;;  %v2806_v42 = vld [vmem:[#allocation2 + $0x90] ss:$2 sm:$0xff] }
 0x150   :  { %3428 = vst.msk [vmem:[#allocation3 + $0x10] sm:$0xf] %vm3427_vm1, %v3416_v14  ;;  %v1312_v21 = vpop.f32.mrf.mxu0 }
 0x151   :  { %v2248_v24 = vadd.f32 %v9591_v23, %v2020_v13  ;;  %v1843_v25 = vmul.f32 %v9578_v28, %v1312_v21  ;;  %2671 = vst.msk [vmem:[#allocation2 + $0x568] sm:$0xff] %vm2497_vm5, %v2446_v26  ;;  %v1692_v36 = vpop.f32.mrf.mxu1 }
 0x152   :  { %v1995_v40 = vmul.f32 %v9578_v28, %v1692_v36 }
 0x153   :  { %v2472_v29 = vmax.f32 %v2248_v24, 0.0  ;;  %v2071_v30 = vadd.f32 %v9591_v23, %v1843_v25  ;;  %7823 = vmatmul.msk.bf16.gmra.mxu0 %vm904_vm4, %v8431_v16 }
 0x154   :  { %v2223_v7 = vadd.f32 %v9591_v23, %v1995_v40 }
 0x155   :  { %v2295_v35 = vmax.f32 %v2071_v30, 0.0  ;;  %2697 = vst.msk [vmem:[#allocation2 + $0x638] sm:$0xff] %vm2497_vm5, %v2472_v29  ;;  %v3244_v30 = vmax.f32 %v2806_v42, %v3030_v49 }
 0x156   :  { %v1757_v37 = vpop.f32.mrf.mxu2  ;;  %v2808_v38 = vld [vmem:[#allocation2 + $0xa0] ss:$2 sm:$0xff]  ;;  %v3032_v39 = vld [vmem:[#allocation2 + $0xa1] ss:$2 sm:$0xff]  ;;  %v2447_v53 = vmax.f32 %v2223_v7, 0.0 }
 0x157   :  { %2520 = vst.msk [vmem:[#allocation2 + $0xb0] sm:$0xff] %vm2497_vm5, %v2295_v35  ;;  %v2021_v41 = vmul.f32 %v9578_v28, %v1757_v37  ;;  %v3245_v45 = vmax.f32 %v2808_v38, %v3032_v39  ;;  %v7926_v26 = vld [vmem:[#allocation3 + $0x10] sm:$0xf]  ;;  %v8529_v39 = vld [vmem:[#allocation3 + $0x24] sm:$0xf] }
 0x158   :  { %v1314_v46 = vpop.f32.mrf.mxu0  ;;  %2672 = vst.msk [vmem:[#allocation2 + $0x570] sm:$0xff] %vm2497_vm5, %v2447_v53  ;;  %v1782_v53 = vpop.f32.mrf.mxu3 }
 0x159   :  { %v2249_v47 = vadd.f32 %v9591_v23, %v2021_v41  ;;  %v1844_v51 = vmul.f32 %v9578_v28, %v1314_v46  ;;  %v3594_v52 = vmax.f32 %v3243_v44, %v3245_v45  ;;  %v1694_v56 = vpop.f32.mrf.mxu1 }
 0x15a   :  { %v1996_v60 = vmul.f32 %v9578_v28, %v1694_v56 }
 0x15b   :  { %v2473_v15 = vmax.f32 %v2249_v47, 0.0  ;;  %v2072_v48 = vadd.f32 %v9591_v23, %v1844_v51  ;;  %v9699_v6 = vpack.c.bf16 %v3594_v52, %v3594_v52 }
 0x15c   :  { %v2224_v34 = vadd.f32 %v9591_v23, %v1996_v60 }
 0x15d   :  { %v2296_v5 = vmax.f32 %v2072_v48, 0.0  ;;  %3654 = vrot.lane.b32.xlu2 %v9699_v6, %s8808_s2  ;;  %v3606_v55 = vshll.u32 %v9699_v6, 16  ;;  %2698 = vst.msk [vmem:[#allocation2 + $0x640] sm:$0xff] %vm2497_vm5, %v2473_v15  ;;  %v3603_v4 = vshrl.u32 %v9699_v6, 16 }
 0x15e   :  { %v1759_v57 = vpop.f32.mrf.mxu2  ;;  %v2448_v11 = vmax.f32 %v2224_v34, 0.0 }
 0x15f   :  { %2521 = vst.msk [vmem:[#allocation2 + $0xb8] sm:$0xff] %vm2497_vm5, %v2296_v5  ;;  %v3670_v59 = vrot.slane %v3606_v55, 5  ;;  %v3418_v61 = vpop.permute.xlu0 %3417  ;;  %v2022_v1 = vmul.f32 %v9578_v28, %v1759_v57  ;;  %v3671_v13 = vrot.slane %v3603_v4, 4  ;;  %v2031_v5 = vmul.f32 %v9578_v28, %v1782_v53 }
 0x160   :  { %3430 = vst.msk [vmem:[#allocation3 + $0x18] sm:$0x7] %vm3429_vm2, %v3418_v61  ;;  %v1317_v3 = vpop.f32.mrf.mxu0  ;;  %v3605_v49 = vrot.slane %v3603_v4, 7 }
 0x161   :  { %v3695_v22 = vsel %vm9191_vm10, %v3670_v59, %v3694_v27  ;;  %v2250_v8 = vadd.f32 %v9591_v23, %v2022_v1  ;;  %v1845_v9 = vmul.f32 %v9578_v28, %v1317_v3  ;;  %2673 = vst.msk [vmem:[#allocation2 + $0x578] sm:$0xff] %vm2497_vm5, %v2448_v11  ;;  %v1697_v16 = vpop.f32.mrf.mxu1  ;;  %v3672_v44 = vor.u32 %v3671_v13, %v3670_v59 }
 0x162   :  { %3696 = vst [vmem:[#allocation3 + $0x2c] sm:$0x8] %v3695_v22  ;;  %v1997_v24 = vmul.f32 %v9578_v28, %v1697_v16  ;;  %v2259_v1 = vadd.f32 %v9591_v23, %v2031_v5 }
 0x163   :  { %7824 = vmatmul.msk.bf16.gmra.mxu0 %vm904_vm4, %v8432_v63  ;;  %v2474_v12 = vmax.f32 %v2250_v8, 0.0  ;;  %v2073_v10 = vadd.f32 %v9591_v23, %v1845_v9  ;;  %v3673_v57 = vrot.slane %v3672_v44, 4  ;;  %v8433_v63 = vld [vmem:[%s12598_s0 + $0xa8] sm:$0xff]  ;;  %v8434_v44 = vld [vmem:[%s12598_s0 + $0xb0] sm:$0xff] }
 0x164   :  { %v2225_v36 = vadd.f32 %v9591_v23, %v1997_v24  ;;  %v2483_v11 = vmax.f32 %v2259_v1, 0.0 }
 0x165   :  { %v2297_v14 = vmax.f32 %v2073_v10, 0.0  ;;  %2699 = vst.msk [vmem:[#allocation2 + $0x648] sm:$0xff] %vm2497_vm5, %v2474_v12  ;;  %v3698_v12 = vld [vmem:[#allocation3 + $0x3c] sm:$0x7] }
 0x166   :  { %v1762_v18 = vpop.f32.mrf.mxu2  ;;  %v2810_v21 = vld [vmem:[#allocation2 + $0xb0] ss:$2 sm:$0xff]  ;;  %v3034_v33 = vld [vmem:[#allocation2 + $0xb1] ss:$2 sm:$0xff]  ;;  %v2449_v46 = vmax.f32 %v2225_v36, 0.0  ;;  %2708 = vst.msk [vmem:[#allocation2 + $0x690] sm:$0xff] %vm2497_vm5, %v2483_v11 }
 0x167   :  { %v2023_v25 = vmul.f32 %v9578_v28, %v1762_v18  ;;  %v8528_v29 = vld [vmem:[#allocation3 + $0x14] sm:$0xf0]  ;;  %v3246_v31 = vmax.f32 %v2810_v21, %v3034_v33  ;;  %2522 = vst.msk [vmem:[#allocation2 + $0xc0] sm:$0xff] %vm2497_vm5, %v2297_v14  ;;  %v1784_v33 = vpop.f32.mrf.mxu3 }
 0x168   :  { %v1319_v32 = vpop.f32.mrf.mxu0  ;;  %v9730_v35 = vor.u32 %v8528_v29, %v7926_v26  ;;  %2674 = vst.msk [vmem:[#allocation2 + $0x580] sm:$0xff] %vm2497_vm5, %v2449_v46  ;;  %v3608_v29 = vor.u32 %v3606_v55, %v3605_v49  ;;  %v8435_v11 = vld [vmem:[%s12598_s0 + $0xb8] sm:$0xff] }
 0x169   :  { %v2251_v37 = vadd.f32 %v9591_v23, %v2023_v25  ;;  %v1846_v38 = vmul.f32 %v9578_v28, %v1319_v32  ;;  %v7936_v40 = vld [vmem:[#allocation3 + $0x28] sm:$0xf0]  ;;  %v3595_v41 = vmax.f32 %v3244_v30, %v3246_v31  ;;  %v1699_v27 = vpop.f32.mrf.mxu1  ;;  %v2032_v25 = vmul.f32 %v9578_v28, %v1784_v33 }
 0x16a   :  { %12723 = vst [vmem:[#allocation21_spill] sm:$0xff] %v9730_v35  ;;  %5519 = vmatmul.bf16.gmra.mxu1 %v9730_v35  ;;  %5936 = vmatmul.bf16.gmra.mxu3 %v9730_v35  ;;  %v9737_v45 = vor.u32 %v8529_v39, %v7936_v40  ;;  %v1998_v61 = vmul.f32 %v9578_v28, %v1699_v27 }
 0x16b   :  { %v2475_v7 = vmax.f32 %v2251_v37, 0.0  ;;  %v2074_v47 = vadd.f32 %v9591_v23, %v1846_v38  ;;  %v9740_v51 = vpack.c.bf16 %v3595_v41, %v3595_v41  ;;  %v2260_v31 = vadd.f32 %v9591_v23, %v2032_v25  ;;  %v3638_v38 = vld [vmem:[#allocation3 + $0x30] sm:$0xf] }
 0x16c   :  { %8222 = vmatmul.msk.bf16.gmra.mxu2 %vm2497_vm5, %v9737_v45  ;;  %v2226_v9 = vadd.f32 %v9591_v23, %v1998_v61  ;;  %v3639_v40 = vsel %vm9493_vm8, %v3608_v29, %v3638_v38 }
 0x16d   :  { %v2298_v52 = vmax.f32 %v2074_v47, 0.0  ;;  %3656 = vrot.lane.b32.xlu2 %v9740_v51, %s8808_s2  ;;  %v3611_v15 = vshrl.u32 %v9740_v51, 16  ;;  %v3614_v48 = vshll.u32 %v9740_v51, 16  ;;  %2700 = vst.msk [vmem:[#allocation2 + $0x650] sm:$0xff] %vm2497_vm5, %v2475_v7  ;;  %v2484_v37 = vmax.f32 %v2260_v31, 0.0 }
 0x16e   :  { %v1764_v56 = vpop.f32.mrf.mxu2  ;;  %v2450_v14 = vmax.f32 %v2226_v9, 0.0  ;;  %3640 = vst [vmem:[#allocation3 + $0x30] sm:$0xf] %v3639_v40  ;;  %v3641_v51 = vld [vmem:[#allocation3 + $0x38] sm:$0xf] }
 0x16f   :  { %2523 = vst.msk [vmem:[#allocation2 + $0xc8] sm:$0xff] %vm2497_vm5, %v2298_v52  ;;  %v3674_v59 = vrot.slane %v3614_v48, 5  ;;  %v3676_v60 = vrot.slane %v3611_v15, 4  ;;  %v2024_v3 = vmul.f32 %v9578_v28, %v1764_v56  ;;  %v1787_v55 = vpop.f32.mrf.mxu3  ;;  %v3613_v47 = vrot.slane %v3611_v15, 7 }
 0x170   :  { %v1322_v22 = vpop.f32.mrf.mxu0  ;;  %2675 = vst.msk [vmem:[#allocation2 + $0x588] sm:$0xff] %vm2497_vm5, %v2450_v14  ;;  %v2033_v41 = vmul.f32 %v9578_v28, %v1787_v55 }
 0x171   :  { %v3675_v34 = vsel %vm9414_vm14, %v3673_v57, %v3674_v59  ;;  %v3677_v8 = vor.u32 %v3676_v60, %v3674_v59  ;;  %v2252_v10 = vadd.f32 %v9591_v23, %v2024_v3  ;;  %v1847_v42 = vmul.f32 %v9578_v28, %v1322_v22  ;;  %v5515_v4 = vpop.f32.mrf.mxu1  ;;  %2709 = vst.msk [vmem:[#allocation2 + $0x698] sm:$0xff] %vm2497_vm5, %v2484_v37 }
 0x172   :  { %3697 = vst.msk [vmem:[#allocation3 + $0x34] sm:$0xf] %vm3394_vm0, %v3675_v34  ;;  %v2261_v46 = vadd.f32 %v9591_v23, %v2033_v41  ;;  %v3616_v27 = vor.u32 %v3614_v48, %v3613_v47  ;;  %v3609_v60 = vrot.slane %v3605_v49, 4  ;;  %v8436_v47 = vld [vmem:[%s12598_s0 + $0xc0] sm:$0xff] }
 0x173   :  { %v3678_v13 = vrot.slane %v3677_v8, 4  ;;  %7825 = vmatmul.msk.bf16.gmra.mxu0 %vm904_vm4, %v8433_v63  ;;  %v2476_v16 = vmax.f32 %v2252_v10, 0.0  ;;  %v2075_v18 = vadd.f32 %v9591_v23, %v1847_v42 }
 0x174   :  { %v2485_v53 = vmax.f32 %v2261_v46, 0.0  ;;  %v3617_v63 = vsel %vm9498_vm11, %v3609_v60, %v3616_v27  ;;  %v3808_v46 = vld [vmem:[#allocation3 + $0x3c] sm:$0x8] }
 0x175   :  { %v3699_v21 = vsel %vm9424_vm15, %v3678_v13, %v3698_v12  ;;  %v2299_v24 = vmax.f32 %v2075_v18, 0.0  ;;  %2701 = vst.msk [vmem:[#allocation2 + $0x658] sm:$0xff] %vm2497_vm5, %v2476_v16  ;;  %v3642_v48 = vsel %vm9514_vm12, %v3617_v63, %v3641_v51 }
 0x176   :  { %3700 = vst [vmem:[#allocation3 + $0x3c] sm:$0x7] %v3699_v21  ;;  %v5676_v26 = vpop.f32.mrf.mxu2  ;;  %v2812_v14 = vld [vmem:[#allocation2 + $0xc0] ss:$2 sm:$0xff]  ;;  %v3036_v16 = vld [vmem:[#allocation2 + $0xc1] ss:$2 sm:$0xff] }
 0x177   :  { %v9778_v30 = vadd.f32 %v5676_v26, %v5515_v4  ;;  %2524 = vst.msk [vmem:[#allocation2 + $0xd0] sm:$0xff] %vm2497_vm5, %v2299_v24  ;;  %v1789_v57 = vpop.f32.mrf.mxu3  ;;  %v3247_v4 = vmax.f32 %v2812_v14, %v3036_v16 }
 0x178   :  { %v1324_v32 = vpop.f32.mrf.mxu0  ;;  %2710 = vst.msk [vmem:[#allocation2 + $0x6a0] sm:$0xff] %vm2497_vm5, %v2485_v53  ;;  %v2034_v59 = vmul.f32 %v9578_v28, %v1789_v57 }
 0x179   :  { %12724 = vst [vmem:[#allocation22_spill] sm:$0xff] %v9778_v30  ;;  %v1848_v36 = vmul.f32 %v9578_v28, %v1324_v32 }
 0x17a   :  { %v2262_v15 = vadd.f32 %v9591_v23, %v2034_v59  ;;  %3643 = vst [vmem:[#allocation3 + $0x38] sm:$0xf] %v3642_v48 }
 0x17b   :  { %v2076_v39 = vadd.f32 %v9591_v23, %v1848_v36 }
 0x17c   :  { %v2486_v3 = vmax.f32 %v2262_v15, 0.0 }
 0x17d   :  { %v2300_v6 = vmax.f32 %v2076_v39, 0.0 }
 0x17e   :  { %2711 = vst.msk [vmem:[#allocation2 + $0x6a8] sm:$0xff] %vm2497_vm5, %v2486_v3 }
 0x17f   :  { %2525 = vst.msk [vmem:[#allocation2 + $0xd8] sm:$0xff] %vm2497_vm5, %v2300_v6  ;;  %v1792_v8 = vpop.f32.mrf.mxu3 }
 0x180   :  { %v1327_v7 = vpop.f32.mrf.mxu0  ;;  %v2035_v9 = vmul.f32 %v9578_v28, %v1792_v8 }
 0x181   :  { %v1849_v52 = vmul.f32 %v9578_v28, %v1327_v7 }
 0x182   :  { %v2263_v12 = vadd.f32 %v9591_v23, %v2035_v9 }
 0x183   :  { %v2077_v5 = vadd.f32 %v9591_v23, %v1849_v52  ;;  %7826 = vmatmul.msk.bf16.gmra.mxu0 %vm904_vm4, %v8434_v44 }
 0x184   :  { %v2487_v49 = vmax.f32 %v2263_v12, 0.0 }
 0x185   :  { %v2301_v56 = vmax.f32 %v2077_v5, 0.0 }
 0x186   :  { %2712 = vst.msk [vmem:[#allocation2 + $0x6b0] sm:$0xff] %vm2497_vm5, %v2487_v49  ;;  %v2814_v15 = vld [vmem:[#allocation2 + $0xd0] ss:$2 sm:$0xff] }
 0x187   :  { %2526 = vst.msk [vmem:[#allocation2 + $0xe0] sm:$0xff] %vm2497_vm5, %v2301_v56  ;;  %v1794_v21 = vpop.f32.mrf.mxu3 }
 0x188   :  { %v1329_v61 = vpop.f32.mrf.mxu0  ;;  %v2036_v33 = vmul.f32 %v9578_v28, %v1794_v21 }
 0x189   :  { %v1850_v1 = vmul.f32 %v9578_v28, %v1329_v61  ;;  %v3038_v61 = vld [vmem:[#allocation2 + $0xd1] ss:$2 sm:$0xff] }
 0x18a   :  { %v2264_v31 = vadd.f32 %v9591_v23, %v2036_v33 }
 0x18b   :  { %v2078_v22 = vadd.f32 %v9591_v23, %v1850_v1 }
 0x18c   :  { %v2488_v38 = vmax.f32 %v2264_v31, 0.0 }
 0x18d   :  { %v2302_v34 = vmax.f32 %v2078_v22, 0.0 }
 0x18e   :  { %2713 = vst.msk [vmem:[#allocation2 + $0x6b8] sm:$0xff] %vm2497_vm5, %v2488_v38 }
 0x18f   :  { %2527 = vst.msk [vmem:[#allocation2 + $0xe8] sm:$0xff] %vm2497_vm5, %v2302_v34  ;;  %v3541_v29 = vpop.permute.xlu1 %3540  ;;  %v1797_v55 = vpop.f32.mrf.mxu3  ;;  %v3248_v34 = vmax.f32 %v2814_v15, %v3038_v61 }
 0x190   :  { %v1332_v10 = vpop.f32.mrf.mxu0  ;;  %3552 = vst.msk [vmem:[#allocation3 + $0x20] sm:$0xf] %vm3427_vm1, %v3541_v29  ;;  %v2037_v44 = vmul.f32 %v9578_v28, %v1797_v55 }
 0x191   :  { %v1851_v42 = vmul.f32 %v9578_v28, %v1332_v10  ;;  %v8531_v10 = vld [vmem:[#allocation3 + $0x34] sm:$0xf] }
 0x192   :  { %v2265_v52 = vadd.f32 %v9591_v23, %v2037_v44 }
 0x193   :  { %v2079_v13 = vadd.f32 %v9591_v23, %v1851_v42  ;;  %7827 = vmatmul.msk.bf16.gmra.mxu0 %vm904_vm4, %v8435_v11 }
 0x194   :  { %v2489_v56 = vmax.f32 %v2265_v52, 0.0  ;;  %v3812_v52 = vld [vmem:[#allocation3 + $0x4c] sm:$0x7] }
 0x195   :  { %v2303_v18 = vmax.f32 %v2079_v13, 0.0 }
 0x196   :  { %v2816_v24 = vld [vmem:[#allocation2 + $0xe0] ss:$2 sm:$0xff]  ;;  %v3040_v25 = vld [vmem:[#allocation2 + $0xe1] ss:$2 sm:$0xff]  ;;  %2714 = vst.msk [vmem:[#allocation2 + $0x6c0] sm:$0xff] %vm2497_vm5, %v2489_v56 }
 0x197   :  { %2528 = vst.msk [vmem:[#allocation2 + $0xf0] sm:$0xff] %vm2497_vm5, %v2303_v18  ;;  %v3249_v26 = vmax.f32 %v2816_v24, %v3040_v25  ;;  %v1799_v63 = vpop.f32.mrf.mxu3  ;;  %v7934_v14 = vld [vmem:[#allocation3 + $0x20] sm:$0xf] }
 0x198   :  { %v1334_v32 = vpop.f32.mrf.mxu0  ;;  %v2038_v3 = vmul.f32 %v9578_v28, %v1799_v63 }
 0x199   :  { %v1852_v36 = vmul.f32 %v9578_v28, %v1334_v32  ;;  %v3708_v37 = vmax.f32 %v3247_v4, %v3249_v26 }
 0x19a   :  { %v2266_v9 = vadd.f32 %v9591_v23, %v2038_v3 }
 0x19b   :  { %v2080_v39 = vadd.f32 %v9591_v23, %v1852_v36  ;;  %v9825_v40 = vpack.c.bf16 %v3708_v37, %v3708_v37 }
 0x19c   :  { %v2490_v13 = vmax.f32 %v2266_v9, 0.0  ;;  %v8438_v9 = vld [vmem:[%s12598_s0 + $0xd0] sm:$0xff] }
 0x19d   :  { %v2304_v6 = vmax.f32 %v2080_v39, 0.0  ;;  %3768 = vrot.lane.b32.xlu0 %v9825_v40, %s8808_s2  ;;  %v3720_v41 = vshll.u32 %v9825_v40, 16  ;;  %v3717_v59 = vshrl.u32 %v9825_v40, 16  ;;  %v8437_v39 = vld [vmem:[%s12598_s0 + $0xc8] sm:$0xff] }
 0x19e   :  { %2715 = vst.msk [vmem:[#allocation2 + $0x6c8] sm:$0xff] %vm2497_vm5, %v2490_v13 }
 0x19f   :  { %2529 = vst.msk [vmem:[#allocation2 + $0xf8] sm:$0xff] %vm2497_vm5, %v2304_v6  ;;  %v3784_v7 = vrot.slane %v3720_v41, 5  ;;  %v3543_v27 = vpop.permute.xlu1 %3542  ;;  %v3785_v48 = vrot.slane %v3717_v59, 4  ;;  %v1802_v26 = vpop.f32.mrf.mxu3 }
 0x1a0   :  { %v1337_v53 = vpop.f32.mrf.mxu0  ;;  %3553 = vst.msk [vmem:[#allocation3 + $0x28] sm:$0x7] %vm3429_vm2, %v3543_v27  ;;  %v2039_v32 = vmul.f32 %v9578_v28, %v1802_v26 }
 0x1a1   :  { %v3809_v5 = vsel %vm9191_vm10, %v3784_v7, %v3808_v46  ;;  %v1853_v57 = vmul.f32 %v9578_v28, %v1337_v53  ;;  %v3786_v21 = vor.u32 %v3785_v48, %v3784_v7  ;;  %v3719_v53 = vrot.slane %v3717_v59, 7 }
 0x1a2   :  { %3810 = vst [vmem:[#allocation3 + $0x3c] sm:$0x8] %v3809_v5  ;;  %v2267_v6 = vadd.f32 %v9591_v23, %v2039_v32 }
 0x1a3   :  { %7828 = vmatmul.msk.bf16.gmra.mxu0 %vm904_vm4, %v8436_v47  ;;  %v2081_v60 = vadd.f32 %v9591_v23, %v1853_v57  ;;  %v3787_v36 = vrot.slane %v3786_v21, 4  ;;  %v3722_v61 = vor.u32 %v3720_v41, %v3719_v53 }
 0x1a4   :  { %v2491_v47 = vmax.f32 %v2267_v6, 0.0 }
 0x1a5   :  { %v2305_v1 = vmax.f32 %v2081_v60, 0.0 }
 0x1a6   :  { %v2818_v22 = vld [vmem:[#allocation2 + $0xf0] ss:$2 sm:$0xff]  ;;  %v3042_v51 = vld [vmem:[#allocation2 + $0xf1] ss:$2 sm:$0xff]  ;;  %2716 = vst.msk [vmem:[#allocation2 + $0x6d0] sm:$0xff] %vm2497_vm5, %v2491_v47 }
 0x1a7   :  { %v3250_v8 = vmax.f32 %v2818_v22, %v3042_v51  ;;  %2530 = vst.msk [vmem:[#allocation2 + $0x100] sm:$0xff] %vm2497_vm5, %v2305_v1  ;;  %v8530_v16 = vld [vmem:[#allocation3 + $0x24] sm:$0xf0]  ;;  %v1804_v60 = vpop.f32.mrf.mxu3  ;;  %v3752_v51 = vld [vmem:[#allocation3 + $0x40] sm:$0xf]  ;;  %v8439_v47 = vld [vmem:[%s12598_s0 + $0xd8] sm:$0xff] }
 0x1a8   :  { %v1339_v11 = vpop.f32.mrf.mxu0  ;;  %v9854_v24 = vor.u32 %v8530_v16, %v7934_v14  ;;  %v2040_v15 = vmul.f32 %v9578_v28, %v1804_v60 }
 0x1a9   :  { %v1854_v12 = vmul.f32 %v9578_v28, %v1339_v11  ;;  %v7944_v42 = vld [vmem:[#allocation3 + $0x38] sm:$0xf0]  ;;  %v3709_v49 = vmax.f32 %v3248_v34, %v3250_v8  ;;  %v3753_v34 = vsel %vm9493_vm8, %v3722_v61, %v3752_v51 }
 0x1aa   :  { %v9851_v18 = vor.u32 %v8531_v10, %v7944_v42  ;;  %12726 = vst [vmem:[#allocation24_spill] sm:$0xff] %v9854_v24  ;;  %5524 = vmatmul.bf16.gmra.mxu1 %v9854_v24  ;;  %5941 = vmatmul.bf16.gmra.mxu3 %v9854_v24  ;;  %v2268_v63 = vadd.f32 %v9591_v23, %v2040_v15  ;;  %v4731_v24 = vld [vmem:[#allocation3 + $0x1cc] sm:$0x7] }
 0x1ab   :  { %v2082_v33 = vadd.f32 %v9591_v23, %v1854_v12  ;;  %v3713_v25 = vpack.c.bf16 %v3709_v49, %v3709_v49  ;;  %3754 = vst [vmem:[#allocation3 + $0x40] sm:$0xf] %v3753_v34 }
 0x1ac   :  { %12725 = vst [vmem:[#allocation23_spill] sm:$0xff] %v9851_v18  ;;  %8223 = vmatmul.msk.bf16.gmra.mxu2 %vm2497_vm5, %v9851_v18  ;;  %v2492_v22 = vmax.f32 %v2268_v63, 0.0  ;;  %v4617_v18 = vld [vmem:[#allocation3 + $0x1bc] sm:$0x7] }
 0x1ad   :  { %v2306_v4 = vmax.f32 %v2082_v33, 0.0  ;;  %v3725_v29 = vshrl.u32 %v3713_v25, 16  ;;  %v3728_v31 = vshll.u32 %v3713_v25, 16  ;;  %3770 = vrot.lane.b32.xlu1 %v3713_v25, %s8808_s2  ;;  %v3723_v25 = vrot.slane %v3719_v53, 4 }
 0x1ae   :  { %2717 = vst.msk [vmem:[#allocation2 + $0x6d8] sm:$0xff] %vm2497_vm5, %v2492_v22 }
 0x1af   :  { %2531 = vst.msk [vmem:[#allocation2 + $0x108] sm:$0xff] %vm2497_vm5, %v2306_v4  ;;  %v3788_v37 = vrot.slane %v3728_v31, 5  ;;  %v3790_v38 = vrot.slane %v3725_v29, 4  ;;  %v1807_v41 = vpop.f32.mrf.mxu3  ;;  %v3727_v10 = vrot.slane %v3725_v29, 7 }
 0x1b0   :  { %v1342_v55 = vpop.f32.mrf.mxu0  ;;  %v2041_v8 = vmul.f32 %v9578_v28, %v1807_v41 }
 0x1b1   :  { %v3789_v44 = vsel %vm9414_vm14, %v3787_v36, %v3788_v37  ;;  %v3791_v46 = vor.u32 %v3790_v38, %v3788_v37  ;;  %v1855_v7 = vmul.f32 %v9578_v28, %v1342_v55  ;;  %v3730_v14 = vor.u32 %v3728_v31, %v3727_v10  ;;  %v3755_v38 = vld [vmem:[#allocation3 + $0x48] sm:$0xf] }
 0x1b2   :  { %3811 = vst.msk [vmem:[#allocation3 + $0x44] sm:$0xf] %vm3394_vm0, %v3789_v44  ;;  %v2269_v11 = vadd.f32 %v9591_v23, %v2041_v8 }
 0x1b3   :  { %v3792_v5 = vrot.slane %v3791_v46, 4  ;;  %v2083_v27 = vadd.f32 %v9591_v23, %v1855_v7  ;;  %7829 = vmatmul.msk.bf16.gmra.mxu0 %vm904_vm4, %v8437_v39  ;;  %v3731_v32 = vsel %vm9498_vm11, %v3723_v25, %v3730_v14  ;;  %v9936_v14 = vpop.f32.mrf.mxu2 }
 0x1b4   :  { %v2493_v49 = vmax.f32 %v2269_v11, 0.0  ;;  %v3756_v39 = vsel %vm9514_vm12, %v3731_v32, %v3755_v38  ;;  %12729 = vst [vmem:[#allocation27_spill] sm:$0xff] %v9936_v14 }
 0x1b5   :  { %v3813_v56 = vsel %vm9424_vm15, %v3792_v5, %v3812_v52  ;;  %v2307_v57 = vmax.f32 %v2083_v27, 0.0  ;;  %3757 = vst [vmem:[#allocation3 + $0x48] sm:$0xf] %v3756_v39 }
 0x1b6   :  { %3814 = vst [vmem:[#allocation3 + $0x4c] sm:$0x7] %v3813_v56  ;;  %v2820_v60 = vld [vmem:[#allocation2 + $0x100] ss:$2 sm:$0xff]  ;;  %v3044_v15 = vld [vmem:[#allocation2 + $0x101] ss:$2 sm:$0xff] }
 0x1b7   :  { %2532 = vst.msk [vmem:[#allocation2 + $0x110] sm:$0xff] %vm2497_vm5, %v2307_v57  ;;  %v3655_v59 = vpop.permute.xlu2 %3654  ;;  %v1809_v21 = vpop.f32.mrf.mxu3  ;;  %v3251_v22 = vmax.f32 %v2820_v60, %v3044_v15  ;;  %v9956_v15 = vld [vmem:[#allocation9] ss:$0 sm:$0xff] }
 0x1b8   :  { %3666 = vst.msk [vmem:[#allocation3 + $0x30] sm:$0xf] %vm3427_vm1, %v3655_v59  ;;  %v1344_v1 = vpop.f32.mrf.mxu0  ;;  %v2042_v33 = vmul.f32 %v9578_v28, %v1809_v21  ;;  %v8440_v21 = vld [vmem:[%s12598_s0 + $0xe0] sm:$0xff] }
 0x1b9   :  { %v1856_v3 = vmul.f32 %v9578_v28, %v1344_v1  ;;  %2718 = vst.msk [vmem:[#allocation2 + $0x6e0] sm:$0xff] %vm2497_vm5, %v2493_v49  ;;  %v3922_v49 = vld [vmem:[#allocation3 + $0x4c] sm:$0x8] }
 0x1ba   :  { %v2270_v26 = vadd.f32 %v9591_v23, %v2042_v33 }
 0x1bb   :  { %v2084_v48 = vadd.f32 %v9591_v23, %v1856_v3 }
 0x1bc   :  { %v2494_v37 = vmax.f32 %v2270_v26, 0.0 }
 0x1bd   :  { %v2308_v40 = vmax.f32 %v2084_v48, 0.0 }
 0x1be   :  { %2719 = vst.msk [vmem:[#allocation2 + $0x6e8] sm:$0xff] %vm2497_vm5, %v2494_v37 }
 0x1bf   :  { %2533 = vst.msk [vmem:[#allocation2 + $0x118] sm:$0xff] %vm2497_vm5, %v2308_v40  ;;  %v1812_v55 = vpop.f32.mrf.mxu3  ;;  %v7942_v46 = vld [vmem:[#allocation3 + $0x30] sm:$0xf] }
 0x1c0   :  { %v1347_v12 = vpop.f32.mrf.mxu0  ;;  %v2043_v44 = vmul.f32 %v9578_v28, %v1812_v55 }
 0x1c1   :  { %v1857_v42 = vmul.f32 %v9578_v28, %v1347_v12 }
 0x1c2   :  { %v2271_v52 = vadd.f32 %v9591_v23, %v2043_v44 }
 0x1c3   :  { %v2085_v13 = vadd.f32 %v9591_v23, %v1857_v42  ;;  %7830 = vmatmul.msk.bf16.gmra.mxu0 %vm904_vm4, %v8438_v9 }
 0x1c4   :  { %v2495_v56 = vmax.f32 %v2271_v52, 0.0  ;;  %v9951_v52 = vld [vmem:[#allocation7] ss:$0 sm:$0xff] }
 0x1c5   :  { %v2309_v16 = vmax.f32 %v2085_v13, 0.0  ;;  %v9934_v13 = vpop.f32.mrf.mxu1 }
 0x1c6   :  { %2720 = vst.msk [vmem:[#allocation2 + $0x6f0] sm:$0xff] %vm2497_vm5, %v2495_v56  ;;  %v2822_v32 = vld [vmem:[#allocation2 + $0x110] ss:$2 sm:$0xff] }
 0x1c7   :  { %2534 = vst.msk [vmem:[#allocation2 + $0x120] sm:$0xff] %vm2497_vm5, %v2309_v16  ;;  %v3657_v4 = vpop.permute.xlu2 %3656  ;;  %v1814_v59 = vpop.f32.mrf.mxu3 }
 0x1c8   :  { %3667 = vst.msk [vmem:[#allocation3 + $0x38] sm:$0x7] %vm3429_vm2, %v3657_v4  ;;  %v1349_v29 = vpop.f32.mrf.mxu0  ;;  %v2044_v63 = vmul.f32 %v9578_v28, %v1814_v59 }
 0x1c9   :  { %v1858_v36 = vmul.f32 %v9578_v28, %v1349_v29  ;;  %12728 = vst [vmem:[#allocation26_spill] sm:$0xff] %v9934_v13 }
 0x1ca   :  { %v2272_v48 = vadd.f32 %v9591_v23, %v2044_v63 }
 0x1cb   :  { %v2086_v31 = vadd.f32 %v9591_v23, %v1858_v36  ;;  %v3046_v36 = vld [vmem:[#allocation2 + $0x111] ss:$2 sm:$0xff] }
 0x1cc   :  { %v2496_v8 = vmax.f32 %v2272_v48, 0.0 }
 0x1cd   :  { %v2310_v6 = vmax.f32 %v2086_v31, 0.0 }
 0x1ce   :  { %2721 = vst.msk [vmem:[#allocation2 + $0x6f8] sm:$0xff] %vm2497_vm5, %v2496_v8 }
 0x1cf   :  { %2535 = vst.msk [vmem:[#allocation2 + $0x128] sm:$0xff] %vm2497_vm5, %v2310_v6  ;;  %v8532_v7 = vld [vmem:[#allocation3 + $0x34] sm:$0xf0]  ;;  %v5934_v10 = vpop.f32.mrf.mxu3  ;;  %v5681_v6 = vpop.f32.mrf.mxu2 }
 0x1d0   :  { %v1352_v53 = vpop.f32.mrf.mxu0  ;;  %v9915_v5 = vor.u32 %v8532_v7, %v7942_v46  ;;  %v3252_v46 = vmax.f32 %v2822_v32, %v3046_v36 }
 0x1d1   :  { %v1859_v27 = vmul.f32 %v9578_v28, %v1352_v53  ;;  %v8533_v53 = vld [vmem:[#allocation3 + $0x44] sm:$0xf] }
 0x1d2   :  { %12727 = vst [vmem:[#allocation25_spill] sm:$0xff] %v9915_v5  ;;  %5529 = vmatmul.bf16.gmra.mxu1 %v9915_v5  ;;  %5946 = vmatmul.bf16.gmra.mxu3 %v9915_v5 }
 0x1d3   :  { %v2087_v57 = vadd.f32 %v9591_v23, %v1859_v27  ;;  %7831 = vmatmul.msk.bf16.gmra.mxu0 %vm904_vm4, %v8439_v47 }
 0x1d5   :  { %v2311_v61 = vmax.f32 %v2087_v57, 0.0 }
 0x1d6   :  { %v2824_v1 = vld [vmem:[#allocation2 + $0x120] ss:$2 sm:$0xff]  ;;  %v3048_v3 = vld [vmem:[#allocation2 + $0x121] ss:$2 sm:$0xff] }
 0x1d7   :  { %2536 = vst.msk [vmem:[#allocation2 + $0x130] sm:$0xff] %vm2497_vm5, %v2311_v61  ;;  %v3253_v51 = vmax.f32 %v2824_v1, %v3048_v3  ;;  %v5935_v37 = vpop.f32.mrf.mxu3 }
 0x1d8   :  { %v1354_v34 = vpop.f32.mrf.mxu0  ;;  %v8442_v37 = vld [vmem:[%s12598_s0 + $0xf0] sm:$0xff] }
 0x1d9   :  { %v1860_v40 = vmul.f32 %v9578_v28, %v1354_v34  ;;  %v3822_v41 = vmax.f32 %v3251_v22, %v3253_v51  ;;  %v8441_v34 = vld [vmem:[%s12598_s0 + $0xe8] sm:$0xff] }
 0x1db   :  { %v2088_v9 = vadd.f32 %v9591_v23, %v1860_v40  ;;  %v9928_v11 = vpack.c.bf16 %v3822_v41, %v3822_v41 }
 0x1dd   :  { %v2312_v12 = vmax.f32 %v2088_v9, 0.0  ;;  %3882 = vrot.lane.b32.xlu2 %v9928_v11, %s8808_s2  ;;  %v3834_v42 = vshll.u32 %v9928_v11, 16  ;;  %v3831_v26 = vshrl.u32 %v9928_v11, 16  ;;  %v3926_v11 = vld [vmem:[#allocation3 + $0x5c] sm:$0x7] }
 0x1df   :  { %2537 = vst.msk [vmem:[#allocation2 + $0x138] sm:$0xff] %vm2497_vm5, %v2312_v12  ;;  %v3898_v16 = vrot.slane %v3834_v42, 5  ;;  %v3899_v55 = vrot.slane %v3831_v26, 4  ;;  %v3833_v12 = vrot.slane %v3831_v26, 7 }
 0x1e0   :  { %v1357_v33 = vpop.f32.mrf.mxu0 }
 0x1e1   :  { %v3923_v25 = vsel %vm9191_vm10, %v3898_v16, %v3922_v49  ;;  %v1861_v4 = vmul.f32 %v9578_v28, %v1357_v33  ;;  %v3900_v60 = vor.u32 %v3899_v55, %v3898_v16  ;;  %v3836_v33 = vor.u32 %v3834_v42, %v3833_v12 }
 0x1e2   :  { %3924 = vst [vmem:[#allocation3 + $0x4c] sm:$0x8] %v3923_v25 }
 0x1e3   :  { %7832 = vmatmul.msk.bf16.gmra.mxu0 %vm904_vm4, %v8440_v21  ;;  %v2089_v29 = vadd.f32 %v9591_v23, %v1861_v4  ;;  %v3901_v22 = vrot.slane %v3900_v60, 4 }
 0x1e5   :  { %v2313_v31 = vmax.f32 %v2089_v29, 0.0  ;;  %v3866_v29 = vld [vmem:[#allocation3 + $0x50] sm:$0xf] }
 0x1e6   :  { %v2826_v38 = vld [vmem:[#allocation2 + $0x130] ss:$2 sm:$0xff]  ;;  %v3050_v39 = vld [vmem:[#allocation2 + $0x131] ss:$2 sm:$0xff]  ;;  %v3867_v26 = vsel %vm9493_vm8, %v3836_v33, %v3866_v29 }
 0x1e7   :  { %v5520_v44 = vpop.f32.mrf.mxu1  ;;  %v3254_v7 = vmax.f32 %v2826_v38, %v3050_v39  ;;  %2538 = vst.msk [vmem:[#allocation2 + $0x140] sm:$0xff] %vm2497_vm5, %v2313_v31 }
 0x1e8   :  { %v9949_v28 = vadd.f32 %v5681_v6, %v5520_v44  ;;  %v1359_v47 = vpop.f32.mrf.mxu0  ;;  %3868 = vst [vmem:[#allocation3 + $0x50] sm:$0xf] %v3867_v26  ;;  %v3837_v44 = vrot.slane %v3833_v12, 4  ;;  %v10018_v26 = vpop.f32.mrf.mxu2 }
 0x1e9   :  { %v1862_v23 = vmul.f32 %v9951_v52, %v1359_v47  ;;  %v7952_v27 = vld [vmem:[#allocation3 + $0x48] sm:$0xf0]  ;;  %v3823_v56 = vmax.f32 %v3252_v46, %v3254_v7  ;;  %12732 = vst [vmem:[#allocation30_spill] sm:$0xff] %v10018_v26 }
 0x1ea   :  { %12730 = vst [vmem:[#allocation28_spill] sm:$0xff] %v9949_v28  ;;  %v9954_v57 = vor.u32 %v8533_v53, %v7952_v27  ;;  %v3869_v53 = vld [vmem:[#allocation3 + $0x58] sm:$0xf] }
 0x1eb   :  { %v2090_v61 = vadd.f32 %v9956_v15, %v1862_v23  ;;  %v3827_v59 = vpack.c.bf16 %v3823_v56, %v3823_v56 }
 0x1ec   :  { %12731 = vst [vmem:[#allocation29_spill] sm:$0xff] %v9954_v57  ;;  %8224 = vmatmul.msk.bf16.gmra.mxu2 %vm2497_vm5, %v9954_v57 }
 0x1ed   :  { %v2314_v63 = vmax.f32 %v2090_v61, 0.0  ;;  %3884 = vrot.lane.b32.xlu0 %v3827_v59, %s8808_s2  ;;  %v3839_v1 = vshrl.u32 %v3827_v59, 16  ;;  %v3842_v3 = vshll.u32 %v3827_v59, 16  ;;  %v8443_v61 = vld [vmem:[%s12598_s0 + $0xf8] sm:$0xff] }
 0x1ef   :  { %2539 = vst.msk [vmem:[#allocation2 + $0x148] sm:$0xff] %vm2497_vm5, %v2314_v63  ;;  %v3902_v51 = vrot.slane %v3842_v3, 5  ;;  %v3904_v48 = vrot.slane %v3839_v1, 4  ;;  %v3841_v31 = vrot.slane %v3839_v1, 7 }
 0x1f0   :  { %v1362_v40 = vpop.f32.mrf.mxu0 }
 0x1f1   :  { %v3903_v41 = vsel %vm9414_vm14, %v3901_v22, %v3902_v51  ;;  %v3905_v8 = vor.u32 %v3904_v48, %v3902_v51  ;;  %v1863_v9 = vmul.f32 %v9951_v52, %v1362_v40  ;;  %v3844_v6 = vor.u32 %v3842_v3, %v3841_v31 }
 0x1f2   :  { %3925 = vst.msk [vmem:[#allocation3 + $0x54] sm:$0xf] %vm3394_vm0, %v3903_v41 }
 0x1f3   :  { %v3906_v10 = vrot.slane %v3905_v8, 4  ;;  %v2091_v49 = vadd.f32 %v9956_v15, %v1863_v9  ;;  %7833 = vmatmul.msk.bf16.gmra.mxu0 %vm904_vm4, %v8441_v34  ;;  %v3845_v7 = vsel %vm9498_vm11, %v3837_v44, %v3844_v6 }
 0x1f4   :  { %v3870_v27 = vsel %vm9514_vm12, %v3845_v7, %v3869_v53 }
 0x1f5   :  { %v3927_v16 = vsel %vm9424_vm15, %v3906_v10, %v3926_v11  ;;  %v2315_v21 = vmax.f32 %v2091_v49, 0.0  ;;  %3871 = vst [vmem:[#allocation3 + $0x58] sm:$0xf] %v3870_v27 }
 0x1f6   :  { %3928 = vst [vmem:[#allocation3 + $0x5c] sm:$0x7] %v3927_v16  ;;  %v2828_v3 = vld [vmem:[#allocation2 + $0x140] ss:$2 sm:$0xff]  ;;  %v3052_v22 = vld [vmem:[#allocation2 + $0x141] ss:$2 sm:$0xff] }
 0x1f7   :  { %2540 = vst.msk [vmem:[#allocation2 + $0x150] sm:$0xff] %vm2497_vm5, %v2315_v21  ;;  %v3255_v40 = vmax.f32 %v2828_v3, %v3052_v22  ;;  %v4036_v21 = vld [vmem:[#allocation3 + $0x5c] sm:$0x8] }
 0x1f8   :  { %v1364_v25 = vpop.f32.mrf.mxu0 }
 0x1f9   :  { %v1864_v4 = vmul.f32 %v9951_v52, %v1364_v25  ;;  %v8444_v25 = vld [vmem:[%s12598_s0 + $0x100] sm:$0xff] }
 0x1fb   :  { %v2092_v32 = vadd.f32 %v9956_v15, %v1864_v4 }
 0x1fd   :  { %v2316_v36 = vmax.f32 %v2092_v32, 0.0 }
 0x1ff   :  { %2541 = vst.msk [vmem:[#allocation2 + $0x158] sm:$0xff] %vm2497_vm5, %v2316_v36  ;;  %v10020_v36 = vpop.f32.mrf.mxu1 }
 0x200   :  { %v1367_v42 = vpop.f32.mrf.mxu0  ;;  %12733 = vst [vmem:[#allocation31_spill] sm:$0xff] %v10020_v36 }
 0x201   :  { %v1865_v38 = vmul.f32 %v9951_v52, %v1367_v42 }
 0x203   :  { %v2093_v39 = vadd.f32 %v9956_v15, %v1865_v38  ;;  %7834 = vmatmul.msk.bf16.gmra.mxu0 %vm904_vm4, %v8442_v37 }
 0x205   :  { %v2317_v55 = vmax.f32 %v2093_v39, 0.0 }
 0x206   :  { %v2830_v38 = vld [vmem:[#allocation2 + $0x150] ss:$2 sm:$0xff]  ;;  %v3054_v39 = vld [vmem:[#allocation2 + $0x151] ss:$2 sm:$0xff] }
 0x207   :  { %2542 = vst.msk [vmem:[#allocation2 + $0x160] sm:$0xff] %vm2497_vm5, %v2317_v55  ;;  %v3256_v7 = vmax.f32 %v2830_v38, %v3054_v39 }
 0x208   :  { %v1369_v46 = vpop.f32.mrf.mxu0 }
 0x209   :  { %v1866_v47 = vmul.f32 %v9951_v52, %v1369_v46 }
 0x20b   :  { %v2094_v23 = vadd.f32 %v9956_v15, %v1866_v47 }
 0x20d   :  { %v2318_v56 = vmax.f32 %v2094_v23, 0.0 }
 0x20f   :  { %2543 = vst.msk [vmem:[#allocation2 + $0x168] sm:$0xff] %vm2497_vm5, %v2318_v56  ;;  %v3769_v60 = vpop.permute.xlu0 %3768 }
 0x210   :  { %3780 = vst.msk [vmem:[#allocation3 + $0x40] sm:$0xf] %vm3427_vm1, %v3769_v60  ;;  %v1372_v59 = vpop.f32.mrf.mxu0 }
 0x211   :  { %v1867_v63 = vmul.f32 %v9951_v52, %v1372_v59 }
 0x213   :  { %v2095_v1 = vadd.f32 %v9956_v15, %v1867_v63  ;;  %7835 = vmatmul.msk.bf16.gmra.mxu0 %vm904_vm4, %v8443_v61  ;;  %v8535_v61 = vld [vmem:[#allocation3 + $0x54] sm:$0xf] }
 0x215   :  { %v2319_v51 = vmax.f32 %v2095_v1, 0.0  ;;  %v5686_v1 = vpop.f32.mrf.mxu2 }
 0x216   :  { %v2832_v48 = vld [vmem:[#allocation2 + $0x160] ss:$2 sm:$0xff]  ;;  %v3056_v34 = vld [vmem:[#allocation2 + $0x161] ss:$2 sm:$0xff] }
 0x217   :  { %2544 = vst.msk [vmem:[#allocation2 + $0x170] sm:$0xff] %vm2497_vm5, %v2319_v51  ;;  %v3257_v41 = vmax.f32 %v2832_v48, %v3056_v34  ;;  %v7950_v53 = vld [vmem:[#allocation3 + $0x40] sm:$0xf] }
 0x218   :  { %v1374_v8 = vpop.f32.mrf.mxu0 }
 0x219   :  { %v1868_v9 = vmul.f32 %v9951_v52, %v1374_v8  ;;  %v3936_v11 = vmax.f32 %v3255_v40, %v3257_v41 }
 0x21b   :  { %v2096_v12 = vadd.f32 %v9956_v15, %v1868_v9  ;;  %v10004_v10 = vpack.c.bf16 %v3936_v11, %v3936_v11 }
 0x21d   :  { %v2320_v49 = vmax.f32 %v2096_v12, 0.0  ;;  %3996 = vrot.lane.b32.xlu1 %v10004_v10, %s8808_s2  ;;  %v3948_v16 = vshll.u32 %v10004_v10, 16  ;;  %v3945_v37 = vshrl.u32 %v10004_v10, 16  ;;  %v8446_v10 = vld [vmem:[%s12598_s0 + $0x110] sm:$0xff] }
 0x21f   :  { %2545 = vst.msk [vmem:[#allocation2 + $0x178] sm:$0xff] %vm2497_vm5, %v2320_v49  ;;  %v4012_v33 = vrot.slane %v3948_v16, 5  ;;  %v3771_v4 = vpop.permute.xlu1 %3770  ;;  %v4013_v6 = vrot.slane %v3945_v37, 4 }
 0x220   :  { %v1377_v29 = vpop.f32.mrf.mxu0  ;;  %3781 = vst.msk [vmem:[#allocation3 + $0x48] sm:$0x7] %vm3429_vm2, %v3771_v4 }
 0x221   :  { %v4037_v32 = vsel %vm9191_vm10, %v4012_v33, %v4036_v21  ;;  %v1869_v42 = vmul.f32 %v9951_v52, %v1377_v29  ;;  %v4014_v3 = vor.u32 %v4013_v6, %v4012_v33  ;;  %v8445_v21 = vld [vmem:[%s12598_s0 + $0x108] sm:$0xff] }
 0x222   :  { %4038 = vst [vmem:[#allocation3 + $0x5c] sm:$0x8] %v4037_v32  ;;  %v4040_v32 = vld [vmem:[#allocation3 + $0x6c] sm:$0x7] }
 0x223   :  { %7836 = vmatmul.msk.bf16.gmra.mxu0 %vm904_vm4, %v8444_v25  ;;  %v2097_v31 = vadd.f32 %v9956_v15, %v1869_v42  ;;  %v4015_v11 = vrot.slane %v4014_v3, 4  ;;  %v3947_v42 = vrot.slane %v3945_v37, 7 }
 0x225   :  { %v2321_v55 = vmax.f32 %v2097_v31, 0.0  ;;  %v3951_v3 = vrot.slane %v3947_v42, 4 }
 0x226   :  { %v2834_v44 = vld [vmem:[#allocation2 + $0x170] ss:$2 sm:$0xff]  ;;  %v3058_v46 = vld [vmem:[#allocation2 + $0x171] ss:$2 sm:$0xff] }
 0x227   :  { %v3258_v47 = vmax.f32 %v2834_v44, %v3058_v46  ;;  %2546 = vst.msk [vmem:[#allocation2 + $0x180] sm:$0xff] %vm2497_vm5, %v2321_v55  ;;  %v8534_v27 = vld [vmem:[#allocation3 + $0x44] sm:$0xf0]  ;;  %v5525_v22 = vpop.f32.mrf.mxu1  ;;  %v3950_v55 = vor.u32 %v3948_v16, %v3947_v42 }
 0x228   :  { %v1379_v23 = vpop.f32.mrf.mxu0  ;;  %v10028_v60 = vor.u32 %v8534_v27, %v7950_v53  ;;  %v10032_v48 = vadd.f32 %v5686_v1, %v5525_v22  ;;  %v10067_v1 = vpop.f32.mrf.mxu2 }
 0x229   :  { %v1870_v56 = vmul.f32 %v9951_v52, %v1379_v23  ;;  %v7960_v59 = vld [vmem:[#allocation3 + $0x58] sm:$0xf0]  ;;  %v3937_v63 = vmax.f32 %v3256_v7, %v3258_v47  ;;  %v3980_v7 = vld [vmem:[#allocation3 + $0x60] sm:$0xf]  ;;  %12737 = vst [vmem:[#allocation35_spill] sm:$0xff] %v10067_v1 }
 0x22a   :  { %12734 = vst [vmem:[#allocation32_spill] sm:$0xff] %v10028_v60  ;;  %v10030_v51 = vor.u32 %v8535_v61, %v7960_v59  ;;  %5534 = vmatmul.bf16.gmra.mxu1 %v10028_v60  ;;  %5951 = vmatmul.bf16.gmra.mxu3 %v10028_v60  ;;  %v3981_v23 = vsel %vm9493_vm8, %v3950_v55, %v3980_v7 }
 0x22b   :  { %12736 = vst [vmem:[#allocation34_spill] sm:$0xff] %v10032_v48  ;;  %v2098_v34 = vadd.f32 %v9956_v15, %v1870_v56  ;;  %v3941_v40 = vpack.c.bf16 %v3937_v63, %v3937_v63  ;;  %v3208_v48 = vld [vmem:[#allocation2 + $0x621] ss:$2 sm:$0xff] }
 0x22c   :  { %12735 = vst [vmem:[#allocation33_spill] sm:$0xff] %v10030_v51  ;;  %8225 = vmatmul.msk.bf16.gmra.mxu2 %vm2497_vm5, %v10030_v51 }
 0x22d   :  { %v2322_v41 = vmax.f32 %v2098_v34, 0.0  ;;  %3998 = vrot.lane.b32.xlu2 %v3941_v40, %s8808_s2  ;;  %v3953_v8 = vshrl.u32 %v3941_v40, 16  ;;  %v3956_v9 = vshll.u32 %v3941_v40, 16  ;;  %3982 = vst [vmem:[#allocation3 + $0x60] sm:$0xf] %v3981_v23 }
 0x22f   :  { %2547 = vst.msk [vmem:[#allocation2 + $0x188] sm:$0xff] %vm2497_vm5, %v2322_v41  ;;  %v4016_v12 = vrot.slane %v3956_v9, 5  ;;  %v4018_v49 = vrot.slane %v3953_v8, 4  ;;  %v3955_v27 = vrot.slane %v3953_v8, 7  ;;  %v10069_v22 = vpop.f32.mrf.mxu1 }
 0x230   :  { %v1382_v33 = vpop.f32.mrf.mxu0  ;;  %12738 = vst [vmem:[#allocation36_spill] sm:$0xff] %v10069_v22 }
 0x231   :  { %v4017_v25 = vsel %vm9414_vm14, %v4015_v11, %v4016_v12  ;;  %v4019_v4 = vor.u32 %v4018_v49, %v4016_v12  ;;  %v1871_v29 = vmul.f32 %v9951_v52, %v1382_v33  ;;  %v3958_v59 = vor.u32 %v3956_v9, %v3955_v27  ;;  %v3983_v11 = vld [vmem:[#allocation3 + $0x68] sm:$0xf]  ;;  %v5691_v49 = vpop.f32.mrf.mxu2  ;;  %v8447_v33 = vld [vmem:[%s12598_s0 + $0x118] sm:$0xff] }
 0x232   :  { %4039 = vst.msk [vmem:[#allocation3 + $0x64] sm:$0xf] %vm3394_vm0, %v4017_v25 }
 0x233   :  { %v4020_v31 = vrot.slane %v4019_v4, 4  ;;  %v2099_v38 = vadd.f32 %v9956_v15, %v1871_v29  ;;  %7837 = vmatmul.msk.bf16.gmra.mxu0 %vm904_vm4, %v8445_v21  ;;  %v3959_v40 = vsel %vm9498_vm11, %v3951_v3, %v3958_v59 }
 0x234   :  { %v3984_v9 = vsel %vm9514_vm12, %v3959_v40, %v3983_v11 }
 0x235   :  { %v4041_v39 = vsel %vm9424_vm15, %v4020_v31, %v4040_v32  ;;  %v2323_v6 = vmax.f32 %v2099_v38, 0.0  ;;  %3985 = vst [vmem:[#allocation3 + $0x68] sm:$0xf] %v3984_v9 }
 0x236   :  { %4042 = vst [vmem:[#allocation3 + $0x6c] sm:$0x7] %v4041_v39  ;;  %v2836_v42 = vld [vmem:[#allocation2 + $0x180] ss:$2 sm:$0xff]  ;;  %v3060_v31 = vld [vmem:[#allocation2 + $0x181] ss:$2 sm:$0xff] }
 0x237   :  { %2548 = vst.msk [vmem:[#allocation2 + $0x190] sm:$0xff] %vm2497_vm5, %v2323_v6  ;;  %v3883_v44 = vpop.permute.xlu2 %3882  ;;  %v3259_v55 = vmax.f32 %v2836_v42, %v3060_v31 }
 0x238   :  { %3894 = vst.msk [vmem:[#allocation3 + $0x50] sm:$0xf] %vm3427_vm1, %v3883_v44  ;;  %v1384_v46 = vpop.f32.mrf.mxu0 }
 0x239   :  { %v1872_v37 = vmul.f32 %v9951_v52, %v1384_v46 }
 0x23b   :  { %v2100_v47 = vadd.f32 %v9956_v15, %v1872_v37 }
 0x23d   :  { %v2324_v53 = vmax.f32 %v2100_v47, 0.0 }
 0x23f   :  { %2549 = vst.msk [vmem:[#allocation2 + $0x198] sm:$0xff] %vm2497_vm5, %v2324_v53 }
 0x240   :  { %v1387_v16 = vpop.f32.mrf.mxu0 }
 0x241   :  { %v1873_v56 = vmul.f32 %v9951_v52, %v1387_v16  ;;  %v4150_v16 = vld [vmem:[#allocation3 + $0x6c] sm:$0x8] }
 0x243   :  { %v2101_v61 = vadd.f32 %v9956_v15, %v1873_v56  ;;  %7838 = vmatmul.msk.bf16.gmra.mxu0 %vm904_vm4, %v8446_v10 }
 0x245   :  { %v2325_v63 = vmax.f32 %v2101_v61, 0.0  ;;  %v8448_v61 = vld [vmem:[%s12598_s0 + $0x120] sm:$0xff] }
 0x247   :  { %2550 = vst.msk [vmem:[#allocation2 + $0x1a0] sm:$0xff] %vm2497_vm5, %v2325_v63 }
 0x248   :  { %v1389_v34 = vpop.f32.mrf.mxu0 }
 0x249   :  { %v1874_v41 = vmul.f32 %v9951_v52, %v1389_v34 }
 0x24b   :  { %v2102_v8 = vadd.f32 %v9956_v15, %v1874_v41  ;;  %v2838_v41 = vld [vmem:[#allocation2 + $0x190] ss:$2 sm:$0xff] }
 0x24d   :  { %v2326_v12 = vmax.f32 %v2102_v8, 0.0  ;;  %v3062_v8 = vld [vmem:[#allocation2 + $0x191] ss:$2 sm:$0xff] }
 0x24f   :  { %2551 = vst.msk [vmem:[#allocation2 + $0x1a8] sm:$0xff] %vm2497_vm5, %v2326_v12  ;;  %v5530_v21 = vpop.f32.mrf.mxu1 }
 0x250   :  { %v10082_v25 = vadd.f32 %v5691_v49, %v5530_v21  ;;  %v1392_v4 = vpop.f32.mrf.mxu0  ;;  %v7958_v21 = vld [vmem:[#allocation3 + $0x50] sm:$0xf] }
 0x251   :  { %v1875_v29 = vmul.f32 %v9951_v52, %v1392_v4  ;;  %v3260_v4 = vmax.f32 %v2838_v41, %v3062_v8 }
 0x252   :  { %12739 = vst [vmem:[#allocation37_spill] sm:$0xff] %v10082_v25 }
 0x253   :  { %v2103_v32 = vadd.f32 %v9956_v15, %v1875_v29  ;;  %7839 = vmatmul.msk.bf16.gmra.mxu0 %vm904_vm4, %v8447_v33 }
 0x255   :  { %v2327_v38 = vmax.f32 %v2103_v32, 0.0 }
 0x256   :  { %v2840_v39 = vld [vmem:[#allocation2 + $0x1a0] ss:$2 sm:$0xff]  ;;  %v3064_v6 = vld [vmem:[#allocation2 + $0x1a1] ss:$2 sm:$0xff] }
 0x257   :  { %2552 = vst.msk [vmem:[#allocation2 + $0x1b0] sm:$0xff] %vm2497_vm5, %v2327_v38  ;;  %v3261_v44 = vmax.f32 %v2840_v39, %v3064_v6  ;;  %v8537_v38 = vld [vmem:[#allocation3 + $0x64] sm:$0xf] }
 0x258   :  { %v1394_v46 = vpop.f32.mrf.mxu0 }
 0x259   :  { %v1876_v37 = vmul.f32 %v9951_v52, %v1394_v46  ;;  %v4050_v7 = vmax.f32 %v3259_v55, %v3261_v44 }
 0x25b   :  { %v2104_v47 = vadd.f32 %v9956_v15, %v1876_v37  ;;  %v10090_v23 = vpack.c.bf16 %v4050_v7, %v4050_v7 }
 0x25d   :  { %v2328_v53 = vmax.f32 %v2104_v47, 0.0  ;;  %4110 = vrot.lane.b32.xlu0 %v10090_v23, %s8808_s2  ;;  %v4062_v10 = vshll.u32 %v10090_v23, 16  ;;  %v4059_v34 = vshrl.u32 %v10090_v23, 16 }
 0x25f   :  { %2553 = vst.msk [vmem:[#allocation2 + $0x1b8] sm:$0xff] %vm2497_vm5, %v2328_v53  ;;  %v4126_v27 = vrot.slane %v4062_v10, 5  ;;  %v3885_v56 = vpop.permute.xlu0 %3884  ;;  %v4127_v49 = vrot.slane %v4059_v34, 4  ;;  %v4061_v41 = vrot.slane %v4059_v34, 7 }
 0x260   :  { %3895 = vst.msk [vmem:[#allocation3 + $0x58] sm:$0x7] %vm3429_vm2, %v3885_v56  ;;  %v1397_v59 = vpop.f32.mrf.mxu0 }
 0x261   :  { %v4151_v63 = vsel %vm9191_vm10, %v4126_v27, %v4150_v16  ;;  %v1877_v3 = vmul.f32 %v9951_v52, %v1397_v59  ;;  %v4128_v44 = vor.u32 %v4127_v49, %v4126_v27  ;;  %v8449_v27 = vld [vmem:[%s12598_s0 + $0x128] sm:$0xff]  ;;  %v4064_v49 = vor.u32 %v4062_v10, %v4061_v41 }
 0x262   :  { %4152 = vst [vmem:[#allocation3 + $0x6c] sm:$0x8] %v4151_v63 }
 0x263   :  { %7840 = vmatmul.msk.bf16.gmra.mxu0 %vm904_vm4, %v8448_v61  ;;  %v2105_v40 = vadd.f32 %v9956_v15, %v1877_v3  ;;  %v4129_v53 = vrot.slane %v4128_v44, 4 }
 0x265   :  { %v2329_v11 = vmax.f32 %v2105_v40, 0.0  ;;  %v4154_v40 = vld [vmem:[#allocation3 + $0x7c] sm:$0x7] }
 0x266   :  { %v2842_v9 = vld [vmem:[#allocation2 + $0x1b0] ss:$2 sm:$0xff]  ;;  %v3066_v12 = vld [vmem:[#allocation2 + $0x1b1] ss:$2 sm:$0xff] }
 0x267   :  { %v8536_v33 = vld [vmem:[#allocation3 + $0x54] sm:$0xf0]  ;;  %v3262_v29 = vmax.f32 %v2842_v9, %v3066_v12  ;;  %2554 = vst.msk [vmem:[#allocation2 + $0x1c0] sm:$0xff] %vm2497_vm5, %v2329_v11 }
 0x268   :  { %v1399_v32 = vpop.f32.mrf.mxu0  ;;  %v10107_v42 = vor.u32 %v8536_v33, %v7958_v21 }
 0x269   :  { %v1878_v31 = vmul.f32 %v9951_v52, %v1399_v32  ;;  %v7968_v39 = vld [vmem:[#allocation3 + $0x68] sm:$0xf0]  ;;  %v4051_v6 = vmax.f32 %v3260_v4, %v3262_v29  ;;  %v4094_v4 = vld [vmem:[#allocation3 + $0x70] sm:$0xf] }
 0x26a   :  { %12740 = vst [vmem:[#allocation38_spill] sm:$0xff] %v10107_v42  ;;  %5539 = vmatmul.bf16.gmra.mxu1 %v10107_v42  ;;  %5956 = vmatmul.bf16.gmra.mxu3 %v10107_v42  ;;  %v10112_v55 = vor.u32 %v8537_v38, %v7968_v39  ;;  %v4095_v34 = vsel %vm9493_vm8, %v4064_v49, %v4094_v4 }
 0x26b   :  { %v2106_v46 = vadd.f32 %v9956_v15, %v1878_v31  ;;  %v4055_v37 = vpack.c.bf16 %v4051_v6, %v4051_v6  ;;  %4096 = vst [vmem:[#allocation3 + $0x70] sm:$0xf] %v4095_v34  ;;  %v8450_v31 = vld [vmem:[%s12598_s0 + $0x130] sm:$0xff] }
 0x26c   :  { %12741 = vst [vmem:[#allocation39_spill] sm:$0xff] %v10112_v55  ;;  %8226 = vmatmul.msk.bf16.gmra.mxu2 %vm2497_vm5, %v10112_v55 }
 0x26d   :  { %v2330_v7 = vmax.f32 %v2106_v46, 0.0  ;;  %4112 = vrot.lane.b32.xlu1 %v4055_v37, %s8808_s2  ;;  %v4067_v47 = vshrl.u32 %v4055_v37, 16  ;;  %v4070_v23 = vshll.u32 %v4055_v37, 16  ;;  %v4065_v37 = vrot.slane %v4061_v41, 4 }
 0x26f   :  { %2555 = vst.msk [vmem:[#allocation2 + $0x1c8] sm:$0xff] %vm2497_vm5, %v2330_v7  ;;  %v4130_v16 = vrot.slane %v4070_v23, 5  ;;  %v4132_v56 = vrot.slane %v4067_v47, 4  ;;  %v4069_v38 = vrot.slane %v4067_v47, 7 }
 0x270   :  { %v1402_v61 = vpop.f32.mrf.mxu0 }
 0x271   :  { %v4131_v59 = vsel %vm9414_vm14, %v4129_v53, %v4130_v16  ;;  %v4133_v63 = vor.u32 %v4132_v56, %v4130_v16  ;;  %v1879_v3 = vmul.f32 %v9951_v52, %v1402_v61  ;;  %v4072_v44 = vor.u32 %v4070_v23, %v4069_v38 }
 0x272   :  { %4153 = vst.msk [vmem:[#allocation3 + $0x74] sm:$0xf] %vm3394_vm0, %v4131_v59 }
 0x273   :  { %v4134_v8 = vrot.slane %v4133_v63, 4  ;;  %v2107_v11 = vadd.f32 %v9956_v15, %v1879_v3  ;;  %7841 = vmatmul.msk.bf16.gmra.mxu0 %vm904_vm4, %v8449_v27  ;;  %v4073_v16 = vsel %vm9498_vm11, %v4065_v37, %v4072_v44  ;;  %v4097_v27 = vld [vmem:[#allocation3 + $0x78] sm:$0xf]  ;;  %v10166_v37 = vpop.f32.mrf.mxu2 }
 0x274   :  { %v4098_v61 = vsel %vm9514_vm12, %v4073_v16, %v4097_v27  ;;  %v8451_v63 = vld [vmem:[%s12598_s0 + $0x138] sm:$0xff]  ;;  %12743 = vst [vmem:[#allocation41_spill] sm:$0xff] %v10166_v37  ;;  %v10172_v16 = vpop.f32.mrf.mxu1 }
 0x275   :  { %v4155_v9 = vsel %vm9424_vm15, %v4134_v8, %v4154_v40  ;;  %v2331_v12 = vmax.f32 %v2107_v11, 0.0  ;;  %4099 = vst [vmem:[#allocation3 + $0x78] sm:$0xf] %v4098_v61 }
 0x276   :  { %4156 = vst [vmem:[#allocation3 + $0x7c] sm:$0x7] %v4155_v9  ;;  %v2844_v8 = vld [vmem:[#allocation2 + $0x1c0] ss:$2 sm:$0xff]  ;;  %v3068_v11 = vld [vmem:[#allocation2 + $0x1c1] ss:$2 sm:$0xff] }
 0x277   :  { %2556 = vst.msk [vmem:[#allocation2 + $0x1d0] sm:$0xff] %vm2497_vm5, %v2331_v12  ;;  %v3263_v4 = vmax.f32 %v2844_v8, %v3068_v11 }
 0x278   :  { %v1404_v21 = vpop.f32.mrf.mxu0  ;;  %12744 = vst [vmem:[#allocation42_spill] sm:$0xff] %v10172_v16 }
 0x279   :  { %v1880_v33 = vmul.f32 %v9951_v52, %v1404_v21 }
 0x27b   :  { %v2108_v29 = vadd.f32 %v9956_v15, %v1880_v33  ;;  %v5696_v8 = vpop.f32.mrf.mxu2 }
 0x27d   :  { %v2332_v32 = vmax.f32 %v2108_v29, 0.0 }
 0x27f   :  { %2557 = vst.msk [vmem:[#allocation2 + $0x1d8] sm:$0xff] %vm2497_vm5, %v2332_v32 }
 0x280   :  { %v1407_v10 = vpop.f32.mrf.mxu0 }
 0x281   :  { %v1881_v39 = vmul.f32 %v9951_v52, %v1407_v10 }
 0x283   :  { %v2109_v6 = vadd.f32 %v9956_v15, %v1881_v39  ;;  %7842 = vmatmul.msk.bf16.gmra.mxu0 %vm904_vm4, %v8450_v31 }
 0x285   :  { %v2333_v46 = vmax.f32 %v2109_v6, 0.0 }
 0x287   :  { %2558 = vst.msk [vmem:[#allocation2 + $0x1e0] sm:$0xff] %vm2497_vm5, %v2333_v46  ;;  %v3999_v7 = vpop.permute.xlu2 %3998  ;;  %v4264_v46 = vld [vmem:[#allocation3 + $0x7c] sm:$0x8] }
 0x288   :  { %4009 = vst.msk [vmem:[#allocation3 + $0x68] sm:$0x7] %vm3429_vm2, %v3999_v7  ;;  %v1409_v53 = vpop.f32.mrf.mxu0 }
 0x289   :  { %v1882_v47 = vmul.f32 %v9951_v52, %v1409_v53  ;;  %v8452_v53 = vld [vmem:[%s12598_s0 + $0x140] sm:$0xff] }
 0x28b   :  { %v2110_v56 = vadd.f32 %v9956_v15, %v1882_v47 }
 0x28d   :  { %v2334_v23 = vmax.f32 %v2110_v56, 0.0 }
 0x28f   :  { %2559 = vst.msk [vmem:[#allocation2 + $0x1e8] sm:$0xff] %vm2497_vm5, %v2334_v23  ;;  %v3997_v59 = vpop.permute.xlu1 %3996  ;;  %v8538_v33 = vld [vmem:[#allocation3 + $0x64] sm:$0xf0] }
 0x290   :  { %4008 = vst.msk [vmem:[#allocation3 + $0x60] sm:$0xf] %vm3427_vm1, %v3997_v59  ;;  %v1412_v3 = vpop.f32.mrf.mxu0  ;;  %v2846_v59 = vld [vmem:[#allocation2 + $0x1d0] ss:$2 sm:$0xff] }
 0x291   :  { %v1883_v40 = vmul.f32 %v9951_v52, %v1412_v3 }
 0x293   :  { %v2111_v41 = vadd.f32 %v9956_v15, %v1883_v40  ;;  %7843 = vmatmul.msk.bf16.gmra.mxu0 %vm904_vm4, %v8451_v63  ;;  %v3070_v63 = vld [vmem:[#allocation2 + $0x1d1] ss:$2 sm:$0xff] }
 0x295   :  { %v2335_v9 = vmax.f32 %v2111_v41, 0.0 }
 0x296   :  { %v2848_v12 = vld [vmem:[#allocation2 + $0x1e0] ss:$2 sm:$0xff]  ;;  %v3072_v49 = vld [vmem:[#allocation2 + $0x1e1] ss:$2 sm:$0xff] }
 0x297   :  { %2560 = vst.msk [vmem:[#allocation2 + $0x1f0] sm:$0xff] %vm2497_vm5, %v2335_v9  ;;  %v7966_v21 = vld [vmem:[#allocation3 + $0x60] sm:$0xf]  ;;  %v3265_v29 = vmax.f32 %v2848_v12, %v3072_v49  ;;  %v3264_v9 = vmax.f32 %v2846_v59, %v3070_v63 }
 0x298   :  { %v1414_v34 = vpop.f32.mrf.mxu0  ;;  %v10159_v32 = vor.u32 %v8538_v33, %v7966_v21 }
 0x299   :  { %v1884_v31 = vmul.f32 %v9951_v52, %v1414_v34  ;;  %v4164_v10 = vmax.f32 %v3263_v4, %v3265_v29  ;;  %v8539_v29 = vld [vmem:[#allocation3 + $0x74] sm:$0xf] }
 0x29a   :  { %12742 = vst [vmem:[#allocation40_spill] sm:$0xff] %v10159_v32  ;;  %5544 = vmatmul.bf16.gmra.mxu1 %v10159_v32  ;;  %5961 = vmatmul.bf16.gmra.mxu3 %v10159_v32 }
 0x29b   :  { %v2112_v38 = vadd.f32 %v9956_v15, %v1884_v31  ;;  %v4168_v39 = vpack.c.bf16 %v4164_v10, %v4164_v10 }
 0x29d   :  { %v2336_v6 = vmax.f32 %v2112_v38, 0.0  ;;  %4224 = vrot.lane.b32.xlu2 %v4168_v39, %s8808_s2  ;;  %v4176_v44 = vshll.u32 %v4168_v39, 16  ;;  %v4173_v61 = vshrl.u32 %v4168_v39, 16 }
 0x29f   :  { %2561 = vst.msk [vmem:[#allocation2 + $0x1f8] sm:$0xff] %vm2497_vm5, %v2336_v6  ;;  %v4240_v7 = vrot.slane %v4176_v44, 5  ;;  %v4241_v11 = vrot.slane %v4173_v61, 4 }
 0x2a0   :  { %v1417_v47 = vpop.f32.mrf.mxu0 }
 0x2a1   :  { %v4265_v56 = vsel %vm9191_vm10, %v4240_v7, %v4264_v46  ;;  %v1885_v27 = vmul.f32 %v9951_v52, %v1417_v47  ;;  %v4242_v38 = vor.u32 %v4241_v11, %v4240_v7  ;;  %v8453_v7 = vld [vmem:[%s12598_s0 + $0x148] sm:$0xff] }
 0x2a2   :  { %4266 = vst [vmem:[#allocation3 + $0x7c] sm:$0x8] %v4265_v56 }
 0x2a3   :  { %7844 = vmatmul.msk.bf16.gmra.mxu0 %vm904_vm4, %v8452_v53  ;;  %v2113_v23 = vadd.f32 %v9956_v15, %v1885_v27  ;;  %v4243_v56 = vrot.slane %v4242_v38, 4 }
 0x2a5   :  { %v2337_v3 = vmax.f32 %v2113_v23, 0.0 }
 0x2a6   :  { %v2850_v40 = vld [vmem:[#allocation2 + $0x1f0] ss:$2 sm:$0xff]  ;;  %v3074_v41 = vld [vmem:[#allocation2 + $0x1f1] ss:$2 sm:$0xff] }
 0x2a7   :  { %v3266_v12 = vmax.f32 %v2850_v40, %v3074_v41  ;;  %2562 = vst.msk [vmem:[#allocation2 + $0x200] sm:$0xff] %vm2497_vm5, %v2337_v3  ;;  %v5535_v49 = vpop.f32.mrf.mxu1  ;;  %v4268_v40 = vld [vmem:[#allocation3 + $0x8c] sm:$0x7] }
 0x2a8   :  { %v1419_v21 = vpop.f32.mrf.mxu0  ;;  %v10180_v33 = vadd.f32 %v5696_v8, %v5535_v49  ;;  %v4175_v8 = vrot.slane %v4173_v61, 7 }
 0x2a9   :  { %v1886_v4 = vmul.f32 %v9951_v52, %v1419_v21  ;;  %v7976_v34 = vld [vmem:[#allocation3 + $0x78] sm:$0xf0]  ;;  %v4165_v31 = vmax.f32 %v3264_v9, %v3266_v12 }
 0x2aa   :  { %12745 = vst [vmem:[#allocation43_spill] sm:$0xff] %v10180_v33  ;;  %v10183_v10 = vor.u32 %v8539_v29, %v7976_v34  ;;  %v4178_v21 = vor.u32 %v4176_v44, %v4175_v8  ;;  %v4208_v34 = vld [vmem:[#allocation3 + $0x80] sm:$0xf] }
 0x2ab   :  { %v2114_v39 = vadd.f32 %v9956_v15, %v1886_v4  ;;  %v4169_v6 = vpack.c.bf16 %v4165_v31, %v4165_v31 }
 0x2ac   :  { %12746 = vst [vmem:[#allocation44_spill] sm:$0xff] %v10183_v10  ;;  %8227 = vmatmul.msk.bf16.gmra.mxu2 %vm2497_vm5, %v10183_v10  ;;  %v4209_v61 = vsel %vm9493_vm8, %v4178_v21, %v4208_v34  ;;  %v3212_v10 = vld [vmem:[#allocation2 + $0x641] ss:$2 sm:$0xff] }
 0x2ad   :  { %v2338_v46 = vmax.f32 %v2114_v39, 0.0  ;;  %4226 = vrot.lane.b32.xlu0 %v4169_v6, %s8808_s2  ;;  %v4181_v53 = vshrl.u32 %v4169_v6, 16  ;;  %v4184_v47 = vshll.u32 %v4169_v6, 16  ;;  %4210 = vst [vmem:[#allocation3 + $0x80] sm:$0xf] %v4209_v61  ;;  %v8454_v39 = vld [vmem:[%s12598_s0 + $0x150] sm:$0xff] }
 0x2af   :  { %2563 = vst.msk [vmem:[#allocation2 + $0x208] sm:$0xff] %vm2497_vm5, %v2338_v46  ;;  %v4244_v27 = vrot.slane %v4184_v47, 5  ;;  %v4246_v23 = vrot.slane %v4181_v53, 4  ;;  %v4183_v6 = vrot.slane %v4181_v53, 7  ;;  %v4211_v53 = vld [vmem:[#allocation3 + $0x88] sm:$0xf] }
 0x2b0   :  { %v1422_v59 = vpop.f32.mrf.mxu0 }
 0x2b1   :  { %v4245_v63 = vsel %vm9414_vm14, %v4243_v56, %v4244_v27  ;;  %v4247_v3 = vor.u32 %v4246_v23, %v4244_v27  ;;  %v1887_v41 = vmul.f32 %v9951_v52, %v1422_v59  ;;  %v4186_v27 = vor.u32 %v4184_v47, %v4183_v6 }
 0x2b2   :  { %4267 = vst.msk [vmem:[#allocation3 + $0x84] sm:$0xf] %vm3394_vm0, %v4245_v63 }
 0x2b3   :  { %v4248_v11 = vrot.slane %v4247_v3, 4  ;;  %7845 = vmatmul.msk.bf16.gmra.mxu0 %vm904_vm4, %v8453_v7  ;;  %v2115_v9 = vadd.f32 %v9956_v15, %v1887_v41  ;;  %v4179_v7 = vrot.slane %v4175_v8, 4  ;;  %v8455_v8 = vld [vmem:[%s12598_s0 + $0x158] sm:$0xff] }
 0x2b5   :  { %v4269_v12 = vsel %vm9424_vm15, %v4248_v11, %v4268_v40  ;;  %v2339_v49 = vmax.f32 %v2115_v9, 0.0  ;;  %v4187_v63 = vsel %vm9498_vm11, %v4179_v7, %v4186_v27  ;;  %v10236_v7 = vpop.f32.mrf.mxu2 }
 0x2b6   :  { %4270 = vst [vmem:[#allocation3 + $0x8c] sm:$0x7] %v4269_v12  ;;  %v4212_v41 = vsel %vm9514_vm12, %v4187_v63, %v4211_v53  ;;  %v2852_v21 = vld [vmem:[#allocation2 + $0x200] ss:$2 sm:$0xff]  ;;  %v10238_v63 = vpop.f32.mrf.mxu1 }
 0x2b7   :  { %2564 = vst.msk [vmem:[#allocation2 + $0x210] sm:$0xff] %vm2497_vm5, %v2339_v49  ;;  %v8456_v53 = vld [vmem:[%s12598_s0 + $0x160] sm:$0xff] }
 0x2b8   :  { %v1424_v4 = vpop.f32.mrf.mxu0  ;;  %4213 = vst [vmem:[#allocation3 + $0x88] sm:$0xf] %v4212_v41 }
 0x2b9   :  { %v1888_v29 = vmul.f32 %v9951_v52, %v1424_v4  ;;  %v3076_v4 = vld [vmem:[#allocation2 + $0x201] ss:$2 sm:$0xff]  ;;  %12747 = vst [vmem:[#allocation45_spill] sm:$0xff] %v10236_v7 }
 0x2ba   :  { %v3267_v61 = vmax.f32 %v2852_v21, %v3076_v4  ;;  %12748 = vst [vmem:[#allocation46_spill] sm:$0xff] %v10238_v63 }
 0x2bb   :  { %v2116_v31 = vadd.f32 %v9956_v15, %v1888_v29 }
 0x2bd   :  { %v2340_v38 = vmax.f32 %v2116_v31, 0.0 }
 0x2bf   :  { %2565 = vst.msk [vmem:[#allocation2 + $0x218] sm:$0xff] %vm2497_vm5, %v2340_v38 }
 0x2c0   :  { %v1427_v44 = vpop.f32.mrf.mxu0 }
 0x2c1   :  { %v1889_v46 = vmul.f32 %v9951_v52, %v1427_v44 }
 0x2c3   :  { %v2117_v56 = vadd.f32 %v9956_v15, %v1889_v46  ;;  %7846 = vmatmul.msk.bf16.gmra.mxu0 %vm904_vm4, %v8454_v39 }
 0x2c5   :  { %v2341_v23 = vmax.f32 %v2117_v56, 0.0 }
 0x2c7   :  { %2566 = vst.msk [vmem:[#allocation2 + $0x220] sm:$0xff] %vm2497_vm5, %v2341_v23 }
 0x2c8   :  { %v1429_v59 = vpop.f32.mrf.mxu0 }
 0x2c9   :  { %v1890_v3 = vmul.f32 %v9951_v52, %v1429_v59  ;;  %v4378_v59 = vld [vmem:[#allocation3 + $0x8c] sm:$0x8] }
 0x2cb   :  { %v2118_v40 = vadd.f32 %v9956_v15, %v1890_v3 }
 0x2cd   :  { %v2342_v11 = vmax.f32 %v2118_v40, 0.0 }
 0x2cf   :  { %2567 = vst.msk [vmem:[#allocation2 + $0x228] sm:$0xff] %vm2497_vm5, %v2342_v11  ;;  %v4111_v47 = vpop.permute.xlu0 %4110 }
 0x2d0   :  { %4122 = vst.msk [vmem:[#allocation3 + $0x70] sm:$0xf] %vm3427_vm1, %v4111_v47  ;;  %v1432_v9 = vpop.f32.mrf.mxu0 }
 0x2d1   :  { %v1891_v12 = vmul.f32 %v9951_v52, %v1432_v9 }
 0x2d3   :  { %v2119_v49 = vadd.f32 %v9956_v15, %v1891_v12  ;;  %7847 = vmatmul.msk.bf16.gmra.mxu0 %vm904_vm4, %v8455_v8  ;;  %v2854_v12 = vld [vmem:[#allocation2 + $0x210] ss:$2 sm:$0xff] }
 0x2d5   :  { %v2343_v29 = vmax.f32 %v2119_v49, 0.0  ;;  %v3078_v49 = vld [vmem:[#allocation2 + $0x211] ss:$2 sm:$0xff] }
 0x2d6   :  { %v2856_v34 = vld [vmem:[#allocation2 + $0x220] ss:$2 sm:$0xff]  ;;  %v3080_v31 = vld [vmem:[#allocation2 + $0x221] ss:$2 sm:$0xff] }
 0x2d7   :  { %2568 = vst.msk [vmem:[#allocation2 + $0x230] sm:$0xff] %vm2497_vm5, %v2343_v29  ;;  %v3269_v38 = vmax.f32 %v2856_v34, %v3080_v31  ;;  %v5701_v34 = vpop.f32.mrf.mxu2 }
 0x2d8   :  { %v1434_v39 = vpop.f32.mrf.mxu0 }
 0x2d9   :  { %v1892_v44 = vmul.f32 %v9951_v52, %v1434_v39  ;;  %v4278_v6 = vmax.f32 %v3267_v61, %v3269_v38  ;;  %v7974_v38 = vld [vmem:[#allocation3 + $0x70] sm:$0xf] }
 0x2db   :  { %v2120_v46 = vadd.f32 %v9956_v15, %v1892_v44  ;;  %v10231_v56 = vpack.c.bf16 %v4278_v6, %v4278_v6  ;;  %v3268_v44 = vmax.f32 %v2854_v12, %v3078_v49 }
 0x2dd   :  { %v2344_v27 = vmax.f32 %v2120_v46, 0.0  ;;  %4338 = vrot.lane.b32.xlu1 %v10231_v56, %s8808_s2  ;;  %v4290_v23 = vshll.u32 %v10231_v56, 16  ;;  %v4287_v8 = vshrl.u32 %v10231_v56, 16  ;;  %v8458_v56 = vld [vmem:[%s12598_s0 + $0x170] sm:$0xff] }
 0x2df   :  { %2569 = vst.msk [vmem:[#allocation2 + $0x238] sm:$0xff] %vm2497_vm5, %v2344_v27  ;;  %v4354_v3 = vrot.slane %v4290_v23, 5  ;;  %v4113_v40 = vpop.permute.xlu1 %4112  ;;  %v4355_v31 = vrot.slane %v4287_v8, 4 }
 0x2e0   :  { %4123 = vst.msk [vmem:[#allocation3 + $0x78] sm:$0x7] %vm3429_vm2, %v4113_v40  ;;  %v1437_v41 = vpop.f32.mrf.mxu0 }
 0x2e1   :  { %v4379_v11 = vsel %vm9191_vm10, %v4354_v3, %v4378_v59  ;;  %v1893_v47 = vmul.f32 %v9951_v52, %v1437_v41 }
 0x2e2   :  { %4380 = vst [vmem:[#allocation3 + $0x8c] sm:$0x8] %v4379_v11 }
 0x2e3   :  { %7848 = vmatmul.msk.bf16.gmra.mxu0 %vm904_vm4, %v8456_v53  ;;  %v2121_v9 = vadd.f32 %v9956_v15, %v1893_v47  ;;  %v8541_v53 = vld [vmem:[#allocation3 + $0x84] sm:$0xf] }
 0x2e5   :  { %v2345_v21 = vmax.f32 %v2121_v9, 0.0  ;;  %v4356_v9 = vor.u32 %v4355_v31, %v4354_v3  ;;  %v8457_v3 = vld [vmem:[%s12598_s0 + $0x168] sm:$0xff] }
 0x2e6   :  { %v2858_v4 = vld [vmem:[#allocation2 + $0x230] ss:$2 sm:$0xff]  ;;  %v3082_v29 = vld [vmem:[#allocation2 + $0x231] ss:$2 sm:$0xff] }
 0x2e7   :  { %v5540_v61 = vpop.f32.mrf.mxu1  ;;  %v8540_v39 = vld [vmem:[#allocation3 + $0x74] sm:$0xf0]  ;;  %v3270_v6 = vmax.f32 %v2858_v4, %v3082_v29  ;;  %2570 = vst.msk [vmem:[#allocation2 + $0x240] sm:$0xff] %vm2497_vm5, %v2345_v21 }
 0x2e8   :  { %v10254_v46 = vadd.f32 %v5701_v34, %v5540_v61  ;;  %v1439_v27 = vpop.f32.mrf.mxu0  ;;  %v10256_v59 = vor.u32 %v8540_v39, %v7974_v38  ;;  %v4357_v34 = vrot.slane %v4356_v9, 4 }
 0x2e9   :  { %v1894_v40 = vmul.f32 %v9951_v52, %v1439_v27  ;;  %v7984_v41 = vld [vmem:[#allocation3 + $0x88] sm:$0xf0]  ;;  %v4279_v11 = vmax.f32 %v3268_v44, %v3270_v6  ;;  %v4382_v27 = vld [vmem:[#allocation3 + $0x9c] sm:$0x7] }
 0x2ea   :  { %12749 = vst [vmem:[#allocation47_spill] sm:$0xff] %v10254_v46  ;;  %5549 = vmatmul.bf16.gmra.mxu1 %v10256_v59  ;;  %5966 = vmatmul.bf16.gmra.mxu3 %v10256_v59  ;;  %v10261_v47 = vor.u32 %v8541_v53, %v7984_v41 }
 0x2eb   :  { %12750 = vst [vmem:[#allocation48_spill] sm:$0xff] %v10256_v59  ;;  %v2122_v12 = vadd.f32 %v9956_v15, %v1894_v40  ;;  %v4283_v49 = vpack.c.bf16 %v4279_v11, %v4279_v11  ;;  %v4289_v40 = vrot.slane %v4287_v8, 7 }
 0x2ec   :  { %12751 = vst [vmem:[#allocation49_spill] sm:$0xff] %v10261_v47  ;;  %8228 = vmatmul.msk.bf16.gmra.mxu2 %vm2497_vm5, %v10261_v47  ;;  %v8556_v47 = vld [vmem:[#allocation3 + $0xf4] sm:$0xf0] }
 0x2ed   :  { %v2346_v21 = vmax.f32 %v2122_v12, 0.0  ;;  %4340 = vrot.lane.b32.xlu2 %v4283_v49, %s8808_s2  ;;  %v4295_v4 = vshrl.u32 %v4283_v49, 16  ;;  %v4298_v29 = vshll.u32 %v4283_v49, 16  ;;  %v4292_v12 = vor.u32 %v4290_v23, %v4289_v40 }
 0x2ef   :  { %2571 = vst.msk [vmem:[#allocation2 + $0x248] sm:$0xff] %vm2497_vm5, %v2346_v21  ;;  %v4358_v61 = vrot.slane %v4298_v29, 5  ;;  %v4360_v38 = vrot.slane %v4295_v4, 4 }
 0x2f0   :  { %v1442_v31 = vpop.f32.mrf.mxu0 }
 0x2f1   :  { %v4359_v39 = vsel %vm9414_vm14, %v4357_v34, %v4358_v61  ;;  %v4361_v44 = vor.u32 %v4360_v38, %v4358_v61  ;;  %v1895_v6 = vmul.f32 %v9951_v52, %v1442_v31  ;;  %v4322_v34 = vld [vmem:[#allocation3 + $0x90] sm:$0xf]  ;;  %v4297_v31 = vrot.slane %v4295_v4, 7  ;;  %v10300_v4 = vld [vmem:[#allocation9] ss:$0 sm:$0xff] }
 0x2f2   :  { %4381 = vst.msk [vmem:[#allocation3 + $0x94] sm:$0xf] %vm3394_vm0, %v4359_v39  ;;  %v4323_v38 = vsel %vm9493_vm8, %v4292_v12, %v4322_v34 }
 0x2f3   :  { %v4362_v53 = vrot.slane %v4361_v44, 4  ;;  %v2123_v41 = vadd.f32 %v9956_v15, %v1895_v6  ;;  %7849 = vmatmul.msk.bf16.gmra.mxu0 %vm904_vm4, %v8457_v3  ;;  %4324 = vst [vmem:[#allocation3 + $0x90] sm:$0xf] %v4323_v38  ;;  %v4300_v6 = vor.u32 %v4298_v29, %v4297_v31 }
 0x2f5   :  { %v4383_v11 = vsel %vm9424_vm15, %v4362_v53, %v4382_v27  ;;  %v2347_v9 = vmax.f32 %v2123_v41, 0.0  ;;  %v4293_v53 = vrot.slane %v4289_v40, 4  ;;  %v10305_v40 = vpop.f32.mrf.mxu2 }
 0x2f6   :  { %4384 = vst [vmem:[#allocation3 + $0x9c] sm:$0x7] %v4383_v11 }
 0x2f7   :  { %2572 = vst.msk [vmem:[#allocation2 + $0x250] sm:$0xff] %vm2497_vm5, %v2347_v9  ;;  %v4225_v49 = vpop.permute.xlu2 %4224  ;;  %v4301_v11 = vsel %vm9498_vm11, %v4293_v53, %v4300_v6  ;;  %v10297_v9 = vld [vmem:[#allocation7] ss:$0 sm:$0xff] }
 0x2f8   :  { %4236 = vst.msk [vmem:[#allocation3 + $0x80] sm:$0xf] %vm3427_vm1, %v4225_v49  ;;  %v1444_v21 = vpop.f32.mrf.mxu0 }
 0x2f9   :  { %v1896_v8 = vmul.f32 %v9951_v52, %v1444_v21  ;;  %12752 = vst [vmem:[#allocation50_spill] sm:$0xff] %v10305_v40  ;;  %v10307_v21 = vpop.f32.mrf.mxu1 }
 0x2fa   :  { %12753 = vst [vmem:[#allocation51_spill] sm:$0xff] %v10307_v21 }
 0x2fb   :  { %v2124_v61 = vadd.f32 %v9956_v15, %v1896_v8  ;;  %v8459_v8 = vld [vmem:[%s12598_s0 + $0x178] sm:$0xff] }
 0x2fd   :  { %v2348_v3 = vmax.f32 %v2124_v61, 0.0 }
 0x2ff   :  { %2573 = vst.msk [vmem:[#allocation2 + $0x258] sm:$0xff] %vm2497_vm5, %v2348_v3  ;;  %v2860_v3 = vld [vmem:[#allocation2 + $0x240] ss:$2 sm:$0xff] }
 0x300   :  { %v1447_v23 = vpop.f32.mrf.mxu0 }
 0x301   :  { %v1897_v39 = vmul.f32 %v9951_v52, %v1447_v23 }
 0x303   :  { %v2125_v44 = vadd.f32 %v9956_v15, %v1897_v39  ;;  %7850 = vmatmul.msk.bf16.gmra.mxu0 %vm904_vm4, %v8458_v56  ;;  %v4325_v15 = vld [vmem:[#allocation3 + $0x98] sm:$0xf]  ;;  %v3084_v56 = vld [vmem:[#allocation2 + $0x241] ss:$2 sm:$0xff] }
 0x304   :  { %v4326_v29 = vsel %vm9514_vm12, %v4301_v11, %v4325_v15 }
 0x305   :  { %v2349_v27 = vmax.f32 %v2125_v44, 0.0  ;;  %4327 = vst [vmem:[#allocation3 + $0x98] sm:$0xf] %v4326_v29  ;;  %v5706_v44 = vpop.f32.mrf.mxu2 }
 0x307   :  { %2574 = vst.msk [vmem:[#allocation2 + $0x260] sm:$0xff] %vm2497_vm5, %v2349_v27  ;;  %v3271_v27 = vmax.f32 %v2860_v3, %v3084_v56  ;;  %v8460_v3 = vld [vmem:[%s12598_s0 + $0x180] sm:$0xff] }
 0x308   :  { %v1449_v41 = vpop.f32.mrf.mxu0 }
 0x309   :  { %v1898_v12 = vmul.f32 %v10297_v9, %v1449_v41 }
 0x30b   :  { %v2126_v52 = vadd.f32 %v10300_v4, %v1898_v12 }
 0x30d   :  { %v2350_v49 = vmax.f32 %v2126_v52, 0.0 }
 0x30f   :  { %2575 = vst.msk [vmem:[#allocation2 + $0x268] sm:$0xff] %vm2497_vm5, %v2350_v49 }
 0x310   :  { %v1452_v34 = vpop.f32.mrf.mxu0 }
 0x311   :  { %v1899_v61 = vmul.f32 %v10297_v9, %v1452_v34  ;;  %v4492_v34 = vld [vmem:[#allocation3 + $0x9c] sm:$0x8] }
 0x313   :  { %v2127_v38 = vadd.f32 %v10300_v4, %v1899_v61  ;;  %7851 = vmatmul.msk.bf16.gmra.mxu0 %vm904_vm4, %v8459_v8 }
 0x315   :  { %v2351_v23 = vmax.f32 %v2127_v38, 0.0 }
 0x316   :  { %v2864_v31 = vld [vmem:[#allocation2 + $0x260] ss:$2 sm:$0xff]  ;;  %v3088_v39 = vld [vmem:[#allocation2 + $0x261] ss:$2 sm:$0xff] }
 0x317   :  { %2576 = vst.msk [vmem:[#allocation2 + $0x270] sm:$0xff] %vm2497_vm5, %v2351_v23  ;;  %v5545_v6 = vpop.f32.mrf.mxu1  ;;  %v3273_v53 = vmax.f32 %v2864_v31, %v3088_v39 }
 0x318   :  { %v10317_v41 = vadd.f32 %v5706_v44, %v5545_v6  ;;  %v1454_v11 = vpop.f32.mrf.mxu0  ;;  %v2862_v6 = vld [vmem:[#allocation2 + $0x250] ss:$2 sm:$0xff] }
 0x319   :  { %v1900_v12 = vmul.f32 %v10297_v9, %v1454_v11  ;;  %v4392_v52 = vmax.f32 %v3271_v27, %v3273_v53  ;;  %v3086_v27 = vld [vmem:[#allocation2 + $0x251] ss:$2 sm:$0xff] }
 0x31a   :  { %12754 = vst [vmem:[#allocation52_spill] sm:$0xff] %v10317_v41 }
 0x31b   :  { %v2128_v15 = vadd.f32 %v10300_v4, %v1900_v12  ;;  %v10321_v29 = vpack.c.bf16 %v4392_v52, %v4392_v52 }
 0x31d   :  { %v2352_v49 = vmax.f32 %v2128_v15, 0.0  ;;  %4452 = vrot.lane.b32.xlu0 %v10321_v29, %s8808_s2  ;;  %v4404_v8 = vshll.u32 %v10321_v29, 16  ;;  %v4401_v39 = vshrl.u32 %v10321_v29, 16  ;;  %v7982_v15 = vld [vmem:[#allocation3 + $0x80] sm:$0xf] }
 0x31f   :  { %2577 = vst.msk [vmem:[#allocation2 + $0x278] sm:$0xff] %vm2497_vm5, %v2352_v49  ;;  %v4468_v61 = vrot.slane %v4404_v8, 5  ;;  %v4227_v38 = vpop.permute.xlu0 %4226  ;;  %v4469_v52 = vrot.slane %v4401_v39, 4 }
 0x320   :  { %4237 = vst.msk [vmem:[#allocation3 + $0x88] sm:$0x7] %vm3429_vm2, %v4227_v38  ;;  %v1457_v56 = vpop.f32.mrf.mxu0  ;;  %v3272_v38 = vmax.f32 %v2862_v6, %v3086_v27 }
 0x321   :  { %v4493_v23 = vsel %vm9191_vm10, %v4468_v61, %v4492_v34  ;;  %v1901_v31 = vmul.f32 %v10297_v9, %v1457_v56  ;;  %v4470_v21 = vor.u32 %v4469_v52, %v4468_v61  ;;  %v8461_v61 = vld [vmem:[%s12598_s0 + $0x188] sm:$0xff] }
 0x322   :  { %4494 = vst [vmem:[#allocation3 + $0x9c] sm:$0x8] %v4493_v23 }
 0x323   :  { %7852 = vmatmul.msk.bf16.gmra.mxu0 %vm904_vm4, %v8460_v3  ;;  %v2129_v44 = vadd.f32 %v10300_v4, %v1901_v31  ;;  %v8543_v3 = vld [vmem:[#allocation3 + $0x94] sm:$0xf] }
 0x325   :  { %v2353_v53 = vmax.f32 %v2129_v44, 0.0 }
 0x326   :  { %v2866_v11 = vld [vmem:[#allocation2 + $0x270] ss:$2 sm:$0xff]  ;;  %v3090_v12 = vld [vmem:[#allocation2 + $0x271] ss:$2 sm:$0xff] }
 0x327   :  { %v8542_v49 = vld [vmem:[#allocation3 + $0x84] sm:$0xf0]  ;;  %v3274_v40 = vmax.f32 %v2866_v11, %v3090_v12  ;;  %2578 = vst.msk [vmem:[#allocation2 + $0x280] sm:$0xff] %vm2497_vm5, %v2353_v53 }
 0x328   :  { %v1459_v34 = vpop.f32.mrf.mxu0  ;;  %v10338_v56 = vor.u32 %v8542_v49, %v7982_v15  ;;  %v4471_v15 = vrot.slane %v4470_v21, 4 }
 0x329   :  { %v1902_v29 = vmul.f32 %v10297_v9, %v1459_v34  ;;  %v7992_v23 = vld [vmem:[#allocation3 + $0x98] sm:$0xf0]  ;;  %v4393_v31 = vmax.f32 %v3272_v38, %v3274_v40 }
 0x32a   :  { %12755 = vst [vmem:[#allocation53_spill] sm:$0xff] %v10338_v56  ;;  %5554 = vmatmul.bf16.gmra.mxu1 %v10338_v56  ;;  %5971 = vmatmul.bf16.gmra.mxu3 %v10338_v56  ;;  %v10343_v44 = vor.u32 %v8543_v3, %v7992_v23  ;;  %v4496_v3 = vld [vmem:[#allocation3 + $0xac] sm:$0x7]  ;;  %v4403_v23 = vrot.slane %v4401_v39, 7 }
 0x32b   :  { %v2130_v6 = vadd.f32 %v10300_v4, %v1902_v29  ;;  %v4397_v27 = vpack.c.bf16 %v4393_v31, %v4393_v31  ;;  %v2964_v56 = vld [vmem:[#allocation2 + $0x580] ss:$2 sm:$0xff] }
 0x32c   :  { %12756 = vst [vmem:[#allocation54_spill] sm:$0xff] %v10343_v44  ;;  %8229 = vmatmul.msk.bf16.gmra.mxu2 %vm2497_vm5, %v10343_v44  ;;  %v2988_v44 = vld [vmem:[#allocation2 + $0x640] ss:$2 sm:$0xff] }
 0x32d   :  { %v2354_v53 = vmax.f32 %v2130_v6, 0.0  ;;  %4454 = vrot.lane.b32.xlu1 %v4397_v27, %s8808_s2  ;;  %v4409_v11 = vshrl.u32 %v4397_v27, 16  ;;  %v4412_v12 = vshll.u32 %v4397_v27, 16 }
 0x32f   :  { %2579 = vst.msk [vmem:[#allocation2 + $0x288] sm:$0xff] %vm2497_vm5, %v2354_v53  ;;  %v4472_v40 = vrot.slane %v4412_v12, 5  ;;  %v4474_v49 = vrot.slane %v4409_v11, 4  ;;  %v4406_v53 = vor.u32 %v4404_v8, %v4403_v23 }
 0x330   :  { %v1462_v52 = vpop.f32.mrf.mxu0 }
 0x331   :  { %v4473_v38 = vsel %vm9414_vm14, %v4471_v15, %v4472_v40  ;;  %v4475_v34 = vor.u32 %v4474_v49, %v4472_v40  ;;  %v1903_v29 = vmul.f32 %v10297_v9, %v1462_v52  ;;  %v4436_v49 = vld [vmem:[#allocation3 + $0xa0] sm:$0xf] }
 0x332   :  { %4495 = vst.msk [vmem:[#allocation3 + $0xa4] sm:$0xf] %vm3394_vm0, %v4473_v38  ;;  %v4437_v39 = vsel %vm9493_vm8, %v4406_v53, %v4436_v49  ;;  %v4439_v49 = vld [vmem:[#allocation3 + $0xa8] sm:$0xf] }
 0x333   :  { %v4476_v21 = vrot.slane %v4475_v34, 4  ;;  %v2131_v31 = vadd.f32 %v10300_v4, %v1903_v29  ;;  %7853 = vmatmul.msk.bf16.gmra.mxu0 %vm904_vm4, %v8461_v61  ;;  %4438 = vst [vmem:[#allocation3 + $0xa0] sm:$0xf] %v4437_v39  ;;  %v8462_v61 = vld [vmem:[%s12598_s0 + $0x190] sm:$0xff]  ;;  %v4411_v34 = vrot.slane %v4409_v11, 7  ;;  %v8463_v39 = vld [vmem:[%s12598_s0 + $0x198] sm:$0xff] }
 0x335   :  { %v4497_v6 = vsel %vm9424_vm15, %v4476_v21, %v4496_v3  ;;  %v2355_v27 = vmax.f32 %v2131_v31, 0.0  ;;  %v4414_v21 = vor.u32 %v4412_v12, %v4411_v34 }
 0x336   :  { %4498 = vst [vmem:[#allocation3 + $0xac] sm:$0x7] %v4497_v6  ;;  %v4407_v6 = vrot.slane %v4403_v23, 4  ;;  %v2868_v34 = vld [vmem:[#allocation2 + $0x280] ss:$2 sm:$0xff] }
 0x337   :  { %2580 = vst.msk [vmem:[#allocation2 + $0x290] sm:$0xff] %vm2497_vm5, %v2355_v27 }
 0x338   :  { %v1464_v15 = vpop.f32.mrf.mxu0 }
 0x339   :  { %v1904_v40 = vmul.f32 %v10297_v9, %v1464_v15  ;;  %v4415_v15 = vsel %vm9498_vm11, %v4407_v6, %v4414_v21 }
 0x33b   :  { %v2132_v52 = vadd.f32 %v10300_v4, %v1904_v40 }
 0x33d   :  { %v2356_v38 = vmax.f32 %v2132_v52, 0.0  ;;  %v4440_v52 = vsel %vm9514_vm12, %v4415_v15, %v4439_v49 }
 0x33e   :  { %4441 = vst [vmem:[#allocation3 + $0xa8] sm:$0xf] %v4440_v52 }
 0x33f   :  { %2581 = vst.msk [vmem:[#allocation2 + $0x298] sm:$0xff] %vm2497_vm5, %v2356_v38 }
 0x340   :  { %v1467_v8 = vpop.f32.mrf.mxu0 }
 0x341   :  { %v1905_v29 = vmul.f32 %v10297_v9, %v1467_v8 }
 0x343   :  { %v2133_v3 = vadd.f32 %v10300_v4, %v1905_v29  ;;  %7854 = vmatmul.msk.bf16.gmra.mxu0 %vm904_vm4, %v8462_v61  ;;  %v3092_v29 = vld [vmem:[#allocation2 + $0x281] ss:$2 sm:$0xff] }
 0x345   :  { %v2357_v31 = vmax.f32 %v2133_v3, 0.0 }
 0x347   :  { %2582 = vst.msk [vmem:[#allocation2 + $0x2a0] sm:$0xff] %vm2497_vm5, %v2357_v31  ;;  %v4341_v27 = vpop.permute.xlu2 %4340 }
 0x348   :  { %4351 = vst.msk [vmem:[#allocation3 + $0x98] sm:$0x7] %vm3429_vm2, %v4341_v27  ;;  %v1469_v53 = vpop.f32.mrf.mxu0 }
 0x349   :  { %v1906_v11 = vmul.f32 %v10297_v9, %v1469_v53  ;;  %v3275_v53 = vmax.f32 %v2868_v34, %v3092_v29  ;;  %v10399_v34 = vpop.f32.mrf.mxu1 }
 0x34a   :  { %12759 = vst [vmem:[#allocation57_spill] sm:$0xff] %v10399_v34 }
 0x34b   :  { %v2134_v40 = vadd.f32 %v10300_v4, %v1906_v11 }
 0x34d   :  { %v2358_v12 = vmax.f32 %v2134_v40, 0.0 }
 0x34f   :  { %2583 = vst.msk [vmem:[#allocation2 + $0x2a8] sm:$0xff] %vm2497_vm5, %v2358_v12  ;;  %v4339_v23 = vpop.permute.xlu1 %4338  ;;  %v8544_v27 = vld [vmem:[#allocation3 + $0x94] sm:$0xf0] }
 0x350   :  { %4350 = vst.msk [vmem:[#allocation3 + $0x90] sm:$0xf] %vm3427_vm1, %v4339_v23  ;;  %v1472_v38 = vpop.f32.mrf.mxu0 }
 0x351   :  { %v1907_v61 = vmul.f32 %v10297_v9, %v1472_v38 }
 0x353   :  { %v2135_v8 = vadd.f32 %v10300_v4, %v1907_v61  ;;  %7855 = vmatmul.msk.bf16.gmra.mxu0 %vm904_vm4, %v8463_v39  ;;  %v4606_v61 = vld [vmem:[#allocation3 + $0xac] sm:$0x8] }
 0x355   :  { %v2359_v3 = vmax.f32 %v2135_v8, 0.0  ;;  %v10397_v8 = vpop.f32.mrf.mxu2 }
 0x356   :  { %v2872_v21 = vld [vmem:[#allocation2 + $0x2a0] ss:$2 sm:$0xff]  ;;  %v3096_v31 = vld [vmem:[#allocation2 + $0x2a1] ss:$2 sm:$0xff]  ;;  %12758 = vst [vmem:[#allocation56_spill] sm:$0xff] %v10397_v8 }
 0x357   :  { %2584 = vst.msk [vmem:[#allocation2 + $0x2b0] sm:$0xff] %vm2497_vm5, %v2359_v3  ;;  %v7990_v6 = vld [vmem:[#allocation3 + $0x90] sm:$0xf]  ;;  %v3277_v15 = vmax.f32 %v2872_v21, %v3096_v31  ;;  %v8464_v3 = vld [vmem:[%s12598_s0 + $0x1a0] sm:$0xff] }
 0x358   :  { %v1474_v11 = vpop.f32.mrf.mxu0  ;;  %v10390_v40 = vor.u32 %v8544_v27, %v7990_v6 }
 0x359   :  { %v1908_v49 = vmul.f32 %v10297_v9, %v1474_v11  ;;  %v4506_v52 = vmax.f32 %v3275_v53, %v3277_v15  ;;  %v2870_v15 = vld [vmem:[#allocation2 + $0x290] ss:$2 sm:$0xff]  ;;  %v3094_v11 = vld [vmem:[#allocation2 + $0x291] ss:$2 sm:$0xff] }
 0x35a   :  { %12757 = vst [vmem:[#allocation55_spill] sm:$0xff] %v10390_v40  ;;  %5559 = vmatmul.bf16.gmra.mxu1 %v10390_v40  ;;  %5976 = vmatmul.bf16.gmra.mxu3 %v10390_v40  ;;  %v3276_v7 = vmax.f32 %v2870_v15, %v3094_v11 }
 0x35b   :  { %v2136_v12 = vadd.f32 %v10300_v4, %v1908_v49  ;;  %v4510_v23 = vpack.c.bf16 %v4506_v52, %v4506_v52 }
 0x35d   :  { %v2360_v39 = vmax.f32 %v2136_v12, 0.0  ;;  %4566 = vrot.lane.b32.xlu2 %v4510_v23, %s8808_s2  ;;  %v4518_v38 = vshll.u32 %v4510_v23, 16  ;;  %v4515_v27 = vshrl.u32 %v4510_v23, 16 }
 0x35f   :  { %2585 = vst.msk [vmem:[#allocation2 + $0x2b8] sm:$0xff] %vm2497_vm5, %v2360_v39  ;;  %v4582_v29 = vrot.slane %v4518_v38, 5  ;;  %v5711_v39 = vpop.f32.mrf.mxu2  ;;  %v4583_v8 = vrot.slane %v4515_v27, 4 }
 0x360   :  { %v1477_v21 = vpop.f32.mrf.mxu0 }
 0x361   :  { %v4607_v31 = vsel %vm9191_vm10, %v4582_v29, %v4606_v61  ;;  %v1909_v6 = vmul.f32 %v10297_v9, %v1477_v21 }
 0x362   :  { %4608 = vst [vmem:[#allocation3 + $0xac] sm:$0x8] %v4607_v31 }
 0x363   :  { %7856 = vmatmul.msk.bf16.gmra.mxu0 %vm904_vm4, %v8464_v3  ;;  %v2137_v53 = vadd.f32 %v10300_v4, %v1909_v6  ;;  %v8545_v3 = vld [vmem:[#allocation3 + $0xa4] sm:$0xf] }
 0x365   :  { %v2361_v49 = vmax.f32 %v2137_v53, 0.0  ;;  %v4584_v53 = vor.u32 %v4583_v8, %v4582_v29 }
 0x366   :  { %v2874_v52 = vld [vmem:[#allocation2 + $0x2b0] ss:$2 sm:$0xff]  ;;  %v3098_v12 = vld [vmem:[#allocation2 + $0x2b1] ss:$2 sm:$0xff] }
 0x367   :  { %v5550_v34 = vpop.f32.mrf.mxu1  ;;  %v3278_v63 = vmax.f32 %v2874_v52, %v3098_v12  ;;  %2586 = vst.msk [vmem:[#allocation2 + $0x2c0] sm:$0xff] %vm2497_vm5, %v2361_v49  ;;  %v4585_v49 = vrot.slane %v4584_v53, 4 }
 0x368   :  { %v10411_v61 = vadd.f32 %v5711_v39, %v5550_v34  ;;  %v1479_v21 = vpop.f32.mrf.mxu0  ;;  %v4610_v39 = vld [vmem:[#allocation3 + $0xbc] sm:$0x7] }
 0x369   :  { %v1910_v23 = vmul.f32 %v10297_v9, %v1479_v21  ;;  %v8000_v31 = vld [vmem:[#allocation3 + $0xa8] sm:$0xf0]  ;;  %v4507_v6 = vmax.f32 %v3276_v7, %v3278_v63 }
 0x36a   :  { %12760 = vst [vmem:[#allocation58_spill] sm:$0xff] %v10411_v61  ;;  %v10414_v37 = vor.u32 %v8545_v3, %v8000_v31  ;;  %v8465_v7 = vld [vmem:[%s12598_s0 + $0x1a8] sm:$0xff] }
 0x36b   :  { %v2138_v16 = vadd.f32 %v10300_v4, %v1910_v23  ;;  %v4511_v2 = vpack.c.bf16 %v4507_v6, %v4507_v6 }
 0x36c   :  { %12761 = vst [vmem:[#allocation59_spill] sm:$0xff] %v10414_v37  ;;  %8230 = vmatmul.msk.bf16.gmra.mxu2 %vm2497_vm5, %v10414_v37  ;;  %v2982_v37 = vld [vmem:[#allocation2 + $0x610] ss:$2 sm:$0xff] }
 0x36d   :  { %v2362_v15 = vmax.f32 %v2138_v16, 0.0  ;;  %4568 = vrot.lane.b32.xlu0 %v4511_v2, %s8808_s2  ;;  %v4523_v34 = vshrl.u32 %v4511_v2, 16  ;;  %v4526_v11 = vshll.u32 %v4511_v2, 16  ;;  %v4517_v2 = vrot.slane %v4515_v27, 7 }
 0x36f   :  { %2587 = vst.msk [vmem:[#allocation2 + $0x2c8] sm:$0xff] %vm2497_vm5, %v2362_v15  ;;  %v4586_v52 = vrot.slane %v4526_v11, 5  ;;  %v4588_v12 = vrot.slane %v4523_v34, 4  ;;  %v4520_v6 = vor.u32 %v4518_v38, %v4517_v2 }
 0x370   :  { %v1482_v63 = vpop.f32.mrf.mxu0 }
 0x371   :  { %v4587_v8 = vsel %vm9414_vm14, %v4585_v49, %v4586_v52  ;;  %v4589_v29 = vor.u32 %v4588_v12, %v4586_v52  ;;  %v1911_v16 = vmul.f32 %v10297_v9, %v1482_v63  ;;  %v4550_v49 = vld [vmem:[#allocation3 + $0xb0] sm:$0xf]  ;;  %v4525_v63 = vrot.slane %v4523_v34, 7  ;;  %v4553_v34 = vld [vmem:[#allocation3 + $0xb8] sm:$0xf] }
 0x372   :  { %4609 = vst.msk [vmem:[#allocation3 + $0xb4] sm:$0xf] %vm3394_vm0, %v4587_v8  ;;  %v4551_v27 = vsel %vm9493_vm8, %v4520_v6, %v4550_v49 }
 0x373   :  { %v4590_v21 = vrot.slane %v4589_v29, 4  ;;  %v2139_v23 = vadd.f32 %v10300_v4, %v1911_v16  ;;  %7857 = vmatmul.msk.bf16.gmra.mxu0 %vm904_vm4, %v8465_v7  ;;  %4552 = vst [vmem:[#allocation3 + $0xb0] sm:$0xf] %v4551_v27  ;;  %v8466_v7 = vld [vmem:[%s12598_s0 + $0x1b0] sm:$0xff]  ;;  %v4528_v16 = vor.u32 %v4526_v11, %v4525_v63 }
 0x375   :  { %v4611_v3 = vsel %vm9424_vm15, %v4590_v21, %v4610_v39  ;;  %v2363_v31 = vmax.f32 %v2139_v23, 0.0  ;;  %v4521_v21 = vrot.slane %v4517_v2, 4  ;;  %v8467_v2 = vld [vmem:[%s12598_s0 + $0x1b8] sm:$0xff] }
 0x376   :  { %4612 = vst [vmem:[#allocation3 + $0xbc] sm:$0x7] %v4611_v3 }
 0x377   :  { %2588 = vst.msk [vmem:[#allocation2 + $0x2d0] sm:$0xff] %vm2497_vm5, %v2363_v31  ;;  %v4529_v3 = vsel %vm9498_vm11, %v4521_v21, %v4528_v16 }
 0x378   :  { %v1484_v53 = vpop.f32.mrf.mxu0 }
 0x379   :  { %v1912_v15 = vmul.f32 %v10297_v9, %v1484_v53  ;;  %v4554_v53 = vsel %vm9514_vm12, %v4529_v3, %v4553_v34 }
 0x37a   :  { %4555 = vst [vmem:[#allocation3 + $0xb8] sm:$0xf] %v4554_v53  ;;  %v10467_v53 = vpop.f32.mrf.mxu2 }
 0x37b   :  { %v2140_v52 = vadd.f32 %v10300_v4, %v1912_v15  ;;  %12762 = vst [vmem:[#allocation60_spill] sm:$0xff] %v10467_v53 }
 0x37d   :  { %v2364_v12 = vmax.f32 %v2140_v52, 0.0 }
 0x37f   :  { %2589 = vst.msk [vmem:[#allocation2 + $0x2d8] sm:$0xff] %vm2497_vm5, %v2364_v12  ;;  %v2876_v12 = vld [vmem:[#allocation2 + $0x2c0] ss:$2 sm:$0xff] }
 0x380   :  { %v1487_v38 = vpop.f32.mrf.mxu0 }
 0x381   :  { %v1913_v8 = vmul.f32 %v10297_v9, %v1487_v38 }
 0x383   :  { %v2141_v29 = vadd.f32 %v10300_v4, %v1913_v8  ;;  %7858 = vmatmul.msk.bf16.gmra.mxu0 %vm904_vm4, %v8466_v7  ;;  %v3100_v7 = vld [vmem:[#allocation2 + $0x2c1] ss:$2 sm:$0xff] }
 0x385   :  { %v2365_v39 = vmax.f32 %v2141_v29, 0.0  ;;  %v3279_v29 = vmax.f32 %v2876_v12, %v3100_v7 }
 0x387   :  { %2590 = vst.msk [vmem:[#allocation2 + $0x2e0] sm:$0xff] %vm2497_vm5, %v2365_v39 }
 0x388   :  { %v1489_v23 = vpop.f32.mrf.mxu0 }
 0x389   :  { %v1914_v31 = vmul.f32 %v10297_v9, %v1489_v23 }
 0x38b   :  { %v2142_v6 = vadd.f32 %v10300_v4, %v1914_v31 }
 0x38d   :  { %v2366_v15 = vmax.f32 %v2142_v6, 0.0 }
 0x38f   :  { %2591 = vst.msk [vmem:[#allocation2 + $0x2e8] sm:$0xff] %vm2497_vm5, %v2366_v15  ;;  %v4453_v11 = vpop.permute.xlu0 %4452  ;;  %v4720_v15 = vld [vmem:[#allocation3 + $0xbc] sm:$0x8] }
 0x390   :  { %4464 = vst.msk [vmem:[#allocation3 + $0xa0] sm:$0xf] %vm3427_vm1, %v4453_v11  ;;  %v1492_v49 = vpop.f32.mrf.mxu0  ;;  %v10469_v11 = vpop.f32.mrf.mxu1 }
 0x391   :  { %v1915_v52 = vmul.f32 %v10297_v9, %v1492_v49  ;;  %12763 = vst [vmem:[#allocation61_spill] sm:$0xff] %v10469_v11  ;;  %v8547_v11 = vld [vmem:[#allocation3 + $0xb4] sm:$0xf] }
 0x393   :  { %v2143_v27 = vadd.f32 %v10300_v4, %v1915_v52  ;;  %7859 = vmatmul.msk.bf16.gmra.mxu0 %vm904_vm4, %v8467_v2  ;;  %v8468_v52 = vld [vmem:[%s12598_s0 + $0x1c0] sm:$0xff] }
 0x395   :  { %v2367_v38 = vmax.f32 %v2143_v27, 0.0 }
 0x396   :  { %v2880_v63 = vld [vmem:[#allocation2 + $0x2e0] ss:$2 sm:$0xff]  ;;  %v3104_v8 = vld [vmem:[#allocation2 + $0x2e1] ss:$2 sm:$0xff] }
 0x397   :  { %2592 = vst.msk [vmem:[#allocation2 + $0x2f0] sm:$0xff] %vm2497_vm5, %v2367_v38  ;;  %v3281_v16 = vmax.f32 %v2880_v63, %v3104_v8  ;;  %v2878_v8 = vld [vmem:[#allocation2 + $0x2d0] ss:$2 sm:$0xff] }
 0x398   :  { %v1494_v39 = vpop.f32.mrf.mxu0 }
 0x399   :  { %v1916_v21 = vmul.f32 %v10297_v9, %v1494_v39  ;;  %v4620_v23 = vmax.f32 %v3279_v29, %v3281_v16  ;;  %v3102_v29 = vld [vmem:[#allocation2 + $0x2d1] ss:$2 sm:$0xff] }
 0x39b   :  { %v2144_v3 = vadd.f32 %v10300_v4, %v1916_v21  ;;  %v10462_v31 = vpack.c.bf16 %v4620_v23, %v4620_v23  ;;  %v5716_v23 = vpop.f32.mrf.mxu2 }
 0x39d   :  { %v2368_v6 = vmax.f32 %v2144_v3, 0.0  ;;  %4680 = vrot.lane.b32.xlu1 %v10462_v31, %s8808_s2  ;;  %v12608_v34 = vshll.u32 %v10462_v31, 16  ;;  %v4629_v38 = vshrl.u32 %v10462_v31, 16 }
 0x39f   :  { %2593 = vst.msk [vmem:[#allocation2 + $0x2f8] sm:$0xff] %vm2497_vm5, %v2368_v6  ;;  %v4696_v2 = vrot.slane %v12608_v34, 5  ;;  %v4455_v49 = vpop.permute.xlu1 %4454  ;;  %v4697_v3 = vrot.slane %v4629_v38, 4 }
 0x3a0   :  { %4465 = vst.msk [vmem:[#allocation3 + $0xa8] sm:$0x7] %vm3429_vm2, %v4455_v49  ;;  %v1497_v27 = vpop.f32.mrf.mxu0  ;;  %v7998_v49 = vld [vmem:[#allocation3 + $0xa0] sm:$0xf] }
 0x3a1   :  { %v4721_v12 = vsel %vm9191_vm10, %v4696_v2, %v4720_v15  ;;  %v1917_v7 = vmul.f32 %v10297_v9, %v1497_v27  ;;  %v3280_v15 = vmax.f32 %v2878_v8, %v3102_v29  ;;  %v4698_v8 = vor.u32 %v4697_v3, %v4696_v2 }
 0x3a2   :  { %4722 = vst [vmem:[#allocation3 + $0xbc] sm:$0x8] %v4721_v12 }
 0x3a3   :  { %7860 = vmatmul.msk.bf16.gmra.mxu0 %vm904_vm4, %v8468_v52  ;;  %v2145_v63 = vadd.f32 %v10300_v4, %v1917_v7 }
 0x3a5   :  { %v2369_v16 = vmax.f32 %v2145_v63, 0.0 }
 0x3a6   :  { %v2882_v39 = vld [vmem:[#allocation2 + $0x2f0] ss:$2 sm:$0xff]  ;;  %v3106_v21 = vld [vmem:[#allocation2 + $0x2f1] ss:$2 sm:$0xff] }
 0x3a7   :  { %v5555_v6 = vpop.f32.mrf.mxu1  ;;  %v8546_v34 = vld [vmem:[#allocation3 + $0xa4] sm:$0xf0]  ;;  %v3282_v12 = vmax.f32 %v2882_v39, %v3106_v21  ;;  %2594 = vst.msk [vmem:[#allocation2 + $0x300] sm:$0xff] %vm2497_vm5, %v2369_v16  ;;  %v4699_v21 = vrot.slane %v4698_v8, 4 }
 0x3a8   :  { %v10485_v27 = vadd.f32 %v5716_v23, %v5555_v6  ;;  %v1499_v53 = vpop.f32.mrf.mxu0  ;;  %v10487_v52 = vor.u32 %v8546_v34, %v7998_v49 }
 0x3a9   :  { %v1918_v7 = vmul.f32 %v10297_v9, %v1499_v53  ;;  %v8008_v63 = vld [vmem:[#allocation3 + $0xb8] sm:$0xf0]  ;;  %v4621_v1 = vmax.f32 %v3280_v15, %v3282_v12  ;;  %v4724_v15 = vld [vmem:[#allocation3 + $0xcc] sm:$0x7]  ;;  %v4631_v12 = vrot.slane %v4629_v38, 7 }
 0x3aa   :  { %12764 = vst [vmem:[#allocation62_spill] sm:$0xff] %v10485_v27  ;;  %5564 = vmatmul.bf16.gmra.mxu1 %v10487_v52  ;;  %5981 = vmatmul.bf16.gmra.mxu3 %v10487_v52  ;;  %v10492_v22 = vor.u32 %v8547_v11, %v8008_v63  ;;  %v8469_v11 = vld [vmem:[%s12598_s0 + $0x1c8] sm:$0xff] }
 0x3ab   :  { %12765 = vst [vmem:[#allocation63_spill] sm:$0xff] %v10487_v52  ;;  %v2146_v29 = vadd.f32 %v10300_v4, %v1918_v7  ;;  %v4625_v16 = vpack.c.bf16 %v4621_v1, %v4621_v1  ;;  %v10650_v27 = vld [vmem:[#allocation9] ss:$0 sm:$0xff] }
 0x3ac   :  { %12766 = vst [vmem:[#allocation64_spill] sm:$0xff] %v10492_v22  ;;  %8231 = vmatmul.msk.bf16.gmra.mxu2 %vm2497_vm5, %v10492_v22 }
 0x3ad   :  { %v2370_v34 = vmax.f32 %v2146_v29, 0.0  ;;  %4682 = vrot.lane.b32.xlu2 %v4625_v16, %s8808_s2  ;;  %v4637_v53 = vshrl.u32 %v4625_v16, 16  ;;  %v4640_v39 = vshll.u32 %v4625_v16, 16  ;;  %v12767_v16 = vshll.u32 %v10462_v31, 16  ;;  %v8470_v31 = vld [vmem:[%s12598_s0 + $0x1d0] sm:$0xff] }
 0x3af   :  { %2595 = vst.msk [vmem:[#allocation2 + $0x308] sm:$0xff] %vm2497_vm5, %v2370_v34  ;;  %v4700_v23 = vrot.slane %v4640_v39, 5  ;;  %v4702_v6 = vrot.slane %v4637_v53, 4  ;;  %v4634_v34 = vor.u32 %v12767_v16, %v4631_v12 }
 0x3b0   :  { %v1502_v2 = vpop.f32.mrf.mxu0 }
 0x3b1   :  { %v4701_v1 = vsel %vm9414_vm14, %v4699_v21, %v4700_v23  ;;  %v4703_v3 = vor.u32 %v4702_v6, %v4700_v23  ;;  %v1919_v49 = vmul.f32 %v10297_v9, %v1502_v2  ;;  %v4664_v6 = vld [vmem:[#allocation3 + $0xc0] sm:$0xf] }
 0x3b2   :  { %4723 = vst.msk [vmem:[#allocation3 + $0xc4] sm:$0xf] %vm3394_vm0, %v4701_v1 }
 0x3b3   :  { %v4704_v7 = vrot.slane %v4703_v3, 4  ;;  %v2147_v63 = vadd.f32 %v10300_v4, %v1919_v49  ;;  %7861 = vmatmul.msk.bf16.gmra.mxu0 %vm904_vm4, %v8469_v11  ;;  %v4665_v11 = vsel %vm9493_vm8, %v4634_v34, %v4664_v6  ;;  %v4639_v49 = vrot.slane %v4637_v53, 7  ;;  %v4667_v53 = vld [vmem:[#allocation3 + $0xc8] sm:$0xf] }
 0x3b4   :  { %4666 = vst [vmem:[#allocation3 + $0xc0] sm:$0xf] %v4665_v11 }
 0x3b5   :  { %v4725_v8 = vsel %vm9424_vm15, %v4704_v7, %v4724_v15  ;;  %v2371_v29 = vmax.f32 %v2147_v63, 0.0  ;;  %v4642_v63 = vor.u32 %v4640_v39, %v4639_v49  ;;  %v10534_v39 = vpop.f32.mrf.mxu1 }
 0x3b6   :  { %4726 = vst [vmem:[#allocation3 + $0xcc] sm:$0x7] %v4725_v8  ;;  %v3108_v49 = vld [vmem:[#allocation2 + $0x301] ss:$2 sm:$0xff] }
 0x3b7   :  { %2596 = vst.msk [vmem:[#allocation2 + $0x310] sm:$0xff] %vm2497_vm5, %v2371_v29  ;;  %v4567_v21 = vpop.permute.xlu2 %4566  ;;  %v4635_v29 = vrot.slane %v4631_v12, 4  ;;  %v8471_v12 = vld [vmem:[%s12598_s0 + $0x1d8] sm:$0xff] }
 0x3b8   :  { %4578 = vst.msk [vmem:[#allocation3 + $0xb0] sm:$0xf] %vm3427_vm1, %v4567_v21  ;;  %v1504_v23 = vpop.f32.mrf.mxu0 }
 0x3b9   :  { %v1920_v38 = vmul.f32 %v10297_v9, %v1504_v23  ;;  %v4643_v34 = vsel %vm9498_vm11, %v4635_v29, %v4642_v63  ;;  %12769 = vst [vmem:[#allocation66_spill] sm:$0xff] %v10534_v39 }
 0x3bb   :  { %v2148_v2 = vadd.f32 %v10300_v4, %v1920_v38  ;;  %v4668_v38 = vsel %vm9514_vm12, %v4643_v34, %v4667_v53 }
 0x3bc   :  { %4669 = vst [vmem:[#allocation3 + $0xc8] sm:$0xf] %v4668_v38 }
 0x3bd   :  { %v2372_v1 = vmax.f32 %v2148_v2, 0.0  ;;  %v10532_v2 = vpop.f32.mrf.mxu2 }
 0x3be   :  { %12768 = vst [vmem:[#allocation65_spill] sm:$0xff] %v10532_v2 }
 0x3bf   :  { %2597 = vst.msk [vmem:[#allocation2 + $0x318] sm:$0xff] %vm2497_vm5, %v2372_v1 }
 0x3c0   :  { %v1507_v3 = vpop.f32.mrf.mxu0 }
 0x3c1   :  { %v1921_v15 = vmul.f32 %v10297_v9, %v1507_v3  ;;  %v2884_v3 = vld [vmem:[#allocation2 + $0x300] ss:$2 sm:$0xff] }
 0x3c3   :  { %v2149_v7 = vadd.f32 %v10300_v4, %v1921_v15  ;;  %7862 = vmatmul.msk.bf16.gmra.mxu0 %vm904_vm4, %v8470_v31 }
 0x3c5   :  { %v2373_v8 = vmax.f32 %v2149_v7, 0.0 }
 0x3c7   :  { %2598 = vst.msk [vmem:[#allocation2 + $0x320] sm:$0xff] %vm2497_vm5, %v2373_v8  ;;  %v5721_v8 = vpop.f32.mrf.mxu2 }
 0x3c8   :  { %v1509_v16 = vpop.f32.mrf.mxu0 }
 0x3c9   :  { %v1922_v21 = vmul.f32 %v10297_v9, %v1509_v16  ;;  %v3283_v16 = vmax.f32 %v2884_v3, %v3108_v49 }
 0x3cb   :  { %v2150_v23 = vadd.f32 %v10300_v4, %v1922_v21 }
 0x3cd   :  { %v2374_v6 = vmax.f32 %v2150_v23, 0.0 }
 0x3cf   :  { %2599 = vst.msk [vmem:[#allocation2 + $0x328] sm:$0xff] %vm2497_vm5, %v2374_v6 }
 0x3d0   :  { %v1512_v11 = vpop.f32.mrf.mxu0 }
 0x3d1   :  { %v1923_v1 = vmul.f32 %v10297_v9, %v1512_v11 }
 0x3d3   :  { %v2151_v31 = vadd.f32 %v10300_v4, %v1923_v1  ;;  %7863 = vmatmul.msk.bf16.gmra.mxu0 %vm904_vm4, %v8471_v12 }
 0x3d5   :  { %v2375_v15 = vmax.f32 %v2151_v31, 0.0  ;;  %v4834_v31 = vld [vmem:[#allocation3 + $0xcc] sm:$0x8] }
 0x3d6   :  { %v2888_v7 = vld [vmem:[#allocation2 + $0x320] ss:$2 sm:$0xff]  ;;  %v3112_v63 = vld [vmem:[#allocation2 + $0x321] ss:$2 sm:$0xff] }
 0x3d7   :  { %2600 = vst.msk [vmem:[#allocation2 + $0x330] sm:$0xff] %vm2497_vm5, %v2375_v15  ;;  %v5560_v29 = vpop.f32.mrf.mxu1  ;;  %v3285_v34 = vmax.f32 %v2888_v7, %v3112_v63  ;;  %v8472_v15 = vld [vmem:[%s12598_s0 + $0x1e0] sm:$0xff] }
 0x3d8   :  { %v10544_v21 = vadd.f32 %v5721_v8, %v5560_v29  ;;  %v1514_v23 = vpop.f32.mrf.mxu0 }
 0x3d9   :  { %v1924_v53 = vmul.f32 %v10297_v9, %v1514_v23  ;;  %v4734_v38 = vmax.f32 %v3283_v16, %v3285_v34  ;;  %v2886_v34 = vld [vmem:[#allocation2 + $0x310] ss:$2 sm:$0xff]  ;;  %v3110_v23 = vld [vmem:[#allocation2 + $0x311] ss:$2 sm:$0xff] }
 0x3da   :  { %12770 = vst [vmem:[#allocation67_spill] sm:$0xff] %v10544_v21  ;;  %v3284_v39 = vmax.f32 %v2886_v34, %v3110_v23 }
 0x3db   :  { %v2152_v6 = vadd.f32 %v10300_v4, %v1924_v53  ;;  %v10548_v12 = vpack.c.bf16 %v4734_v38, %v4734_v38 }
 0x3dd   :  { %v2376_v11 = vmax.f32 %v2152_v6, 0.0  ;;  %4794 = vrot.lane.b32.xlu0 %v10548_v12, %s8808_s2  ;;  %v4746_v1 = vshll.u32 %v10548_v12, 16  ;;  %v4743_v29 = vshrl.u32 %v10548_v12, 16 }
 0x3df   :  { %2601 = vst.msk [vmem:[#allocation2 + $0x338] sm:$0xff] %vm2497_vm5, %v2376_v11  ;;  %v4810_v3 = vrot.slane %v4746_v1, 5  ;;  %v4569_v49 = vpop.permute.xlu0 %4568  ;;  %v4811_v11 = vrot.slane %v4743_v29, 4 }
 0x3e0   :  { %4579 = vst.msk [vmem:[#allocation3 + $0xb8] sm:$0x7] %vm3429_vm2, %v4569_v49  ;;  %v1517_v7 = vpop.f32.mrf.mxu0  ;;  %v8006_v49 = vld [vmem:[#allocation3 + $0xb0] sm:$0xf] }
 0x3e1   :  { %v4835_v63 = vsel %vm9191_vm10, %v4810_v3, %v4834_v31  ;;  %v1925_v8 = vmul.f32 %v10297_v9, %v1517_v7  ;;  %v4812_v26 = vor.u32 %v4811_v11, %v4810_v3  ;;  %v8473_v3 = vld [vmem:[%s12598_s0 + $0x1e8] sm:$0xff] }
 0x3e2   :  { %4836 = vst [vmem:[#allocation3 + $0xcc] sm:$0x8] %v4835_v63 }
 0x3e3   :  { %7864 = vmatmul.msk.bf16.gmra.mxu0 %vm904_vm4, %v8472_v15  ;;  %v2153_v16 = vadd.f32 %v10300_v4, %v1925_v8  ;;  %v8549_v15 = vld [vmem:[#allocation3 + $0xc4] sm:$0xf] }
 0x3e5   :  { %v2377_v53 = vmax.f32 %v2153_v16, 0.0 }
 0x3e6   :  { %v2890_v38 = vld [vmem:[#allocation2 + $0x330] ss:$2 sm:$0xff]  ;;  %v3114_v6 = vld [vmem:[#allocation2 + $0x331] ss:$2 sm:$0xff] }
 0x3e7   :  { %v8548_v2 = vld [vmem:[#allocation3 + $0xb4] sm:$0xf0]  ;;  %v3286_v21 = vmax.f32 %v2890_v38, %v3114_v6  ;;  %2602 = vst.msk [vmem:[#allocation2 + $0x340] sm:$0xff] %vm2497_vm5, %v2377_v53  ;;  %v4813_v6 = vrot.slane %v4812_v26, 4 }
 0x3e8   :  { %v1519_v31 = vpop.f32.mrf.mxu0  ;;  %v10565_v7 = vor.u32 %v8548_v2, %v8006_v49 }
 0x3e9   :  { %v1926_v12 = vmul.f32 %v10297_v9, %v1519_v31  ;;  %v8016_v63 = vld [vmem:[#allocation3 + $0xc8] sm:$0xf0]  ;;  %v4735_v8 = vmax.f32 %v3284_v39, %v3286_v21 }
 0x3ea   :  { %12771 = vst [vmem:[#allocation68_spill] sm:$0xff] %v10565_v7  ;;  %5569 = vmatmul.bf16.gmra.mxu1 %v10565_v7  ;;  %5986 = vmatmul.bf16.gmra.mxu3 %v10565_v7  ;;  %v10570_v16 = vor.u32 %v8549_v15, %v8016_v63  ;;  %v4838_v15 = vld [vmem:[#allocation3 + $0xdc] sm:$0x7]  ;;  %v4745_v63 = vrot.slane %v4743_v29, 7 }
 0x3eb   :  { %v2154_v34 = vadd.f32 %v10300_v4, %v1926_v12  ;;  %v4739_v23 = vpack.c.bf16 %v4735_v8, %v4735_v8 }
 0x3ec   :  { %12772 = vst [vmem:[#allocation69_spill] sm:$0xff] %v10570_v16  ;;  %8232 = vmatmul.msk.bf16.gmra.mxu2 %vm2497_vm5, %v10570_v16 }
 0x3ed   :  { %v2378_v2 = vmax.f32 %v2154_v34, 0.0  ;;  %4796 = vrot.lane.b32.xlu1 %v4739_v23, %s8808_s2  ;;  %v4751_v53 = vshrl.u32 %v4739_v23, 16  ;;  %v4754_v38 = vshll.u32 %v4739_v23, 16 }
 0x3ef   :  { %2603 = vst.msk [vmem:[#allocation2 + $0x348] sm:$0xff] %vm2497_vm5, %v2378_v2  ;;  %v4814_v39 = vrot.slane %v4754_v38, 5  ;;  %v4816_v21 = vrot.slane %v4751_v53, 4  ;;  %v4748_v2 = vor.u32 %v4746_v1, %v4745_v63 }
 0x3f0   :  { %v1522_v11 = vpop.f32.mrf.mxu0 }
 0x3f1   :  { %v4815_v49 = vsel %vm9414_vm14, %v4813_v6, %v4814_v39  ;;  %v4817_v31 = vor.u32 %v4816_v21, %v4814_v39  ;;  %v1927_v12 = vmul.f32 %v10297_v9, %v1522_v11  ;;  %v4778_v21 = vld [vmem:[#allocation3 + $0xd0] sm:$0xf] }
 0x3f2   :  { %4837 = vst.msk [vmem:[#allocation3 + $0xd4] sm:$0xf] %vm3394_vm0, %v4815_v49  ;;  %v4779_v29 = vsel %vm9493_vm8, %v4748_v2, %v4778_v21  ;;  %v4781_v21 = vld [vmem:[#allocation3 + $0xd8] sm:$0xf] }
 0x3f3   :  { %v4818_v26 = vrot.slane %v4817_v31, 4  ;;  %v2155_v8 = vadd.f32 %v10300_v4, %v1927_v12  ;;  %7865 = vmatmul.msk.bf16.gmra.mxu0 %vm904_vm4, %v8473_v3  ;;  %4780 = vst [vmem:[#allocation3 + $0xd0] sm:$0xf] %v4779_v29  ;;  %v8474_v3 = vld [vmem:[%s12598_s0 + $0x1f0] sm:$0xff]  ;;  %v4753_v31 = vrot.slane %v4751_v53, 7  ;;  %v8475_v29 = vld [vmem:[%s12598_s0 + $0x1f8] sm:$0xff] }
 0x3f5   :  { %v4839_v34 = vsel %vm9424_vm15, %v4818_v26, %v4838_v15  ;;  %v2379_v23 = vmax.f32 %v2155_v8, 0.0  ;;  %v4756_v26 = vor.u32 %v4754_v38, %v4753_v31 }
 0x3f6   :  { %4840 = vst [vmem:[#allocation3 + $0xdc] sm:$0x7] %v4839_v34  ;;  %v4749_v34 = vrot.slane %v4745_v63, 4  ;;  %v2892_v31 = vld [vmem:[#allocation2 + $0x340] ss:$2 sm:$0xff] }
 0x3f7   :  { %2604 = vst.msk [vmem:[#allocation2 + $0x350] sm:$0xff] %vm2497_vm5, %v2379_v23 }
 0x3f8   :  { %v1524_v6 = vpop.f32.mrf.mxu0 }
 0x3f9   :  { %v1928_v39 = vmul.f32 %v10297_v9, %v1524_v6  ;;  %v4757_v6 = vsel %vm9498_vm11, %v4749_v34, %v4756_v26 }
 0x3fb   :  { %v2156_v11 = vadd.f32 %v10300_v4, %v1928_v39 }
 0x3fd   :  { %v2380_v49 = vmax.f32 %v2156_v11, 0.0  ;;  %v4782_v11 = vsel %vm9514_vm12, %v4757_v6, %v4781_v21 }
 0x3fe   :  { %4783 = vst [vmem:[#allocation3 + $0xd8] sm:$0xf] %v4782_v11 }
 0x3ff   :  { %2605 = vst.msk [vmem:[#allocation2 + $0x358] sm:$0xff] %vm2497_vm5, %v2380_v49 }
 0x400   :  { %v1527_v1 = vpop.f32.mrf.mxu0 }
 0x401   :  { %v1929_v12 = vmul.f32 %v10297_v9, %v1527_v1 }
 0x403   :  { %v2157_v15 = vadd.f32 %v10300_v4, %v1929_v12  ;;  %7866 = vmatmul.msk.bf16.gmra.mxu0 %vm904_vm4, %v8474_v3  ;;  %v3116_v12 = vld [vmem:[#allocation2 + $0x341] ss:$2 sm:$0xff] }
 0x405   :  { %v2381_v8 = vmax.f32 %v2157_v15, 0.0 }
 0x407   :  { %2606 = vst.msk [vmem:[#allocation2 + $0x360] sm:$0xff] %vm2497_vm5, %v2381_v8  ;;  %v4683_v23 = vpop.permute.xlu2 %4682 }
 0x408   :  { %4693 = vst.msk [vmem:[#allocation3 + $0xc8] sm:$0x7] %vm3429_vm2, %v4683_v23  ;;  %v1529_v2 = vpop.f32.mrf.mxu0 }
 0x409   :  { %v1930_v53 = vmul.f32 %v10297_v9, %v1529_v2  ;;  %v3287_v2 = vmax.f32 %v2892_v31, %v3116_v12  ;;  %v10630_v31 = vpop.f32.mrf.mxu1 }
 0x40a   :  { %12775 = vst [vmem:[#allocation72_spill] sm:$0xff] %v10630_v31 }
 0x40b   :  { %v2158_v39 = vadd.f32 %v10300_v4, %v1930_v53 }
 0x40d   :  { %v2382_v38 = vmax.f32 %v2158_v39, 0.0 }
 0x40f   :  { %2607 = vst.msk [vmem:[#allocation2 + $0x368] sm:$0xff] %vm2497_vm5, %v2382_v38  ;;  %v4681_v63 = vpop.permute.xlu1 %4680  ;;  %v8550_v23 = vld [vmem:[#allocation3 + $0xc4] sm:$0xf0] }
 0x410   :  { %4692 = vst.msk [vmem:[#allocation3 + $0xc0] sm:$0xf] %vm3427_vm1, %v4681_v63  ;;  %v1532_v49 = vpop.f32.mrf.mxu0 }
 0x411   :  { %v1931_v3 = vmul.f32 %v10297_v9, %v1532_v49 }
 0x413   :  { %v2159_v1 = vadd.f32 %v10300_v4, %v1931_v3  ;;  %7867 = vmatmul.msk.bf16.gmra.mxu0 %vm904_vm4, %v8475_v29  ;;  %v4948_v3 = vld [vmem:[#allocation3 + $0xdc] sm:$0x8] }
 0x415   :  { %v2383_v15 = vmax.f32 %v2159_v1, 0.0  ;;  %v10628_v1 = vpop.f32.mrf.mxu2 }
 0x416   :  { %v2896_v26 = vld [vmem:[#allocation2 + $0x360] ss:$2 sm:$0xff]  ;;  %v3120_v8 = vld [vmem:[#allocation2 + $0x361] ss:$2 sm:$0xff]  ;;  %12774 = vst [vmem:[#allocation71_spill] sm:$0xff] %v10628_v1 }
 0x417   :  { %2608 = vst.msk [vmem:[#allocation2 + $0x370] sm:$0xff] %vm2497_vm5, %v2383_v15  ;;  %v8014_v34 = vld [vmem:[#allocation3 + $0xc0] sm:$0xf]  ;;  %v3289_v6 = vmax.f32 %v2896_v26, %v3120_v8 }
 0x418   :  { %v1534_v53 = vpop.f32.mrf.mxu0  ;;  %v10617_v39 = vor.u32 %v8550_v23, %v8014_v34  ;;  %v8476_v15 = vld [vmem:[%s12598_s0 + $0x200] sm:$0xff] }
 0x419   :  { %v1932_v21 = vmul.f32 %v10297_v9, %v1534_v53  ;;  %v4848_v11 = vmax.f32 %v3287_v2, %v3289_v6  ;;  %v2894_v6 = vld [vmem:[#allocation2 + $0x350] ss:$2 sm:$0xff]  ;;  %v3118_v53 = vld [vmem:[#allocation2 + $0x351] ss:$2 sm:$0xff] }
 0x41a   :  { %12773 = vst [vmem:[#allocation70_spill] sm:$0xff] %v10617_v39  ;;  %5574 = vmatmul.bf16.gmra.mxu1 %v10617_v39  ;;  %5991 = vmatmul.bf16.gmra.mxu3 %v10617_v39  ;;  %v3288_v39 = vmax.f32 %v2894_v6, %v3118_v53 }
 0x41b   :  { %v2160_v38 = vadd.f32 %v10300_v4, %v1932_v21  ;;  %v10623_v63 = vpack.c.bf16 %v4848_v11, %v4848_v11 }
 0x41d   :  { %v2384_v29 = vmax.f32 %v2160_v38, 0.0  ;;  %4908 = vrot.lane.b32.xlu2 %v10623_v63, %s8808_s2  ;;  %v4860_v49 = vshll.u32 %v10623_v63, 16  ;;  %v4857_v23 = vshrl.u32 %v10623_v63, 16  ;;  %v10645_v63 = vld [vmem:[#allocation7] ss:$0 sm:$0xff] }
 0x41f   :  { %2609 = vst.msk [vmem:[#allocation2 + $0x378] sm:$0xff] %vm2497_vm5, %v2384_v29  ;;  %v4924_v12 = vrot.slane %v4860_v49, 5  ;;  %v5726_v29 = vpop.f32.mrf.mxu2  ;;  %v4925_v1 = vrot.slane %v4857_v23, 4 }
 0x420   :  { %v1537_v26 = vpop.f32.mrf.mxu0 }
 0x421   :  { %v4949_v8 = vsel %vm9191_vm10, %v4924_v12, %v4948_v3  ;;  %v1933_v34 = vmul.f32 %v10297_v9, %v1537_v26 }
 0x422   :  { %4950 = vst [vmem:[#allocation3 + $0xdc] sm:$0x8] %v4949_v8 }
 0x423   :  { %7868 = vmatmul.msk.bf16.gmra.mxu0 %vm904_vm4, %v8476_v15  ;;  %v2161_v2 = vadd.f32 %v10300_v4, %v1933_v34  ;;  %v8551_v4 = vld [vmem:[#allocation3 + $0xd4] sm:$0xf] }
 0x425   :  { %v2385_v21 = vmax.f32 %v2161_v2, 0.0  ;;  %v4926_v2 = vor.u32 %v4925_v1, %v4924_v12  ;;  %v8477_v1 = vld [vmem:[%s12598_s0 + $0x208] sm:$0xff] }
 0x426   :  { %v2898_v11 = vld [vmem:[#allocation2 + $0x370] ss:$2 sm:$0xff]  ;;  %v3122_v38 = vld [vmem:[#allocation2 + $0x371] ss:$2 sm:$0xff] }
 0x427   :  { %v5565_v31 = vpop.f32.mrf.mxu1  ;;  %v3290_v36 = vmax.f32 %v2898_v11, %v3122_v38  ;;  %2610 = vst.msk [vmem:[#allocation2 + $0x380] sm:$0xff] %vm2497_vm5, %v2385_v21  ;;  %v4927_v38 = vrot.slane %v4926_v2, 4  ;;  %v10719_v7 = vpop.f32.mrf.mxu2 }
 0x428   :  { %v10643_v3 = vadd.f32 %v5726_v29, %v5565_v31  ;;  %v1539_v9 = vpop.f32.mrf.mxu0  ;;  %12784 = vst [vmem:[#allocation81_spill] sm:$0xff] %v10719_v7 }
 0x429   :  { %v1934_v15 = vmul.f32 %v10645_v63, %v1539_v9  ;;  %v8024_v26 = vld [vmem:[#allocation3 + $0xd8] sm:$0xf0]  ;;  %v4849_v8 = vmax.f32 %v3288_v39, %v3290_v36 }
 0x42a   :  { %12776 = vst [vmem:[#allocation73_spill] sm:$0xff] %v10643_v3  ;;  %v10648_v34 = vor.u32 %v8551_v4, %v8024_v26  ;;  %v4952_v4 = vld [vmem:[#allocation3 + $0xec] sm:$0x7]  ;;  %v4859_v26 = vrot.slane %v4857_v23, 7 }
 0x42b   :  { %v2162_v6 = vadd.f32 %v10650_v27, %v1934_v15  ;;  %v4853_v53 = vpack.c.bf16 %v4849_v8, %v4849_v8 }
 0x42c   :  { %12777 = vst [vmem:[#allocation74_spill] sm:$0xff] %v10648_v34  ;;  %8233 = vmatmul.msk.bf16.gmra.mxu2 %vm2497_vm5, %v10648_v34 }
 0x42d   :  { %v2386_v31 = vmax.f32 %v2162_v6, 0.0  ;;  %4910 = vrot.lane.b32.xlu0 %v4853_v53, %s8808_s2  ;;  %v4865_v21 = vshrl.u32 %v4853_v53, 16  ;;  %v4868_v11 = vshll.u32 %v4853_v53, 16 }
 0x42f   :  { %2611 = vst.msk [vmem:[#allocation2 + $0x388] sm:$0xff] %vm2497_vm5, %v2386_v31  ;;  %v4928_v36 = vrot.slane %v4868_v11, 5  ;;  %v4930_v39 = vrot.slane %v4865_v21, 4  ;;  %v4862_v31 = vor.u32 %v4860_v49, %v4859_v26  ;;  %v8478_v49 = vld [vmem:[%s12598_s0 + $0x210] sm:$0xff]  ;;  %v5731_v14 = vpop.f32.mrf.mxu2 }
 0x430   :  { %v1542_v12 = vpop.f32.mrf.mxu0 }
 0x431   :  { %v4929_v29 = vsel %vm9414_vm14, %v4927_v38, %v4928_v36  ;;  %v4931_v9 = vor.u32 %v4930_v39, %v4928_v36  ;;  %v1935_v15 = vmul.f32 %v10645_v63, %v1542_v12  ;;  %v4892_v39 = vld [vmem:[#allocation3 + $0xe0] sm:$0xf] }
 0x432   :  { %4951 = vst.msk [vmem:[#allocation3 + $0xe4] sm:$0xf] %vm3394_vm0, %v4929_v29  ;;  %v4893_v23 = vsel %vm9493_vm8, %v4862_v31, %v4892_v39 }
 0x433   :  { %v4932_v8 = vrot.slane %v4931_v9, 4  ;;  %v2163_v2 = vadd.f32 %v10650_v27, %v1935_v15  ;;  %7869 = vmatmul.msk.bf16.gmra.mxu0 %vm904_vm4, %v8477_v1  ;;  %4894 = vst [vmem:[#allocation3 + $0xe0] sm:$0xf] %v4893_v23 }
 0x435   :  { %v4953_v6 = vsel %vm9424_vm15, %v4932_v8, %v4952_v4  ;;  %v2387_v53 = vmax.f32 %v2163_v2, 0.0  ;;  %v4867_v8 = vrot.slane %v4865_v21, 7  ;;  %v8555_v21 = vld [vmem:[#allocation3 + $0xf4] sm:$0xf] }
 0x436   :  { %4954 = vst [vmem:[#allocation3 + $0xec] sm:$0x7] %v4953_v6  ;;  %v10682_v6 = vpop.f32.mrf.mxu3 }
 0x437   :  { %2612 = vst.msk [vmem:[#allocation2 + $0x390] sm:$0xff] %vm2497_vm5, %v2387_v53  ;;  %v4870_v31 = vor.u32 %v4868_v11, %v4867_v8  ;;  %v8479_v8 = vld [vmem:[%s12598_s0 + $0x218] sm:$0xff] }
 0x438   :  { %v1544_v38 = vpop.f32.mrf.mxu0  ;;  %12779 = vst [vmem:[#allocation76_spill] sm:$0xff] %v10682_v6 }
 0x439   :  { %v1936_v36 = vmul.f32 %v10645_v63, %v1544_v38  ;;  %v8553_v1 = vld [vmem:[#allocation3 + $0xe4] sm:$0xf] }
 0x43b   :  { %v2164_v12 = vadd.f32 %v10650_v27, %v1936_v36  ;;  %v4863_v36 = vrot.slane %v4859_v26, 4 }
 0x43d   :  { %v2388_v29 = vmax.f32 %v2164_v12, 0.0  ;;  %v8032_v9 = vld [vmem:[#allocation3 + $0xe8] sm:$0xf0]  ;;  %v4871_v12 = vsel %vm9498_vm11, %v4863_v36, %v4870_v31 }
 0x43e   :  { %v10673_v15 = vor.u32 %v8553_v1, %v8032_v9  ;;  %v4895_v9 = vld [vmem:[#allocation3 + $0xe8] sm:$0xf] }
 0x43f   :  { %2613 = vst.msk [vmem:[#allocation2 + $0x398] sm:$0xff] %vm2497_vm5, %v2388_v29  ;;  %v8040_v29 = vld [vmem:[#allocation3 + $0xf8] sm:$0xf0]  ;;  %v4896_v11 = vsel %vm9514_vm12, %v4871_v12, %v4895_v9  ;;  %v3124_v12 = vld [vmem:[#allocation2 + $0x381] ss:$2 sm:$0xff] }
 0x440   :  { %12778 = vst [vmem:[#allocation75_spill] sm:$0xff] %v10673_v15  ;;  %v1547_v4 = vpop.f32.mrf.mxu0  ;;  %8234 = vmatmul.msk.bf16.gmra.mxu2 %vm2497_vm5, %v10673_v15 }
 0x441   :  { %v1937_v2 = vmul.f32 %v10645_v63, %v1547_v4  ;;  %v10691_v4 = vpop.f32.mrf.mxu3  ;;  %4897 = vst [vmem:[#allocation3 + $0xe8] sm:$0xf] %v4896_v11 }
 0x442   :  { %12780 = vst [vmem:[#allocation77_spill] sm:$0xff] %v10691_v4 }
 0x443   :  { %v2165_v53 = vadd.f32 %v10650_v27, %v1937_v2  ;;  %7870 = vmatmul.msk.bf16.gmra.mxu0 %vm904_vm4, %v8478_v49  ;;  %v10693_v2 = vor.u32 %v8555_v21, %v8040_v29 }
 0x445   :  { %v2389_v38 = vmax.f32 %v2165_v53, 0.0  ;;  %12781 = vst [vmem:[#allocation78_spill] sm:$0xff] %v10693_v2 }
 0x447   :  { %2614 = vst.msk [vmem:[#allocation2 + $0x3a0] sm:$0xff] %vm2497_vm5, %v2389_v38 }
 0x448   :  { %v1549_v39 = vpop.f32.mrf.mxu0 }
 0x449   :  { %v1938_v23 = vmul.f32 %v10645_v63, %v1549_v39  ;;  %v10707_v36 = vpop.f32.mrf.mxu3  ;;  %v2900_v39 = vld [vmem:[#allocation2 + $0x380] ss:$2 sm:$0xff] }
 0x44a   :  { %12782 = vst [vmem:[#allocation79_spill] sm:$0xff] %v10707_v36  ;;  %v3214_v36 = vld [vmem:[#allocation2 + $0x651] ss:$2 sm:$0xff] }
 0x44b   :  { %v2166_v1 = vadd.f32 %v10650_v27, %v1938_v23 }
 0x44d   :  { %v2390_v26 = vmax.f32 %v2166_v1, 0.0  ;;  %v3291_v1 = vmax.f32 %v2900_v39, %v3124_v12  ;;  %v3473_v39 = vld [vmem:[#allocation3 + $0x10c] sm:$0x8]  ;;  %v10721_v12 = vpop.f32.mrf.mxu1 }
 0x44e   :  { %12785 = vst [vmem:[#allocation82_spill] sm:$0xff] %v10721_v12 }
 0x44f   :  { %2615 = vst.msk [vmem:[#allocation2 + $0x3a8] sm:$0xff] %vm2497_vm5, %v2390_v26  ;;  %v4795_v49 = vpop.permute.xlu0 %4794 }
 0x450   :  { %4806 = vst.msk [vmem:[#allocation3 + $0xd0] sm:$0xf] %vm3427_vm1, %v4795_v49  ;;  %v1552_v53 = vpop.f32.mrf.mxu0  ;;  %8235 = vmatmul.msk.bf16.gmra.mxu2 %vm2497_vm5, %v10693_v2 }
 0x451   :  { %v1939_v31 = vmul.f32 %v10645_v63, %v1552_v53  ;;  %v10717_v3 = vpop.f32.mrf.mxu3 }
 0x452   :  { %12783 = vst [vmem:[#allocation80_spill] sm:$0xff] %v10717_v3 }
 0x453   :  { %v2167_v38 = vadd.f32 %v10650_v27, %v1939_v31  ;;  %7871 = vmatmul.msk.bf16.gmra.mxu0 %vm904_vm4, %v8479_v8 }
 0x455   :  { %v2391_v23 = vmax.f32 %v2167_v38, 0.0 }
 0x456   :  { %v2904_v21 = vld [vmem:[#allocation2 + $0x3a0] ss:$2 sm:$0xff]  ;;  %v3128_v29 = vld [vmem:[#allocation2 + $0x3a1] ss:$2 sm:$0xff] }
 0x457   :  { %2616 = vst.msk [vmem:[#allocation2 + $0x3b0] sm:$0xff] %vm2497_vm5, %v2391_v23  ;;  %v3293_v9 = vmax.f32 %v2904_v21, %v3128_v29  ;;  %v8480_v29 = vld [vmem:[%s12598_s0 + $0x220] sm:$0xff] }
 0x458   :  { %v1554_v11 = vpop.f32.mrf.mxu0 }
 0x459   :  { %v1940_v26 = vmul.f32 %v10645_v63, %v1554_v11  ;;  %v3349_v49 = vmax.f32 %v3291_v1, %v3293_v9  ;;  %v10736_v7 = vpop.f32.mrf.mxu3 }
 0x45a   :  { %12786 = vst [vmem:[#allocation83_spill] sm:$0xff] %v10736_v7 }
 0x45b   :  { %v2168_v53 = vadd.f32 %v10650_v27, %v1940_v26  ;;  %v10712_v31 = vpack.c.bf16 %v3349_v49, %v3349_v49 }
 0x45d   :  { %v2392_v8 = vmax.f32 %v2168_v53, 0.0  ;;  %3419 = vrot.lane.b32.xlu1 %v10712_v31, %s8808_s2  ;;  %v12611_v38 = vshll.u32 %v10712_v31, 16  ;;  %v3375_v26 = vshrl.u32 %v10712_v31, 16  ;;  %v2902_v53 = vld [vmem:[#allocation2 + $0x390] ss:$2 sm:$0xff] }
 0x45f   :  { %2617 = vst.msk [vmem:[#allocation2 + $0x3b8] sm:$0xff] %vm2497_vm5, %v2392_v8  ;;  %v3444_v23 = vrot.slane %v12611_v38, 5  ;;  %v4797_v21 = vpop.permute.xlu1 %4796  ;;  %v3126_v8 = vld [vmem:[#allocation2 + $0x391] ss:$2 sm:$0xff]  ;;  %v8557_v38 = vld [vmem:[#allocation3 + $0x104] sm:$0xf] }
 0x460   :  { %4807 = vst.msk [vmem:[#allocation3 + $0xd8] sm:$0x7] %vm3429_vm2, %v4797_v21  ;;  %v1557_v1 = vpop.f32.mrf.mxu0  ;;  %v3445_v13 = vrot.slane %v3375_v26, 4 }
 0x461   :  { %v3474_v9 = vsel %vm9191_vm10, %v3444_v23, %v3473_v39  ;;  %v1941_v11 = vmul.f32 %v10645_v63, %v1557_v1  ;;  %v3292_v1 = vmax.f32 %v2902_v53, %v3126_v8 }
 0x462   :  { %3475 = vst [vmem:[#allocation3 + $0x10c] sm:$0x8] %v3474_v9  ;;  %v8022_v9 = vld [vmem:[#allocation3 + $0xd0] sm:$0xf]  ;;  %v3446_v46 = vor.u32 %v3445_v13, %v3444_v23  ;;  %v10761_v23 = vpop.f32.mrf.mxu3 }
 0x463   :  { %7872 = vmatmul.msk.bf16.gmra.mxu0 %vm904_vm4, %v8480_v29  ;;  %v2169_v49 = vadd.f32 %v10650_v27, %v1941_v11  ;;  %12790 = vst [vmem:[#allocation87_spill] sm:$0xff] %v10761_v23  ;;  %v2972_v23 = vld [vmem:[#allocation2 + $0x5c0] ss:$2 sm:$0xff] }
 0x465   :  { %v2393_v12 = vmax.f32 %v2169_v49, 0.0 }
 0x466   :  { %v2906_v21 = vld [vmem:[#allocation2 + $0x3b0] ss:$2 sm:$0xff]  ;;  %v3130_v3 = vld [vmem:[#allocation2 + $0x3b1] ss:$2 sm:$0xff] }
 0x467   :  { %v5570_v39 = vpop.f32.mrf.mxu1  ;;  %v8552_v4 = vld [vmem:[#allocation3 + $0xd4] sm:$0xf0]  ;;  %v3294_v61 = vmax.f32 %v2906_v21, %v3130_v3  ;;  %2618 = vst.msk [vmem:[#allocation2 + $0x3c0] sm:$0xff] %vm2497_vm5, %v2393_v12  ;;  %v3447_v12 = vrot.slane %v3446_v46, 4  ;;  %v10767_v46 = vrot.slane %v3375_v26, 7 }
 0x468   :  { %v10739_v29 = vadd.f32 %v5731_v14, %v5570_v39  ;;  %v1559_v11 = vpop.f32.mrf.mxu0  ;;  %v10741_v52 = vor.u32 %v8552_v4, %v8022_v9  ;;  %v3477_v9 = vld [vmem:[#allocation3 + $0x11c] sm:$0x7] }
 0x469   :  { %v1942_v41 = vmul.f32 %v10645_v63, %v1559_v11  ;;  %v8048_v2 = vld [vmem:[#allocation3 + $0x108] sm:$0xf0]  ;;  %v3350_v49 = vmax.f32 %v3292_v1, %v3294_v61 }
 0x46a   :  { %12787 = vst [vmem:[#allocation84_spill] sm:$0xff] %v10739_v29  ;;  %5579 = vmatmul.bf16.gmra.mxu1 %v10741_v52  ;;  %5996 = vmatmul.bf16.gmra.mxu3 %v10741_v52  ;;  %v10746_v40 = vor.u32 %v8557_v38, %v8048_v2  ;;  %v3170_v29 = vld [vmem:[#allocation2 + $0x4f1] ss:$2 sm:$0xff] }
 0x46b   :  { %12788 = vst [vmem:[#allocation85_spill] sm:$0xff] %v10741_v52  ;;  %v2170_v3 = vadd.f32 %v10650_v27, %v1942_v41  ;;  %v10749_v53 = vpack.c.bf16 %v3350_v49, %v3350_v49  ;;  %v8481_v41 = vld [vmem:[%s12598_s0 + $0x228] sm:$0xff] }
 0x46c   :  { %12789 = vst [vmem:[#allocation86_spill] sm:$0xff] %v10746_v40  ;;  %8236 = vmatmul.msk.bf16.gmra.mxu2 %vm2497_vm5, %v10746_v40 }
 0x46d   :  { %v2394_v14 = vmax.f32 %v2170_v3, 0.0  ;;  %3421 = vrot.lane.b32.xlu2 %v10749_v53, %s8808_s2  ;;  %v3383_v61 = vshrl.u32 %v10749_v53, 16  ;;  %v3386_v4 = vshll.u32 %v10749_v53, 16  ;;  %v12791_v53 = vshll.u32 %v10712_v31, 16  ;;  %v2966_v31 = vld [vmem:[#allocation2 + $0x590] ss:$2 sm:$0xff] }
 0x46f   :  { %2619 = vst.msk [vmem:[#allocation2 + $0x3c8] sm:$0xff] %vm2497_vm5, %v2394_v14  ;;  %v3448_v2 = vrot.slane %v3386_v4, 5  ;;  %v3450_v13 = vrot.slane %v3383_v61, 4  ;;  %v3380_v14 = vor.u32 %v12791_v53, %v10767_v46 }
 0x470   :  { %v1562_v38 = vpop.f32.mrf.mxu0 }
 0x471   :  { %v3449_v8 = vsel %vm9414_vm14, %v3447_v12, %v3448_v2  ;;  %v3451_v21 = vor.u32 %v3450_v13, %v3448_v2  ;;  %v1943_v39 = vmul.f32 %v10645_v63, %v1562_v38  ;;  %v10778_v2 = vpop.f32.mrf.mxu3 }
 0x472   :  { %3476 = vst.msk [vmem:[#allocation3 + $0x114] sm:$0xf] %vm3394_vm0, %v3449_v8 }
 0x473   :  { %v3452_v1 = vrot.slane %v3451_v21, 4  ;;  %v2171_v11 = vadd.f32 %v10650_v27, %v1943_v39  ;;  %7873 = vmatmul.msk.bf16.gmra.mxu0 %vm904_vm4, %v8481_v41  ;;  %12792 = vst [vmem:[#allocation88_spill] sm:$0xff] %v10778_v2  ;;  %v3405_v41 = vld [vmem:[#allocation3 + $0x110] sm:$0xf] }
 0x474   :  { %v3406_v8 = vsel %vm9493_vm8, %v3380_v14, %v3405_v41  ;;  %v2970_v39 = vld [vmem:[#allocation2 + $0x5b0] ss:$2 sm:$0xff] }
 0x475   :  { %v3478_v49 = vsel %vm9424_vm15, %v3452_v1, %v3477_v9  ;;  %v2395_v3 = vmax.f32 %v2171_v11, 0.0  ;;  %3407 = vst [vmem:[#allocation3 + $0x110] sm:$0xf] %v3406_v8  ;;  %v3190_v9 = vld [vmem:[#allocation2 + $0x591] ss:$2 sm:$0xff] }
 0x476   :  { %3479 = vst [vmem:[#allocation3 + $0x11c] sm:$0x7] %v3478_v49  ;;  %v3194_v1 = vld [vmem:[#allocation2 + $0x5b1] ss:$2 sm:$0xff]  ;;  %v8624_v49 = vld [vmem:[#allocation10 + $0x118] sm:$0xff] }
 0x477   :  { %2620 = vst.msk [vmem:[#allocation2 + $0x3d0] sm:$0xff] %vm2497_vm5, %v2395_v3  ;;  %v4909_v12 = vpop.permute.xlu2 %4908  ;;  %v8482_v11 = vld [vmem:[%s12598_s0 + $0x230] sm:$0xff]  ;;  %v3324_v3 = vmax.f32 %v2966_v31, %v3190_v9  ;;  %v3326_v53 = vmax.f32 %v2970_v39, %v3194_v1  ;;  %6565 = vmatpush.bf16.msra.mxu3 %v8624_v49  ;;  %v3196_v39 = vld [vmem:[#allocation2 + $0x5c1] ss:$2 sm:$0xff] }
 0x478   :  { %4920 = vst.msk [vmem:[#allocation3 + $0xe0] sm:$0xf] %vm3427_vm1, %v4909_v12  ;;  %v1564_v26 = vpop.f32.mrf.mxu0  ;;  %v3385_v12 = vrot.slane %v3383_v61, 7  ;;  %v2942_v14 = vld [vmem:[#allocation2 + $0x4d0] ss:$2 sm:$0xff]  ;;  %v3327_v49 = vmax.f32 %v2972_v23, %v3196_v39 }
 0x479   :  { %v1944_v13 = vmul.f32 %v10645_v63, %v1564_v26  ;;  %v2946_v41 = vld [vmem:[#allocation2 + $0x4f0] ss:$2 sm:$0xff]  ;;  %v4281_v8 = vmax.f32 %v3324_v3, %v3326_v53  ;;  %v10789_v40 = vpop.f32.mrf.mxu3  ;;  %v3200_v9 = vld [vmem:[#allocation2 + $0x5e1] ss:$2 sm:$0xff]  ;;  %v2968_v3 = vld [vmem:[#allocation2 + $0x5a0] ss:$2 sm:$0xff] }
 0x47a   :  { %12793 = vst [vmem:[#allocation89_spill] sm:$0xff] %v10789_v40  ;;  %v3314_v31 = vmax.f32 %v2946_v41, %v3170_v29  ;;  %v3388_v1 = vor.u32 %v3386_v4, %v3385_v12  ;;  %v3188_v53 = vld [vmem:[#allocation2 + $0x581] ss:$2 sm:$0xff] }
 0x47b   :  { %v2172_v38 = vadd.f32 %v10650_v27, %v1944_v13  ;;  %v10793_v61 = vpack.c.bf16 %v4281_v8, %v4281_v8  ;;  %v8620_v8 = vld [vmem:[#allocation10 + $0xf8] sm:$0xff] }
 0x47c   :  { %6400 = vmatpush.bf16.msra.mxu1 %v8620_v8 }
 0x47d   :  { %v2396_v21 = vmax.f32 %v2172_v38, 0.0  ;;  %v3166_v38 = vld [vmem:[#allocation2 + $0x4d1] ss:$2 sm:$0xff]  ;;  %v12623_v33 = vshrl.u32 %v10793_v61, 16  ;;  %v12622_v40 = vshll.u32 %v10793_v61, 16 }
 0x47e   :  { %v3312_v52 = vmax.f32 %v2942_v14, %v3166_v38 }
 0x47f   :  { %2621 = vst.msk [vmem:[#allocation2 + $0x3d8] sm:$0xff] %vm2497_vm5, %v2396_v21  ;;  %v2976_v21 = vld [vmem:[#allocation2 + $0x5e0] ss:$2 sm:$0xff]  ;;  %v10803_v4 = vrot.slane %v12622_v40, 5 }
 0x480   :  { %v1567_v26 = vpop.f32.mrf.mxu0  ;;  %v3939_v38 = vmax.f32 %v3312_v52, %v3314_v31  ;;  %v2948_v52 = vld [vmem:[#allocation2 + $0x500] ss:$2 sm:$0xff] }
 0x481   :  { %v1945_v13 = vmul.f32 %v10645_v63, %v1567_v26  ;;  %v3329_v26 = vmax.f32 %v2976_v21, %v3200_v9  ;;  %v2952_v21 = vld [vmem:[#allocation2 + $0x520] ss:$2 sm:$0xff] }
 0x482   :  { %v10799_v41 = vpack.c.bf16 %v3939_v38, %v3939_v38 }
 0x483   :  { %v2173_v15 = vadd.f32 %v10650_v27, %v1945_v13  ;;  %7874 = vmatmul.msk.bf16.gmra.mxu0 %vm904_vm4, %v8482_v11  ;;  %v3192_v13 = vld [vmem:[#allocation2 + $0x5a1] ss:$2 sm:$0xff]  ;;  %v3381_v11 = vrot.slane %v10767_v46, 4  ;;  %v4394_v29 = vmax.f32 %v3327_v49, %v3329_v26  ;;  %v3323_v46 = vmax.f32 %v2964_v56, %v3188_v53 }
 0x484   :  { %v3325_v31 = vmax.f32 %v2968_v3, %v3192_v13  ;;  %v3969_v9 = vshrl.u32 %v10799_v41, 16  ;;  %v3172_v26 = vld [vmem:[#allocation2 + $0x501] ss:$2 sm:$0xff]  ;;  %v3972_v40 = vshll.u32 %v10799_v41, 16  ;;  %v3408_v3 = vld [vmem:[#allocation3 + $0x118] sm:$0xf] }
 0x485   :  { %v2397_v14 = vmax.f32 %v2173_v15, 0.0  ;;  %v4369_v15 = vrot.slane %v12623_v33, 4  ;;  %v3389_v23 = vsel %vm9498_vm11, %v3381_v11, %v3388_v1  ;;  %v10812_v38 = vpack.c.bf16 %v4394_v29, %v4394_v29  ;;  %v10815_v11 = vpop.f32.mrf.mxu3 }
 0x486   :  { %v3315_v33 = vmax.f32 %v2948_v52, %v3172_v26  ;;  %12794 = vst [vmem:[#allocation90_spill] sm:$0xff] %v10815_v11  ;;  %v3971_v53 = vrot.slane %v3969_v9, 7  ;;  %v10820_v34 = vrot.slane %v3972_v40, 5  ;;  %v4027_v29 = vrot.slane %v3969_v9, 4  ;;  %v2956_v52 = vld [vmem:[#allocation2 + $0x540] ss:$2 sm:$0xff]  ;;  %v10830_v9 = vpop.f32.mrf.mxu2 }
 0x487   :  { %2622 = vst.msk [vmem:[#allocation2 + $0x3e0] sm:$0xff] %vm2497_vm5, %v2397_v14  ;;  %v4370_v49 = vor.u32 %v4369_v15, %v10803_v4  ;;  %v3176_v14 = vld [vmem:[#allocation2 + $0x521] ss:$2 sm:$0xff]  ;;  %v3409_v15 = vsel %vm9514_vm12, %v3389_v23, %v3408_v3  ;;  %v4280_v26 = vmax.f32 %v3323_v46, %v3325_v31  ;;  %v12797_v2 = vshll.u32 %v10812_v38, 16 }
 0x488   :  { %v1569_v12 = vpop.f32.mrf.mxu0  ;;  %v3317_v1 = vmax.f32 %v2952_v21, %v3176_v14  ;;  %3410 = vst [vmem:[#allocation3 + $0x118] sm:$0xf] %v3409_v15  ;;  %v10822_v25 = vor.u32 %v3972_v40, %v3971_v53  ;;  %v2960_v14 = vld [vmem:[#allocation2 + $0x560] ss:$2 sm:$0xff]  ;;  %v3184_v11 = vld [vmem:[#allocation2 + $0x561] ss:$2 sm:$0xff] }
 0x489   :  { %v1946_v39 = vmul.f32 %v10645_v63, %v1569_v12  ;;  %v4371_v13 = vrot.slane %v4370_v49, 4  ;;  %v4389_v12 = vld [vmem:[#allocation3 + $0x19c] sm:$0x7]  ;;  %v3180_v49 = vld [vmem:[#allocation2 + $0x541] ss:$2 sm:$0xff]  ;;  %12795 = vst [vmem:[#allocation91_spill] sm:$0xff] %v10830_v9 }
 0x48a   :  { %v4052_v59 = vmax.f32 %v3315_v33, %v3317_v1  ;;  %v10832_v33 = vpop.f32.mrf.mxu1  ;;  %v8483_v40 = vld [vmem:[%s12598_s0 + $0x238] sm:$0xff]  ;;  %v8612_v46 = vld [vmem:[#allocation10 + $0xb8] sm:$0xff]  ;;  %v3319_v31 = vmax.f32 %v2956_v52, %v3180_v49  ;;  %v3321_v1 = vmax.f32 %v2960_v14, %v3184_v11  ;;  %v4157_v9 = vld [vmem:[#allocation3 + $0x16c] sm:$0x8]  ;;  %v10844_v52 = vrot.slane %v12797_v2, 5 }
 0x48b   :  { %v2174_v56 = vadd.f32 %v10650_v27, %v1946_v39  ;;  %v4028_v39 = vor.u32 %v4027_v29, %v10820_v34  ;;  %v4390_v23 = vsel %vm9424_vm15, %v4371_v13, %v4389_v12  ;;  %12796 = vst [vmem:[#allocation92_spill] sm:$0xff] %v10832_v33  ;;  %v4499_v53 = vld [vmem:[#allocation3 + $0x19c] sm:$0x8]  ;;  %6090 = vmatpush.bf16.msra.mxu2 %v8612_v46  ;;  %v4047_v13 = vld [vmem:[#allocation3 + $0x16c] sm:$0x7] }
 0x48c   :  { %v10828_v3 = vpack.c.bf16 %v4052_v59, %v4052_v59  ;;  %v4166_v12 = vmax.f32 %v3319_v31, %v3321_v1  ;;  %4391 = vst [vmem:[#allocation3 + $0x19c] sm:$0x7] %v4390_v23  ;;  %v10839_v29 = vpack.c.bf16 %v4280_v26, %v4280_v26  ;;  %v2908_v21 = vld [vmem:[#allocation2 + $0x3c0] ss:$2 sm:$0xff]  ;;  %v2958_v33 = vld [vmem:[#allocation2 + $0x550] ss:$2 sm:$0xff] }
 0x48d   :  { %v2398_v8 = vmax.f32 %v2174_v56, 0.0  ;;  %v4029_v59 = vrot.slane %v4028_v39, 4  ;;  %v2962_v26 = vld [vmem:[#allocation2 + $0x570] ss:$2 sm:$0xff]  ;;  %v3182_v49 = vld [vmem:[#allocation2 + $0x551] ss:$2 sm:$0xff] }
 0x48e   :  { %v10850_v14 = vpack.c.bf16 %v4166_v12, %v4166_v12  ;;  %v3186_v23 = vld [vmem:[#allocation2 + $0x571] ss:$2 sm:$0xff]  ;;  %v3132_v46 = vld [vmem:[#allocation2 + $0x3c1] ss:$2 sm:$0xff]  ;;  %v3320_v2 = vmax.f32 %v2958_v33, %v3182_v49  ;;  %v5736_v49 = vpop.f32.mrf.mxu2 }
 0x48f   :  { %2623 = vst.msk [vmem:[#allocation2 + $0x3e8] sm:$0xff] %vm2497_vm5, %v2398_v8  ;;  %v12629_v8 = vshll.u32 %v10828_v3, 16  ;;  %v4048_v39 = vsel %vm9424_vm15, %v4029_v59, %v4047_v13  ;;  %v3322_v1 = vmax.f32 %v2962_v26, %v3186_v23  ;;  %v3295_v23 = vmax.f32 %v2908_v21, %v3132_v46 }
 0x490   :  { %v1572_v56 = vpop.f32.mrf.mxu0  ;;  %4049 = vst [vmem:[#allocation3 + $0x16c] sm:$0x7] %v4048_v39  ;;  %v12632_v59 = vshrl.u32 %v10850_v14, 16  ;;  %v12631_v13 = vshll.u32 %v10850_v14, 16 }
 0x491   :  { %v1947_v15 = vmul.f32 %v10645_v63, %v1572_v56  ;;  %v10854_v31 = vrot.slane %v12629_v8, 5  ;;  %v10859_v56 = vpop.f32.mrf.mxu3  ;;  %v4167_v26 = vmax.f32 %v3320_v2, %v3322_v1  ;;  %v12635_v2 = vshll.u32 %v10839_v29, 16 }
 0x492   :  { %12798 = vst [vmem:[#allocation93_spill] sm:$0xff] %v10859_v56  ;;  %v10870_v8 = vrot.slane %v12631_v13, 5  ;;  %v4250_v12 = vrot.slane %v12632_v59, 4 }
 0x493   :  { %v2175_v11 = vadd.f32 %v10650_v27, %v1947_v15  ;;  %7875 = vmatmul.msk.bf16.gmra.mxu0 %vm904_vm4, %v8483_v40  ;;  %v4500_v40 = vsel %vm9191_vm10, %v10844_v52, %v4499_v53  ;;  %v4158_v33 = vsel %vm9191_vm10, %v10854_v31, %v4157_v9  ;;  %v10876_v9 = vpack.c.bf16 %v4167_v26, %v4167_v26 }
 0x494   :  { %4501 = vst [vmem:[#allocation3 + $0x19c] sm:$0x8] %v4500_v40 }
 0x495   :  { %v2399_v15 = vmax.f32 %v2175_v11, 0.0  ;;  %4159 = vst [vmem:[#allocation3 + $0x16c] sm:$0x8] %v4158_v33  ;;  %v12634_v21 = vshrl.u32 %v10876_v9, 16  ;;  %v12633_v46 = vshll.u32 %v10876_v9, 16 }
 0x496   :  { %v2912_v39 = vld [vmem:[#allocation2 + $0x3e0] ss:$2 sm:$0xff]  ;;  %v3136_v16 = vld [vmem:[#allocation2 + $0x3e1] ss:$2 sm:$0xff] }
 0x497   :  { %2624 = vst.msk [vmem:[#allocation2 + $0x3f0] sm:$0xff] %vm2497_vm5, %v2399_v15  ;;  %v5575_v53 = vpop.f32.mrf.mxu1  ;;  %v3297_v11 = vmax.f32 %v2912_v39, %v3136_v16  ;;  %v4251_v16 = vor.u32 %v4250_v12, %v10870_v8  ;;  %v4363_v15 = vrot.slane %v12635_v2, 5  ;;  %v12800_v39 = vshrl.u32 %v10839_v29, 16 }
 0x498   :  { %v10874_v56 = vadd.f32 %v5736_v49, %v5575_v53  ;;  %v1574_v32 = vpop.f32.mrf.mxu0  ;;  %v4385_v53 = vld [vmem:[#allocation3 + $0x18c] sm:$0x8]  ;;  %v4255_v12 = vrot.slane %v12634_v21, 4 }
 0x499   :  { %v1948_v1 = vmul.f32 %v10645_v63, %v1574_v32  ;;  %v3482_v40 = vmax.f32 %v3295_v23, %v3297_v11  ;;  %v4364_v49 = vrot.slane %v12800_v39, 4  ;;  %v4252_v13 = vrot.slane %v4251_v16, 4  ;;  %v10896_v11 = vpop.f32.mrf.mxu3 }
 0x49a   :  { %12799 = vst [vmem:[#allocation94_spill] sm:$0xff] %v10874_v56  ;;  %v4253_v32 = vrot.slane %v12633_v46, 5  ;;  %v4386_v23 = vsel %vm9191_vm10, %v4363_v15, %v4385_v53  ;;  %v2910_v56 = vld [vmem:[#allocation2 + $0x3d0] ss:$2 sm:$0xff] }
 0x49b   :  { %v2176_v33 = vadd.f32 %v10650_v27, %v1948_v1  ;;  %v10888_v26 = vpack.c.bf16 %v3482_v40, %v3482_v40  ;;  %12801 = vst [vmem:[#allocation95_spill] sm:$0xff] %v10896_v11  ;;  %v3587_v40 = vld [vmem:[#allocation3 + $0x11c] sm:$0x8]  ;;  %v4365_v39 = vor.u32 %v4364_v49, %v4363_v15  ;;  %v2984_v49 = vld [vmem:[#allocation2 + $0x620] ss:$2 sm:$0xff] }
 0x49c   :  { %4387 = vst [vmem:[#allocation3 + $0x18c] sm:$0x8] %v4386_v23  ;;  %v4256_v16 = vor.u32 %v4255_v12, %v4253_v32  ;;  %v2980_v23 = vld [vmem:[#allocation2 + $0x600] ss:$2 sm:$0xff]  ;;  %v4254_v15 = vsel %vm9414_vm14, %v4252_v13, %v4253_v32  ;;  %v3204_v12 = vld [vmem:[#allocation2 + $0x601] ss:$2 sm:$0xff]  ;;  %v3333_v13 = vmax.f32 %v2984_v49, %v3208_v48 }
 0x49d   :  { %v2400_v59 = vmax.f32 %v2176_v33, 0.0  ;;  %3544 = vrot.lane.b32.xlu0 %v10888_v26, %s8808_s2  ;;  %v12636_v1 = vshll.u32 %v10888_v26, 16  ;;  %v8484_v33 = vld [vmem:[%s12598_s0 + $0x240] sm:$0xff]  ;;  %v3134_v11 = vld [vmem:[#allocation2 + $0x3d1] ss:$2 sm:$0xff]  ;;  %v3331_v7 = vmax.f32 %v2980_v23, %v3204_v12  ;;  %v4366_v22 = vrot.slane %v4365_v39, 4 }
 0x49e   :  { %v12802_v42 = vshrl.u32 %v10888_v26, 16  ;;  %4274 = vst.msk [vmem:[#allocation3 + $0x184] sm:$0xf] %vm3394_vm0, %v4254_v15  ;;  %v2990_v32 = vld [vmem:[#allocation2 + $0x650] ss:$2 sm:$0xff]  ;;  %v12803_v15 = vshrl.u32 %v10839_v29, 16  ;;  %v3296_v30 = vmax.f32 %v2910_v56, %v3134_v11  ;;  %v10944_v11 = vpop.f32.mrf.mxu2 }
 0x49f   :  { %2625 = vst.msk [vmem:[#allocation2 + $0x3f8] sm:$0xff] %vm2497_vm5, %v2400_v59  ;;  %v10905_v21 = vrot.slane %v12636_v1, 5  ;;  %v4911_v53 = vpop.permute.xlu0 %4910  ;;  %v4275_v1 = vld [vmem:[#allocation3 + $0x18c] sm:$0x7]  ;;  %v3218_v23 = vld [vmem:[#allocation2 + $0x671] ss:$2 sm:$0xff]  ;;  %v4508_v39 = vmax.f32 %v3331_v7, %v3333_v13  ;;  %v3336_v12 = vmax.f32 %v2990_v32, %v3214_v36 }
 0x4a0   :  { %4921 = vst.msk [vmem:[#allocation3 + $0xe8] sm:$0x7] %vm3429_vm2, %v4911_v53  ;;  %v1577_v2 = vpop.f32.mrf.mxu0  ;;  %v4257_v53 = vrot.slane %v4256_v16, 4  ;;  %v10919_v28 = vrot.slane %v12802_v42, 4  ;;  %v8030_v16 = vld [vmem:[#allocation3 + $0xe0] sm:$0xf] }
 0x4a1   :  { %v3588_v59 = vsel %vm9191_vm10, %v10905_v21, %v3587_v40  ;;  %v1949_v46 = vmul.f32 %v10645_v63, %v1577_v2  ;;  %v10928_v49 = vrot.slane %v12803_v15, 7  ;;  %v10935_v13 = vpack.c.bf16 %v4508_v39, %v4508_v39  ;;  %v2986_v32 = vld [vmem:[#allocation2 + $0x630] ss:$2 sm:$0xff]  ;;  %12807 = vst [vmem:[#allocation98_spill] sm:$0xff] %v10944_v11 }
 0x4a2   :  { %3589 = vst [vmem:[#allocation3 + $0x11c] sm:$0x8] %v3588_v59  ;;  %v4276_v2 = vsel %vm9424_vm15, %v4257_v53, %v4275_v1  ;;  %v2994_v59 = vld [vmem:[#allocation2 + $0x670] ss:$2 sm:$0xff]  ;;  %v10933_v1 = vpop.f32.mrf.mxu3 }
 0x4a3   :  { %7876 = vmatmul.msk.bf16.gmra.mxu0 %vm904_vm4, %v8484_v33  ;;  %v2177_v40 = vadd.f32 %v10650_v27, %v1949_v46  ;;  %4277 = vst [vmem:[#allocation3 + $0x18c] sm:$0x7] %v4276_v2  ;;  %v3338_v42 = vmax.f32 %v2994_v59, %v3218_v23  ;;  %v4368_v46 = vsel %vm9414_vm14, %v4366_v22, %v10803_v4  ;;  %v8559_v15 = vld [vmem:[#allocation3 + $0x114] sm:$0xf]  ;;  %v12806_v22 = vshrl.u32 %v10793_v61, 16 }
 0x4a4   :  { %12804 = vst [vmem:[#allocation96_spill] sm:$0xff] %v10933_v1  ;;  %v3567_v2 = vor.u32 %v10919_v28, %v10905_v21  ;;  %v3210_v1 = vld [vmem:[#allocation2 + $0x631] ss:$2 sm:$0xff]  ;;  %v12643_v28 = vshll.u32 %v10935_v13, 16 }
 0x4a5   :  { %v2401_v60 = vmax.f32 %v2177_v40, 0.0  ;;  %v4623_v36 = vmax.f32 %v3336_v12, %v3338_v42  ;;  %v3206_v40 = vld [vmem:[#allocation2 + $0x611] ss:$2 sm:$0xff]  ;;  %v4313_v4 = vrot.slane %v12806_v22, 7  ;;  %4388 = vst.msk [vmem:[#allocation3 + $0x194] sm:$0xf] %vm3394_vm0, %v4368_v46 }
 0x4a6   :  { %v2914_v33 = vld [vmem:[#allocation2 + $0x3f0] ss:$2 sm:$0xff]  ;;  %v3138_v48 = vld [vmem:[#allocation2 + $0x3f1] ss:$2 sm:$0xff]  ;;  %v3332_v56 = vmax.f32 %v2982_v37, %v3206_v40  ;;  %v3334_v37 = vmax.f32 %v2986_v32, %v3210_v1  ;;  %v3000_v40 = vld [vmem:[#allocation2 + $0x6a0] ss:$2 sm:$0xff] }
 0x4a7   :  { %v8554_v53 = vld [vmem:[#allocation3 + $0xe4] sm:$0xf0]  ;;  %v3298_v7 = vmax.f32 %v2914_v33, %v3138_v48  ;;  %2626 = vst.msk [vmem:[#allocation2 + $0x400] sm:$0xff] %vm2497_vm5, %v2401_v60  ;;  %v12644_v33 = vshrl.u32 %v10935_v13, 16  ;;  %v10954_v21 = vpack.c.bf16 %v4623_v36, %v4623_v36  ;;  %v12809_v1 = vshll.u32 %v10793_v61, 16 }
 0x4a8   :  { %v1579_v59 = vpop.f32.mrf.mxu0  ;;  %v10940_v23 = vor.u32 %v8554_v53, %v8030_v16  ;;  %v4309_v16 = vrot.slane %v10928_v49, 4  ;;  %v10962_v53 = vrot.slane %v12643_v28, 5  ;;  %v3220_v22 = vld [vmem:[#allocation2 + $0x681] ss:$2 sm:$0xff]  ;;  %v8120_v17 = vld [vmem:[#allocation3 + $0x198] sm:$0xf0] }
 0x4a9   :  { %v1950_v39 = vmul.f32 %v10645_v63, %v1579_v59  ;;  %v8056_v12 = vld [vmem:[#allocation3 + $0x118] sm:$0xf0]  ;;  %v3483_v42 = vmax.f32 %v3296_v30, %v3298_v7  ;;  %v4592_v46 = vrot.slane %v12644_v33, 4  ;;  %v2996_v7 = vld [vmem:[#allocation2 + $0x680] ss:$2 sm:$0xff]  ;;  %v4316_v36 = vor.u32 %v12809_v1, %v4313_v4 }
 0x4aa   :  { %12805 = vst [vmem:[#allocation97_spill] sm:$0xff] %v10940_v23  ;;  %5584 = vmatmul.bf16.gmra.mxu1 %v10940_v23  ;;  %6001 = vmatmul.bf16.gmra.mxu3 %v10940_v23  ;;  %v10952_v60 = vor.u32 %v8559_v15, %v8056_v12  ;;  %v12649_v32 = vshrl.u32 %v10954_v21, 16  ;;  %v12645_v59 = vshll.u32 %v10954_v21, 16  ;;  %v4509_v15 = vmax.f32 %v3332_v56, %v3334_v37 }
 0x4ab   :  { %v2178_v48 = vadd.f32 %v10650_v27, %v1950_v39  ;;  %v10958_v30 = vpack.c.bf16 %v3483_v42, %v3483_v42  ;;  %v3224_v39 = vld [vmem:[#allocation2 + $0x6a1] ss:$2 sm:$0xff]  ;;  %v3568_v12 = vrot.slane %v3567_v2, 4  ;;  %v4593_v11 = vor.u32 %v4592_v46, %v10962_v53  ;;  %v10985_v2 = vpop.f32.mrf.mxu3 }
 0x4ac   :  { %12808 = vst [vmem:[#allocation99_spill] sm:$0xff] %v10952_v60  ;;  %8237 = vmatmul.msk.bf16.gmra.mxu2 %vm2497_vm5, %v10952_v60  ;;  %v10979_v4 = vrot.slane %v12645_v59, 5  ;;  %v4711_v56 = vrot.slane %v12649_v32, 4  ;;  %v10983_v37 = vpack.c.bf16 %v4509_v15, %v4509_v15  ;;  %v8485_v46 = vld [vmem:[%s12598_s0 + $0x248] sm:$0xff]  ;;  %v3339_v59 = vmax.f32 %v2996_v7, %v3220_v22  ;;  %v10995_v60 = vld [vmem:[#allocation3 + $0x198] sm:$0xf] }
 0x4ad   :  { %v2402_v42 = vmax.f32 %v2178_v48, 0.0  ;;  %3546 = vrot.lane.b32.xlu1 %v10958_v30, %s8808_s2  ;;  %v12653_v28 = vshrl.u32 %v10958_v30, 16  ;;  %v12650_v33 = vshll.u32 %v10958_v30, 16  ;;  %12810 = vst [vmem:[#allocation100_spill] sm:$0xff] %v10985_v2  ;;  %v3341_v23 = vmax.f32 %v3000_v40, %v3224_v39  ;;  %v3591_v2 = vld [vmem:[#allocation3 + $0x12c] sm:$0x7] }
 0x4ae   :  { %v12811_v15 = vshrl.u32 %v10888_v26, 16  ;;  %v4712_v6 = vor.u32 %v4711_v56, %v10979_v4  ;;  %v4317_v5 = vsel %vm9498_vm11, %v4309_v16, %v4316_v36  ;;  %v3216_v56 = vld [vmem:[#allocation2 + $0x661] ss:$2 sm:$0xff]  ;;  %v12670_v55 = vshll.u32 %v10983_v37, 16 }
 0x4af   :  { %2627 = vst.msk [vmem:[#allocation2 + $0x408] sm:$0xff] %vm2497_vm5, %v2402_v42  ;;  %v3569_v48 = vrot.slane %v12650_v33, 5  ;;  %v3571_v1 = vrot.slane %v12653_v28, 4  ;;  %v2992_v28 = vld [vmem:[#allocation2 + $0x660] ss:$2 sm:$0xff]  ;;  %v11007_v22 = vpop.f32.mrf.mxu2  ;;  %v4594_v33 = vrot.slane %v4593_v11, 4  ;;  %v4736_v62 = vmax.f32 %v3339_v59, %v3341_v23 }
 0x4b0   :  { %v10999_v32 = vrot.slane %v12811_v15, 7  ;;  %v1582_v42 = vpop.f32.mrf.mxu0  ;;  %v8038_v15 = vld [vmem:[#allocation3 + $0xf0] sm:$0xf]  ;;  %v4713_v35 = vrot.slane %v4712_v6, 4  ;;  %v12812_v16 = vshrl.u32 %v10983_v37, 16  ;;  %v4332_v51 = vsel %vm9514_vm12, %v4317_v5, %v10995_v60 }
 0x4b1   :  { %v3570_v7 = vsel %vm9414_vm14, %v3568_v12, %v3569_v48  ;;  %v3572_v40 = vor.u32 %v3571_v1, %v3569_v48  ;;  %v1951_v39 = vmul.f32 %v10645_v63, %v1582_v42  ;;  %v2950_v1 = vld [vmem:[#allocation2 + $0x510] ss:$2 sm:$0xff]  ;;  %v3174_v11 = vld [vmem:[#allocation2 + $0x511] ss:$2 sm:$0xff]  ;;  %v3337_v57 = vmax.f32 %v2992_v28, %v3216_v56  ;;  %4333 = vst [vmem:[#allocation3 + $0x198] sm:$0xf] %v4332_v51 }
 0x4b2   :  { %3590 = vst.msk [vmem:[#allocation3 + $0x124] sm:$0xf] %vm3394_vm0, %v3570_v7  ;;  %v4597_v36 = vrot.slane %v12812_v16, 4  ;;  %v2954_v42 = vld [vmem:[#allocation2 + $0x530] ss:$2 sm:$0xff]  ;;  %v4732_v6 = vsel %vm9424_vm15, %v4713_v35, %v4731_v24  ;;  %v4595_v16 = vrot.slane %v12670_v55, 5  ;;  %v3316_v23 = vmax.f32 %v2950_v1, %v3174_v11 }
 0x4b3   :  { %v3573_v12 = vrot.slane %v3572_v40, 4  ;;  %v2179_v48 = vadd.f32 %v10650_v27, %v1951_v39  ;;  %7877 = vmatmul.msk.bf16.gmra.mxu0 %vm904_vm4, %v8485_v46  ;;  %v3178_v7 = vld [vmem:[#allocation2 + $0x531] ss:$2 sm:$0xff]  ;;  %v3335_v40 = vmax.f32 %v2988_v44, %v3212_v10  ;;  %4733 = vst [vmem:[#allocation3 + $0x1cc] sm:$0x7] %v4732_v6  ;;  %v11025_v5 = vor.u32 %v8556_v47, %v8038_v15 }
 0x4b4   :  { %v3318_v59 = vmax.f32 %v2954_v42, %v3178_v7  ;;  %v4596_v35 = vsel %vm9414_vm14, %v4594_v33, %v4595_v16  ;;  %v4598_v24 = vor.u32 %v4597_v36, %v4595_v16  ;;  %v11029_v60 = vpack.c.bf16 %v4736_v62, %v4736_v62  ;;  %v2974_v55 = vld [vmem:[#allocation2 + $0x5d0] ss:$2 sm:$0xff]  ;;  %v3198_v10 = vld [vmem:[#allocation2 + $0x5d1] ss:$2 sm:$0xff]  ;;  %v11037_v33 = vpop.f32.mrf.mxu3  ;;  %v3530_v42 = vld [vmem:[#allocation3 + $0x120] sm:$0xf] }
 0x4b5   :  { %v3592_v46 = vsel %vm9424_vm15, %v3573_v12, %v3591_v2  ;;  %v2403_v39 = vmax.f32 %v2179_v48, 0.0  ;;  %v12813_v44 = vshll.u32 %v10888_v26, 16  ;;  %v2978_v56 = vld [vmem:[#allocation2 + $0x5f0] ss:$2 sm:$0xff]  ;;  %v3202_v12 = vld [vmem:[#allocation2 + $0x5f1] ss:$2 sm:$0xff]  ;;  %v3328_v1 = vmax.f32 %v2974_v55, %v3198_v10 }
 0x4b6   :  { %3593 = vst [vmem:[#allocation3 + $0x12c] sm:$0x7] %v3592_v46  ;;  %v4053_v2 = vmax.f32 %v3316_v23, %v3318_v59  ;;  %v4417_v47 = vshrl.u32 %v10812_v38, 16  ;;  %v4599_v15 = vrot.slane %v4598_v24, 4  ;;  %v4622_v26 = vmax.f32 %v3335_v40, %v3337_v57 }
 0x4b7   :  { %v3510_v28 = vor.u32 %v12813_v44, %v10999_v32  ;;  %2628 = vst.msk [vmem:[#allocation2 + $0x410] sm:$0xff] %vm2497_vm5, %v2403_v39  ;;  %v4075_v6 = vshrl.u32 %v10828_v3, 16  ;;  %v12671_v7 = vshll.u32 %v11029_v60, 16  ;;  %v3330_v16 = vmax.f32 %v2978_v56, %v3202_v12  ;;  %v11048_v46 = vpop.f32.mrf.mxu2  ;;  %v8486_v44 = vld [vmem:[%s12598_s0 + $0x250] sm:$0xff]  ;;  %v4841_v12 = vld [vmem:[#allocation3 + $0x1cc] sm:$0x8] }
 0x4b8   :  { %v1584_v48 = vpop.f32.mrf.mxu0  ;;  %4616 = vst.msk [vmem:[#allocation3 + $0x1b4] sm:$0xf] %vm3394_vm0, %v4596_v35  ;;  %v11040_v36 = vpack.c.bf16 %v4053_v2, %v4053_v2  ;;  %v4618_v11 = vsel %vm9424_vm15, %v4599_v15, %v4617_v18  ;;  %v4478_v18 = vrot.slane %v4417_v47, 4  ;;  %v11059_v35 = vpack.c.bf16 %v4622_v26, %v4622_v26 }
 0x4b9   :  { %12814 = vst [vmem:[#allocation101_spill] sm:$0xff] %v11037_v33  ;;  %v1952_v62 = vmul.f32 %v10645_v63, %v1584_v48  ;;  %v3531_v57 = vsel %vm9493_vm8, %v3510_v28, %v3530_v42  ;;  %v4136_v40 = vrot.slane %v4075_v6, 4  ;;  %v11064_v24 = vrot.slane %v12671_v7, 5  ;;  %v4613_v42 = vld [vmem:[#allocation3 + $0x1ac] sm:$0x8] }
 0x4ba   :  { %5587 = vmatmul.bf16.gmra.mxu1 %v11025_v5  ;;  %6006 = vmatmul.bf16.gmra.mxu3 %v11025_v5  ;;  %12815 = vst [vmem:[#allocation102_spill] sm:$0xff] %v11048_v46  ;;  %v4083_v51 = vshrl.u32 %v11040_v36, 16  ;;  %v4086_v55 = vshll.u32 %v11040_v36, 16  ;;  %v3511_v10 = vrot.slane %v10999_v32, 4  ;;  %v12816_v28 = vshrl.u32 %v10954_v21, 16 }
 0x4bb   :  { %v2180_v63 = vadd.f32 %v10650_v27, %v1952_v62  ;;  %4619 = vst [vmem:[#allocation3 + $0x1bc] sm:$0x7] %v4618_v11  ;;  %v4137_v27 = vor.u32 %v4136_v40, %v10854_v31  ;;  %v4395_v48 = vmax.f32 %v3328_v1, %v3330_v16  ;;  %v12817_v31 = vshrl.u32 %v10958_v30, 16 }
 0x4bc   :  { %3532 = vst [vmem:[#allocation3 + $0x120] sm:$0xf] %v3531_v57  ;;  %v4139_v23 = vrot.slane %v4086_v55, 5  ;;  %v4141_v59 = vrot.slane %v4083_v51, 4  ;;  %v11073_v2 = vrot.slane %v12816_v28, 7  ;;  %v4479_v32 = vor.u32 %v4478_v18, %v10844_v52 }
 0x4bd   :  { %v2404_v39 = vmax.f32 %v2180_v63, 0.0  ;;  %v3515_v15 = vrot.slane %v12817_v31, 7  ;;  %v4138_v26 = vrot.slane %v4137_v27, 4  ;;  %v12672_v11 = vshll.u32 %v11059_v35, 16  ;;  %v11079_v63 = vpop.f32.mrf.mxu3  ;;  %v11081_v57 = vld [vmem:[#allocation7] ss:$0 sm:$0xff] }
 0x4be   :  { %v4142_v56 = vor.u32 %v4141_v59, %v4139_v23  ;;  %v4614_v1 = vsel %vm9191_vm10, %v10962_v53, %v4613_v42  ;;  %v4161_v59 = vld [vmem:[#allocation3 + $0x17c] sm:$0x7]  ;;  %v12673_v27 = vshrl.u32 %v11059_v35, 16  ;;  %v8046_v28 = vld [vmem:[#allocation3 + $0x100] sm:$0xf]  ;;  %v11096_v7 = vpack.c.bf16 %v4395_v48, %v4395_v48 }
 0x4bf   :  { %2629 = vst.msk [vmem:[#allocation2 + $0x418] sm:$0xff] %vm2497_vm5, %v2404_v39  ;;  %v4271_v39 = vld [vmem:[#allocation3 + $0x17c] sm:$0x8]  ;;  %v8558_v31 = vld [vmem:[#allocation3 + $0x104] sm:$0xf0]  ;;  %v4140_v18 = vsel %vm9414_vm14, %v4138_v26, %v4139_v23  ;;  %v4705_v23 = vrot.slane %v12672_v11, 5 }
 0x4c0   :  { %v1587_v62 = vpop.f32.mrf.mxu0  ;;  %v4143_v16 = vrot.slane %v4142_v56, 4  ;;  %v4272_v52 = vsel %vm9191_vm10, %v10870_v8, %v4271_v39  ;;  %4615 = vst [vmem:[#allocation3 + $0x1ac] sm:$0x8] %v4614_v1  ;;  %v11098_v53 = vld [vmem:[#allocation9] ss:$0 sm:$0xff]  ;;  %v4706_v26 = vrot.slane %v12673_v27, 4  ;;  %v11115_v11 = vor.u32 %v8558_v31, %v8046_v28 }
 0x4c1   :  { %v1953_v40 = vmul.f32 %v11081_v57, %v1587_v62  ;;  %v4842_v62 = vsel %vm9191_vm10, %v11064_v24, %v4841_v12  ;;  %4273 = vst [vmem:[#allocation3 + $0x17c] sm:$0x8] %v4272_v52  ;;  %v4727_v12 = vld [vmem:[#allocation3 + $0x1bc] sm:$0x8]  ;;  %v12818_v48 = vshll.u32 %v10958_v30, 16  ;;  %v4480_v1 = vrot.slane %v4479_v32, 4 }
 0x4c2   :  { %v4162_v8 = vsel %vm9424_vm15, %v4143_v16, %v4161_v59  ;;  %4160 = vst.msk [vmem:[#allocation3 + $0x174] sm:$0xf] %vm3394_vm0, %v4140_v18  ;;  %v4085_v16 = vrot.slane %v4083_v51, 7  ;;  %v4707_v59 = vor.u32 %v4706_v26, %v4705_v23  ;;  %v2998_v32 = vld [vmem:[#allocation2 + $0x690] ss:$2 sm:$0xff]  ;;  %v4728_v28 = vsel %vm9191_vm10, %v4705_v23, %v4727_v12 }
 0x4c3   :  { %v2181_v56 = vadd.f32 %v11098_v53, %v1953_v40  ;;  %7878 = vmatmul.msk.bf16.gmra.mxu0 %vm904_vm4, %v8486_v44  ;;  %v5746_v42 = vpop.f32.mrf.mxu2  ;;  %v3518_v39 = vor.u32 %v12818_v48, %v3515_v15  ;;  %v4425_v44 = vshrl.u32 %v11096_v7, 16  ;;  %v12674_v40 = vshll.u32 %v11096_v7, 16  ;;  %4163 = vst [vmem:[#allocation3 + $0x17c] sm:$0x7] %v4162_v8  ;;  %v3004_v48 = vld [vmem:[#allocation2 + $0x6c0] ss:$2 sm:$0xff] }
 0x4c4   :  { %v11113_v42 = vrot.slane %v4075_v6, 7  ;;  %4843 = vst [vmem:[#allocation3 + $0x1cc] sm:$0x8] %v4842_v62  ;;  %v3008_v27 = vld [vmem:[#allocation2 + $0x6e0] ss:$2 sm:$0xff]  ;;  %v12819_v6 = vshll.u32 %v10839_v29, 16 }
 0x4c5   :  { %v2405_v52 = vmax.f32 %v2181_v56, 0.0  ;;  %v4481_v30 = vrot.slane %v12674_v40, 5  ;;  %v4483_v15 = vrot.slane %v4425_v44, 4  ;;  %v4503_v51 = vld [vmem:[#allocation3 + $0x1ac] sm:$0x7]  ;;  %v4708_v8 = vrot.slane %v4707_v59, 4 }
 0x4c6   :  { %v11123_v56 = vor.u32 %v12819_v6, %v10928_v49  ;;  %v3519_v31 = vsel %vm9498_vm11, %v3511_v10, %v3518_v39  ;;  %v8619_v26 = vld [vmem:[#allocation10 + $0xf0] sm:$0xff]  ;;  %v12820_v23 = vshll.u32 %v10828_v3, 16  ;;  %4729 = vst [vmem:[#allocation3 + $0x1bc] sm:$0x8] %v4728_v28  ;;  %v4427_v46 = vrot.slane %v4425_v44, 7 }
 0x4c7   :  { %2630 = vst.msk [vmem:[#allocation2 + $0x420] sm:$0xff] %vm2497_vm5, %v2405_v52  ;;  %v3422_v18 = vpop.permute.xlu2 %3421  ;;  %v11132_v52 = vrot.slane %v4417_v47, 7  ;;  %v3228_v40 = vld [vmem:[#allocation2 + $0x6c1] ss:$2 sm:$0xff]  ;;  %v4482_v49 = vsel %vm9414_vm14, %v4480_v1, %v4481_v30  ;;  %v4484_v6 = vor.u32 %v4483_v15, %v4481_v30  ;;  %v4710_v47 = vsel %vm9414_vm14, %v4708_v8, %v10979_v4  ;;  %6401 = vmatpush.bf16.msra.mxu1 %v8619_v26 }
 0x4c8   :  { %3432 = vst.msk [vmem:[#allocation3 + $0x118] sm:$0x7] %vm3429_vm2, %v3422_v18  ;;  %v1589_v62 = vpop.f32.mrf.mxu0  ;;  %v4080_v12 = vor.u32 %v12820_v23, %v11113_v42  ;;  %v3232_v10 = vld [vmem:[#allocation2 + $0x6e1] ss:$2 sm:$0xff]  ;;  %v3343_v39 = vmax.f32 %v3004_v48, %v3228_v40  ;;  %v3002_v18 = vld [vmem:[#allocation2 + $0x6b0] ss:$2 sm:$0xff]  ;;  %v4088_v30 = vor.u32 %v4086_v55, %v4085_v16  ;;  %v11149_v48 = vpop.f32.mrf.mxu3 }
 0x4c9   :  { %v1954_v59 = vmul.f32 %v11081_v57, %v1589_v62  ;;  %4502 = vst.msk [vmem:[#allocation3 + $0x1a4] sm:$0xf] %vm3394_vm0, %v4482_v49  ;;  %v4081_v1 = vrot.slane %v11113_v42, 4  ;;  %v3345_v15 = vmax.f32 %v3008_v27, %v3232_v10  ;;  %v4485_v62 = vrot.slane %v4484_v6, 4  ;;  %v3222_v40 = vld [vmem:[#allocation2 + $0x691] ss:$2 sm:$0xff] }
 0x4ca   :  { %5590 = vmatmul.bf16.gmra.mxu1 %v11115_v11  ;;  %6009 = vmatmul.bf16.gmra.mxu3 %v11115_v11  ;;  %12821 = vst [vmem:[#allocation103_spill] sm:$0xff] %v11149_v48  ;;  %v3533_v4 = vld [vmem:[#allocation3 + $0x128] sm:$0xf]  ;;  %v12676_v8 = vshrl.u32 %v11029_v60, 16  ;;  %v3340_v42 = vmax.f32 %v2998_v32, %v3222_v40  ;;  %v12822_v28 = vshrl.u32 %v11059_v35, 16  ;;  %v12823_v32 = vshll.u32 %v10954_v21, 16 }
 0x4cb   :  { %v2182_v49 = vadd.f32 %v11098_v53, %v1954_v59  ;;  %v5747_v23 = vpop.f32.mrf.mxu2  ;;  %4730 = vst.msk [vmem:[#allocation3 + $0x1c4] sm:$0xf] %vm3394_vm0, %v4710_v47  ;;  %v3534_v55 = vsel %vm9514_vm12, %v3519_v31, %v3533_v4  ;;  %v4850_v27 = vmax.f32 %v3343_v39, %v3345_v15  ;;  %v4504_v16 = vsel %vm9424_vm15, %v4485_v62, %v4503_v51  ;;  %v3226_v59 = vld [vmem:[#allocation2 + $0x6b1] ss:$2 sm:$0xff]  ;;  %v4959_v48 = vld [vmem:[#allocation3 + $0x1ec] sm:$0x7] }
 0x4cc   :  { %v4647_v6 = vrot.slane %v12822_v28, 7  ;;  %3535 = vst [vmem:[#allocation3 + $0x128] sm:$0xf] %v3534_v55  ;;  %v4820_v26 = vrot.slane %v12676_v8, 4  ;;  %v3342_v44 = vmax.f32 %v3002_v18, %v3226_v59  ;;  %v4328_v23 = vld [vmem:[#allocation3 + $0x190] sm:$0xf]  ;;  %v4658_v47 = vor.u32 %v12823_v32, %v11073_v2 }
 0x4cd   :  { %v2406_v10 = vmax.f32 %v2182_v49, 0.0  ;;  %v11165_v31 = vpack.c.bf16 %v4850_v27, %v4850_v27  ;;  %4505 = vst [vmem:[#allocation3 + $0x1ac] sm:$0x7] %v4504_v16  ;;  %v4100_v51 = vld [vmem:[#allocation3 + $0x170] sm:$0xf]  ;;  %v8487_v62 = vld [vmem:[%s12598_s0 + $0x258] sm:$0xff]  ;;  %v4089_v27 = vsel %vm9498_vm11, %v4081_v1, %v4088_v30  ;;  %v4329_v16 = vsel %vm9493_vm8, %v11123_v56, %v4328_v23 }
 0x4ce   :  { %v4651_v39 = vrot.slane %v4647_v6, 4  ;;  %v4423_v40 = vrot.slane %v11132_v52, 4  ;;  %v12824_v18 = vshll.u32 %v11096_v7, 16  ;;  %v4737_v4 = vmax.f32 %v3340_v42, %v3342_v44  ;;  %v2916_v59 = vld [vmem:[#allocation2 + $0x400] ss:$2 sm:$0xff] }
 0x4cf   :  { %2631 = vst.msk [vmem:[#allocation2 + $0x428] sm:$0xff] %vm2497_vm5, %v2406_v10  ;;  %v3420_v15 = vpop.permute.xlu1 %3419  ;;  %v4101_v2 = vsel %vm9493_vm8, %v4080_v12, %v4100_v51  ;;  %v12675_v10 = vshll.u32 %v11165_v31, 16  ;;  %v4955_v42 = vld [vmem:[#allocation3 + $0x1dc] sm:$0x8]  ;;  %v4103_v12 = vld [vmem:[#allocation3 + $0x178] sm:$0xf] }
 0x4d0   :  { %v4430_v49 = vor.u32 %v12824_v18, %v4427_v46  ;;  %3431 = vst.msk [vmem:[#allocation3 + $0x110] sm:$0xf] %vm3427_vm1, %v3420_v15  ;;  %v1592_v55 = vpop.f32.mrf.mxu0  ;;  %v4821_v46 = vor.u32 %v4820_v26, %v11064_v24  ;;  %v11185_v44 = vpack.c.bf16 %v4737_v4, %v4737_v4  ;;  %v4659_v32 = vsel %vm9498_vm11, %v4651_v39, %v4658_v47  ;;  %v11189_v1 = vpop.f32.mrf.mxu3  ;;  %v3140_v56 = vld [vmem:[#allocation2 + $0x401] ss:$2 sm:$0xff] }
 0x4d1   :  { %v1955_v28 = vmul.f32 %v11081_v57, %v1592_v55  ;;  %4102 = vst [vmem:[#allocation3 + $0x170] sm:$0xf] %v4101_v2  ;;  %v11195_v51 = vrot.slane %v12675_v10, 5  ;;  %v4104_v26 = vsel %vm9514_vm12, %v4089_v27, %v4103_v12  ;;  %v4445_v2 = vld [vmem:[#allocation3 + $0x1a8] sm:$0xf]  ;;  %v12825_v27 = vshll.u32 %v10812_v38, 16 }
 0x4d2   :  { %v4431_v24 = vsel %vm9498_vm11, %v4423_v40, %v4430_v49  ;;  %4330 = vst [vmem:[#allocation3 + $0x190] sm:$0xf] %v4329_v16  ;;  %v4767_v47 = vshrl.u32 %v11185_v44, 16  ;;  %v4770_v39 = vshll.u32 %v11185_v44, 16  ;;  %v4822_v4 = vrot.slane %v4821_v46, 4 }
 0x4d3   :  { %v2183_v30 = vadd.f32 %v11098_v53, %v1955_v28  ;;  %7879 = vmatmul.msk.bf16.gmra.mxu0 %vm904_vm4, %v8487_v62  ;;  %v5749_v23 = vpop.f32.mrf.mxu2  ;;  %4105 = vst [vmem:[#allocation3 + $0x178] sm:$0xf] %v4104_v26  ;;  %v8560_v62 = vld [vmem:[#allocation3 + $0x114] sm:$0xf0]  ;;  %v4956_v18 = vsel %vm9191_vm10, %v11195_v51, %v4955_v42  ;;  %v4673_v55 = vld [vmem:[#allocation3 + $0x1c8] sm:$0xf]  ;;  %v3299_v49 = vmax.f32 %v2916_v59, %v3140_v56 }
 0x4d4   :  { %v4422_v16 = vor.u32 %v12825_v27, %v11132_v52  ;;  %4957 = vst [vmem:[#allocation3 + $0x1dc] sm:$0x8] %v4956_v18  ;;  %v4446_v12 = vsel %vm9514_vm12, %v4431_v24, %v4445_v2  ;;  %v12826_v23 = vshll.u32 %v11059_v35, 16  ;;  %v4823_v10 = vrot.slane %v4770_v39, 5  ;;  %v4442_v52 = vld [vmem:[#allocation3 + $0x1a0] sm:$0xf] }
 0x4d5   :  { %v2407_v15 = vmax.f32 %v2183_v30, 0.0  ;;  %v4674_v30 = vsel %vm9514_vm12, %v4659_v32, %v4673_v55  ;;  %v4825_v59 = vrot.slane %v4767_v47, 4  ;;  %4447 = vst [vmem:[#allocation3 + $0x1a8] sm:$0xf] %v4446_v12  ;;  %v4670_v18 = vld [vmem:[#allocation3 + $0x1c0] sm:$0xf] }
 0x4d6   :  { %v2920_v28 = vld [vmem:[#allocation2 + $0x420] ss:$2 sm:$0xff]  ;;  %v3144_v40 = vld [vmem:[#allocation2 + $0x421] ss:$2 sm:$0xff]  ;;  %v4650_v26 = vor.u32 %v12826_v23, %v4647_v6  ;;  %v4824_v32 = vsel %vm9414_vm14, %v4822_v4, %v4823_v10  ;;  %4675 = vst [vmem:[#allocation3 + $0x1c8] sm:$0xf] %v4674_v30 }
 0x4d7   :  { %2632 = vst.msk [vmem:[#allocation2 + $0x430] sm:$0xff] %vm2497_vm5, %v2407_v15  ;;  %v8054_v42 = vld [vmem:[#allocation3 + $0x110] sm:$0xf]  ;;  %v3301_v46 = vmax.f32 %v2920_v28, %v3144_v40  ;;  %v4826_v6 = vor.u32 %v4825_v59, %v4823_v10  ;;  %v4443_v15 = vsel %vm9493_vm8, %v4422_v16, %v4442_v52  ;;  %v4845_v40 = vld [vmem:[#allocation3 + $0x1dc] sm:$0x7]  ;;  %v11240_v59 = vpop.f32.mrf.mxu1 }
 0x4d8   :  { %v1594_v56 = vpop.f32.mrf.mxu0  ;;  %v11216_v8 = vor.u32 %v8560_v62, %v8054_v42  ;;  %4844 = vst.msk [vmem:[#allocation3 + $0x1d4] sm:$0xf] %vm3394_vm0, %v4824_v32  ;;  %v4671_v4 = vsel %vm9493_vm8, %v4650_v26, %v4670_v18  ;;  %v11233_v10 = vpop.f32.mrf.mxu3  ;;  %v4769_v42 = vrot.slane %v4767_v47, 7  ;;  %v12831_v18 = vshll.u32 %v11029_v60, 16 }
 0x4d9   :  { %v1956_v24 = vmul.f32 %v11081_v57, %v1594_v56  ;;  %v3596_v2 = vmax.f32 %v3299_v49, %v3301_v46  ;;  %4444 = vst [vmem:[#allocation3 + $0x1a0] sm:$0xf] %v4443_v15  ;;  %v12828_v49 = vshrl.u32 %v11029_v60, 16  ;;  %v4827_v12 = vrot.slane %v4826_v6, 4  ;;  %v3701_v46 = vld [vmem:[#allocation3 + $0x12c] sm:$0x8] }
 0x4da   :  { %12827 = vst [vmem:[#allocation104_spill] sm:$0xff] %v11216_v8  ;;  %5595 = vmatmul.bf16.gmra.mxu1 %v11216_v8  ;;  %6012 = vmatmul.bf16.gmra.mxu3 %v11216_v8  ;;  %v8488_v56 = vld [vmem:[%s12598_s0 + $0x260] sm:$0xff]  ;;  %v4772_v32 = vor.u32 %v4770_v39, %v4769_v42 }
 0x4db   :  { %v2184_v62 = vadd.f32 %v11098_v53, %v1956_v24  ;;  %v11227_v55 = vpack.c.bf16 %v3596_v2, %v3596_v2  ;;  %v5750_v28 = vpop.f32.mrf.mxu2  ;;  %v4761_v27 = vrot.slane %v12828_v49, 7  ;;  %4672 = vst [vmem:[#allocation3 + $0x1c0] sm:$0xf] %v4671_v4  ;;  %v4846_v23 = vsel %vm9424_vm15, %v4827_v12, %v4845_v40  ;;  %v2918_v40 = vld [vmem:[#allocation2 + $0x410] ss:$2 sm:$0xff] }
 0x4dc   :  { %12829 = vst [vmem:[#allocation105_spill] sm:$0xff] %v11233_v10  ;;  %v3142_v4 = vld [vmem:[#allocation2 + $0x411] ss:$2 sm:$0xff] }
 0x4dd   :  { %v2408_v30 = vmax.f32 %v2184_v62, 0.0  ;;  %3658 = vrot.lane.b32.xlu2 %v11227_v55, %s8808_s2  ;;  %v3622_v16 = vshll.u32 %v11227_v55, 16  ;;  %12830 = vst [vmem:[#allocation106_spill] sm:$0xff] %v11240_v59  ;;  %v4764_v24 = vor.u32 %v12831_v18, %v4761_v27  ;;  %v4765_v2 = vrot.slane %v4761_v27, 4  ;;  %v4784_v62 = vld [vmem:[#allocation3 + $0x1d0] sm:$0xf] }
 0x4de   :  { %4847 = vst [vmem:[#allocation3 + $0x1dc] sm:$0x7] %v4846_v23  ;;  %v3619_v15 = vshrl.u32 %v11227_v55, 16  ;;  %v4787_v18 = vld [vmem:[#allocation3 + $0x1d8] sm:$0xf] }
 0x4df   :  { %2633 = vst.msk [vmem:[#allocation2 + $0x438] sm:$0xff] %vm2497_vm5, %v2408_v30  ;;  %v3679_v26 = vrot.slane %v3622_v16, 5  ;;  %v4785_v49 = vsel %vm9493_vm8, %v4764_v24, %v4784_v62  ;;  %v4773_v39 = vsel %vm9498_vm11, %v4765_v2, %v4772_v32  ;;  %v8561_v32 = vld [vmem:[#allocation3 + $0x124] sm:$0xf] }
 0x4e0   :  { %v1597_v52 = vpop.f32.mrf.mxu0  ;;  %v11258_v12 = vpop.f32.mrf.mxu3  ;;  %4786 = vst [vmem:[#allocation3 + $0x1d0] sm:$0xf] %v4785_v49 }
 0x4e1   :  { %v3702_v47 = vsel %vm9191_vm10, %v3679_v26, %v3701_v46  ;;  %v1957_v6 = vmul.f32 %v11081_v57, %v1597_v52  ;;  %v3680_v46 = vrot.slane %v3619_v15, 4 }
 0x4e2   :  { %3703 = vst [vmem:[#allocation3 + $0x12c] sm:$0x8] %v3702_v47 }
 0x4e3   :  { %7880 = vmatmul.msk.bf16.gmra.mxu0 %vm904_vm4, %v8488_v56  ;;  %v2185_v28 = vadd.f32 %v11098_v53, %v1957_v6  ;;  %v3300_v56 = vmax.f32 %v2918_v40, %v3142_v4  ;;  %v4788_v6 = vsel %vm9514_vm12, %v4773_v39, %v4787_v18  ;;  %v3681_v40 = vor.u32 %v3680_v46, %v3679_v26 }
 0x4e4   :  { %4789 = vst [vmem:[#allocation3 + $0x1d8] sm:$0xf] %v4788_v6  ;;  %v3705_v6 = vld [vmem:[#allocation3 + $0x13c] sm:$0x7]  ;;  %vm7187_vm4 = vcmask 1043459  }
 0x4e5   :  { %v2409_v27 = vmax.f32 %v2185_v28, 0.0 }
 0x4e6   :  { %v2922_v30 = vld [vmem:[#allocation2 + $0x430] ss:$2 sm:$0xff]  ;;  %v3146_v42 = vld [vmem:[#allocation2 + $0x431] ss:$2 sm:$0xff] }
 0x4e7   :  { %v5580_v23 = vpop.f32.mrf.mxu1  ;;  %v3302_v52 = vmax.f32 %v2922_v30, %v3146_v42  ;;  %2634 = vst.msk [vmem:[#allocation2 + $0x440] sm:$0xff] %vm2497_vm5, %v2409_v27 }
 0x4e8   :  { %v11264_v47 = vadd.f32 %v11007_v22, %v5580_v23  ;;  %v1599_v24 = vpop.f32.mrf.mxu0  ;;  %v11275_v42 = vpop.f32.mrf.mxu3  ;;  %v3682_v23 = vrot.slane %v3681_v40, 4 }
 0x4e9   :  { %v1958_v2 = vmul.f32 %v11081_v57, %v1599_v24  ;;  %v8064_v62 = vld [vmem:[#allocation3 + $0x128] sm:$0xf0]  ;;  %v3597_v28 = vmax.f32 %v3300_v56, %v3302_v52  ;;  %12832 = vst [vmem:[#allocation107_spill] sm:$0xff] %v11275_v42  ;;  %v12839_v42 = vshll.u32 %v10983_v37, 16 }
 0x4ea   :  { %v11269_v49 = vor.u32 %v8561_v32, %v8064_v62 }
 0x4eb   :  { %v2186_v4 = vadd.f32 %v11098_v53, %v1958_v2  ;;  %v3601_v30 = vpack.c.bf16 %v3597_v28, %v3597_v28  ;;  %v3621_v2 = vrot.slane %v3619_v15, 7 }
 0x4ec   :  { %8238 = vmatmul.msk.bf16.gmra.mxu2 %vm2497_vm5, %v11269_v49 }
 0x4ed   :  { %v2410_v22 = vmax.f32 %v2186_v4, 0.0  ;;  %3660 = vrot.lane.b32.xlu0 %v3601_v30, %s8808_s2  ;;  %v3627_v27 = vshrl.u32 %v3601_v30, 16  ;;  %v3630_v39 = vshll.u32 %v3601_v30, 16  ;;  %v3624_v30 = vor.u32 %v3622_v16, %v3621_v2 }
 0x4ef   :  { %2635 = vst.msk [vmem:[#allocation2 + $0x448] sm:$0xff] %vm2497_vm5, %v2410_v22  ;;  %v3683_v56 = vrot.slane %v3630_v39, 5  ;;  %v3685_v52 = vrot.slane %v3627_v27, 4  ;;  %v3629_v55 = vrot.slane %v3627_v27, 7 }
 0x4f0   :  { %v1602_v18 = vpop.f32.mrf.mxu0  ;;  %v11285_v4 = vpop.f32.mrf.mxu3 }
 0x4f1   :  { %v3684_v26 = vsel %vm9414_vm14, %v3682_v23, %v3683_v56  ;;  %v3686_v46 = vor.u32 %v3685_v52, %v3683_v56  ;;  %v1959_v24 = vmul.f32 %v11081_v57, %v1602_v18  ;;  %v3644_v56 = vld [vmem:[#allocation3 + $0x130] sm:$0xf] }
 0x4f2   :  { %3704 = vst.msk [vmem:[#allocation3 + $0x134] sm:$0xf] %vm3394_vm0, %v3684_v26  ;;  %v3645_v52 = vsel %vm9493_vm8, %v3624_v30, %v3644_v56  ;;  %v8623_v26 = vld [vmem:[#allocation10 + $0x110] sm:$0xff]  ;;  %v3632_v30 = vor.u32 %v3630_v39, %v3629_v55  ;;  %v12835_v39 = vshrl.u32 %v10935_v13, 16  ;;  %v12677_v55 = vshrl.u32 %v11165_v31, 16 }
 0x4f3   :  { %v3687_v32 = vrot.slane %v3686_v46, 4  ;;  %v2187_v62 = vadd.f32 %v11098_v53, %v1959_v24  ;;  %3646 = vst [vmem:[#allocation3 + $0x130] sm:$0xf] %v3645_v52  ;;  %6566 = vmatpush.bf16.msra.mxu3 %v8623_v26  ;;  %v12834_v52 = vshrl.u32 %v10850_v14, 16 }
 0x4f5   :  { %v3706_v28 = vsel %vm9424_vm15, %v3687_v32, %v3705_v6  ;;  %v2411_v40 = vmax.f32 %v2187_v62, 0.0  ;;  %v3006_v32 = vld [vmem:[#allocation2 + $0x6d0] ss:$2 sm:$0xff] }
 0x4f6   :  { %3707 = vst [vmem:[#allocation3 + $0x13c] sm:$0x7] %v3706_v28  ;;  %v3010_v62 = vld [vmem:[#allocation2 + $0x6f0] ss:$2 sm:$0xff]  ;;  %v3230_v28 = vld [vmem:[#allocation2 + $0x6d1] ss:$2 sm:$0xff] }
 0x4f7   :  { %2636 = vst.msk [vmem:[#allocation2 + $0x450] sm:$0xff] %vm2497_vm5, %v2411_v40  ;;  %v3234_v40 = vld [vmem:[#allocation2 + $0x6f1] ss:$2 sm:$0xff] }
 0x4f8   :  { %v1604_v22 = vpop.f32.mrf.mxu0  ;;  %v11295_v24 = vpop.f32.mrf.mxu3  ;;  %v3346_v56 = vmax.f32 %v3010_v62, %v3234_v40  ;;  %v3647_v40 = vld [vmem:[#allocation3 + $0x138] sm:$0xf] }
 0x4f9   :  { %v1960_v23 = vmul.f32 %v11081_v57, %v1604_v22  ;;  %12833 = vst [vmem:[#allocation108_spill] sm:$0xff] %v11295_v24  ;;  %v3344_v22 = vmax.f32 %v3006_v32, %v3230_v28 }
 0x4fb   :  { %v2188_v15 = vadd.f32 %v11098_v53, %v1960_v23  ;;  %v4851_v27 = vmax.f32 %v3344_v22, %v3346_v56  ;;  %v12837_v22 = vshll.u32 %v10850_v14, 16 }
 0x4fd   :  { %v2412_v18 = vmax.f32 %v2188_v15, 0.0  ;;  %v3625_v15 = vrot.slane %v3621_v2, 4  ;;  %v11307_v32 = vpack.c.bf16 %v4851_v27, %v4851_v27  ;;  %v4533_v2 = vrot.slane %v12835_v39, 7 }
 0x4fe   :  { %v12838_v27 = vshrl.u32 %v10876_v9, 16 }
 0x4ff   :  { %2637 = vst.msk [vmem:[#allocation2 + $0x458] sm:$0xff] %vm2497_vm5, %v2412_v18  ;;  %v4191_v18 = vrot.slane %v12834_v52, 7 }
 0x500   :  { %v1607_v46 = vpop.f32.mrf.mxu0  ;;  %v11302_v26 = vpop.f32.mrf.mxu3 }
 0x501   :  { %v1961_v16 = vmul.f32 %v11081_v57, %v1607_v46  ;;  %v8618_v46 = vld [vmem:[#allocation10 + $0xe8] sm:$0xff] }
 0x502   :  { %6402 = vmatpush.bf16.msra.mxu1 %v8618_v46  ;;  %v4199_v46 = vrot.slane %v12838_v27, 7 }
 0x503   :  { %v2189_v6 = vadd.f32 %v11098_v53, %v1961_v16  ;;  %v3633_v16 = vsel %vm9498_vm11, %v3625_v15, %v3632_v30  ;;  %v12679_v30 = vshrl.u32 %v11307_v32, 16  ;;  %v4934_v15 = vrot.slane %v12677_v55, 4 }
 0x504   :  { %v3648_v56 = vsel %vm9514_vm12, %v3633_v16, %v3647_v40  ;;  %v4214_v40 = vld [vmem:[#allocation3 + $0x180] sm:$0xf]  ;;  %v12840_v55 = vshll.u32 %v10935_v13, 16 }
 0x505   :  { %v2413_v23 = vmax.f32 %v2189_v6, 0.0  ;;  %v12836_v6 = vshrl.u32 %v10983_v37, 16  ;;  %3649 = vst [vmem:[#allocation3 + $0x138] sm:$0xf] %v3648_v56  ;;  %v4939_v39 = vrot.slane %v12679_v30, 4  ;;  %v8611_v56 = vld [vmem:[#allocation10 + $0xb0] sm:$0xff] }
 0x506   :  { %v4536_v27 = vor.u32 %v12840_v55, %v4533_v2  ;;  %6091 = vmatpush.bf16.msra.mxu2 %v8611_v56 }
 0x507   :  { %2638 = vst.msk [vmem:[#allocation2 + $0x460] sm:$0xff] %vm2497_vm5, %v2413_v23  ;;  %v4541_v62 = vrot.slane %v12836_v6, 7  ;;  %v4194_v23 = vor.u32 %v12837_v22, %v4191_v18  ;;  %v4537_v6 = vrot.slane %v4533_v2, 4  ;;  %v4935_v22 = vor.u32 %v4934_v15, %v11195_v51 }
 0x508   :  { %v1609_v59 = vpop.f32.mrf.mxu0  ;;  %v4195_v15 = vrot.slane %v4191_v18, 4  ;;  %v11343_v8 = vpop.f32.mrf.mxu3 }
 0x509   :  { %v1962_v24 = vmul.f32 %v11081_v57, %v1609_v59  ;;  %v12678_v59 = vshll.u32 %v11307_v32, 16  ;;  %v4544_v16 = vor.u32 %v12839_v42, %v4541_v62  ;;  %v12841_v42 = vshll.u32 %v10876_v9, 16  ;;  %12842 = vst [vmem:[#allocation109_spill] sm:$0xff] %v11343_v8  ;;  %v4901_v8 = vld [vmem:[#allocation3 + $0x1e8] sm:$0xf] }
 0x50b   :  { %v2190_v28 = vadd.f32 %v11098_v53, %v1962_v24  ;;  %v4937_v24 = vrot.slane %v12678_v59, 5  ;;  %v4215_v59 = vsel %vm9493_vm8, %v4194_v23, %v4214_v40  ;;  %v4202_v62 = vor.u32 %v12841_v42, %v4199_v46  ;;  %v2924_v40 = vld [vmem:[#allocation2 + $0x440] ss:$2 sm:$0xff]  ;;  %v3148_v46 = vld [vmem:[#allocation2 + $0x441] ss:$2 sm:$0xff] }
 0x50c   :  { %4216 = vst [vmem:[#allocation3 + $0x180] sm:$0xf] %v4215_v59  ;;  %v4545_v2 = vsel %vm9498_vm11, %v4537_v6, %v4544_v16  ;;  %v4559_v6 = vld [vmem:[#allocation3 + $0x1b8] sm:$0xf]  ;;  %v3303_v56 = vmax.f32 %v2924_v40, %v3148_v46 }
 0x50d   :  { %v2414_v52 = vmax.f32 %v2190_v28, 0.0  ;;  %v4940_v10 = vor.u32 %v4939_v39, %v4937_v24  ;;  %v4556_v39 = vld [vmem:[#allocation3 + $0x1b0] sm:$0xf]  ;;  %v4560_v16 = vsel %vm9514_vm12, %v4545_v2, %v4559_v6  ;;  %v11373_v6 = vpop.f32.mrf.mxu1 }
 0x50e   :  { %v4557_v18 = vsel %vm9493_vm8, %v4536_v27, %v4556_v39  ;;  %4561 = vst [vmem:[#allocation3 + $0x1b8] sm:$0xf] %v4560_v16  ;;  %v12843_v39 = vshrl.u32 %v11165_v31, 16 }
 0x50f   :  { %2639 = vst.msk [vmem:[#allocation2 + $0x468] sm:$0xff] %vm2497_vm5, %v2414_v52  ;;  %v3545_v28 = vpop.permute.xlu0 %3544  ;;  %v4936_v52 = vrot.slane %v4935_v22, 4  ;;  %v4941_v55 = vrot.slane %v4940_v10, 4  ;;  %v4203_v22 = vsel %vm9498_vm11, %v4195_v15, %v4202_v62 }
 0x510   :  { %3554 = vst.msk [vmem:[#allocation3 + $0x120] sm:$0xf] %vm3427_vm1, %v3545_v28  ;;  %v1612_v30 = vpop.f32.mrf.mxu0  ;;  %v11361_v62 = vpop.f32.mrf.mxu3 }
 0x511   :  { %v1963_v51 = vmul.f32 %v11081_v57, %v1612_v30  ;;  %v4938_v30 = vsel %vm9414_vm14, %v4936_v52, %v4937_v24  ;;  %v4960_v59 = vsel %vm9424_vm15, %v4941_v55, %v4959_v48  ;;  %4558 = vst [vmem:[#allocation3 + $0x1b0] sm:$0xf] %v4557_v18  ;;  %v12844_v18 = vshrl.u32 %v11307_v32, 16 }
 0x512   :  { %4958 = vst.msk [vmem:[#allocation3 + $0x1e4] sm:$0xf] %vm3394_vm0, %v4938_v30 }
 0x513   :  { %v2191_v23 = vadd.f32 %v11098_v53, %v1963_v51  ;;  %4961 = vst [vmem:[#allocation3 + $0x1ec] sm:$0x7] %v4960_v59  ;;  %v4217_v51 = vld [vmem:[#allocation3 + $0x188] sm:$0xf]  ;;  %v4883_v46 = vrot.slane %v12844_v18, 7 }
 0x514   :  { %v4218_v42 = vsel %vm9514_vm12, %v4203_v22, %v4217_v51  ;;  %v3815_v59 = vld [vmem:[#allocation3 + $0x13c] sm:$0x8]  ;;  %12845 = vst [vmem:[#allocation110_spill] sm:$0xff] %v11373_v6  ;;  %v12847_v51 = vshll.u32 %v11307_v32, 16 }
 0x515   :  { %v2415_v10 = vmax.f32 %v2191_v23, 0.0  ;;  %4219 = vst [vmem:[#allocation3 + $0x188] sm:$0xf] %v4218_v42  ;;  %v4875_v23 = vrot.slane %v12843_v39, 7  ;;  %v2926_v39 = vld [vmem:[#allocation2 + $0x450] ss:$2 sm:$0xff] }
 0x516   :  { %v2928_v28 = vld [vmem:[#allocation2 + $0x460] ss:$2 sm:$0xff]  ;;  %v3152_v24 = vld [vmem:[#allocation2 + $0x461] ss:$2 sm:$0xff] }
 0x517   :  { %2640 = vst.msk [vmem:[#allocation2 + $0x470] sm:$0xff] %vm2497_vm5, %v2415_v10  ;;  %v3305_v27 = vmax.f32 %v2928_v28, %v3152_v24  ;;  %v12846_v28 = vshll.u32 %v11165_v31, 16 }
 0x518   :  { %v1614_v48 = vpop.f32.mrf.mxu0 }
 0x519   :  { %v1964_v52 = vmul.f32 %v11081_v57, %v1614_v48  ;;  %v3710_v15 = vmax.f32 %v3303_v56, %v3305_v27  ;;  %v4878_v24 = vor.u32 %v12846_v28, %v4875_v23  ;;  %v4879_v27 = vrot.slane %v4875_v23, 4 }
 0x51a   :  { %v4886_v48 = vor.u32 %v12847_v51, %v4883_v46 }
 0x51b   :  { %v2192_v2 = vadd.f32 %v11098_v53, %v1964_v52  ;;  %v11364_v55 = vpack.c.bf16 %v3710_v15, %v3710_v15  ;;  %v4898_v15 = vld [vmem:[#allocation3 + $0x1e0] sm:$0xf] }
 0x51c   :  { %v4899_v18 = vsel %vm9493_vm8, %v4878_v24, %v4898_v15  ;;  %v4887_v23 = vsel %vm9498_vm11, %v4879_v27, %v4886_v48  ;;  %v8563_v48 = vld [vmem:[#allocation3 + $0x134] sm:$0xf] }
 0x51d   :  { %v2416_v40 = vmax.f32 %v2192_v2, 0.0  ;;  %3772 = vrot.lane.b32.xlu1 %v11364_v55, %s8808_s2  ;;  %v12681_v30 = vshll.u32 %v11364_v55, 16  ;;  %v3733_v52 = vshrl.u32 %v11364_v55, 16  ;;  %4900 = vst [vmem:[#allocation3 + $0x1e0] sm:$0xf] %v4899_v18  ;;  %v4902_v15 = vsel %vm9514_vm12, %v4887_v23, %v4901_v8 }
 0x51e   :  { %4903 = vst [vmem:[#allocation3 + $0x1e8] sm:$0xf] %v4902_v15 }
 0x51f   :  { %2641 = vst.msk [vmem:[#allocation2 + $0x478] sm:$0xff] %vm2497_vm5, %v2416_v40  ;;  %v3793_v10 = vrot.slane %v12681_v30, 5  ;;  %v3547_v22 = vpop.permute.xlu1 %3546  ;;  %v3150_v40 = vld [vmem:[#allocation2 + $0x451] ss:$2 sm:$0xff] }
 0x520   :  { %3555 = vst.msk [vmem:[#allocation3 + $0x128] sm:$0x7] %vm3429_vm2, %v3547_v22  ;;  %v1617_v16 = vpop.f32.mrf.mxu0  ;;  %v11390_v22 = vpop.f32.mrf.mxu3  ;;  %v3304_v6 = vmax.f32 %v2926_v39, %v3150_v40 }
 0x521   :  { %v3816_v56 = vsel %vm9191_vm10, %v3793_v10, %v3815_v59  ;;  %v1965_v42 = vmul.f32 %v11081_v57, %v1617_v16  ;;  %12848 = vst [vmem:[#allocation111_spill] sm:$0xff] %v11390_v22  ;;  %v8062_v59 = vld [vmem:[#allocation3 + $0x120] sm:$0xf] }
 0x522   :  { %3817 = vst [vmem:[#allocation3 + $0x13c] sm:$0x8] %v3816_v56  ;;  %v3794_v56 = vrot.slane %v3733_v52, 4 }
 0x523   :  { %v2193_v2 = vadd.f32 %v11098_v53, %v1965_v42 }
 0x524   :  { %v3795_v40 = vor.u32 %v3794_v56, %v3793_v10 }
 0x525   :  { %v2417_v46 = vmax.f32 %v2193_v2, 0.0 }
 0x526   :  { %v2930_v28 = vld [vmem:[#allocation2 + $0x470] ss:$2 sm:$0xff]  ;;  %v3154_v16 = vld [vmem:[#allocation2 + $0x471] ss:$2 sm:$0xff]  ;;  %v3796_v23 = vrot.slane %v3795_v40, 4 }
 0x527   :  { %v5585_v51 = vpop.f32.mrf.mxu1  ;;  %v8562_v30 = vld [vmem:[#allocation3 + $0x124] sm:$0xf0]  ;;  %v3306_v42 = vmax.f32 %v2930_v28, %v3154_v16  ;;  %2642 = vst.msk [vmem:[#allocation2 + $0x480] sm:$0xff] %vm2497_vm5, %v2417_v46 }
 0x528   :  { %v1619_v33 = vpop.f32.mrf.mxu0  ;;  %v11395_v24 = vor.u32 %v8562_v30, %v8062_v59 }
 0x529   :  { %v1966_v27 = vmul.f32 %v11081_v57, %v1619_v33  ;;  %v8072_v2 = vld [vmem:[#allocation3 + $0x138] sm:$0xf0]  ;;  %v3711_v18 = vmax.f32 %v3304_v6, %v3306_v42 }
 0x52a   :  { %5600 = vmatmul.bf16.gmra.mxu1 %v11395_v24  ;;  %6017 = vmatmul.bf16.gmra.mxu3 %v11395_v24  ;;  %v11402_v39 = vor.u32 %v8563_v48, %v8072_v2  ;;  %v3735_v48 = vrot.slane %v3733_v52, 7 }
 0x52b   :  { %v2194_v46 = vadd.f32 %v11098_v53, %v1966_v27  ;;  %v3715_v30 = vpack.c.bf16 %v3711_v18, %v3711_v18  ;;  %v3819_v27 = vld [vmem:[#allocation3 + $0x14c] sm:$0x7] }
 0x52c   :  { %8239 = vmatmul.msk.bf16.gmra.mxu2 %vm2497_vm5, %v11402_v39 }
 0x52d   :  { %v2418_v8 = vmax.f32 %v2194_v46, 0.0  ;;  %v11407_v59 = vpop.f32.mrf.mxu3  ;;  %3774 = vrot.lane.b32.xlu2 %v3715_v30, %s8808_s2  ;;  %v3741_v33 = vshrl.u32 %v3715_v30, 16  ;;  %v3744_v6 = vshll.u32 %v3715_v30, 16 }
 0x52f   :  { %2643 = vst.msk [vmem:[#allocation2 + $0x488] sm:$0xff] %vm2497_vm5, %v2418_v8  ;;  %v3797_v28 = vrot.slane %v3744_v6, 5  ;;  %v3799_v16 = vrot.slane %v3741_v33, 4  ;;  %v5586_v51 = vpop.f32.mrf.mxu1  ;;  %v12850_v8 = vshll.u32 %v11364_v55, 16 }
 0x530   :  { %v1622_v10 = vpop.f32.mrf.mxu0 }
 0x531   :  { %v3798_v56 = vsel %vm9414_vm14, %v3796_v23, %v3797_v28  ;;  %v3800_v42 = vor.u32 %v3799_v16, %v3797_v28  ;;  %v1967_v15 = vmul.f32 %v11081_v57, %v1622_v10  ;;  %v3738_v23 = vor.u32 %v12850_v8, %v3735_v48  ;;  %v3758_v10 = vld [vmem:[#allocation3 + $0x140] sm:$0xf]  ;;  %v11431_v8 = vpop.f32.mrf.mxu2 }
 0x532   :  { %3818 = vst.msk [vmem:[#allocation3 + $0x144] sm:$0xf] %vm3394_vm0, %v3798_v56 }
 0x533   :  { %v3801_v2 = vrot.slane %v3800_v42, 4  ;;  %v2195_v18 = vadd.f32 %v11098_v53, %v1967_v15  ;;  %v3759_v42 = vsel %vm9493_vm8, %v3738_v23, %v3758_v10 }
 0x534   :  { %3760 = vst [vmem:[#allocation3 + $0x140] sm:$0xf] %v3759_v42 }
 0x535   :  { %v3820_v40 = vsel %vm9424_vm15, %v3801_v2, %v3819_v27  ;;  %v2419_v46 = vmax.f32 %v2195_v18, 0.0  ;;  %v11418_v30 = vpop.f32.mrf.mxu3  ;;  %v3743_v18 = vrot.slane %v3741_v33, 7 }
 0x536   :  { %12849 = vst [vmem:[#allocation112_spill] sm:$0xff] %v11418_v30 }
 0x537   :  { %3821 = vst [vmem:[#allocation3 + $0x14c] sm:$0x7] %v3820_v40  ;;  %v5588_v28 = vpop.f32.mrf.mxu1  ;;  %v3659_v16 = vpop.permute.xlu2 %3658 }
 0x538   :  { %2644 = vst.msk [vmem:[#allocation2 + $0x490] sm:$0xff] %vm2497_vm5, %v2419_v46  ;;  %v1624_v51 = vpop.f32.mrf.mxu0  ;;  %v3746_v28 = vor.u32 %v3744_v6, %v3743_v18 }
 0x539   :  { %3668 = vst.msk [vmem:[#allocation3 + $0x130] sm:$0xf] %vm3427_vm1, %v3659_v16  ;;  %v1968_v52 = vmul.f32 %v11081_v57, %v1624_v51  ;;  %v8565_v22 = vld [vmem:[#allocation3 + $0x144] sm:$0xf] }
 0x53b   :  { %v2196_v56 = vadd.f32 %v11098_v53, %v1968_v52  ;;  %v3739_v52 = vrot.slane %v3735_v48, 4 }
 0x53d   :  { %v2420_v15 = vmax.f32 %v2196_v56, 0.0  ;;  %v6007_v27 = vpop.f32.mrf.mxu3  ;;  %v8617_v56 = vld [vmem:[#allocation10 + $0xe0] sm:$0xff]  ;;  %v3747_v42 = vsel %vm9498_vm11, %v3739_v52, %v3746_v28 }
 0x53e   :  { %6403 = vmatpush.bf16.msra.mxu1 %v8617_v56  ;;  %v3761_v27 = vld [vmem:[#allocation3 + $0x148] sm:$0xf] }
 0x53f   :  { %2645 = vst.msk [vmem:[#allocation2 + $0x498] sm:$0xff] %vm2497_vm5, %v2420_v15  ;;  %v5589_v55 = vpop.f32.mrf.mxu1  ;;  %v3762_v6 = vsel %vm9514_vm12, %v3747_v42, %v3761_v27 }
 0x540   :  { %v1627_v2 = vpop.f32.mrf.mxu0  ;;  %3763 = vst [vmem:[#allocation3 + $0x148] sm:$0xf] %v3762_v6 }
 0x541   :  { %v1969_v40 = vmul.f32 %v11081_v57, %v1627_v2  ;;  %v11442_v2 = vpop.f32.mrf.mxu2 }
 0x542   :  { %12851 = vst [vmem:[#allocation113_spill] sm:$0xff] %v11442_v2 }
 0x543   :  { %v2197_v46 = vadd.f32 %v11098_v53, %v1969_v40 }
 0x545   :  { %v2421_v16 = vmax.f32 %v2197_v46, 0.0  ;;  %v6008_v51 = vpop.f32.mrf.mxu3 }
 0x546   :  { %v3156_v51 = vld [vmem:[#allocation2 + $0x481] ss:$2 sm:$0xff] }
 0x547   :  { %2646 = vst.msk [vmem:[#allocation2 + $0x4a0] sm:$0xff] %vm2497_vm5, %v2421_v16  ;;  %v11434_v23 = vpop.f32.mrf.mxu1  ;;  %v2932_v16 = vld [vmem:[#allocation2 + $0x480] ss:$2 sm:$0xff] }
 0x548   :  { %v1629_v10 = vpop.f32.mrf.mxu0  ;;  %v3307_v27 = vmax.f32 %v2932_v16, %v3156_v51 }
 0x549   :  { %v1970_v33 = vmul.f32 %v11081_v57, %v1629_v10 }
 0x54b   :  { %v2198_v15 = vadd.f32 %v11098_v53, %v1970_v33  ;;  %v5757_v33 = vpop.f32.mrf.mxu2 }
 0x54d   :  { %v2422_v55 = vmax.f32 %v2198_v15, 0.0  ;;  %v6010_v48 = vpop.f32.mrf.mxu3 }
 0x54f   :  { %2647 = vst.msk [vmem:[#allocation2 + $0x4a8] sm:$0xff] %vm2497_vm5, %v2422_v55  ;;  %v11445_v18 = vpop.f32.mrf.mxu1 }
 0x550   :  { %12852 = vst [vmem:[#allocation114_spill] sm:$0xff] %v11445_v18  ;;  %v1632_v40 = vpop.f32.mrf.mxu0 }
 0x551   :  { %v1971_v46 = vmul.f32 %v11081_v57, %v1632_v40 }
 0x553   :  { %v2199_v28 = vadd.f32 %v11098_v53, %v1971_v46 }
 0x555   :  { %v2423_v52 = vmax.f32 %v2199_v28, 0.0  ;;  %v6011_v10 = vpop.f32.mrf.mxu3 }
 0x556   :  { %v2936_v56 = vld [vmem:[#allocation2 + $0x4a0] ss:$2 sm:$0xff]  ;;  %v3160_v42 = vld [vmem:[#allocation2 + $0x4a1] ss:$2 sm:$0xff] }
 0x557   :  { %2648 = vst.msk [vmem:[#allocation2 + $0x4b0] sm:$0xff] %vm2497_vm5, %v2423_v52  ;;  %v5596_v15 = vpop.f32.mrf.mxu1  ;;  %v3309_v6 = vmax.f32 %v2936_v56, %v3160_v42  ;;  %v3929_v52 = vld [vmem:[#allocation3 + $0x14c] sm:$0x8] }
 0x558   :  { %v11450_v55 = vadd.f32 %v5757_v33, %v5596_v15  ;;  %v1634_v48 = vpop.f32.mrf.mxu0 }
 0x559   :  { %v1972_v2 = vmul.f32 %v11081_v57, %v1634_v48  ;;  %v3824_v40 = vmax.f32 %v3307_v27, %v3309_v6  ;;  %v2934_v27 = vld [vmem:[#allocation2 + $0x490] ss:$2 sm:$0xff]  ;;  %v3158_v6 = vld [vmem:[#allocation2 + $0x491] ss:$2 sm:$0xff] }
 0x55a   :  { %12853 = vst [vmem:[#allocation115_spill] sm:$0xff] %v11450_v55 }
 0x55b   :  { %v2200_v46 = vadd.f32 %v11098_v53, %v1972_v2  ;;  %v11454_v18 = vpack.c.bf16 %v3824_v40, %v3824_v40 }
 0x55d   :  { %v2424_v28 = vmax.f32 %v2200_v46, 0.0  ;;  %3886 = vrot.lane.b32.xlu0 %v11454_v18, %s8808_s2  ;;  %v12682_v10 = vshll.u32 %v11454_v18, 16  ;;  %v12683_v33 = vshrl.u32 %v11454_v18, 16 }
 0x55f   :  { %2649 = vst.msk [vmem:[#allocation2 + $0x4b8] sm:$0xff] %vm2497_vm5, %v2424_v28  ;;  %v3907_v16 = vrot.slane %v12682_v10, 5  ;;  %v3661_v51 = vpop.permute.xlu0 %3660  ;;  %v3908_v28 = vrot.slane %v12683_v33, 4 }
 0x560   :  { %3669 = vst.msk [vmem:[#allocation3 + $0x138] sm:$0x7] %vm3429_vm2, %v3661_v51  ;;  %v1637_v56 = vpop.f32.mrf.mxu0  ;;  %v8070_v51 = vld [vmem:[#allocation3 + $0x130] sm:$0xf] }
 0x561   :  { %v3930_v2 = vsel %vm9191_vm10, %v3907_v16, %v3929_v52  ;;  %v1973_v42 = vmul.f32 %v11081_v57, %v1637_v56  ;;  %v3909_v33 = vor.u32 %v3908_v28, %v3907_v16  ;;  %v2944_v28 = vld [vmem:[#allocation2 + $0x4e0] ss:$2 sm:$0xff] }
 0x562   :  { %3931 = vst [vmem:[#allocation3 + $0x14c] sm:$0x8] %v3930_v2  ;;  %v3308_v2 = vmax.f32 %v2934_v27, %v3158_v6 }
 0x563   :  { %v2201_v15 = vadd.f32 %v11098_v53, %v1973_v42 }
 0x565   :  { %4002 = vrot.lane.b32.xlu0 %v10799_v41, %s8808_s2  ;;  %v2425_v48 = vmax.f32 %v2201_v15, 0.0 }
 0x566   :  { %v2938_v40 = vld [vmem:[#allocation2 + $0x4b0] ss:$2 sm:$0xff]  ;;  %v3162_v46 = vld [vmem:[#allocation2 + $0x4b1] ss:$2 sm:$0xff] }
 0x567   :  { %v8564_v52 = vld [vmem:[#allocation3 + $0x134] sm:$0xf0]  ;;  %v3310_v10 = vmax.f32 %v2938_v40, %v3162_v46  ;;  %2650 = vst.msk [vmem:[#allocation2 + $0x4c0] sm:$0xff] %vm2497_vm5, %v2425_v48  ;;  %v3933_v46 = vld [vmem:[#allocation3 + $0x15c] sm:$0x7] }
 0x568   :  { %v1639_v56 = vpop.f32.mrf.mxu0  ;;  %v11473_v30 = vor.u32 %v8564_v52, %v8070_v51  ;;  %v3168_v51 = vld [vmem:[#allocation2 + $0x4e1] ss:$2 sm:$0xff] }
 0x569   :  { %v1974_v42 = vmul.f32 %v11081_v57, %v1639_v56  ;;  %v8080_v55 = vld [vmem:[#allocation3 + $0x148] sm:$0xf0]  ;;  %v3825_v41 = vmax.f32 %v3308_v2, %v3310_v10 }
 0x56a   :  { %5605 = vmatmul.bf16.gmra.mxu1 %v11473_v30  ;;  %6022 = vmatmul.bf16.gmra.mxu3 %v11473_v30  ;;  %v11478_v15 = vor.u32 %v8565_v22, %v8080_v55  ;;  %v3910_v55 = vrot.slane %v3909_v33, 4 }
 0x56b   :  { %v2202_v27 = vadd.f32 %v11098_v53, %v1974_v42  ;;  %v11481_v6 = vpack.c.bf16 %v3825_v41, %v3825_v41  ;;  %v3313_v42 = vmax.f32 %v2944_v28, %v3168_v51  ;;  %v12855_v28 = vshll.u32 %v11454_v18, 16 }
 0x56c   :  { %8240 = vmatmul.msk.bf16.gmra.mxu2 %vm2497_vm5, %v11478_v15 }
 0x56d   :  { %v2426_v48 = vmax.f32 %v2202_v27, 0.0  ;;  %4228 = vrot.lane.b32.xlu0 %v10850_v14, %s8808_s2  ;;  %3888 = vrot.lane.b32.xlu1 %v11481_v6, %s8808_s2  ;;  %v3855_v57 = vshrl.u32 %v11481_v6, 16  ;;  %v3858_v22 = vshll.u32 %v11481_v6, 16  ;;  %v8622_v27 = vld [vmem:[#allocation10 + $0x108] sm:$0xff] }
 0x56e   :  { %6567 = vmatpush.bf16.msra.mxu3 %v8622_v27 }
 0x56f   :  { %2651 = vst.msk [vmem:[#allocation2 + $0x4c8] sm:$0xff] %vm2497_vm5, %v2426_v48  ;;  %v3911_v53 = vrot.slane %v3858_v22, 5  ;;  %v3913_v10 = vrot.slane %v3855_v57, 4 }
 0x571   :  { %v3912_v16 = vsel %vm9414_vm14, %v3910_v55, %v3911_v53  ;;  %v3914_v40 = vor.u32 %v3913_v10, %v3911_v53  ;;  %v8616_v55 = vld [vmem:[#allocation10 + $0xd8] sm:$0xff] }
 0x572   :  { %3932 = vst.msk [vmem:[#allocation3 + $0x154] sm:$0xf] %vm3394_vm0, %v3912_v16  ;;  %6404 = vmatpush.bf16.msra.mxu1 %v8616_v55 }
 0x573   :  { %v3915_v14 = vrot.slane %v3914_v40, 4 }
 0x575   :  { %v3934_v52 = vsel %vm9424_vm15, %v3915_v14, %v3933_v46  ;;  %4344 = vrot.lane.b32.xlu0 %v10793_v61, %s8808_s2  ;;  %4114 = vrot.lane.b32.xlu1 %v10828_v3, %s8808_s2  ;;  %v4043_v3 = vld [vmem:[#allocation3 + $0x15c] sm:$0x8]  ;;  %vm7248_vm15 = vsmask.f32 7946 }
 0x576   :  { %3935 = vst [vmem:[#allocation3 + $0x15c] sm:$0x7] %v3934_v52  ;;  %v2940_v33 = vld [vmem:[#allocation2 + $0x4c0] ss:$2 sm:$0xff]  ;;  %v3164_v2 = vld [vmem:[#allocation2 + $0x4c1] ss:$2 sm:$0xff] }
 0x577   :  { %v3311_v56 = vmax.f32 %v2940_v33, %v3164_v2  ;;  %v8610_v52 = vld [vmem:[#allocation10 + $0xa8] sm:$0xff] }
 0x578   :  { %6092 = vmatpush.bf16.msra.mxu2 %v8610_v52  ;;  %v8577_v52 = vld [vmem:[#allocation3 + $0x1a4] sm:$0xf] }
 0x579   :  { %v3938_v41 = vmax.f32 %v3311_v56, %v3313_v42  ;;  %v8567_v43 = vld [vmem:[#allocation3 + $0x154] sm:$0xf] }
 0x57b   :  { %v11503_v48 = vpack.c.bf16 %v3938_v41, %v3938_v41 }
 0x57d   :  { %4570 = vrot.lane.b32.xlu0 %v10935_v13, %s8808_s2  ;;  %4230 = vrot.lane.b32.xlu1 %v10876_v9, %s8808_s2  ;;  %v3961_v20 = vshrl.u32 %v11503_v48, 16  ;;  %v3964_v61 = vshll.u32 %v11503_v48, 16  ;;  %v12854_v9 = vshrl.u32 %v11454_v18, 16  ;;  %v3857_v18 = vrot.slane %v3855_v57, 7  ;;  %v11565_v57 = vpop.f32.mrf.mxu2 }
 0x57e   :  { %4000 = vrot.lane.b32.xlu2 %v11503_v48, %s8808_s2  ;;  %12856 = vst [vmem:[#allocation116_spill] sm:$0xff] %v11565_v57 }
 0x57f   :  { %v4021_v53 = vrot.slane %v3964_v61, 5  ;;  %v4022_v10 = vrot.slane %v3961_v20, 4  ;;  %v3849_v46 = vrot.slane %v12854_v9, 7  ;;  %v3860_v2 = vor.u32 %v3858_v22, %v3857_v18  ;;  %v11567_v22 = vpop.f32.mrf.mxu1  ;;  %v3989_v9 = vld [vmem:[#allocation3 + $0x168] sm:$0xf] }
 0x580   :  { %12857 = vst [vmem:[#allocation117_spill] sm:$0xff] %v11567_v22  ;;  %v3963_v48 = vrot.slane %v3961_v20, 7 }
 0x581   :  { %v4023_v16 = vor.u32 %v4022_v10, %v4021_v53  ;;  %v4044_v40 = vsel %vm9191_vm10, %v4021_v53, %v4043_v3  ;;  %v3852_v51 = vor.u32 %v12855_v28, %v3849_v46  ;;  %v3853_v42 = vrot.slane %v3849_v46, 4  ;;  %v8571_v53 = vld [vmem:[#allocation3 + $0x174] sm:$0xf]  ;;  %v8104_v10 = vld [vmem:[#allocation3 + $0x178] sm:$0xf0]  ;;  %vm12046_vm10 = vmand %vm7187_vm4, %vm3460_vm9 }
 0x582   :  { %4045 = vst [vmem:[#allocation3 + $0x15c] sm:$0x8] %v4044_v40  ;;  %v8573_v46 = vld [vmem:[#allocation3 + $0x184] sm:$0xf]  ;;  %v8615_v28 = vld [vmem:[#allocation10 + $0xd0] sm:$0xff]  ;;  %vm7212_vm9 = vcmask 1042432  }
 0x583   :  { %v4024_v13 = vrot.slane %v4023_v16, 4  ;;  %v3861_v27 = vsel %vm9498_vm11, %v3853_v42, %v3860_v2  ;;  %v3967_v16 = vrot.slane %v3963_v48, 4  ;;  %6405 = vmatpush.bf16.msra.mxu1 %v8615_v28  ;;  %vm7335_vm4 = vcmask 1040384  }
 0x585   :  { %v4026_v14 = vsel %vm9414_vm14, %v4024_v13, %v10820_v34  ;;  %4686 = vrot.lane.b32.xlu0 %v10954_v21, %s8808_s2  ;;  %4456 = vrot.lane.b32.xlu1 %v10812_v38, %s8808_s2  ;;  %v3872_v21 = vld [vmem:[#allocation3 + $0x150] sm:$0xf]  ;;  %v5762_v3 = vpop.f32.mrf.mxu2  ;;  %v11573_v13 = vor.u32 %v8571_v53, %v8104_v10  ;;  %v3975_v20 = vsel %vm9498_vm11, %v3967_v16, %v10822_v25  ;;  %vm12102_vm14 = vmand %vm7212_vm9, %vm3468_vm13  ;;  %vm7247_vm13 = vcmask 1043458  }
 0x586   :  { %4046 = vst.msk [vmem:[#allocation3 + $0x164] sm:$0xf] %vm3394_vm0, %v4026_v14  ;;  %4116 = vrot.lane.b32.xlu2 %v11040_v36, %s8808_s2  ;;  %v3873_v38 = vsel %vm9493_vm8, %v3852_v51, %v3872_v21  ;;  %v8112_v14 = vld [vmem:[#allocation3 + $0x188] sm:$0xf0]  ;;  %v8575_v51 = vld [vmem:[#allocation3 + $0x194] sm:$0xf]  ;;  %vm12150_vm0 = vmand %vm7247_vm13, %vm7248_vm15 }
 0x587   :  { %v3775_v19 = vpop.permute.xlu2 %3774  ;;  %3874 = vst [vmem:[#allocation3 + $0x150] sm:$0xf] %v3873_v38  ;;  %v11588_v25 = vor.u32 %v8575_v51, %v8120_v17  ;;  %vm12316_vm9 = vmand %vm7335_vm4, %vm3355_vm6 }
 0x588   :  { %3783 = vst.msk [vmem:[#allocation3 + $0x148] sm:$0x7] %vm3429_vm2, %v3775_v19  ;;  %v11584_v19 = vor.u32 %v8573_v46, %v8112_v14  ;;  %v8581_v46 = vld [vmem:[#allocation3 + $0x1c4] sm:$0xf]  ;;  %v8144_v14 = vld [vmem:[#allocation3 + $0x1c8] sm:$0xf0] }
 0x589   :  { %v8088_v34 = vld [vmem:[#allocation3 + $0x158] sm:$0xf0] }
 0x58a   :  { %v11530_v33 = vor.u32 %v8567_v43, %v8088_v34  ;;  %v8128_v43 = vld [vmem:[#allocation3 + $0x1a8] sm:$0xf0] }
 0x58b   :  { %v11595_v21 = vor.u32 %v8577_v52, %v8128_v43 }
 0x58c   :  { %8241 = vmatmul.msk.bf16.gmra.mxu2 %vm2497_vm5, %v11530_v33 }
 0x58d   :  { %4912 = vrot.lane.b32.xlu0 %v11165_v31, %s8808_s2  ;;  %4572 = vrot.lane.b32.xlu1 %v10983_v37, %s8808_s2  ;;  %v8569_v37 = vld [vmem:[#allocation3 + $0x164] sm:$0xf]  ;;  %v11599_v38 = vpop.f32.mrf.mxu2 }
 0x58e   :  { %4342 = vrot.lane.b32.xlu2 %v10839_v29, %s8808_s2  ;;  %v8096_v29 = vld [vmem:[#allocation3 + $0x168] sm:$0xf0]  ;;  %12859 = vst [vmem:[#allocation119_spill] sm:$0xff] %v11599_v38 }
 0x58f   :  { %v3773_v36 = vpop.permute.xlu1 %3772  ;;  %v8566_v56 = vld [vmem:[#allocation3 + $0x144] sm:$0xf0] }
 0x590   :  { %3782 = vst.msk [vmem:[#allocation3 + $0x140] sm:$0xf] %vm3427_vm1, %v3773_v36 }
 0x595   :  { %4798 = vrot.lane.b32.xlu1 %v11029_v60, %s8808_s2  ;;  %v11555_v60 = vor.u32 %v8569_v37, %v8096_v29  ;;  %v8579_v29 = vld [vmem:[#allocation3 + $0x1b4] sm:$0xf] }
 0x596   :  { %4458 = vrot.lane.b32.xlu2 %v11096_v7, %s8808_s2  ;;  %v3875_v7 = vld [vmem:[#allocation3 + $0x158] sm:$0xf] }
 0x597   :  { %v8078_v31 = vld [vmem:[#allocation3 + $0x140] sm:$0xf]  ;;  %v3876_v6 = vsel %vm9514_vm12, %v3861_v27, %v3875_v7  ;;  %v8136_v27 = vld [vmem:[#allocation3 + $0x1b8] sm:$0xf0] }
 0x598   :  { %v11549_v41 = vor.u32 %v8566_v56, %v8078_v31  ;;  %3877 = vst [vmem:[#allocation3 + $0x158] sm:$0xf] %v3876_v6  ;;  %v11613_v10 = vor.u32 %v8579_v29, %v8136_v27  ;;  %v8609_v29 = vld [vmem:[#allocation10 + $0xa0] sm:$0xff] }
 0x599   :  { %6093 = vmatpush.bf16.msra.mxu2 %v8609_v29 }
 0x59a   :  { %5610 = vmatmul.bf16.gmra.mxu1 %v11549_v41  ;;  %6027 = vmatmul.bf16.gmra.mxu3 %v11549_v41  ;;  %12863 = vst [vmem:[#allocation123_spill] sm:$0xff] %v11613_v10 }
 0x59c   :  { %8242 = vmatmul.msk.bf16.gmra.mxu2 %vm2497_vm5, %v11555_v60 }
 0x59d   :  { %4914 = vrot.lane.b32.xlu1 %v11307_v32, %s8808_s2  ;;  %v3966_v32 = vor.u32 %v3964_v61, %v3963_v48  ;;  %v3990_v61 = vsel %vm9514_vm12, %v3975_v20, %v3989_v9  ;;  %vm7309_vm12 = vcmask 1043457  }
 0x59e   :  { %4684 = vrot.lane.b32.xlu2 %v11059_v35, %s8808_s2  ;;  %v3986_v35 = vld [vmem:[#allocation3 + $0x160] sm:$0xf]  ;;  %3991 = vst [vmem:[#allocation3 + $0x168] sm:$0xf] %v3990_v61 }
 0x5a6   :  { %4800 = vrot.lane.b32.xlu2 %v11185_v44, %s8808_s2  ;;  %v3987_v44 = vsel %vm9493_vm8, %v3966_v32, %v3986_v35  ;;  %vm7274_vm8 = vsmask.f32 1280 }
 0x5a7   :  { %v5601_v55 = vpop.f32.mrf.mxu1  ;;  %3988 = vst [vmem:[#allocation3 + $0x160] sm:$0xf] %v3987_v44  ;;  %vm12202_vm11 = vmand %vm7273_vm7, %vm7274_vm8 }
 0x5a8   :  { %v11571_v40 = vadd.f32 %v5762_v3, %v5601_v55 }
 0x5aa   :  { %12858 = vst [vmem:[#allocation118_spill] sm:$0xff] %v11571_v40  ;;  %v12987_v40 = vld [vmem:[#allocation26_spill] sm:$0xff] }
 0x5ac   :  { %8243 = vmatmul.msk.bf16.gmra.mxu2 %vm2497_vm5, %v11573_v13 }
 0x5af   :  { %v11601_v36 = vpop.f32.mrf.mxu1  ;;  %v5767_v56 = vpop.f32.mrf.mxu2 }
 0x5b0   :  { %12860 = vst [vmem:[#allocation120_spill] sm:$0xff] %v11601_v36 }
 0x5b7   :  { %v11622_v9 = vpop.f32.mrf.mxu2 }
 0x5b8   :  { %12864 = vst [vmem:[#allocation124_spill] sm:$0xff] %v11622_v9  ;;  %v12979_v9 = vld [vmem:[#allocation55_spill] sm:$0xff] }
 0x5bc   :  { %8244 = vmatmul.msk.bf16.gmra.mxu2 %vm2497_vm5, %v11584_v19 }
 0x5cc   :  { %8245 = vmatmul.msk.bf16.gmra.mxu2 %vm2497_vm5, %v11588_v25 }
 0x5cf   :  { %v3887_v54 = vpop.permute.xlu0 %3886 }
 0x5d0   :  { %3896 = vst.msk [vmem:[#allocation3 + $0x150] sm:$0xf] %vm3427_vm1, %v3887_v54  ;;  %v11629_v54 = vor.u32 %v8581_v46, %v8144_v14  ;;  %v8160_v46 = vld [vmem:[#allocation3 + $0x1e8] sm:$0xf0] }
 0x5d2   :  { %12866 = vst [vmem:[#allocation126_spill] sm:$0xff] %v11629_v54 }
 0x5d7   :  { %v4003_v0 = vpop.permute.xlu0 %4002  ;;  %v8086_v3 = vld [vmem:[#allocation3 + $0x150] sm:$0xf] }
 0x5d8   :  { %4011 = vst.msk [vmem:[#allocation3 + $0x168] sm:$0x7] %vm3429_vm2, %v4003_v0  ;;  %v4001_v34 = vpop.permute.xlu2 %4000  ;;  %v8621_v0 = vld [vmem:[#allocation10 + $0x100] sm:$0xff] }
 0x5d9   :  { %4010 = vst.msk [vmem:[#allocation3 + $0x160] sm:$0xf] %vm3427_vm1, %v4001_v34  ;;  %6568 = vmatpush.bf16.msra.mxu3 %v8621_v0 }
 0x5dc   :  { %8246 = vmatmul.msk.bf16.gmra.mxu2 %vm2497_vm5, %v11595_v21 }
 0x5df   :  { %v4229_v18 = vpop.permute.xlu0 %4228  ;;  %v3889_v2 = vpop.permute.xlu1 %3888  ;;  %v8570_v44 = vld [vmem:[#allocation3 + $0x164] sm:$0xf0] }
 0x5e0   :  { %4238 = vst.msk [vmem:[#allocation3 + $0x180] sm:$0xf] %vm3427_vm1, %v4229_v18  ;;  %v4117_v31 = vpop.permute.xlu2 %4116  ;;  %v8094_v20 = vld [vmem:[#allocation3 + $0x160] sm:$0xf]  ;;  %v8614_v18 = vld [vmem:[#allocation10 + $0xc8] sm:$0xff] }
 0x5e1   :  { %3897 = vst.msk [vmem:[#allocation3 + $0x158] sm:$0x7] %vm3429_vm2, %v3889_v2  ;;  %v11626_v17 = vor.u32 %v8570_v44, %v8094_v20  ;;  %6406 = vmatpush.bf16.msra.mxu1 %v8614_v18  ;;  %v8168_v18 = vld [vmem:[#allocation3 + $0x1f8] sm:$0xf0] }
 0x5e2   :  { %4125 = vst.msk [vmem:[#allocation3 + $0x178] sm:$0x7] %vm3429_vm2, %v4117_v31 }
 0x5e3   :  { %12865 = vst [vmem:[#allocation125_spill] sm:$0xff] %v11626_v17 }
 0x5e7   :  { %v5606_v37 = vpop.f32.mrf.mxu1  ;;  %v4345_v42 = vpop.permute.xlu0 %4344 }
 0x5e8   :  { %v11606_v7 = vadd.f32 %v5767_v56, %v5606_v37  ;;  %4353 = vst.msk [vmem:[#allocation3 + $0x198] sm:$0x7] %vm3429_vm2, %v4345_v42  ;;  %v4115_v6 = vpop.permute.xlu1 %4114  ;;  %v4343_v48 = vpop.permute.xlu2 %4342  ;;  %v8568_v55 = vld [vmem:[#allocation3 + $0x154] sm:$0xf0]  ;;  %v8583_v37 = vld [vmem:[#allocation3 + $0x1d4] sm:$0xf] }
 0x5e9   :  { %4124 = vst.msk [vmem:[#allocation3 + $0x170] sm:$0xf] %vm3427_vm1, %v4115_v6  ;;  %v11610_v53 = vor.u32 %v8568_v55, %v8086_v3  ;;  %v8152_v42 = vld [vmem:[#allocation3 + $0x1d8] sm:$0xf0]  ;;  %v8572_v6 = vld [vmem:[#allocation3 + $0x174] sm:$0xf0] }
 0x5ea   :  { %12861 = vst [vmem:[#allocation121_spill] sm:$0xff] %v11606_v7  ;;  %v11643_v3 = vor.u32 %v8583_v37, %v8152_v42  ;;  %v12983_v7 = vld [vmem:[#allocation63_spill] sm:$0xff] }
 0x5eb   :  { %12862 = vst [vmem:[#allocation122_spill] sm:$0xff] %v11610_v53  ;;  %5615 = vmatmul.bf16.gmra.mxu1 %v11610_v53  ;;  %6032 = vmatmul.bf16.gmra.mxu3 %v11610_v53 }
 0x5ec   :  { %4352 = vst.msk [vmem:[#allocation3 + $0x190] sm:$0xf] %vm3427_vm1, %v4343_v48  ;;  %8247 = vmatmul.msk.bf16.gmra.mxu2 %vm2497_vm5, %v11613_v10 }
 0x5ed   :  { %12869 = vst [vmem:[#allocation129_spill] sm:$0xff] %v11643_v3 }
 0x5ef   :  { %v4571_v32 = vpop.permute.xlu0 %4570  ;;  %v5772_v52 = vpop.f32.mrf.mxu2 }
 0x5f0   :  { %4580 = vst.msk [vmem:[#allocation3 + $0x1b0] sm:$0xf] %vm3427_vm1, %v4571_v32  ;;  %v4231_v16 = vpop.permute.xlu1 %4230  ;;  %v4459_v35 = vpop.permute.xlu2 %4458  ;;  %v8102_v31 = vld [vmem:[#allocation3 + $0x170] sm:$0xf] }
 0x5f1   :  { %4239 = vst.msk [vmem:[#allocation3 + $0x188] sm:$0x7] %vm3429_vm2, %v4231_v16  ;;  %v11641_v48 = vor.u32 %v8572_v6, %v8102_v31  ;;  %v11649_v55 = vpop.f32.mrf.mxu1  ;;  %v8576_v31 = vld [vmem:[#allocation3 + $0x194] sm:$0xf0] }
 0x5f2   :  { %4467 = vst.msk [vmem:[#allocation3 + $0x1a8] sm:$0x7] %vm3429_vm2, %v4459_v35 }
 0x5f3   :  { %12868 = vst [vmem:[#allocation128_spill] sm:$0xff] %v11641_v48 }
 0x5f4   :  { %12870 = vst [vmem:[#allocation130_spill] sm:$0xff] %v11649_v55  ;;  %v12981_v55 = vld [vmem:[#allocation100_spill] sm:$0xff] }
 0x5f7   :  { %v4687_v61 = vpop.permute.xlu0 %4686  ;;  %v11638_v56 = vpop.f32.mrf.mxu2  ;;  %v8134_v38 = vld [vmem:[#allocation3 + $0x1b0] sm:$0xf] }
 0x5f8   :  { %4695 = vst.msk [vmem:[#allocation3 + $0x1c8] sm:$0x7] %vm3429_vm2, %v4687_v61  ;;  %v4457_v28 = vpop.permute.xlu1 %4456  ;;  %v4685_v51 = vpop.permute.xlu2 %4684  ;;  %v8574_v35 = vld [vmem:[#allocation3 + $0x184] sm:$0xf0]  ;;  %v8585_v61 = vld [vmem:[#allocation3 + $0x1e4] sm:$0xf] }
 0x5f9   :  { %4466 = vst.msk [vmem:[#allocation3 + $0x1a0] sm:$0xf] %vm3427_vm1, %v4457_v28  ;;  %v8110_v28 = vld [vmem:[#allocation3 + $0x180] sm:$0xf]  ;;  %v11660_v0 = vor.u32 %v8585_v61, %v8160_v46  ;;  %v8578_v61 = vld [vmem:[#allocation3 + $0x1a4] sm:$0xf0] }
 0x5fa   :  { %4694 = vst.msk [vmem:[#allocation3 + $0x1c0] sm:$0xf] %vm3427_vm1, %v4685_v51  ;;  %v11658_v51 = vor.u32 %v8574_v35, %v8110_v28 }
 0x5fb   :  { %5620 = vmatmul.bf16.gmra.mxu1 %v11626_v17  ;;  %6037 = vmatmul.bf16.gmra.mxu3 %v11626_v17  ;;  %12867 = vst [vmem:[#allocation127_spill] sm:$0xff] %v11638_v56  ;;  %v12965_v56 = vld [vmem:[#allocation40_spill] sm:$0xff] }
 0x5fc   :  { %8248 = vmatmul.msk.bf16.gmra.mxu2 %vm2497_vm5, %v11629_v54  ;;  %12874 = vst [vmem:[#allocation134_spill] sm:$0xff] %v11658_v51  ;;  %v12986_v54 = vld [vmem:[#allocation77_spill] sm:$0xff] }
 0x5fd   :  { %12875 = vst [vmem:[#allocation135_spill] sm:$0xff] %v11660_v0 }
 0x5ff   :  { %v4913_v43 = vpop.permute.xlu0 %4912  ;;  %v8582_v22 = vld [vmem:[#allocation3 + $0x1c4] sm:$0xf0] }
 0x600   :  { %4922 = vst.msk [vmem:[#allocation3 + $0x1e0] sm:$0xf] %vm3427_vm1, %v4913_v43  ;;  %v4573_v34 = vpop.permute.xlu1 %4572  ;;  %v4801_v2 = vpop.permute.xlu2 %4800 }
 0x601   :  { %4581 = vst.msk [vmem:[#allocation3 + $0x1b8] sm:$0x7] %vm3429_vm2, %v4573_v34  ;;  %v8587_v34 = vld [vmem:[#allocation3 + $0x1f4] sm:$0xf]  ;;  %v8142_v57 = vld [vmem:[#allocation3 + $0x1c0] sm:$0xf] }
 0x602   :  { %4809 = vst.msk [vmem:[#allocation3 + $0x1d8] sm:$0x7] %vm3429_vm2, %v4801_v2  ;;  %v11668_v2 = vpop.f32.mrf.mxu3  ;;  %v11672_v42 = vor.u32 %v8587_v34, %v8168_v18  ;;  %v8613_v34 = vld [vmem:[#allocation10 + $0xc0] sm:$0xff] }
 0x603   :  { %6407 = vmatpush.bf16.msra.mxu1 %v8613_v34 }
 0x604   :  { %12878 = vst [vmem:[#allocation138_spill] sm:$0xff] %v11672_v42 }
 0x608   :  { %v4799_v27 = vpop.permute.xlu1 %4798 }
 0x609   :  { %4808 = vst.msk [vmem:[#allocation3 + $0x1d0] sm:$0xf] %vm3427_vm1, %v4799_v27  ;;  %vm7310_vm1 = vsmask.f32 7942 }
 0x60a   :  { %v11682_v6 = vpop.f32.mrf.mxu3 }
 0x60b   :  { %5625 = vmatmul.bf16.gmra.mxu1 %v11641_v48  ;;  %6042 = vmatmul.bf16.gmra.mxu3 %v11641_v48  ;;  %12881 = vst [vmem:[#allocation141_spill] sm:$0xff] %v11682_v6  ;;  %v12975_v48 = vld [vmem:[#allocation53_spill] sm:$0xff] }
 0x60c   :  { %8249 = vmatmul.msk.bf16.gmra.mxu2 %vm2497_vm5, %v11643_v3 }
 0x60f   :  { %v11651_v32 = vpop.f32.mrf.mxu2 }
 0x610   :  { %12871 = vst [vmem:[#allocation131_spill] sm:$0xff] %v11651_v32  ;;  %v4915_v16 = vpop.permute.xlu1 %4914  ;;  %v12947_v32 = vld [vmem:[#allocation22_spill] sm:$0xff] }
 0x611   :  { %4923 = vst.msk [vmem:[#allocation3 + $0x1e8] sm:$0x7] %vm3429_vm2, %v4915_v16  ;;  %v8126_v16 = vld [vmem:[#allocation3 + $0x1a0] sm:$0xf]  ;;  %vm12262_vm2 = vmand %vm7309_vm12, %vm7310_vm1 }
 0x612   :  { %v11688_v46 = vor.u32 %v8578_v61, %v8126_v16 }
 0x614   :  { %12884 = vst [vmem:[#allocation144_spill] sm:$0xff] %v11688_v46 }
 0x617   :  { %v5611_v20 = vpop.f32.mrf.mxu1  ;;  %v11654_v44 = vpop.f32.mrf.mxu2 }
 0x618   :  { %12872 = vst [vmem:[#allocation132_spill] sm:$0xff] %v11654_v44  ;;  %v11656_v14 = vadd.f32 %v5772_v52, %v5611_v20  ;;  %v8118_v52 = vld [vmem:[#allocation3 + $0x190] sm:$0xf]  ;;  %v11686_v20 = vpop.f32.mrf.mxu3 }
 0x619   :  { %v11674_v29 = vor.u32 %v8576_v31, %v8118_v52  ;;  %12883 = vst [vmem:[#allocation143_spill] sm:$0xff] %v11686_v20  ;;  %v8580_v52 = vld [vmem:[#allocation3 + $0x1b4] sm:$0xf0] }
 0x61a   :  { %12873 = vst [vmem:[#allocation133_spill] sm:$0xff] %v11656_v14  ;;  %v11700_v36 = vor.u32 %v8580_v52, %v8134_v38  ;;  %v12971_v14 = vld [vmem:[#allocation48_spill] sm:$0xff] }
 0x61b   :  { %5630 = vmatmul.bf16.gmra.mxu1 %v11658_v51  ;;  %6047 = vmatmul.bf16.gmra.mxu3 %v11658_v51  ;;  %12879 = vst [vmem:[#allocation139_spill] sm:$0xff] %v11674_v29  ;;  %v12989_v20 = vld [vmem:[#allocation68_spill] sm:$0xff] }
 0x61c   :  { %8250 = vmatmul.msk.bf16.gmra.mxu2 %vm2497_vm5, %v11660_v0  ;;  %12888 = vst [vmem:[#allocation148_spill] sm:$0xff] %v11700_v36 }
 0x61f   :  { %v11666_v43 = vpop.f32.mrf.mxu2 }
 0x620   :  { %12876 = vst [vmem:[#allocation136_spill] sm:$0xff] %v11666_v43  ;;  %v11696_v18 = vpop.f32.mrf.mxu3 }
 0x621   :  { %12886 = vst [vmem:[#allocation146_spill] sm:$0xff] %v11696_v18 }
 0x627   :  { %v11670_v37 = vpop.f32.mrf.mxu2 }
 0x628   :  { %12877 = vst [vmem:[#allocation137_spill] sm:$0xff] %v11670_v37  ;;  %v11702_v16 = vpop.f32.mrf.mxu3 }
 0x629   :  { %12889 = vst [vmem:[#allocation149_spill] sm:$0xff] %v11702_v16 }
 0x62b   :  { %5635 = vmatmul.bf16.gmra.mxu1 %v11674_v29  ;;  %6052 = vmatmul.bf16.gmra.mxu3 %v11674_v29  ;;  %v8166_v29 = vld [vmem:[#allocation3 + $0x1f0] sm:$0xf] }
 0x62c   :  { %8251 = vmatmul.msk.bf16.gmra.mxu2 %vm2497_vm5, %v11672_v42 }
 0x62f   :  { %v11680_v27 = vpop.f32.mrf.mxu2 }
 0x630   :  { %12880 = vst [vmem:[#allocation140_spill] sm:$0xff] %v11680_v27  ;;  %v11710_v34 = vpop.f32.mrf.mxu3 }
 0x631   :  { %12891 = vst [vmem:[#allocation151_spill] sm:$0xff] %v11710_v34 }
 0x637   :  { %v11684_v35 = vpop.f32.mrf.mxu2 }
 0x638   :  { %12882 = vst [vmem:[#allocation142_spill] sm:$0xff] %v11684_v35  ;;  %v11718_v38 = vpop.f32.mrf.mxu3 }
 0x639   :  { %12894 = vst [vmem:[#allocation154_spill] sm:$0xff] %v11718_v38  ;;  %v11933_v38 = vld [vmem:[#allocation12] ss:$0 sm:$0xff] }
 0x63b   :  { %5640 = vmatmul.bf16.gmra.mxu1 %v11688_v46  ;;  %6057 = vmatmul.bf16.gmra.mxu3 %v11688_v46 }
 0x63c   :  { %8300 = vmatmul.msk.bf16.vlgmr.msra.gmra.mxu2 %vm2497_vm5, %v9299_v58 }
 0x63f   :  { %v11694_v28 = vpop.f32.mrf.mxu2 }
 0x640   :  { %12885 = vst [vmem:[#allocation145_spill] sm:$0xff] %v11694_v28  ;;  %v11726_v34 = vpop.f32.mrf.mxu3  ;;  %v8150_v28 = vld [vmem:[#allocation3 + $0x1d0] sm:$0xf] }
 0x641   :  { %12897 = vst [vmem:[#allocation157_spill] sm:$0xff] %v11726_v34 }
 0x647   :  { %v11698_v31 = vpop.f32.mrf.mxu2 }
 0x648   :  { %12887 = vst [vmem:[#allocation147_spill] sm:$0xff] %v11698_v31  ;;  %v11714_v31 = vor.u32 %v8582_v22, %v8142_v57  ;;  %v8584_v22 = vld [vmem:[#allocation3 + $0x1d4] sm:$0xf0] }
 0x64a   :  { %12893 = vst [vmem:[#allocation153_spill] sm:$0xff] %v11714_v31 }
 0x64b   :  { %5645 = vmatmul.bf16.gmra.mxu1 %v11700_v36  ;;  %6062 = vmatmul.bf16.gmra.mxu3 %v11700_v36 }
 0x64c   :  { %8301 = vmatmul.msk.bf16.gmra.mxu2 %vm2497_vm5, %v9601_v50 }
 0x64f   :  { %v11708_v61 = vpop.f32.mrf.mxu2 }
 0x650   :  { %12890 = vst [vmem:[#allocation150_spill] sm:$0xff] %v11708_v61  ;;  %v11724_v61 = vpop.f32.mrf.mxu1 }
 0x651   :  { %12896 = vst [vmem:[#allocation156_spill] sm:$0xff] %v11724_v61 }
 0x657   :  { %v11712_v18 = vpop.f32.mrf.mxu2 }
 0x658   :  { %12892 = vst [vmem:[#allocation152_spill] sm:$0xff] %v11712_v18  ;;  %v11732_v18 = vor.u32 %v8584_v22, %v8150_v28  ;;  %v8158_v22 = vld [vmem:[#allocation3 + $0x1e0] sm:$0xf] }
 0x65a   :  { %12900 = vst [vmem:[#allocation160_spill] sm:$0xff] %v11732_v18 }
 0x65b   :  { %5650 = vmatmul.bf16.gmra.mxu1 %v11714_v31  ;;  %6067 = vmatmul.bf16.gmra.mxu3 %v11714_v31  ;;  %v12901_v31 = vld [vmem:[#allocation23_spill] sm:$0xff] }
 0x65c   :  { %8302 = vmatmul.msk.bf16.gmra.mxu2 %vm2497_vm5, %v9737_v45 }
 0x65f   :  { %v11722_v52 = vpop.f32.mrf.mxu2 }
 0x660   :  { %12895 = vst [vmem:[#allocation155_spill] sm:$0xff] %v11722_v52 }
 0x667   :  { %v11728_v36 = vpop.f32.mrf.mxu2 }
 0x668   :  { %12898 = vst [vmem:[#allocation158_spill] sm:$0xff] %v11728_v36  ;;  %v11730_v57 = vpop.f32.mrf.mxu1  ;;  %v8586_v36 = vld [vmem:[#allocation3 + $0x1e4] sm:$0xf0] }
 0x669   :  { %12899 = vst [vmem:[#allocation159_spill] sm:$0xff] %v11730_v57  ;;  %v11750_v37 = vor.u32 %v8586_v36, %v8158_v22 }
 0x66b   :  { %5655 = vmatmul.bf16.gmra.mxu1 %v11732_v18  ;;  %6072 = vmatmul.bf16.gmra.mxu3 %v11732_v18  ;;  %12908 = vst [vmem:[#allocation166_spill] sm:$0xff] %v11750_v37  ;;  %v12909_v18 = vld [vmem:[#allocation29_spill] sm:$0xff] }
 0x66c   :  { %8303 = vmatmul.msk.bf16.gmra.mxu2 %vm2497_vm5, %v12901_v31 }
 0x66e   :  { %v11738_v52 = vpop.f32.mrf.mxu3 }
 0x66f   :  { %12902 = vst [vmem:[#allocation23_spill] sm:$0xff] %v11738_v52  ;;  %v11740_v35 = vpop.f32.mrf.mxu2 }
 0x670   :  { %12903 = vst [vmem:[#allocation161_spill] sm:$0xff] %v11740_v35  ;;  %v11742_v6 = vpop.f32.mrf.mxu1 }
 0x671   :  { %12904 = vst [vmem:[#allocation162_spill] sm:$0xff] %v11742_v6 }
 0x676   :  { %v11744_v27 = vpop.f32.mrf.mxu3 }
 0x677   :  { %12905 = vst [vmem:[#allocation163_spill] sm:$0xff] %v11744_v27  ;;  %v11746_v46 = vpop.f32.mrf.mxu2 }
 0x678   :  { %12906 = vst [vmem:[#allocation164_spill] sm:$0xff] %v11746_v46  ;;  %v11748_v28 = vpop.f32.mrf.mxu1  ;;  %v8588_v46 = vld [vmem:[#allocation3 + $0x1f4] sm:$0xf0] }
 0x679   :  { %12907 = vst [vmem:[#allocation165_spill] sm:$0xff] %v11748_v28  ;;  %v11766_v36 = vor.u32 %v8588_v46, %v8166_v29  ;;  %v12924_v46 = vld [vmem:[#allocation20_spill] sm:$0xff] }
 0x67b   :  { %5660 = vmatmul.bf16.gmra.mxu1 %v11750_v37  ;;  %6077 = vmatmul.bf16.gmra.mxu3 %v11750_v37  ;;  %12915 = vst [vmem:[#allocation171_spill] sm:$0xff] %v11766_v36  ;;  %v12917_v37 = vld [vmem:[#allocation33_spill] sm:$0xff] }
 0x67c   :  { %8304 = vmatmul.msk.bf16.gmra.mxu2 %vm2497_vm5, %v12909_v18 }
 0x67e   :  { %v11756_v35 = vpop.f32.mrf.mxu3 }
 0x67f   :  { %12910 = vst [vmem:[#allocation29_spill] sm:$0xff] %v11756_v35  ;;  %v11758_v43 = vpop.f32.mrf.mxu2 }
 0x680   :  { %12911 = vst [vmem:[#allocation167_spill] sm:$0xff] %v11758_v43  ;;  %v11760_v42 = vpop.f32.mrf.mxu1 }
 0x681   :  { %12912 = vst [vmem:[#allocation168_spill] sm:$0xff] %v11760_v42 }
 0x686   :  { %v11762_v44 = vpop.f32.mrf.mxu3 }
 0x687   :  { %12913 = vst [vmem:[#allocation169_spill] sm:$0xff] %v11762_v44  ;;  %v11764_v28 = vpop.f32.mrf.mxu2 }
 0x688   :  { %12914 = vst [vmem:[#allocation170_spill] sm:$0xff] %v11764_v28  ;;  %v11768_v22 = vpop.f32.mrf.mxu1 }
 0x689   :  { %12916 = vst [vmem:[#allocation172_spill] sm:$0xff] %v11768_v22 }
 0x68b   :  { %5663 = vmatmul.bf16.gmra.mxu1 %v11766_v36  ;;  %6082 = vmatmul.bf16.gmra.mxu3 %v11766_v36  ;;  %v12925_v36 = vld [vmem:[#allocation39_spill] sm:$0xff] }
 0x68c   :  { %8305 = vmatmul.msk.bf16.gmra.mxu2 %vm2497_vm5, %v12917_v37 }
 0x68e   :  { %v11774_v43 = vpop.f32.mrf.mxu3 }
 0x68f   :  { %12918 = vst [vmem:[#allocation33_spill] sm:$0xff] %v11774_v43  ;;  %v11776_v42 = vpop.f32.mrf.mxu2 }
 0x690   :  { %12919 = vst [vmem:[#allocation173_spill] sm:$0xff] %v11776_v42  ;;  %v11778_v6 = vpop.f32.mrf.mxu1 }
 0x691   :  { %12920 = vst [vmem:[#allocation174_spill] sm:$0xff] %v11778_v6 }
 0x696   :  { %v11780_v44 = vpop.f32.mrf.mxu3 }
 0x697   :  { %12921 = vst [vmem:[#allocation175_spill] sm:$0xff] %v11780_v44  ;;  %v11782_v28 = vpop.f32.mrf.mxu2 }
 0x698   :  { %12922 = vst [vmem:[#allocation176_spill] sm:$0xff] %v11782_v28  ;;  %v11784_v29 = vpop.f32.mrf.mxu1  ;;  %v12930_v28 = vld [vmem:[#allocation21_spill] sm:$0xff] }
 0x699   :  { %12923 = vst [vmem:[#allocation177_spill] sm:$0xff] %v11784_v29 }
 0x69b   :  { %6408 = vmatmul.bf16.vlgmr.msra.gmra.mxu1 %v12924_v46  ;;  %8380 = vmatmul.msk.bf16.vlgmr.msra.gmra.mxu3 %vm2497_vm5, %v9299_v58  ;;  %v12931_v46 = vld [vmem:[#allocation44_spill] sm:$0xff] }
 0x69c   :  { %8306 = vmatmul.msk.bf16.gmra.mxu2 %vm2497_vm5, %v12925_v36 }
 0x69e   :  { %v11791_v22 = vpop.f32.mrf.mxu3 }
 0x69f   :  { %12926 = vst [vmem:[#allocation20_spill] sm:$0xff] %v11791_v22  ;;  %v5822_v43 = vpop.f32.mrf.mxu2 }
 0x6a0   :  { %v11793_v42 = vpop.f32.mrf.mxu1 }
 0x6a1   :  { %12927 = vst [vmem:[#allocation39_spill] sm:$0xff] %v11793_v42 }
 0x6a6   :  { %v11795_v6 = vpop.f32.mrf.mxu3 }
 0x6a7   :  { %12928 = vst [vmem:[#allocation178_spill] sm:$0xff] %v11795_v6  ;;  %v5823_v44 = vpop.f32.mrf.mxu2 }
 0x6a8   :  { %v11797_v35 = vpop.f32.mrf.mxu1  ;;  %v12936_v44 = vld [vmem:[#allocation24_spill] sm:$0xff] }
 0x6a9   :  { %12929 = vst [vmem:[#allocation179_spill] sm:$0xff] %v11797_v35 }
 0x6ab   :  { %6411 = vmatmul.bf16.gmra.mxu1 %v12930_v28  ;;  %8381 = vmatmul.msk.bf16.gmra.mxu3 %vm2497_vm5, %v9601_v50  ;;  %v12937_v28 = vld [vmem:[#allocation49_spill] sm:$0xff] }
 0x6ac   :  { %8307 = vmatmul.msk.bf16.gmra.mxu2 %vm2497_vm5, %v12931_v46 }
 0x6ae   :  { %v11804_v58 = vpop.f32.mrf.mxu3 }
 0x6af   :  { %12932 = vst [vmem:[#allocation21_spill] sm:$0xff] %v11804_v58  ;;  %v5825_v29 = vpop.f32.mrf.mxu2 }
 0x6b0   :  { %v11806_v22 = vpop.f32.mrf.mxu1 }
 0x6b1   :  { %12933 = vst [vmem:[#allocation44_spill] sm:$0xff] %v11806_v22 }
 0x6b6   :  { %v11808_v43 = vpop.f32.mrf.mxu3 }
 0x6b7   :  { %12934 = vst [vmem:[#allocation180_spill] sm:$0xff] %v11808_v43  ;;  %v5826_v42 = vpop.f32.mrf.mxu2 }
 0x6b8   :  { %v11810_v6 = vpop.f32.mrf.mxu1  ;;  %v12942_v42 = vld [vmem:[#allocation25_spill] sm:$0xff] }
 0x6b9   :  { %12935 = vst [vmem:[#allocation181_spill] sm:$0xff] %v11810_v6 }
 0x6bb   :  { %6414 = vmatmul.bf16.gmra.mxu1 %v12936_v44  ;;  %8382 = vmatmul.msk.bf16.gmra.mxu3 %vm2497_vm5, %v9737_v45  ;;  %v12943_v44 = vld [vmem:[#allocation54_spill] sm:$0xff] }
 0x6bc   :  { %8308 = vmatmul.msk.bf16.gmra.mxu2 %vm2497_vm5, %v12937_v28 }
 0x6be   :  { %v11817_v50 = vpop.f32.mrf.mxu3 }
 0x6bf   :  { %12938 = vst [vmem:[#allocation24_spill] sm:$0xff] %v11817_v50  ;;  %v6095_v35 = vpop.f32.mrf.mxu2 }
 0x6c0   :  { %v11819_v58 = vpop.f32.mrf.mxu1  ;;  %v12946_v35 = vld [vmem:[#allocation76_spill] sm:$0xff] }
 0x6c1   :  { %12939 = vst [vmem:[#allocation49_spill] sm:$0xff] %v11819_v58 }
 0x6c6   :  { %v11821_v29 = vpop.f32.mrf.mxu3 }
 0x6c7   :  { %12940 = vst [vmem:[#allocation182_spill] sm:$0xff] %v11821_v29  ;;  %v6096_v22 = vpop.f32.mrf.mxu2 }
 0x6c8   :  { %v11823_v43 = vpop.f32.mrf.mxu1 }
 0x6c9   :  { %12941 = vst [vmem:[#allocation183_spill] sm:$0xff] %v11823_v43 }
 0x6cb   :  { %6419 = vmatmul.bf16.gmra.mxu1 %v12942_v42  ;;  %8383 = vmatmul.msk.bf16.gmra.mxu3 %vm2497_vm5, %v12901_v31  ;;  %v12950_v31 = vld [vmem:[#allocation32_spill] sm:$0xff] }
 0x6cc   :  { %8309 = vmatmul.msk.bf16.gmra.mxu2 %vm2497_vm5, %v12943_v44 }
 0x6ce   :  { %v11830_v45 = vpop.f32.mrf.mxu3 }
 0x6cf   :  { %12944 = vst [vmem:[#allocation25_spill] sm:$0xff] %v11830_v45  ;;  %v6098_v6 = vpop.f32.mrf.mxu2  ;;  %v12951_v45 = vld [vmem:[#allocation59_spill] sm:$0xff] }
 0x6d0   :  { %v11832_v50 = vpop.f32.mrf.mxu1  ;;  %v6099_v58 = vadd.f32 %v6098_v6, %v12946_v35 }
 0x6d1   :  { %12945 = vst [vmem:[#allocation54_spill] sm:$0xff] %v11832_v50 }
 0x6d2   :  { %v11836_v29 = vadd.f32 %v6099_v58, %v12947_v32  ;;  %v12954_v32 = vld [vmem:[#allocation79_spill] sm:$0xff] }
 0x6d6   :  { %v11838_v22 = vpop.f32.mrf.mxu3 }
 0x6d7   :  { %12948 = vst [vmem:[#allocation76_spill] sm:$0xff] %v11838_v22  ;;  %v11840_v43 = vpop.f32.mrf.mxu2  ;;  %v12955_v22 = vld [vmem:[#allocation28_spill] sm:$0xff] }
 0x6d8   :  { %v11842_v42 = vpop.f32.mrf.mxu1 }
 0x6d9   :  { %12949 = vst [vmem:[#allocation22_spill] sm:$0xff] %v11842_v42 }
 0x6db   :  { %6424 = vmatmul.bf16.gmra.mxu1 %v12950_v31  ;;  %8384 = vmatmul.msk.bf16.gmra.mxu3 %vm2497_vm5, %v12909_v18  ;;  %v12958_v18 = vld [vmem:[#allocation38_spill] sm:$0xff] }
 0x6dc   :  { %8310 = vmatmul.msk.bf16.gmra.mxu2 %vm2497_vm5, %v12951_v45 }
 0x6de   :  { %v11849_v50 = vpop.f32.mrf.mxu3 }
 0x6df   :  { %12952 = vst [vmem:[#allocation32_spill] sm:$0xff] %v11849_v50  ;;  %v6103_v6 = vpop.f32.mrf.mxu2  ;;  %v12959_v50 = vld [vmem:[#allocation64_spill] sm:$0xff] }
 0x6e0   :  { %v11851_v35 = vpop.f32.mrf.mxu1  ;;  %v6104_v58 = vadd.f32 %v6103_v6, %v12954_v32 }
 0x6e1   :  { %12953 = vst [vmem:[#allocation59_spill] sm:$0xff] %v11851_v35 }
 0x6e2   :  { %v11855_v57 = vadd.f32 %v6104_v58, %v12955_v22  ;;  %v12962_v22 = vld [vmem:[#allocation83_spill] sm:$0xff] }
 0x6e6   :  { %v11857_v0 = vpop.f32.mrf.mxu3 }
 0x6e7   :  { %12956 = vst [vmem:[#allocation79_spill] sm:$0xff] %v11857_v0  ;;  %v11859_v42 = vpop.f32.mrf.mxu2  ;;  %v12963_v0 = vld [vmem:[#allocation34_spill] sm:$0xff] }
 0x6e8   :  { %v11861_v31 = vpop.f32.mrf.mxu1 }
 0x6e9   :  { %12957 = vst [vmem:[#allocation28_spill] sm:$0xff] %v11861_v31 }
 0x6eb   :  { %6429 = vmatmul.bf16.gmra.mxu1 %v12958_v18  ;;  %8385 = vmatmul.msk.bf16.gmra.mxu3 %vm2497_vm5, %v12917_v37  ;;  %v12966_v37 = vld [vmem:[#allocation69_spill] sm:$0xff] }
 0x6ec   :  { %8311 = vmatmul.msk.bf16.gmra.mxu2 %vm2497_vm5, %v12959_v50 }
 0x6ee   :  { %v11868_v35 = vpop.f32.mrf.mxu3 }
 0x6ef   :  { %12960 = vst [vmem:[#allocation38_spill] sm:$0xff] %v11868_v35  ;;  %v6108_v6 = vpop.f32.mrf.mxu2 }
 0x6f0   :  { %v11870_v32 = vpop.f32.mrf.mxu1  ;;  %v6109_v58 = vadd.f32 %v6108_v6, %v12962_v22  ;;  %v12968_v22 = vld [vmem:[#allocation88_spill] sm:$0xff] }
 0x6f1   :  { %12961 = vst [vmem:[#allocation64_spill] sm:$0xff] %v11870_v32 }
 0x6f2   :  { %v11874_v51 = vadd.f32 %v6109_v58, %v12963_v0  ;;  %v12969_v58 = vld [vmem:[#allocation37_spill] sm:$0xff] }
 0x6f6   :  { %v11876_v27 = vpop.f32.mrf.mxu3 }
 0x6f7   :  { %12964 = vst [vmem:[#allocation83_spill] sm:$0xff] %v11876_v27  ;;  %v11878_v31 = vpop.f32.mrf.mxu2 }
 0x6f8   :  { %v5661_v18 = vpop.f32.mrf.mxu1 }
 0x6fb   :  { %6434 = vmatmul.bf16.gmra.mxu1 %v12965_v56  ;;  %8386 = vmatmul.msk.bf16.gmra.mxu3 %vm2497_vm5, %v12925_v36  ;;  %v12972_v36 = vld [vmem:[#allocation74_spill] sm:$0xff] }
 0x6fc   :  { %8312 = vmatmul.msk.bf16.gmra.mxu2 %vm2497_vm5, %v12966_v37 }
 0x6fe   :  { %v11885_v35 = vpop.f32.mrf.mxu3 }
 0x6ff   :  { %12967 = vst [vmem:[#allocation34_spill] sm:$0xff] %v11885_v35  ;;  %v6113_v32 = vpop.f32.mrf.mxu2 }
 0x700   :  { %v5662_v6 = vpop.f32.mrf.mxu1  ;;  %v6114_v0 = vadd.f32 %v6113_v32, %v12968_v22  ;;  %v12973_v32 = vld [vmem:[#allocation90_spill] sm:$0xff] }
 0x702   :  { %v11889_v61 = vadd.f32 %v6114_v0, %v12969_v58  ;;  %v12974_v0 = vld [vmem:[#allocation43_spill] sm:$0xff] }
 0x706   :  { %v11891_v27 = vpop.f32.mrf.mxu3 }
 0x707   :  { %12970 = vst [vmem:[#allocation40_spill] sm:$0xff] %v11891_v27  ;;  %v11893_v18 = vpop.f32.mrf.mxu2 }
 0x708   :  { %v5664_v56 = vpop.f32.mrf.mxu1 }
 0x70b   :  { %6439 = vmatmul.bf16.gmra.mxu1 %v12971_v14  ;;  %8387 = vmatmul.msk.bf16.gmra.mxu3 %vm2497_vm5, %v12931_v46  ;;  %v12976_v14 = vld [vmem:[#allocation75_spill] sm:$0xff] }
 0x70c   :  { %8313 = vmatmul.msk.bf16.gmra.mxu2 %vm2497_vm5, %v12972_v36 }
 0x70e   :  { %v6083_v35 = vpop.f32.mrf.mxu3 }
 0x70f   :  { %v6118_v6 = vpop.f32.mrf.mxu2 }
 0x710   :  { %v5665_v52 = vpop.f32.mrf.mxu1  ;;  %v6119_v22 = vadd.f32 %v6118_v6, %v12973_v32  ;;  %v12978_v32 = vld [vmem:[#allocation47_spill] sm:$0xff] }
 0x711   :  { %v12977_v52 = vld [vmem:[#allocation95_spill] sm:$0xff] }
 0x712   :  { %v11902_v58 = vadd.f32 %v6119_v22, %v12974_v0 }
 0x716   :  { %v6084_v27 = vpop.f32.mrf.mxu3 }
 0x717   :  { %v11904_v3 = vpop.f32.mrf.mxu2 }
 0x718   :  { %v6409_v56 = vpop.f32.mrf.mxu1 }
 0x71b   :  { %6444 = vmatmul.bf16.gmra.mxu1 %v12975_v48  ;;  %8388 = vmatmul.msk.bf16.gmra.mxu3 %vm2497_vm5, %v12937_v28  ;;  %v12980_v48 = vld [vmem:[#allocation78_spill] sm:$0xff] }
 0x71c   :  { %8314 = vmatmul.msk.bf16.gmra.mxu2 %vm2497_vm5, %v12976_v14 }
 0x71e   :  { %v6570_v46 = vpop.f32.mrf.mxu3 }
 0x71f   :  { %v6123_v35 = vpop.f32.mrf.mxu2 }
 0x720   :  { %v6124_v34 = vadd.f32 %v6123_v35, %v12977_v52  ;;  %v6410_v6 = vpop.f32.mrf.mxu1 }
 0x721   :  { %v12982_v6 = vld [vmem:[#allocation52_spill] sm:$0xff] }
 0x722   :  { %v11913_v22 = vadd.f32 %v6124_v34, %v12978_v32 }
 0x726   :  { %v6571_v27 = vpop.f32.mrf.mxu3 }
 0x727   :  { %v11915_v0 = vpop.f32.mrf.mxu2 }
 0x728   :  { %v6412_v56 = vpop.f32.mrf.mxu1 }
 0x72b   :  { %6449 = vmatmul.bf16.gmra.mxu1 %v12979_v9  ;;  %8389 = vmatmul.msk.bf16.gmra.mxu3 %vm2497_vm5, %v12943_v44  ;;  %v12984_v9 = vld [vmem:[#allocation86_spill] sm:$0xff] }
 0x72c   :  { %8315 = vmatmul.msk.bf16.gmra.mxu2 %vm2497_vm5, %v12980_v48 }
 0x72e   :  { %v6573_v28 = vpop.f32.mrf.mxu3 }
 0x72f   :  { %v6128_v46 = vpop.f32.mrf.mxu2 }
 0x730   :  { %v6129_v35 = vadd.f32 %v6128_v46, %v12981_v55  ;;  %v6413_v52 = vpop.f32.mrf.mxu1 }
 0x732   :  { %v11924_v34 = vadd.f32 %v6129_v35, %v12982_v6  ;;  %v11937_v6 = vld [vmem:[#allocation13] ss:$0 sm:$0xff] }
 0x736   :  { %v6574_v32 = vpop.f32.mrf.mxu3 }
 0x737   :  { %v11926_v27 = vpop.f32.mrf.mxu2  ;;  %v12985_v32 = vld [vmem:[#allocation58_spill] sm:$0xff] }
 0x738   :  { %v6415_v56 = vpop.f32.mrf.mxu1 }
 0x73b   :  { %6454 = vmatmul.bf16.gmra.mxu1 %v12983_v7  ;;  %8390 = vmatmul.msk.bf16.gmra.mxu3 %vm2497_vm5, %v12951_v45  ;;  %v6101_v45 = vadd.f32 %v11840_v43, %v12986_v54  ;;  %v12990_v54 = vld [vmem:[#allocation99_spill] sm:$0xff] }
 0x73c   :  { %8316 = vmatmul.msk.bf16.gmra.mxu2 %vm2497_vm5, %v12984_v9 }
 0x73e   :  { %v6576_v44 = vpop.f32.mrf.mxu3 }
 0x73f   :  { %v6577_v28 = vadd.f32 %v6576_v44, %v6415_v56  ;;  %v6133_v55 = vpop.f32.mrf.mxu2  ;;  %v12988_v56 = vld [vmem:[#allocation27_spill] sm:$0xff] }
 0x740   :  { %v6134_v46 = vadd.f32 %v6133_v55, %v11079_v63  ;;  %v6417_v35 = vpop.f32.mrf.mxu1  ;;  %v5679_v44 = vadd.f32 %v12988_v56, %v12987_v40  ;;  %v12992_v56 = vld [vmem:[#allocation80_spill] sm:$0xff] }
 0x741   :  { %v6722_v52 = vadd.f32 %v6577_v28, %v11836_v29 }
 0x742   :  { %v11940_v7 = vadd.f32 %v6134_v46, %v12985_v32  ;;  %v6248_v63 = vadd.f32 %v6101_v45, %v5679_v44  ;;  %v12991_v45 = vld [vmem:[#allocation62_spill] sm:$0xff] }
 0x743   :  { %v6782_v17 = vmul.f32 %v11933_v38, %v6722_v52 }
 0x745   :  { %v6842_v16 = vadd.f32 %v11937_v6, %v6782_v17 }
 0x746   :  { %v6578_v10 = vpop.f32.mrf.mxu3 }
 0x747   :  { %v6898_v55 = vmax.f32 %v6842_v16, 0.0  ;;  %v6579_v53 = vadd.f32 %v6578_v10, %v6417_v35  ;;  %v11948_v29 = vpop.f32.mrf.mxu2 }
 0x748   :  { %v6420_v28 = vpop.f32.mrf.mxu1 }
 0x749   :  { %6954 = vst [vmem:[#allocation4] sm:$0xff] %v6898_v55  ;;  %v6723_v46 = vadd.f32 %v6579_v53, %v6248_v63  ;;  %v12993_v63 = vld [vmem:[#allocation31_spill] sm:$0xff]  ;;  %v12994_v55 = vld [vmem:[#allocation30_spill] sm:$0xff] }
 0x74b   :  { %v6783_v32 = vmul.f32 %v11933_v38, %v6723_v46  ;;  %6459 = vmatmul.bf16.gmra.mxu1 %v12989_v20  ;;  %8391 = vmatmul.msk.bf16.gmra.mxu3 %vm2497_vm5, %v12959_v50  ;;  %v6106_v50 = vadd.f32 %v11859_v42, %v12992_v56  ;;  %v5684_v46 = vadd.f32 %v12994_v55, %v12993_v63  ;;  %v12996_v55 = vld [vmem:[#allocation67_spill] sm:$0xff] }
 0x74c   :  { %8317 = vmatmul.msk.bf16.gmra.mxu2 %vm2497_vm5, %v12990_v54 }
 0x74d   :  { %v6843_v40 = vadd.f32 %v11937_v6, %v6783_v32 }
 0x74e   :  { %v6581_v17 = vpop.f32.mrf.mxu3 }
 0x74f   :  { %v6899_v16 = vmax.f32 %v6843_v40, 0.0  ;;  %v6582_v10 = vadd.f32 %v6581_v17, %v6420_v28  ;;  %v6138_v43 = vpop.f32.mrf.mxu2  ;;  %v6250_v40 = vadd.f32 %v6106_v50, %v5684_v46 }
 0x750   :  { %v6139_v35 = vadd.f32 %v6138_v43, %v11189_v1  ;;  %v6422_v52 = vpop.f32.mrf.mxu1 }
 0x751   :  { %6955 = vst [vmem:[#allocation4 + $0x8] sm:$0xff] %v6899_v16  ;;  %v6724_v53 = vadd.f32 %v6582_v10, %v11855_v57 }
 0x752   :  { %v11960_v20 = vadd.f32 %v6139_v35, %v12991_v45  ;;  %v12995_v35 = vld [vmem:[#allocation70_spill] sm:$0xff] }
 0x753   :  { %v6784_v44 = vmul.f32 %v11933_v38, %v6724_v53 }
 0x755   :  { %v6844_v28 = vadd.f32 %v11937_v6, %v6784_v44 }
 0x756   :  { %v6583_v32 = vpop.f32.mrf.mxu3 }
 0x757   :  { %v6900_v1 = vmax.f32 %v6844_v28, 0.0  ;;  %v6584_v17 = vadd.f32 %v6583_v32, %v6422_v52  ;;  %v11968_v16 = vpop.f32.mrf.mxu2  ;;  %v12997_v28 = vld [vmem:[#allocation87_spill] sm:$0xff] }
 0x758   :  { %v6425_v57 = vpop.f32.mrf.mxu1 }
 0x759   :  { %6956 = vst [vmem:[#allocation4 + $0x10] sm:$0xff] %v6900_v1  ;;  %v6725_v10 = vadd.f32 %v6584_v17, %v6250_v40  ;;  %v12998_v40 = vld [vmem:[#allocation36_spill] sm:$0xff]  ;;  %v12999_v1 = vld [vmem:[#allocation35_spill] sm:$0xff] }
 0x75a   :  { %v5689_v17 = vadd.f32 %v12999_v1, %v12998_v40  ;;  %v13000_v40 = vld [vmem:[#allocation85_spill] sm:$0xff] }
 0x75b   :  { %v6785_v43 = vmul.f32 %v11933_v38, %v6725_v10  ;;  %6464 = vmatmul.bf16.gmra.mxu1 %v12995_v35  ;;  %8392 = vmatmul.msk.bf16.gmra.mxu3 %vm2497_vm5, %v12966_v37  ;;  %v6111_v37 = vadd.f32 %v11878_v31, %v12997_v28  ;;  %v7010_v10 = vld [vmem:[#allocation4] ss:$2 sm:$0xff] }
 0x75c   :  { %8318 = vmatmul.msk.bf16.gmra.mxu2 %vm2497_vm5, %v11269_v49 }
 0x75d   :  { %v6845_v42 = vadd.f32 %v11937_v6, %v6785_v43  ;;  %v7066_v43 = vld [vmem:[#allocation4 + $0x1] ss:$2 sm:$0xff]  ;;  %v6252_v35 = vadd.f32 %v6111_v37, %v5689_v17 }
 0x75e   :  { %v6586_v53 = vpop.f32.mrf.mxu3 }
 0x75f   :  { %v6901_v45 = vmax.f32 %v6845_v42, 0.0  ;;  %v6587_v52 = vadd.f32 %v6586_v53, %v6425_v57  ;;  %v6143_v56 = vpop.f32.mrf.mxu2 }
 0x760   :  { %v6144_v50 = vadd.f32 %v6143_v56, %v11258_v12  ;;  %v6427_v44 = vpop.f32.mrf.mxu1 }
 0x761   :  { %6957 = vst [vmem:[#allocation4 + $0x18] sm:$0xff] %v6901_v45  ;;  %v6726_v63 = vadd.f32 %v6587_v52, %v11874_v51 }
 0x762   :  { %v11980_v46 = vadd.f32 %v6144_v50, %v12996_v55  ;;  %v7121_v50 = vmax.f32 %v7010_v10, %v7066_v43 }
 0x763   :  { %v6786_v32 = vmul.f32 %v11933_v38, %v6726_v63 }
 0x765   :  { %v6846_v57 = vadd.f32 %v11937_v6, %v6786_v32 }
 0x766   :  { %v6588_v12 = vpop.f32.mrf.mxu3 }
 0x767   :  { %v6902_v42 = vmax.f32 %v6846_v57, 0.0  ;;  %v6589_v53 = vadd.f32 %v6588_v12, %v6427_v44  ;;  %v11988_v51 = vpop.f32.mrf.mxu2  ;;  %v7155_v44 = vld [vmem:[%s12605_s7] sm:$0xf] }
 0x768   :  { %v7012_v45 = vld [vmem:[#allocation4 + $0x10] ss:$2 sm:$0xff]  ;;  %v7068_v52 = vld [vmem:[#allocation4 + $0x11] ss:$2 sm:$0xff]  ;;  %v6430_v56 = vpop.f32.mrf.mxu1 }
 0x769   :  { %v7122_v31 = vmax.f32 %v7012_v45, %v7068_v52  ;;  %6958 = vst [vmem:[#allocation4 + $0x20] sm:$0xff] %v6902_v42  ;;  %v6727_v63 = vadd.f32 %v6589_v53, %v6252_v35  ;;  %v13002_v53 = vld [vmem:[#allocation73_spill] sm:$0xff] }
 0x76a   :  { %v13003_v52 = vld [vmem:[#allocation89_spill] sm:$0xff] }
 0x76b   :  { %v7149_v55 = vmax.f32 %v7121_v50, %v7122_v31  ;;  %v6787_v28 = vmul.f32 %v11933_v38, %v6727_v63  ;;  %6469 = vmatmul.bf16.gmra.mxu1 %v13000_v40  ;;  %8393 = vmatmul.msk.bf16.gmra.mxu3 %vm2497_vm5, %v12972_v36  ;;  %v6116_v50 = vadd.f32 %v11893_v18, %v13003_v52  ;;  %v13005_v63 = vld [vmem:[#allocation41_spill] sm:$0xff] }
 0x76c   :  { %8319 = vmatmul.msk.bf16.gmra.mxu2 %vm2497_vm5, %v11402_v39 }
 0x76d   :  { %v7151_v37 = vpack.c.bf16 %v7149_v55, %v7149_v55  ;;  %v6847_v32 = vadd.f32 %v11937_v6, %v6787_v28 }
 0x76e   :  { %v6591_v1 = vpop.f32.mrf.mxu3 }
 0x76f   :  { %v7156_v57 = vsel %vm8881_vm3, %v7151_v37, %v7155_v44  ;;  %v6903_v10 = vmax.f32 %v6847_v32, 0.0  ;;  %v6592_v43 = vadd.f32 %v6591_v1, %v6430_v56  ;;  %v6148_v12 = vpop.f32.mrf.mxu2  ;;  %v13004_v56 = vld [vmem:[#allocation42_spill] sm:$0xff] }
 0x770   :  { %7157 = vst [vmem:[%s12605_s7] sm:$0xf] %v7156_v57  ;;  %v6149_v36 = vadd.f32 %v6148_v12, %v11285_v4  ;;  %v6432_v35 = vpop.f32.mrf.mxu1  ;;  %v5694_v55 = vadd.f32 %v13005_v63, %v13004_v56  ;;  %v13008_v56 = vld [vmem:[#allocation93_spill] sm:$0xff] }
 0x771   :  { %6959 = vst [vmem:[#allocation4 + $0x28] sm:$0xff] %v6903_v10  ;;  %v6728_v42 = vadd.f32 %v6592_v43, %v11889_v61  ;;  %v13006_v10 = vld [vmem:[#allocation97_spill] sm:$0xff] }
 0x772   :  { %v12008_v45 = vadd.f32 %v6149_v36, %v13002_v53  ;;  %v6254_v44 = vadd.f32 %v6116_v50, %v5694_v55  ;;  %v13007_v50 = vld [vmem:[#allocation84_spill] sm:$0xff]  ;;  %v13009_v55 = vld [vmem:[#allocation46_spill] sm:$0xff] }
 0x773   :  { %v6788_v31 = vmul.f32 %v11933_v38, %v6728_v42 }
 0x775   :  { %v6848_v28 = vadd.f32 %v11937_v6, %v6788_v31 }
 0x776   :  { %v6593_v40 = vpop.f32.mrf.mxu3 }
 0x777   :  { %v6904_v4 = vmax.f32 %v6848_v28, 0.0  ;;  %v6594_v37 = vadd.f32 %v6593_v40, %v6432_v35  ;;  %v12016_v32 = vpop.f32.mrf.mxu2  ;;  %v13010_v28 = vld [vmem:[#allocation45_spill] sm:$0xff] }
 0x778   :  { %v6435_v61 = vpop.f32.mrf.mxu1  ;;  %v5699_v40 = vadd.f32 %v13010_v28, %v13009_v55 }
 0x779   :  { %6960 = vst [vmem:[#allocation4 + $0x30] sm:$0xff] %v6904_v4  ;;  %v6729_v1 = vadd.f32 %v6594_v37, %v6254_v44  ;;  %v7014_v4 = vld [vmem:[#allocation4 + $0x20] ss:$2 sm:$0xff]  ;;  %v7070_v37 = vld [vmem:[#allocation4 + $0x21] ss:$2 sm:$0xff] }
 0x77b   :  { %v6789_v57 = vmul.f32 %v11933_v38, %v6729_v1  ;;  %6474 = vmatmul.bf16.gmra.mxu1 %v13006_v10  ;;  %8394 = vmatmul.msk.bf16.gmra.mxu3 %vm2497_vm5, %v12976_v14  ;;  %v6121_v14 = vadd.f32 %v11904_v3, %v13008_v56 }
 0x77c   :  { %8320 = vmatmul.msk.bf16.gmra.mxu2 %vm2497_vm5, %v11478_v15 }
 0x77d   :  { %v6849_v18 = vadd.f32 %v11937_v6, %v6789_v57 }
 0x77e   :  { %v6596_v43 = vpop.f32.mrf.mxu3 }
 0x77f   :  { %v6905_v12 = vmax.f32 %v6849_v18, 0.0  ;;  %v6597_v36 = vadd.f32 %v6596_v43, %v6435_v61  ;;  %v6153_v35 = vpop.f32.mrf.mxu2  ;;  %v6256_v61 = vadd.f32 %v6121_v14, %v5699_v40  ;;  %v13137_v40 = vld [vmem:[#allocation170_spill] sm:$0xff] }
 0x780   :  { %v6154_v42 = vadd.f32 %v6153_v35, %v11302_v26  ;;  %v6437_v53 = vpop.f32.mrf.mxu1 }
 0x781   :  { %6961 = vst [vmem:[#allocation4 + $0x38] sm:$0xff] %v6905_v12  ;;  %v6730_v52 = vadd.f32 %v6597_v36, %v11902_v58  ;;  %v7123_v12 = vmax.f32 %v7014_v4, %v7070_v37 }
 0x782   :  { %v12028_v31 = vadd.f32 %v6154_v42, %v13007_v50 }
 0x783   :  { %v6790_v63 = vmul.f32 %v11933_v38, %v6730_v52 }
 0x785   :  { %v6850_v44 = vadd.f32 %v11937_v6, %v6790_v63 }
 0x786   :  { %v6598_v26 = vpop.f32.mrf.mxu3 }
 0x787   :  { %v6906_v1 = vmax.f32 %v6850_v44, 0.0  ;;  %v6599_v57 = vadd.f32 %v6598_v26, %v6437_v53  ;;  %v12036_v58 = vpop.f32.mrf.mxu2  ;;  %v7189_v26 = vld [vmem:[%s12605_s7] sm:$0x8] }
 0x788   :  { %v7016_v10 = vld [vmem:[#allocation4 + $0x30] ss:$2 sm:$0xff]  ;;  %v7072_v18 = vld [vmem:[#allocation4 + $0x31] ss:$2 sm:$0xff]  ;;  %v6440_v43 = vpop.f32.mrf.mxu1 }
 0x789   :  { %v7124_v3 = vmax.f32 %v7016_v10, %v7072_v18  ;;  %6962 = vst [vmem:[#allocation4 + $0x40] sm:$0xff] %v6906_v1  ;;  %v6731_v36 = vadd.f32 %v6599_v57, %v6256_v61  ;;  %v13013_v61 = vld [vmem:[#allocation94_spill] sm:$0xff]  ;;  %v13014_v57 = vld [vmem:[#allocation96_spill] sm:$0xff] }
 0x78a   :  { %v6126_v10 = vadd.f32 %v11915_v0, %v13014_v57 }
 0x78b   :  { %v7161_v35 = vmax.f32 %v7123_v12, %v7124_v3  ;;  %v6791_v42 = vmul.f32 %v11933_v38, %v6731_v36  ;;  %6479 = vmatmul.bf16.gmra.mxu1 %v11025_v5  ;;  %8395 = vmatmul.msk.bf16.gmra.mxu3 %vm2497_vm5, %v12980_v48  ;;  %v13016_v12 = vld [vmem:[#allocation50_spill] sm:$0xff] }
 0x78c   :  { %8321 = vmatmul.msk.bf16.gmra.mxu2 %vm2497_vm5, %v11530_v33 }
 0x78d   :  { %v7163_v53 = vpack.c.bf16 %v7161_v35, %v7161_v35  ;;  %v6851_v52 = vadd.f32 %v11937_v6, %v6791_v42 }
 0x78e   :  { %v6601_v50 = vpop.f32.mrf.mxu3 }
 0x78f   :  { %v7166_v56 = vshll.u32 %v7163_v53, 16  ;;  %v7169_v14 = vshrl.u32 %v7163_v53, 16  ;;  %v6907_v63 = vmax.f32 %v6851_v52, 0.0  ;;  %v6602_v55 = vadd.f32 %v6601_v50, %v6440_v43  ;;  %v6158_v28 = vpop.f32.mrf.mxu2 }
 0x790   :  { %v6159_v5 = vadd.f32 %v6158_v28, %v11361_v62  ;;  %v6442_v48 = vpop.f32.mrf.mxu1 }
 0x791   :  { %v7168_v44 = vrot.slane %v7166_v56, 5  ;;  %v7171_v4 = vrot.slane %v7169_v14, 4  ;;  %6963 = vst [vmem:[#allocation4 + $0x48] sm:$0xff] %v6907_v63  ;;  %v6732_v37 = vadd.f32 %v6602_v55, %v11913_v22  ;;  %v13015_v22 = vld [vmem:[#allocation51_spill] sm:$0xff] }
 0x792   :  { %v12056_v1 = vadd.f32 %v6159_v5, %v13013_v61  ;;  %v5704_v3 = vadd.f32 %v13016_v12, %v13015_v22  ;;  %v13017_v61 = vld [vmem:[#allocation101_spill] sm:$0xff] }
 0x793   :  { %v7172_v18 = vor.u32 %v7171_v4, %v7168_v44  ;;  %v7190_v62 = vsel %vm12046_vm10, %v7168_v44, %v7189_v26  ;;  %v6792_v43 = vmul.f32 %v11933_v38, %v6732_v37 }
 0x794   :  { %7191 = vst [vmem:[%s12605_s7] sm:$0x8] %v7190_v62  ;;  %v6258_v53 = vadd.f32 %v6126_v10, %v5704_v3  ;;  %v13018_v10 = vld [vmem:[#allocation57_spill] sm:$0xff] }
 0x795   :  { %v7173_v36 = vrot.slane %v7172_v18, 4  ;;  %v6852_v35 = vadd.f32 %v11937_v6, %v6792_v43  ;;  %v13019_v18 = vld [vmem:[#allocation56_spill] sm:$0xff] }
 0x796   :  { %v6603_v42 = vpop.f32.mrf.mxu3  ;;  %v5709_v62 = vadd.f32 %v13019_v18, %v13018_v10  ;;  %v13023_v10 = vld [vmem:[#allocation103_spill] sm:$0xff] }
 0x797   :  { %7192 = vst [vmem:[%s12605_s7 + $0x4] sm:$0x7] %v7173_v36  ;;  %v6908_v0 = vmax.f32 %v6852_v35, 0.0  ;;  %v6604_v52 = vadd.f32 %v6603_v42, %v6442_v48  ;;  %v12072_v50 = vpop.f32.mrf.mxu2  ;;  %v6136_v18 = vadd.f32 %v11948_v29, %v13023_v10 }
 0x798   :  { %v6445_v56 = vpop.f32.mrf.mxu1  ;;  %v7018_v22 = vld [vmem:[#allocation4 + $0x40] ss:$2 sm:$0xff]  ;;  %v7074_v12 = vld [vmem:[#allocation4 + $0x41] ss:$2 sm:$0xff] }
 0x799   :  { %6964 = vst [vmem:[#allocation4 + $0x50] sm:$0xff] %v6908_v0  ;;  %v6733_v14 = vadd.f32 %v6604_v52, %v6258_v53  ;;  %v7125_v0 = vmax.f32 %v7018_v22, %v7074_v12  ;;  %v13024_v22 = vld [vmem:[#allocation61_spill] sm:$0xff]  ;;  %v13025_v12 = vld [vmem:[#allocation60_spill] sm:$0xff] }
 0x79b   :  { %v6793_v63 = vmul.f32 %v11933_v38, %v6733_v14  ;;  %6484 = vmatmul.bf16.gmra.mxu1 %v11115_v11  ;;  %8396 = vmatmul.msk.bf16.gmra.mxu3 %vm2497_vm5, %v12984_v9  ;;  %v6131_v9 = vadd.f32 %v11926_v27, %v13017_v61 }
 0x79c   :  { %8322 = vmatmul.msk.bf16.gmra.mxu2 %vm2497_vm5, %v11555_v60 }
 0x79d   :  { %v6853_v55 = vadd.f32 %v11937_v6, %v6793_v63  ;;  %v6260_v3 = vadd.f32 %v6131_v9, %v5709_v62  ;;  %v13020_v63 = vld [vmem:[#allocation104_spill] sm:$0xff] }
 0x79e   :  { %v6606_v28 = vpop.f32.mrf.mxu3 }
 0x79f   :  { %v6909_v5 = vmax.f32 %v6853_v55, 0.0  ;;  %v6607_v48 = vadd.f32 %v6606_v28, %v6445_v56  ;;  %v6163_v44 = vpop.f32.mrf.mxu2 }
 0x7a0   :  { %v6164_v4 = vadd.f32 %v6163_v44, %v11407_v59  ;;  %v6447_v37 = vpop.f32.mrf.mxu1 }
 0x7a1   :  { %6965 = vst [vmem:[#allocation4 + $0x58] sm:$0xff] %v6909_v5  ;;  %v6734_v26 = vadd.f32 %v6607_v48, %v11924_v34 }
 0x7a2   :  { %v12084_v11 = vadd.f32 %v6164_v4, %v11264_v47 }
 0x7a3   :  { %v6794_v57 = vmul.f32 %v11933_v38, %v6734_v26 }
 0x7a5   :  { %v6854_v43 = vadd.f32 %v11937_v6, %v6794_v57 }
 0x7a6   :  { %v6608_v59 = vpop.f32.mrf.mxu3 }
 0x7a7   :  { %v6910_v36 = vmax.f32 %v6854_v43, 0.0  ;;  %v6609_v35 = vadd.f32 %v6608_v59, %v6447_v37  ;;  %v12092_v34 = vpop.f32.mrf.mxu2  ;;  %v5714_v59 = vadd.f32 %v13025_v12, %v13024_v22 }
 0x7a8   :  { %v7020_v47 = vld [vmem:[#allocation4 + $0x50] ss:$2 sm:$0xff]  ;;  %v7076_v42 = vld [vmem:[#allocation4 + $0x51] ss:$2 sm:$0xff]  ;;  %v6450_v53 = vpop.f32.mrf.mxu1 }
 0x7a9   :  { %v7126_v27 = vmax.f32 %v7020_v47, %v7076_v42  ;;  %6966 = vst [vmem:[#allocation4 + $0x60] sm:$0xff] %v6910_v36  ;;  %v6735_v52 = vadd.f32 %v6609_v35, %v6260_v3 }
 0x7ab   :  { %v7197_v56 = vmax.f32 %v7125_v0, %v7126_v27  ;;  %v6795_v14 = vmul.f32 %v11933_v38, %v6735_v52  ;;  %6487 = vmatmul.bf16.gmra.mxu1 %v13020_v63  ;;  %8397 = vmatmul.msk.bf16.gmra.mxu3 %vm2497_vm5, %v12990_v54  ;;  %v7214_v54 = vld [vmem:[%s12605_s7 + $0x8] sm:$0x7] }
 0x7ac   :  { %8323 = vmatmul.msk.bf16.gmra.mxu2 %vm2497_vm5, %v11573_v13 }
 0x7ad   :  { %v7199_v55 = vpack.c.bf16 %v7197_v56, %v7197_v56  ;;  %v6855_v28 = vadd.f32 %v11937_v6, %v6795_v14 }
 0x7ae   :  { %v6611_v5 = vpop.f32.mrf.mxu3 }
 0x7af   :  { %v7203_v48 = vrot.slane %v7199_v55, 5  ;;  %v6911_v44 = vmax.f32 %v6855_v28, 0.0  ;;  %v6612_v4 = vadd.f32 %v6611_v5, %v6450_v53  ;;  %v6168_v37 = vpop.f32.mrf.mxu2  ;;  %v13026_v5 = vld [vmem:[#allocation105_spill] sm:$0xff] }
 0x7b0   :  { %v6452_v61 = vpop.f32.mrf.mxu1 }
 0x7b1   :  { %v7204_v9 = vrot.slane %v7203_v48, 4  ;;  %7211 = vst [vmem:[%s12605_s7 + $0x4] sm:$0x8] %v7203_v48  ;;  %v6736_v57 = vadd.f32 %v6612_v4, %v11940_v7  ;;  %v6262_v7 = vadd.f32 %v6136_v18, %v5714_v59  ;;  %v6141_v48 = vadd.f32 %v11968_v16, %v13026_v5  ;;  %v13031_v5 = vld [vmem:[#allocation107_spill] sm:$0xff] }
 0x7b2   :  { %6967 = vst [vmem:[#allocation4 + $0x68] sm:$0xff] %v6911_v44  ;;  %v13027_v44 = vld [vmem:[#allocation66_spill] sm:$0xff] }
 0x7b3   :  { %v7215_v62 = vsel %vm12102_vm14, %v7204_v9, %v7214_v54  ;;  %v6796_v43 = vmul.f32 %v11933_v38, %v6736_v57 }
 0x7b4   :  { %7216 = vst [vmem:[%s12605_s7 + $0x8] sm:$0x7] %v7215_v62 }
 0x7b5   :  { %v6856_v3 = vadd.f32 %v11937_v6, %v6796_v43 }
 0x7b6   :  { %v6613_v36 = vpop.f32.mrf.mxu3 }
 0x7b7   :  { %v6912_v35 = vmax.f32 %v6856_v3, 0.0  ;;  %v6614_v47 = vadd.f32 %v6613_v36, %v6452_v61  ;;  %v6169_v42 = vpop.f32.mrf.mxu2 }
 0x7b8   :  { %v6455_v29 = vpop.f32.mrf.mxu1 }
 0x7b9   :  { %6968 = vst [vmem:[#allocation4 + $0x70] sm:$0xff] %v6912_v35  ;;  %v6737_v53 = vadd.f32 %v6614_v47, %v6262_v7  ;;  %v7022_v54 = vld [vmem:[#allocation4 + $0x60] ss:$2 sm:$0xff]  ;;  %v7078_v61 = vld [vmem:[#allocation4 + $0x61] ss:$2 sm:$0xff] }
 0x7ba   :  { %v7127_v12 = vmax.f32 %v7022_v54, %v7078_v61 }
 0x7bb   :  { %v6797_v0 = vmul.f32 %v11933_v38, %v6737_v53  ;;  %6490 = vmatmul.bf16.gmra.mxu1 %v11395_v24  ;;  %8398 = vmatmul.msk.bf16.gmra.mxu3 %vm2497_vm5, %v11269_v49  ;;  %v13028_v49 = vld [vmem:[#allocation65_spill] sm:$0xff] }
 0x7bc   :  { %8324 = vmatmul.msk.bf16.gmra.mxu2 %vm2497_vm5, %v11584_v19  ;;  %v5719_v4 = vadd.f32 %v13028_v49, %v13027_v44  ;;  %v13033_v44 = vld [vmem:[#allocation71_spill] sm:$0xff] }
 0x7bd   :  { %v6857_v27 = vadd.f32 %v11937_v6, %v6797_v0 }
 0x7be   :  { %v6616_v52 = vpop.f32.mrf.mxu3  ;;  %v6264_v57 = vadd.f32 %v6141_v48, %v5719_v4  ;;  %v6146_v48 = vadd.f32 %v11988_v51, %v13031_v5 }
 0x7bf   :  { %v6913_v56 = vmax.f32 %v6857_v27, 0.0  ;;  %v6617_v14 = vadd.f32 %v6616_v52, %v6455_v29  ;;  %v6171_v63 = vpop.f32.mrf.mxu2 }
 0x7c0   :  { %v6457_v55 = vpop.f32.mrf.mxu1 }
 0x7c1   :  { %6969 = vst [vmem:[#allocation4 + $0x78] sm:$0xff] %v6913_v56  ;;  %v6738_v28 = vadd.f32 %v6617_v14, %v11960_v20 }
 0x7c3   :  { %v6798_v24 = vmul.f32 %v11933_v38, %v6738_v28 }
 0x7c5   :  { %v6858_v37 = vadd.f32 %v11937_v6, %v6798_v24 }
 0x7c6   :  { %v6618_v9 = vpop.f32.mrf.mxu3 }
 0x7c7   :  { %v6914_v10 = vmax.f32 %v6858_v37, 0.0  ;;  %v6619_v18 = vadd.f32 %v6618_v9, %v6457_v55  ;;  %v6172_v62 = vpop.f32.mrf.mxu2 }
 0x7c8   :  { %v7024_v43 = vld [vmem:[#allocation4 + $0x70] ss:$2 sm:$0xff]  ;;  %v7080_v22 = vld [vmem:[#allocation4 + $0x71] ss:$2 sm:$0xff]  ;;  %v6460_v20 = vpop.f32.mrf.mxu1 }
 0x7c9   :  { %v7128_v59 = vmax.f32 %v7024_v43, %v7080_v22  ;;  %6970 = vst [vmem:[#allocation4 + $0x80] sm:$0xff] %v6914_v10  ;;  %v6739_v16 = vadd.f32 %v6619_v18, %v6264_v57 }
 0x7cb   :  { %v7221_v3 = vmax.f32 %v7127_v12, %v7128_v59  ;;  %v6799_v36 = vmul.f32 %v11933_v38, %v6739_v16  ;;  %6495 = vmatmul.bf16.gmra.mxu1 %v11473_v30  ;;  %8399 = vmatmul.msk.bf16.gmra.mxu3 %vm2497_vm5, %v11402_v39  ;;  %v5753_v30 = vadd.f32 %v11431_v8, %v11434_v23  ;;  %v7250_v23 = vld [vmem:[%s12605_s7 + $0x8] sm:$0xc]  ;;  %v13034_v16 = vld [vmem:[#allocation143_spill] sm:$0xff] }
 0x7cc   :  { %8325 = vmatmul.msk.bf16.gmra.mxu2 %vm2497_vm5, %v11588_v25 }
 0x7cd   :  { %v7223_v7 = vpack.c.bf16 %v7221_v3, %v7221_v3  ;;  %v6859_v35 = vadd.f32 %v11937_v6, %v6799_v36 }
 0x7ce   :  { %v6621_v47 = vpop.f32.mrf.mxu3 }
 0x7cf   :  { %v7226_v42 = vshrl.u32 %v7223_v7, 16  ;;  %v7229_v29 = vshll.u32 %v7223_v7, 16  ;;  %v6915_v53 = vmax.f32 %v6859_v35, 0.0  ;;  %v6622_v0 = vadd.f32 %v6621_v47, %v6460_v20  ;;  %v6174_v27 = vpop.f32.mrf.mxu2  ;;  %v13035_v35 = vld [vmem:[#allocation115_spill] sm:$0xff]  ;;  %v13036_v47 = vld [vmem:[#allocation108_spill] sm:$0xff] }
 0x7d0   :  { %v6175_v52 = vadd.f32 %v6174_v27, %v11668_v2  ;;  %v6462_v39 = vpop.f32.mrf.mxu1  ;;  %v13032_v2 = vld [vmem:[#allocation72_spill] sm:$0xff] }
 0x7d1   :  { %v7228_v56 = vrot.slane %v7226_v42, 5  ;;  %v7231_v14 = vrot.slane %v7229_v29, 6  ;;  %6971 = vst [vmem:[#allocation4 + $0x88] sm:$0xff] %v6915_v53  ;;  %v6740_v63 = vadd.f32 %v6622_v0, %v11980_v46  ;;  %v5724_v46 = vadd.f32 %v13033_v44, %v13032_v2  ;;  %v13037_v29 = vld [vmem:[#allocation82_spill] sm:$0xff]  ;;  %v13038_v53 = vld [vmem:[#allocation81_spill] sm:$0xff] }
 0x7d2   :  { %v12154_v28 = vadd.f32 %v6175_v52, %v5753_v30  ;;  %v5729_v0 = vadd.f32 %v13038_v53, %v13037_v29 }
 0x7d3   :  { %v7232_v24 = vor.u32 %v7231_v14, %v7228_v56  ;;  %v6800_v8 = vmul.f32 %v11933_v38, %v6740_v63  ;;  %v6266_v54 = vadd.f32 %v6146_v48, %v5724_v46  ;;  %v13039_v46 = vld [vmem:[#allocation122_spill] sm:$0xff] }
 0x7d5   :  { %v7233_v49 = vrot.slane %v7232_v24, 4  ;;  %v7251_v4 = vsel %vm12150_vm0, %v7232_v24, %v7250_v23  ;;  %v6860_v37 = vadd.f32 %v11937_v6, %v6800_v8 }
 0x7d6   :  { %7252 = vst [vmem:[%s12605_s7 + $0x8] sm:$0xc] %v7251_v4  ;;  %v6623_v51 = vpop.f32.mrf.mxu3 }
 0x7d7   :  { %7253 = vst [vmem:[%s12605_s7 + $0xc] sm:$0x3] %v7233_v49  ;;  %v6916_v61 = vmax.f32 %v6860_v37, 0.0  ;;  %v6624_v9 = vadd.f32 %v6623_v51, %v6462_v39  ;;  %v12173_v57 = vpop.f32.mrf.mxu2  ;;  %v13040_v49 = vld [vmem:[#allocation123_spill] sm:$0xff] }
 0x7d8   :  { %v6465_v10 = vpop.f32.mrf.mxu1  ;;  %v7026_v30 = vld [vmem:[#allocation4 + $0x80] ss:$2 sm:$0xff]  ;;  %v7082_v52 = vld [vmem:[#allocation4 + $0x81] ss:$2 sm:$0xff] }
 0x7d9   :  { %6972 = vst [vmem:[#allocation4 + $0x90] sm:$0xff] %v6916_v61  ;;  %v6741_v18 = vadd.f32 %v6624_v9, %v6266_v54  ;;  %v7129_v8 = vmax.f32 %v7026_v30, %v7082_v52 }
 0x7db   :  { %v6801_v62 = vmul.f32 %v11933_v38, %v6741_v18  ;;  %6500 = vmatmul.bf16.gmra.mxu1 %v11549_v41  ;;  %8400 = vmatmul.msk.bf16.gmra.mxu3 %vm2497_vm5, %v11478_v15  ;;  %v6151_v15 = vadd.f32 %v12016_v32, %v13036_v47  ;;  %v13046_v47 = vld [vmem:[#allocation92_spill] sm:$0xff] }
 0x7dc   :  { %8326 = vmatmul.msk.bf16.gmra.mxu2 %vm2497_vm5, %v11595_v21 }
 0x7dd   :  { %v6861_v43 = vadd.f32 %v11937_v6, %v6801_v62  ;;  %v6268_v56 = vadd.f32 %v6151_v15, %v5729_v0  ;;  %v13043_v62 = vld [vmem:[#allocation149_spill] sm:$0xff]  ;;  %v13047_v15 = vld [vmem:[#allocation91_spill] sm:$0xff] }
 0x7de   :  { %v6626_v22 = vpop.f32.mrf.mxu3 }
 0x7df   :  { %v6917_v20 = vmax.f32 %v6861_v43, 0.0  ;;  %v6627_v12 = vadd.f32 %v6626_v22, %v6465_v10  ;;  %v6179_v59 = vpop.f32.mrf.mxu2 }
 0x7e0   :  { %v6180_v3 = vadd.f32 %v6179_v59, %v13034_v16  ;;  %v6467_v36 = vpop.f32.mrf.mxu1  ;;  %v13044_v59 = vld [vmem:[#allocation118_spill] sm:$0xff] }
 0x7e1   :  { %6973 = vst [vmem:[#allocation4 + $0x98] sm:$0xff] %v6917_v20  ;;  %v6742_v7 = vadd.f32 %v6627_v12, %v12008_v45 }
 0x7e2   :  { %v12185_v41 = vadd.f32 %v6180_v3, %v13035_v35  ;;  %v13045_v3 = vld [vmem:[#allocation109_spill] sm:$0xff] }
 0x7e3   :  { %v6802_v42 = vmul.f32 %v11933_v38, %v6742_v7 }
 0x7e5   :  { %v6862_v27 = vadd.f32 %v11937_v6, %v6802_v42  ;;  %v5734_v42 = vadd.f32 %v13047_v15, %v13046_v47 }
 0x7e6   :  { %v6628_v39 = vpop.f32.mrf.mxu3 }
 0x7e7   :  { %v6918_v14 = vmax.f32 %v6862_v27, 0.0  ;;  %v6629_v63 = vadd.f32 %v6628_v39, %v6467_v36  ;;  %v12193_v45 = vpop.f32.mrf.mxu2  ;;  %v6156_v36 = vadd.f32 %v12036_v58, %v13045_v3  ;;  %v13056_v3 = vld [vmem:[#allocation124_spill] sm:$0xff] }
 0x7e8   :  { %v7028_v5 = vld [vmem:[#allocation4 + $0x90] ss:$2 sm:$0xff]  ;;  %v7084_v48 = vld [vmem:[#allocation4 + $0x91] ss:$2 sm:$0xff]  ;;  %v6470_v24 = vpop.f32.mrf.mxu1 }
 0x7e9   :  { %v7130_v32 = vmax.f32 %v7028_v5, %v7084_v48  ;;  %6974 = vst [vmem:[#allocation4 + $0xa0] sm:$0xff] %v6918_v14  ;;  %v6743_v23 = vadd.f32 %v6629_v63, %v6268_v56  ;;  %v6270_v53 = vadd.f32 %v6156_v36, %v5734_v42  ;;  %v13048_v56 = vld [vmem:[#allocation125_spill] sm:$0xff]  ;;  %v13049_v14 = vld [vmem:[#allocation126_spill] sm:$0xff] }
 0x7eb   :  { %v7258_v2 = vmax.f32 %v7129_v8, %v7130_v32  ;;  %v6803_v44 = vmul.f32 %v11933_v38, %v6743_v23  ;;  %6505 = vmatmul.bf16.gmra.mxu1 %v13039_v46  ;;  %8401 = vmatmul.msk.bf16.gmra.mxu3 %vm2497_vm5, %v11530_v33  ;;  %v7276_v33 = vld [vmem:[%s12605_s7 + $0x10] sm:$0x3]  ;;  %v13050_v32 = vld [vmem:[#allocation154_spill] sm:$0xff]  ;;  %v13051_v46 = vld [vmem:[#allocation121_spill] sm:$0xff] }
 0x7ec   :  { %8327 = vmatmul.msk.bf16.gmra.mxu2 %vm2497_vm5, %v13040_v49 }
 0x7ed   :  { %v7260_v4 = vpack.c.bf16 %v7258_v2, %v7258_v2  ;;  %v6863_v37 = vadd.f32 %v11937_v6, %v6803_v44 }
 0x7ee   :  { %v6631_v51 = vpop.f32.mrf.mxu3 }
 0x7ef   :  { %v7264_v54 = vrot.slane %v7260_v4, 6  ;;  %v6919_v61 = vmax.f32 %v6863_v37, 0.0  ;;  %v6632_v9 = vadd.f32 %v6631_v51, %v6470_v24  ;;  %v6184_v10 = vpop.f32.mrf.mxu2  ;;  %v13052_v37 = vld [vmem:[#allocation111_spill] sm:$0xff] }
 0x7f0   :  { %v6185_v43 = vadd.f32 %v6184_v10, %v13043_v62  ;;  %v6472_v22 = vpop.f32.mrf.mxu1 }
 0x7f1   :  { %v7265_v20 = vrot.slane %v7264_v54, 4  ;;  %7272 = vst [vmem:[%s12605_s7 + $0xc] sm:$0xc] %v7264_v54  ;;  %v6744_v12 = vadd.f32 %v6632_v9, %v12028_v31  ;;  %v13053_v54 = vld [vmem:[#allocation106_spill] sm:$0xff] }
 0x7f2   :  { %6975 = vst [vmem:[#allocation4 + $0xa8] sm:$0xff] %v6919_v61  ;;  %v12215_v16 = vadd.f32 %v6185_v43, %v13044_v59  ;;  %v13054_v61 = vld [vmem:[#allocation98_spill] sm:$0xff] }
 0x7f3   :  { %v7277_v7 = vsel %vm12202_vm11, %v7265_v20, %v7276_v33  ;;  %v6804_v35 = vmul.f32 %v11933_v38, %v6744_v12  ;;  %v5739_v9 = vadd.f32 %v13054_v61, %v13053_v54  ;;  %v13055_v59 = vld [vmem:[#allocation130_spill] sm:$0xff]  ;;  %v13064_v61 = vld [vmem:[#allocation112_spill] sm:$0xff] }
 0x7f4   :  { %7278 = vst [vmem:[%s12605_s7 + $0x10] sm:$0x3] %v7277_v7  ;;  %v5770_v36 = vadd.f32 %v13056_v3, %v13055_v59 }
 0x7f5   :  { %v6864_v31 = vadd.f32 %v11937_v6, %v6804_v35 }
 0x7f6   :  { %v6633_v29 = vpop.f32.mrf.mxu3 }
 0x7f7   :  { %v6920_v0 = vmax.f32 %v6864_v31, 0.0  ;;  %v6634_v27 = vadd.f32 %v6633_v29, %v6472_v22  ;;  %v12228_v30 = vpop.f32.mrf.mxu2 }
 0x7f8   :  { %v6475_v58 = vpop.f32.mrf.mxu1 }
 0x7f9   :  { %6976 = vst [vmem:[#allocation4 + $0xb0] sm:$0xff] %v6920_v0  ;;  %v6745_v52 = vadd.f32 %v6634_v27, %v6270_v53  ;;  %v7030_v33 = vld [vmem:[#allocation4 + $0xa0] ss:$2 sm:$0xff]  ;;  %v7086_v62 = vld [vmem:[#allocation4 + $0xa1] ss:$2 sm:$0xff] }
 0x7fa   :  { %v7131_v42 = vmax.f32 %v7030_v33, %v7086_v62 }
 0x7fb   :  { %v6805_v39 = vmul.f32 %v11933_v38, %v6745_v52  ;;  %6510 = vmatmul.bf16.gmra.mxu1 %v13048_v56  ;;  %8402 = vmatmul.msk.bf16.gmra.mxu3 %vm2497_vm5, %v11555_v60  ;;  %v6161_v60 = vadd.f32 %v12072_v50, %v13052_v37  ;;  %v13057_v50 = vld [vmem:[#allocation157_spill] sm:$0xff]  ;;  %v7312_v62 = vld [vmem:[%s12605_s7 + $0x10] sm:$0xe] }
 0x7fc   :  { %8328 = vmatmul.msk.bf16.gmra.mxu2 %vm2497_vm5, %v13049_v14  ;;  %v13059_v52 = vld [vmem:[#allocation129_spill] sm:$0xff] }
 0x7fd   :  { %v6865_v63 = vadd.f32 %v11937_v6, %v6805_v39  ;;  %v6272_v22 = vadd.f32 %v6161_v60, %v5739_v9  ;;  %v6166_v9 = vadd.f32 %v12092_v34, %v13064_v61  ;;  %v13076_v61 = vld [vmem:[#allocation132_spill] sm:$0xff] }
 0x7fe   :  { %v6636_v5 = vpop.f32.mrf.mxu3 }
 0x7ff   :  { %v6921_v48 = vmax.f32 %v6865_v63, 0.0  ;;  %v6637_v24 = vadd.f32 %v6636_v5, %v6475_v58  ;;  %v6189_v8 = vpop.f32.mrf.mxu2  ;;  %v13058_v58 = vld [vmem:[#allocation128_spill] sm:$0xff] }
 0x800   :  { %v6190_v23 = vadd.f32 %v6189_v8, %v13050_v32  ;;  %v6477_v2 = vpop.f32.mrf.mxu1 }
 0x801   :  { %6977 = vst [vmem:[#allocation4 + $0xb8] sm:$0xff] %v6921_v48  ;;  %v6746_v44 = vadd.f32 %v6637_v24, %v12056_v1 }
 0x802   :  { %v12240_v4 = vadd.f32 %v6190_v23, %v13051_v46  ;;  %v13060_v23 = vld [vmem:[#allocation23_spill] sm:$0xff] }
 0x803   :  { %v6806_v51 = vmul.f32 %v11933_v38, %v6746_v44 }
 0x805   :  { %v6866_v10 = vadd.f32 %v11937_v6, %v6806_v51  ;;  %v13063_v51 = vld [vmem:[#allocation133_spill] sm:$0xff] }
 0x806   :  { %v6638_v43 = vpop.f32.mrf.mxu3 }
 0x807   :  { %v6922_v20 = vmax.f32 %v6866_v10, 0.0  ;;  %v6639_v12 = vadd.f32 %v6638_v43, %v6477_v2  ;;  %v6191_v1 = vpop.f32.mrf.mxu2  ;;  %v13065_v43 = vld [vmem:[#allocation110_spill] sm:$0xff] }
 0x808   :  { %v7032_v7 = vld [vmem:[#allocation4 + $0xb0] ss:$2 sm:$0xff]  ;;  %v7088_v35 = vld [vmem:[#allocation4 + $0xb1] ss:$2 sm:$0xff]  ;;  %v6192_v47 = vadd.f32 %v6191_v1, %v13057_v50  ;;  %v6480_v15 = vpop.f32.mrf.mxu1 }
 0x809   :  { %v7132_v31 = vmax.f32 %v7032_v7, %v7088_v35  ;;  %6978 = vst [vmem:[#allocation4 + $0xc0] sm:$0xff] %v6922_v20  ;;  %v6747_v29 = vadd.f32 %v6639_v12, %v6272_v22  ;;  %v13066_v22 = vld [vmem:[#allocation102_spill] sm:$0xff]  ;;  %v13067_v35 = vld [vmem:[#allocation156_spill] sm:$0xff]  ;;  %v13068_v50 = vld [vmem:[#allocation127_spill] sm:$0xff] }
 0x80a   :  { %v12251_v53 = vadd.f32 %v6192_v47, %v5770_v36  ;;  %v5775_v47 = vadd.f32 %v13068_v50, %v13067_v35  ;;  %v13080_v35 = vld [vmem:[#allocation165_spill] sm:$0xff]  ;;  %v13081_v50 = vld [vmem:[#allocation136_spill] sm:$0xff] }
 0x80b   :  { %v7283_v0 = vmax.f32 %v7131_v42, %v7132_v31  ;;  %v6807_v27 = vmul.f32 %v11933_v38, %v6747_v29  ;;  %6515 = vmatmul.bf16.gmra.mxu1 %v13058_v58  ;;  %8403 = vmatmul.msk.bf16.gmra.mxu3 %vm2497_vm5, %v11573_v13  ;;  %v13070_v58 = vld [vmem:[#allocation134_spill] sm:$0xff] }
 0x80c   :  { %8329 = vmatmul.msk.bf16.gmra.mxu2 %vm2497_vm5, %v13059_v52 }
 0x80d   :  { %v7285_v39 = vpack.c.bf16 %v7283_v0, %v7283_v0  ;;  %v6867_v56 = vadd.f32 %v11937_v6, %v6807_v27 }
 0x80e   :  { %v6641_v63 = vpop.f32.mrf.mxu3 }
 0x80f   :  { %v7288_v5 = vshrl.u32 %v7285_v39, 16  ;;  %v7291_v48 = vshll.u32 %v7285_v39, 16  ;;  %v6923_v24 = vmax.f32 %v6867_v56, 0.0  ;;  %v6642_v8 = vadd.f32 %v6641_v63, %v6480_v15  ;;  %v6194_v32 = vpop.f32.mrf.mxu2  ;;  %v13069_v15 = vld [vmem:[#allocation163_spill] sm:$0xff] }
 0x810   :  { %v6195_v2 = vadd.f32 %v6194_v32, %v13060_v23  ;;  %v6482_v44 = vpop.f32.mrf.mxu1  ;;  %v13071_v39 = vld [vmem:[#allocation135_spill] sm:$0xff]  ;;  %v13074_v23 = vld [vmem:[#allocation29_spill] sm:$0xff] }
 0x811   :  { %v7290_v46 = vrot.slane %v7288_v5, 6  ;;  %v7293_v37 = vrot.slane %v7291_v48, 7  ;;  %6979 = vst [vmem:[#allocation4 + $0xc8] sm:$0xff] %v6923_v24  ;;  %v6748_v13 = vadd.f32 %v6642_v8, %v12084_v11  ;;  %v5744_v11 = vadd.f32 %v13066_v22, %v13065_v43  ;;  %v13072_v24 = vld [vmem:[#allocation159_spill] sm:$0xff] }
 0x812   :  { %v12267_v54 = vadd.f32 %v6195_v2, %v13063_v51  ;;  %v13073_v8 = vld [vmem:[#allocation131_spill] sm:$0xff]  ;;  %v13075_v51 = vld [vmem:[#allocation162_spill] sm:$0xff] }
 0x813   :  { %v7294_v10 = vor.u32 %v7293_v37, %v7290_v46  ;;  %v6808_v33 = vmul.f32 %v11933_v38, %v6748_v13  ;;  %v6274_v59 = vadd.f32 %v6166_v9, %v5744_v11  ;;  %v5778_v32 = vadd.f32 %v13073_v8, %v13072_v24  ;;  %v13086_v24 = vld [vmem:[#allocation137_spill] sm:$0xff] }
 0x814   :  { %v5780_v9 = vadd.f32 %v13076_v61, %v13075_v51  ;;  %v13089_v51 = vld [vmem:[#allocation172_spill] sm:$0xff] }
 0x815   :  { %v7295_v20 = vrot.slane %v7294_v10, 4  ;;  %v7313_v12 = vsel %vm12262_vm2, %v7294_v10, %v7312_v62  ;;  %v6868_v1 = vadd.f32 %v11937_v6, %v6808_v33  ;;  %v13077_v33 = vld [vmem:[#allocation169_spill] sm:$0xff]  ;;  %v13090_v61 = vld [vmem:[#allocation140_spill] sm:$0xff] }
 0x816   :  { %7314 = vst [vmem:[%s12605_s7 + $0x10] sm:$0xe] %v7313_v12  ;;  %v6643_v34 = vpop.f32.mrf.mxu3 }
 0x817   :  { %7315 = vst [vmem:[%s12605_s7 + $0x14] sm:$0x1] %v7295_v20  ;;  %v6924_v3 = vmax.f32 %v6868_v1, 0.0  ;;  %v6644_v36 = vadd.f32 %v6643_v34, %v6482_v44  ;;  %v6196_v7 = vpop.f32.mrf.mxu2  ;;  %v13078_v1 = vld [vmem:[#allocation139_spill] sm:$0xff]  ;;  %v13079_v34 = vld [vmem:[#allocation138_spill] sm:$0xff] }
 0x818   :  { %v6197_v42 = vadd.f32 %v6196_v7, %v13069_v15  ;;  %v6485_v31 = vpop.f32.mrf.mxu1  ;;  %v7034_v46 = vld [vmem:[#allocation4 + $0xc0] ss:$2 sm:$0xff]  ;;  %v7090_v37 = vld [vmem:[#allocation4 + $0xc1] ss:$2 sm:$0xff] }
 0x819   :  { %6980 = vst [vmem:[#allocation4 + $0xd0] sm:$0xff] %v6924_v3  ;;  %v6749_v29 = vadd.f32 %v6644_v36, %v6274_v59  ;;  %v7133_v22 = vmax.f32 %v7034_v46, %v7090_v37  ;;  %v13088_v46 = vld [vmem:[#allocation144_spill] sm:$0xff] }
 0x81a   :  { %v12289_v0 = vadd.f32 %v6197_v42, %v5775_v47  ;;  %v5783_v47 = vadd.f32 %v13081_v50, %v13080_v35  ;;  %v13084_v42 = vld [vmem:[#allocation33_spill] sm:$0xff] }
 0x81b   :  { %v6809_v27 = vmul.f32 %v11933_v38, %v6749_v29  ;;  %6520 = vmatmul.bf16.gmra.mxu1 %v13070_v58  ;;  %8404 = vmatmul.msk.bf16.gmra.mxu3 %vm2497_vm5, %v11584_v19 }
 0x81c   :  { %8330 = vmatmul.msk.bf16.gmra.mxu2 %vm2497_vm5, %v13071_v39 }
 0x81d   :  { %v6869_v56 = vadd.f32 %v11937_v6, %v6809_v27 }
 0x81e   :  { %v6646_v63 = vpop.f32.mrf.mxu3 }
 0x81f   :  { %v6925_v5 = vmax.f32 %v6869_v56, 0.0  ;;  %v6199_v48 = vpop.f32.mrf.mxu2 }
 0x820   :  { %v6200_v2 = vadd.f32 %v6199_v48, %v13074_v23  ;;  %v6486_v44 = vpop.f32.mrf.mxu1  ;;  %v13085_v48 = vld [vmem:[#allocation168_spill] sm:$0xff] }
 0x821   :  { %6981 = vst [vmem:[#allocation4 + $0xd8] sm:$0xff] %v6925_v5  ;;  %v5785_v8 = vadd.f32 %v13086_v24, %v13085_v48  ;;  %v13098_v24 = vld [vmem:[#allocation148_spill] sm:$0xff] }
 0x822   :  { %v12301_v38 = vadd.f32 %v6200_v2, %v5778_v32  ;;  %v13087_v32 = vld [vmem:[#allocation175_spill] sm:$0xff] }
 0x826   :  { %v6647_v19 = vpop.f32.mrf.mxu3 }
 0x827   :  { %v6201_v13 = vpop.f32.mrf.mxu2 }
 0x828   :  { %v7036_v6 = vld [vmem:[#allocation4 + $0xd0] ss:$2 sm:$0xff]  ;;  %v7092_v10 = vld [vmem:[#allocation4 + $0xd1] ss:$2 sm:$0xff]  ;;  %v6202_v62 = vadd.f32 %v6201_v13, %v13077_v33  ;;  %v6488_v43 = vpop.f32.mrf.mxu1 }
 0x829   :  { %v7134_v11 = vmax.f32 %v7036_v6, %v7092_v10  ;;  %v13091_v6 = vld [vmem:[#allocation20_spill] sm:$0xff] }
 0x82a   :  { %v12306_v20 = vadd.f32 %v6202_v62, %v5780_v9  ;;  %v5788_v9 = vadd.f32 %v13090_v61, %v13089_v51  ;;  %v13101_v51 = vld [vmem:[#allocation21_spill] sm:$0xff] }
 0x82b   :  { %v7320_v12 = vmax.f32 %v7133_v22, %v7134_v11  ;;  %6525 = vmatmul.bf16.gmra.mxu1 %v13078_v1  ;;  %8405 = vmatmul.msk.bf16.gmra.mxu3 %vm2497_vm5, %v11588_v25  ;;  %v7337_v25 = vld [vmem:[%s12605_s7 + $0x18] sm:$0x1]  ;;  %v13092_v22 = vld [vmem:[#allocation141_spill] sm:$0xff]  ;;  %v13093_v1 = vld [vmem:[#allocation114_spill] sm:$0xff] }
 0x82c   :  { %8331 = vmatmul.msk.bf16.gmra.mxu2 %vm2497_vm5, %v13079_v34  ;;  %v6177_v11 = vadd.f32 %v12173_v57, %v13092_v22  ;;  %v13097_v57 = vld [vmem:[#allocation178_spill] sm:$0xff]  ;;  %v13103_v22 = vld [vmem:[#allocation117_spill] sm:$0xff] }
 0x82d   :  { %v7322_v59 = vpack.c.bf16 %v7320_v12, %v7320_v12  ;;  %v12350_v12 = vld [vmem:[#allocation12] ss:$0 sm:$0xff] }
 0x82e   :  { %v6649_v3 = vpop.f32.mrf.mxu3 }
 0x82f   :  { %v7326_v36 = vrot.slane %v7322_v59, 7  ;;  %v6204_v7 = vpop.f32.mrf.mxu2  ;;  %v13094_v59 = vld [vmem:[#allocation113_spill] sm:$0xff] }
 0x830   :  { %v6205_v31 = vadd.f32 %v6204_v7, %v13084_v42  ;;  %v6489_v29 = vpop.f32.mrf.mxu1  ;;  %v5755_v3 = vadd.f32 %v13094_v59, %v13093_v1  ;;  %v13095_v42 = vld [vmem:[#allocation174_spill] sm:$0xff] }
 0x831   :  { %v7327_v27 = vrot.slane %v7326_v36, 4  ;;  %7334 = vst [vmem:[%s12605_s7 + $0x14] sm:$0xe] %v7326_v36  ;;  %v12355_v36 = vld [vmem:[#allocation13] ss:$0 sm:$0xff] }
 0x832   :  { %v12327_v58 = vadd.f32 %v6205_v31, %v5783_v47  ;;  %v6276_v50 = vadd.f32 %v6177_v11, %v5755_v3  ;;  %v13096_v31 = vld [vmem:[#allocation142_spill] sm:$0xff]  ;;  %v13104_v11 = vld [vmem:[#allocation116_spill] sm:$0xff] }
 0x833   :  { %v7338_v56 = vsel %vm12316_vm9, %v7327_v27, %v7337_v25  ;;  %v5790_v29 = vadd.f32 %v13096_v31, %v13095_v42 }
 0x834   :  { %7339 = vst [vmem:[%s12605_s7 + $0x18] sm:$0x1] %v7338_v56 }
 0x836   :  { %v6650_v63 = vpop.f32.mrf.mxu3 }
 0x837   :  { %v6206_v5 = vpop.f32.mrf.mxu2 }
 0x838   :  { %v6207_v23 = vadd.f32 %v6206_v5, %v13087_v32  ;;  %v6491_v2 = vpop.f32.mrf.mxu1 }
 0x83a   :  { %v12337_v44 = vadd.f32 %v6207_v23, %v5785_v8 }
 0x83b   :  { %6530 = vmatmul.bf16.gmra.mxu1 %v13088_v46  ;;  %8406 = vmatmul.msk.bf16.gmra.mxu3 %vm2497_vm5, %v11595_v21 }
 0x83e   :  { %v6652_v37 = vpop.f32.mrf.mxu3 }
 0x83f   :  { %v6653_v19 = vadd.f32 %v6652_v37, %v6491_v2  ;;  %v6209_v13 = vpop.f32.mrf.mxu2  ;;  %v13099_v37 = vld [vmem:[#allocation177_spill] sm:$0xff] }
 0x840   :  { %v6210_v10 = vadd.f32 %v6209_v13, %v13091_v6  ;;  %v6493_v33 = vpop.f32.mrf.mxu1 }
 0x841   :  { %v6750_v62 = vadd.f32 %v6653_v19, %v12154_v28  ;;  %v13100_v19 = vld [vmem:[#allocation145_spill] sm:$0xff] }
 0x842   :  { %v12346_v43 = vadd.f32 %v6210_v10, %v5788_v9  ;;  %v5793_v13 = vadd.f32 %v13100_v19, %v13099_v37 }
 0x843   :  { %v6810_v21 = vmul.f32 %v12350_v12, %v6750_v62 }
 0x845   :  { %v6870_v7 = vadd.f32 %v12355_v36, %v6810_v21  ;;  %v5760_v21 = vadd.f32 %v13104_v11, %v13103_v22 }
 0x846   :  { %v6654_v35 = vpop.f32.mrf.mxu3 }
 0x847   :  { %v6926_v47 = vmax.f32 %v6870_v7, 0.0  ;;  %v6655_v28 = vadd.f32 %v6654_v35, %v6493_v33  ;;  %v6211_v25 = vpop.f32.mrf.mxu2  ;;  %v13102_v33 = vld [vmem:[#allocation146_spill] sm:$0xff] }
 0x848   :  { %v6212_v27 = vadd.f32 %v6211_v25, %v13097_v57  ;;  %v6496_v56 = vpop.f32.mrf.mxu1  ;;  %v13107_v25 = vld [vmem:[#allocation180_spill] sm:$0xff] }
 0x849   :  { %6982 = vst [vmem:[#allocation4 + $0xe0] sm:$0xff] %v6926_v47  ;;  %v6751_v63 = vadd.f32 %v6655_v28, %v6276_v50  ;;  %v13105_v47 = vld [vmem:[#allocation39_spill] sm:$0xff] }
 0x84a   :  { %v12361_v5 = vadd.f32 %v6212_v27, %v5790_v29  ;;  %v13106_v28 = vld [vmem:[#allocation147_spill] sm:$0xff]  ;;  %v13108_v27 = vld [vmem:[#allocation153_spill] sm:$0xff] }
 0x84b   :  { %v6811_v48 = vmul.f32 %v12350_v12, %v6751_v63  ;;  %6535 = vmatmul.bf16.gmra.mxu1 %v13098_v24  ;;  %8407 = vmatmul.msk.bf16.gmra.mxu3 %vm2497_vm5, %v13040_v49  ;;  %v6182_v49 = vadd.f32 %v12193_v45, %v13102_v33  ;;  %v13114_v33 = vld [vmem:[#allocation119_spill] sm:$0xff] }
 0x84d   :  { %v6871_v8 = vadd.f32 %v12355_v36, %v6811_v48  ;;  %v6278_v3 = vadd.f32 %v6182_v49, %v5760_v21 }
 0x84e   :  { %v6657_v32 = vpop.f32.mrf.mxu3 }
 0x84f   :  { %v6927_v23 = vmax.f32 %v6871_v8, 0.0  ;;  %v6658_v2 = vadd.f32 %v6657_v32, %v6496_v56  ;;  %v6214_v46 = vpop.f32.mrf.mxu2  ;;  %v13109_v32 = vld [vmem:[#allocation179_spill] sm:$0xff] }
 0x850   :  { %v6215_v61 = vadd.f32 %v6214_v46, %v13101_v51  ;;  %v6498_v9 = vpop.f32.mrf.mxu1  ;;  %v13111_v46 = vld [vmem:[#allocation24_spill] sm:$0xff] }
 0x851   :  { %6983 = vst [vmem:[#allocation4 + $0xe8] sm:$0xff] %v6927_v23  ;;  %v6752_v6 = vadd.f32 %v6658_v2, %v12185_v41  ;;  %v5795_v41 = vadd.f32 %v13106_v28, %v13105_v47  ;;  %v13110_v23 = vld [vmem:[#allocation150_spill] sm:$0xff] }
 0x852   :  { %v12372_v10 = vadd.f32 %v6215_v61, %v5793_v13  ;;  %v5798_v2 = vadd.f32 %v13110_v23, %v13109_v32  ;;  %v13112_v61 = vld [vmem:[#allocation151_spill] sm:$0xff] }
 0x853   :  { %v6812_v62 = vmul.f32 %v12350_v12, %v6752_v6  ;;  %v13113_v6 = vld [vmem:[#allocation120_spill] sm:$0xff] }
 0x854   :  { %v5765_v49 = vadd.f32 %v13114_v33, %v13113_v6 }
 0x855   :  { %v6872_v1 = vadd.f32 %v12355_v36, %v6812_v62 }
 0x856   :  { %v6659_v59 = vpop.f32.mrf.mxu3 }
 0x857   :  { %v6928_v7 = vmax.f32 %v6872_v1, 0.0  ;;  %v6660_v35 = vadd.f32 %v6659_v59, %v6498_v9  ;;  %v6216_v50 = vpop.f32.mrf.mxu2 }
 0x858   :  { %v6217_v42 = vadd.f32 %v6216_v50, %v13107_v25  ;;  %v6501_v31 = vpop.f32.mrf.mxu1  ;;  %v7038_v22 = vld [vmem:[#allocation4 + $0xe0] ss:$2 sm:$0xff]  ;;  %v7094_v11 = vld [vmem:[#allocation4 + $0xe1] ss:$2 sm:$0xff] }
 0x859   :  { %6984 = vst [vmem:[#allocation4 + $0xf0] sm:$0xff] %v6928_v7  ;;  %v6753_v45 = vadd.f32 %v6660_v35, %v6278_v3  ;;  %v13116_v35 = vld [vmem:[#allocation152_spill] sm:$0xff] }
 0x85a   :  { %v12383_v29 = vadd.f32 %v6217_v42, %v5795_v41  ;;  %v7135_v42 = vmax.f32 %v7038_v22, %v7094_v11 }
 0x85b   :  { %v6813_v57 = vmul.f32 %v12350_v12, %v6753_v45  ;;  %6540 = vmatmul.bf16.gmra.mxu1 %v13108_v27  ;;  %8408 = vmatmul.msk.bf16.gmra.mxu3 %vm2497_vm5, %v13049_v14  ;;  %v6187_v14 = vadd.f32 %v12228_v30, %v13112_v61  ;;  %v13117_v30 = vld [vmem:[#allocation182_spill] sm:$0xff] }
 0x85d   :  { %v6873_v56 = vadd.f32 %v12355_v36, %v6813_v57  ;;  %v6280_v1 = vadd.f32 %v6187_v14, %v5765_v49 }
 0x85e   :  { %v6662_v63 = vpop.f32.mrf.mxu3 }
 0x85f   :  { %v6929_v48 = vmax.f32 %v6873_v56, 0.0  ;;  %v6663_v24 = vadd.f32 %v6662_v63, %v6501_v31  ;;  %v6219_v8 = vpop.f32.mrf.mxu2  ;;  %v13118_v63 = vld [vmem:[#allocation160_spill] sm:$0xff] }
 0x860   :  { %v6220_v37 = vadd.f32 %v6219_v8, %v13111_v46  ;;  %v6503_v19 = vpop.f32.mrf.mxu1 }
 0x861   :  { %6985 = vst [vmem:[#allocation4 + $0xf8] sm:$0xff] %v6929_v48  ;;  %v6754_v13 = vadd.f32 %v6663_v24, %v12215_v16  ;;  %v13115_v16 = vld [vmem:[#allocation44_spill] sm:$0xff] }
 0x862   :  { %v12394_v51 = vadd.f32 %v6220_v37, %v5798_v2  ;;  %v5800_v50 = vadd.f32 %v13116_v35, %v13115_v16  ;;  %v7158_v48 = vld [vmem:[%s12605_s7 + $0x1c] sm:$0xf] }
 0x863   :  { %v6814_v9 = vmul.f32 %v12350_v12, %v6754_v13  ;;  %v13120_v13 = vld [vmem:[#allocation155_spill] sm:$0xff] }
 0x865   :  { %v6874_v62 = vadd.f32 %v12355_v36, %v6814_v9 }
 0x866   :  { %v6664_v21 = vpop.f32.mrf.mxu3 }
 0x867   :  { %v6930_v59 = vmax.f32 %v6874_v62, 0.0  ;;  %v6665_v3 = vadd.f32 %v6664_v21, %v6503_v19  ;;  %v6221_v7 = vpop.f32.mrf.mxu2  ;;  %v13119_v19 = vld [vmem:[#allocation181_spill] sm:$0xff] }
 0x868   :  { %v7040_v47 = vld [vmem:[#allocation4 + $0xf0] ss:$2 sm:$0xff]  ;;  %v7096_v28 = vld [vmem:[#allocation4 + $0xf1] ss:$2 sm:$0xff]  ;;  %v6222_v41 = vadd.f32 %v6221_v7, %v13117_v30  ;;  %v6506_v25 = vpop.f32.mrf.mxu1  ;;  %v5803_v61 = vadd.f32 %v13120_v13, %v13119_v19 }
 0x869   :  { %v7136_v31 = vmax.f32 %v7040_v47, %v7096_v28  ;;  %6986 = vst [vmem:[#allocation4 + $0x100] sm:$0xff] %v6930_v59  ;;  %v6755_v45 = vadd.f32 %v6665_v3, %v6280_v1  ;;  %v13122_v1 = vld [vmem:[#allocation49_spill] sm:$0xff]  ;;  %v13123_v59 = vld [vmem:[#allocation158_spill] sm:$0xff]  ;;  %v13124_v7 = vld [vmem:[#allocation76_spill] sm:$0xff] }
 0x86a   :  { %v12405_v57 = vadd.f32 %v6222_v41, %v5800_v50  ;;  %v5805_v3 = vadd.f32 %v13123_v59, %v13122_v1  ;;  %v13125_v28 = vld [vmem:[#allocation166_spill] sm:$0xff] }
 0x86b   :  { %v7150_v27 = vmax.f32 %v7135_v42, %v7136_v31  ;;  %v6815_v56 = vmul.f32 %v12350_v12, %v6755_v45  ;;  %6545 = vmatmul.bf16.gmra.mxu1 %v13118_v63  ;;  %8409 = vmatmul.msk.bf16.gmra.mxu3 %vm2497_vm5, %v13059_v52  ;;  %v13121_v52 = vld [vmem:[#allocation25_spill] sm:$0xff]  ;;  %v13126_v45 = vld [vmem:[#allocation183_spill] sm:$0xff]  ;;  %v13128_v63 = vld [vmem:[#allocation32_spill] sm:$0xff] }
 0x86d   :  { %v7152_v24 = vpack.c.bf16 %v7150_v27, %v7150_v27  ;;  %v6875_v8 = vadd.f32 %v12355_v36, %v6815_v56  ;;  %v13127_v27 = vld [vmem:[#allocation161_spill] sm:$0xff] }
 0x86e   :  { %v6667_v32 = vpop.f32.mrf.mxu3  ;;  %v5808_v56 = vadd.f32 %v13127_v27, %v13126_v45 }
 0x86f   :  { %v7159_v23 = vsel %vm8881_vm3, %v7152_v24, %v7158_v48  ;;  %v6931_v2 = vmax.f32 %v6875_v8, 0.0  ;;  %v6668_v46 = vadd.f32 %v6667_v32, %v6506_v25  ;;  %v6224_v37 = vpop.f32.mrf.mxu2 }
 0x870   :  { %7160 = vst [vmem:[%s12605_s7 + $0x1c] sm:$0xf] %v7159_v23  ;;  %v6225_v14 = vadd.f32 %v6224_v37, %v13121_v52  ;;  %v6508_v9 = vpop.f32.mrf.mxu1  ;;  %v13130_v52 = vld [vmem:[#allocation164_spill] sm:$0xff] }
 0x871   :  { %6987 = vst [vmem:[#allocation4 + $0x108] sm:$0xff] %v6931_v2  ;;  %v6756_v6 = vadd.f32 %v6668_v46, %v12240_v4 }
 0x872   :  { %v12424_v33 = vadd.f32 %v6225_v14, %v5803_v61  ;;  %v13129_v61 = vld [vmem:[#allocation54_spill] sm:$0xff] }
 0x873   :  { %v6816_v17 = vmul.f32 %v12350_v12, %v6756_v6  ;;  %v5810_v14 = vadd.f32 %v13130_v52, %v13129_v61  ;;  %v13138_v52 = vld [vmem:[#allocation83_spill] sm:$0xff] }
 0x875   :  { %v6876_v49 = vadd.f32 %v12355_v36, %v6816_v17  ;;  %v13131_v17 = vld [vmem:[#allocation79_spill] sm:$0xff] }
 0x876   :  { %v6669_v62 = vpop.f32.mrf.mxu3 }
 0x877   :  { %v6932_v22 = vmax.f32 %v6876_v49, 0.0  ;;  %v6670_v11 = vadd.f32 %v6669_v62, %v6508_v9  ;;  %v6226_v21 = vpop.f32.mrf.mxu2 }
 0x878   :  { %v6227_v16 = vadd.f32 %v6226_v21, %v13124_v7  ;;  %v6511_v35 = vpop.f32.mrf.mxu1  ;;  %v7042_v23 = vld [vmem:[#allocation4 + $0x100] ss:$2 sm:$0xff]  ;;  %v7098_v2 = vld [vmem:[#allocation4 + $0x101] ss:$2 sm:$0xff] }
 0x879   :  { %6988 = vst [vmem:[#allocation4 + $0x110] sm:$0xff] %v6932_v22  ;;  %v6757_v50 = vadd.f32 %v6670_v11, %v12251_v53  ;;  %v7137_v62 = vmax.f32 %v7042_v23, %v7098_v2 }
 0x87a   :  { %v12432_v4 = vadd.f32 %v6227_v16, %v5805_v3  ;;  %v13132_v3 = vld [vmem:[#allocation171_spill] sm:$0xff] }
 0x87b   :  { %v6817_v47 = vmul.f32 %v12350_v12, %v6757_v50  ;;  %6550 = vmatmul.bf16.gmra.mxu1 %v13125_v28  ;;  %8410 = vmatmul.msk.bf16.gmra.mxu3 %vm2497_vm5, %v13071_v39 }
 0x87d   :  { %v6877_v30 = vadd.f32 %v12355_v36, %v6817_v47 }
 0x87e   :  { %v6672_v41 = vpop.f32.mrf.mxu3 }
 0x87f   :  { %v6933_v25 = vmax.f32 %v6877_v30, 0.0  ;;  %v6673_v42 = vadd.f32 %v6672_v41, %v6511_v35  ;;  %v6229_v31 = vpop.f32.mrf.mxu2 }
 0x880   :  { %v6230_v53 = vadd.f32 %v6229_v31, %v13128_v63  ;;  %v6513_v48 = vpop.f32.mrf.mxu1  ;;  %v13135_v31 = vld [vmem:[#allocation38_spill] sm:$0xff] }
 0x881   :  { %6989 = vst [vmem:[#allocation4 + $0x118] sm:$0xff] %v6933_v25  ;;  %v6758_v24 = vadd.f32 %v6673_v42, %v12267_v54  ;;  %v13134_v25 = vld [vmem:[#allocation167_spill] sm:$0xff] }
 0x882   :  { %v12443_v8 = vadd.f32 %v6230_v53, %v5808_v56  ;;  %v7193_v53 = vld [vmem:[%s12605_s7 + $0x1c] sm:$0x8] }
 0x883   :  { %v6818_v32 = vmul.f32 %v12350_v12, %v6758_v24 }
 0x885   :  { %v6878_v39 = vadd.f32 %v12355_v36, %v6818_v32 }
 0x886   :  { %v6674_v46 = vpop.f32.mrf.mxu3 }
 0x887   :  { %v6934_v37 = vmax.f32 %v6878_v39, 0.0  ;;  %v6675_v19 = vadd.f32 %v6674_v46, %v6513_v48  ;;  %v6231_v13 = vpop.f32.mrf.mxu2 }
 0x888   :  { %v7044_v9 = vld [vmem:[#allocation4 + $0x110] ss:$2 sm:$0xff]  ;;  %v7100_v6 = vld [vmem:[#allocation4 + $0x111] ss:$2 sm:$0xff]  ;;  %v6232_v49 = vadd.f32 %v6231_v13, %v13131_v17  ;;  %v6516_v54 = vpop.f32.mrf.mxu1 }
 0x889   :  { %v7138_v22 = vmax.f32 %v7044_v9, %v7100_v6  ;;  %6990 = vst [vmem:[#allocation4 + $0x120] sm:$0xff] %v6934_v37  ;;  %v6759_v11 = vadd.f32 %v6675_v19, %v12289_v0  ;;  %v13133_v0 = vld [vmem:[#allocation22_spill] sm:$0xff]  ;;  %v13136_v13 = vld [vmem:[#allocation59_spill] sm:$0xff] }
 0x88a   :  { %v12451_v21 = vadd.f32 %v6232_v49, %v5810_v14  ;;  %v5813_v42 = vadd.f32 %v13134_v25, %v13133_v0  ;;  %v5815_v61 = vadd.f32 %v13137_v40, %v13136_v13 }
 0x88b   :  { %v7162_v1 = vmax.f32 %v7137_v62, %v7138_v22  ;;  %v6819_v59 = vmul.f32 %v12350_v12, %v6759_v11  ;;  %6555 = vmatmul.bf16.gmra.mxu1 %v13132_v3  ;;  %8411 = vmatmul.msk.bf16.gmra.mxu3 %vm2497_vm5, %v13079_v34  ;;  %v13140_v3 = vld [vmem:[#allocation173_spill] sm:$0xff] }
 0x88d   :  { %v7164_v7 = vpack.c.bf16 %v7162_v1, %v7162_v1  ;;  %v6879_v16 = vadd.f32 %v12355_v36, %v6819_v59  ;;  %v13139_v59 = vld [vmem:[#allocation28_spill] sm:$0xff] }
 0x88e   :  { %v6677_v35 = vpop.f32.mrf.mxu3 }
 0x88f   :  { %v7175_v50 = vshll.u32 %v7164_v7, 16  ;;  %v7178_v47 = vshrl.u32 %v7164_v7, 16  ;;  %v6935_v28 = vmax.f32 %v6879_v16, 0.0  ;;  %v6678_v30 = vadd.f32 %v6677_v35, %v6516_v54  ;;  %v6234_v41 = vpop.f32.mrf.mxu2  ;;  %v13141_v16 = vld [vmem:[#allocation34_spill] sm:$0xff] }
 0x890   :  { %v6235_v45 = vadd.f32 %v6234_v41, %v13135_v31  ;;  %v6518_v27 = vpop.f32.mrf.mxu1  ;;  %v5818_v7 = vadd.f32 %v13140_v3, %v13139_v59 }
 0x891   :  { %v7177_v56 = vrot.slane %v7175_v50, 5  ;;  %v7180_v63 = vrot.slane %v7178_v47, 4  ;;  %6991 = vst [vmem:[#allocation4 + $0x128] sm:$0xff] %v6935_v28  ;;  %v6760_v34 = vadd.f32 %v6678_v30, %v12301_v38 }
 0x892   :  { %v12465_v48 = vadd.f32 %v6235_v45, %v5813_v42 }
 0x893   :  { %v7181_v24 = vor.u32 %v7180_v63, %v7177_v56  ;;  %v7194_v32 = vsel %vm12046_vm10, %v7177_v56, %v7193_v53  ;;  %v6820_v39 = vmul.f32 %v12350_v12, %v6760_v34  ;;  %v13143_v56 = vld [vmem:[#allocation176_spill] sm:$0xff] }
 0x894   :  { %7195 = vst [vmem:[%s12605_s7 + $0x1c] sm:$0x8] %v7194_v32 }
 0x895   :  { %v7182_v23 = vrot.slane %v7181_v24, 4  ;;  %v6880_v2 = vadd.f32 %v12355_v36, %v6820_v39  ;;  %v13144_v24 = vld [vmem:[#allocation40_spill] sm:$0xff] }
 0x896   :  { %v6679_v38 = vpop.f32.mrf.mxu3 }
 0x897   :  { %7196 = vst [vmem:[%s12605_s7 + $0x20] sm:$0x7] %v7182_v23  ;;  %v6936_v46 = vmax.f32 %v6880_v2, 0.0  ;;  %v6680_v37 = vadd.f32 %v6679_v38, %v6518_v27  ;;  %v6236_v19 = vpop.f32.mrf.mxu2  ;;  %v13142_v27 = vld [vmem:[#allocation64_spill] sm:$0xff] }
 0x898   :  { %v6237_v14 = vadd.f32 %v6236_v19, %v13138_v52  ;;  %v6521_v9 = vpop.f32.mrf.mxu1  ;;  %v7046_v41 = vld [vmem:[#allocation4 + $0x120] ss:$2 sm:$0xff]  ;;  %v7102_v0 = vld [vmem:[#allocation4 + $0x121] ss:$2 sm:$0xff]  ;;  %v5820_v63 = vadd.f32 %v13143_v56, %v13142_v27 }
 0x899   :  { %6992 = vst [vmem:[#allocation4 + $0x130] sm:$0xff] %v6936_v46  ;;  %v6761_v6 = vadd.f32 %v6680_v37, %v12306_v20  ;;  %v7139_v39 = vmax.f32 %v7046_v41, %v7102_v0 }
 0x89a   :  { %v12481_v17 = vadd.f32 %v6237_v14, %v5815_v61 }
 0x89b   :  { %v6821_v49 = vmul.f32 %v12350_v12, %v6761_v6  ;;  %v7218_v6 = vld [vmem:[%s12605_s7 + $0x24] sm:$0x7] }
 0x89d   :  { %v6881_v54 = vadd.f32 %v12355_v36, %v6821_v49 }
 0x89e   :  { %v6682_v62 = vpop.f32.mrf.mxu3 }
 0x89f   :  { %v6937_v22 = vmax.f32 %v6881_v54, 0.0  ;;  %v6683_v11 = vadd.f32 %v6682_v62, %v6521_v9  ;;  %v6239_v1 = vpop.f32.mrf.mxu2 }
 0x8a0   :  { %v6240_v35 = vadd.f32 %v6239_v1, %v13141_v16  ;;  %v6523_v50 = vpop.f32.mrf.mxu1 }
 0x8a1   :  { %6993 = vst [vmem:[#allocation4 + $0x138] sm:$0xff] %v6937_v22  ;;  %v6762_v47 = vadd.f32 %v6683_v11, %v12327_v58 }
 0x8a2   :  { %v12489_v20 = vadd.f32 %v6240_v35, %v5818_v7 }
 0x8a3   :  { %v6822_v28 = vmul.f32 %v12350_v12, %v6762_v47 }
 0x8a5   :  { %v6882_v30 = vadd.f32 %v12355_v36, %v6822_v28 }
 0x8a6   :  { %v6684_v25 = vpop.f32.mrf.mxu3 }
 0x8a7   :  { %v6938_v42 = vmax.f32 %v6882_v30, 0.0  ;;  %v6685_v31 = vadd.f32 %v6684_v25, %v6523_v50  ;;  %v6241_v45 = vpop.f32.mrf.mxu2 }
 0x8a8   :  { %v7048_v34 = vld [vmem:[#allocation4 + $0x130] ss:$2 sm:$0xff]  ;;  %v7104_v53 = vld [vmem:[#allocation4 + $0x131] ss:$2 sm:$0xff]  ;;  %v6242_v32 = vadd.f32 %v6241_v45, %v13144_v24  ;;  %v6526_v58 = vpop.f32.mrf.mxu1 }
 0x8a9   :  { %v7140_v23 = vmax.f32 %v7048_v34, %v7104_v53  ;;  %6994 = vst [vmem:[#allocation4 + $0x140] sm:$0xff] %v6938_v42  ;;  %v6763_v2 = vadd.f32 %v6685_v31, %v12337_v44 }
 0x8aa   :  { %v12497_v38 = vadd.f32 %v6242_v32, %v5820_v63 }
 0x8ab   :  { %v7198_v46 = vmax.f32 %v7139_v39, %v7140_v23  ;;  %v6823_v37 = vmul.f32 %v12350_v12, %v6763_v2 }
 0x8ad   :  { %v7200_v19 = vpack.c.bf16 %v7198_v46, %v7198_v46  ;;  %v6883_v13 = vadd.f32 %v12355_v36, %v6823_v37 }
 0x8ae   :  { %v6687_v40 = vpop.f32.mrf.mxu3 }
 0x8af   :  { %v7205_v61 = vrot.slane %v7200_v19, 5  ;;  %v6939_v52 = vmax.f32 %v6883_v13, 0.0  ;;  %v6688_v14 = vadd.f32 %v6687_v40, %v6526_v58  ;;  %v6244_v9 = vpop.f32.mrf.mxu2 }
 0x8b0   :  { %v6528_v49 = vpop.f32.mrf.mxu1 }
 0x8b1   :  { %v7206_v54 = vrot.slane %v7205_v61, 4  ;;  %7217 = vst [vmem:[%s12605_s7 + $0x20] sm:$0x8] %v7205_v61  ;;  %v6764_v44 = vadd.f32 %v6688_v14, %v12346_v43 }
 0x8b2   :  { %6995 = vst [vmem:[#allocation4 + $0x148] sm:$0xff] %v6939_v52 }
 0x8b3   :  { %v7219_v62 = vsel %vm12102_vm14, %v7206_v54, %v7218_v6  ;;  %v6824_v22 = vmul.f32 %v12350_v12, %v6764_v44 }
 0x8b4   :  { %7220 = vst [vmem:[%s12605_s7 + $0x24] sm:$0x7] %v7219_v62 }
 0x8b5   :  { %v6884_v11 = vadd.f32 %v12355_v36, %v6824_v22 }
 0x8b6   :  { %v6689_v1 = vpop.f32.mrf.mxu3 }
 0x8b7   :  { %v6940_v59 = vmax.f32 %v6884_v11, 0.0  ;;  %v6690_v3 = vadd.f32 %v6689_v1, %v6528_v49  ;;  %v6245_v7 = vpop.f32.mrf.mxu2 }
 0x8b8   :  { %v6531_v16 = vpop.f32.mrf.mxu1 }
 0x8b9   :  { %6996 = vst [vmem:[#allocation4 + $0x150] sm:$0xff] %v6940_v59  ;;  %v6765_v43 = vadd.f32 %v6690_v3, %v12361_v5  ;;  %v7050_v42 = vld [vmem:[#allocation4 + $0x140] ss:$2 sm:$0xff]  ;;  %v7106_v31 = vld [vmem:[#allocation4 + $0x141] ss:$2 sm:$0xff] }
 0x8ba   :  { %v7141_v53 = vmax.f32 %v7050_v42, %v7106_v31 }
 0x8bb   :  { %v6825_v35 = vmul.f32 %v12350_v12, %v6765_v43  ;;  %v7254_v6 = vld [vmem:[%s12605_s7 + $0x24] sm:$0xc] }
 0x8bd   :  { %v6885_v26 = vadd.f32 %v12355_v36, %v6825_v35 }
 0x8be   :  { %v6692_v50 = vpop.f32.mrf.mxu3 }
 0x8bf   :  { %v6941_v47 = vmax.f32 %v6885_v26, 0.0  ;;  %v6693_v28 = vadd.f32 %v6692_v50, %v6531_v16 }
 0x8c0   :  { %v6533_v30 = vpop.f32.mrf.mxu1 }
 0x8c1   :  { %6997 = vst [vmem:[#allocation4 + $0x158] sm:$0xff] %v6941_v47  ;;  %v6766_v41 = vadd.f32 %v6693_v28, %v12372_v10 }
 0x8c3   :  { %v6826_v0 = vmul.f32 %v12350_v12, %v6766_v41 }
 0x8c5   :  { %v6886_v25 = vadd.f32 %v12355_v36, %v6826_v0 }
 0x8c6   :  { %v6694_v45 = vpop.f32.mrf.mxu3 }
 0x8c7   :  { %v6942_v27 = vmax.f32 %v6886_v25, 0.0  ;;  %v6695_v5 = vadd.f32 %v6694_v45, %v6533_v30 }
 0x8c8   :  { %v7052_v56 = vld [vmem:[#allocation4 + $0x150] ss:$2 sm:$0xff]  ;;  %v7108_v63 = vld [vmem:[#allocation4 + $0x151] ss:$2 sm:$0xff]  ;;  %v6536_v34 = vpop.f32.mrf.mxu1 }
 0x8c9   :  { %v7142_v24 = vmax.f32 %v7052_v56, %v7108_v63  ;;  %6998 = vst [vmem:[#allocation4 + $0x160] sm:$0xff] %v6942_v27  ;;  %v6767_v32 = vadd.f32 %v6695_v5, %v12383_v29 }
 0x8cb   :  { %v7222_v58 = vmax.f32 %v7141_v53, %v7142_v24  ;;  %v6827_v10 = vmul.f32 %v12350_v12, %v6767_v32 }
 0x8cd   :  { %v7224_v39 = vpack.c.bf16 %v7222_v58, %v7222_v58  ;;  %v6887_v23 = vadd.f32 %v12355_v36, %v6827_v10  ;;  %v7280_v58 = vld [vmem:[%s12605_s7 + $0x2c] sm:$0x3] }
 0x8ce   :  { %v6697_v2 = vpop.f32.mrf.mxu3 }
 0x8cf   :  { %v7235_v46 = vshrl.u32 %v7224_v39, 16  ;;  %v7238_v37 = vshll.u32 %v7224_v39, 16  ;;  %v6943_v19 = vmax.f32 %v6887_v23, 0.0  ;;  %v6698_v13 = vadd.f32 %v6697_v2, %v6536_v34 }
 0x8d0   :  { %v6538_v40 = vpop.f32.mrf.mxu1 }
 0x8d1   :  { %v7237_v61 = vrot.slane %v7235_v46, 5  ;;  %v7240_v52 = vrot.slane %v7238_v37, 6  ;;  %6999 = vst [vmem:[#allocation4 + $0x168] sm:$0xff] %v6943_v19  ;;  %v6768_v14 = vadd.f32 %v6698_v13, %v12394_v51 }
 0x8d3   :  { %v7241_v9 = vor.u32 %v7240_v52, %v7237_v61  ;;  %v6828_v29 = vmul.f32 %v12350_v12, %v6768_v14 }
 0x8d5   :  { %v7242_v49 = vrot.slane %v7241_v9, 4  ;;  %v7255_v54 = vsel %vm12150_vm0, %v7241_v9, %v7254_v6  ;;  %v6888_v44 = vadd.f32 %v12355_v36, %v6828_v29 }
 0x8d6   :  { %7256 = vst [vmem:[%s12605_s7 + $0x24] sm:$0xc] %v7255_v54  ;;  %v6699_v62 = vpop.f32.mrf.mxu3 }
 0x8d7   :  { %7257 = vst [vmem:[%s12605_s7 + $0x28] sm:$0x3] %v7242_v49  ;;  %v6944_v51 = vmax.f32 %v6888_v44, 0.0  ;;  %v6700_v22 = vadd.f32 %v6699_v62, %v6538_v40 }
 0x8d8   :  { %v6541_v11 = vpop.f32.mrf.mxu1  ;;  %v7054_v47 = vld [vmem:[#allocation4 + $0x160] ss:$2 sm:$0xff]  ;;  %v7110_v28 = vld [vmem:[#allocation4 + $0x161] ss:$2 sm:$0xff] }
 0x8d9   :  { %7000 = vst [vmem:[#allocation4 + $0x170] sm:$0xff] %v6944_v51  ;;  %v6769_v1 = vadd.f32 %v6700_v22, %v12405_v57  ;;  %v7143_v31 = vmax.f32 %v7054_v47, %v7110_v28 }
 0x8db   :  { %v6829_v55 = vmul.f32 %v12350_v12, %v6769_v1 }
 0x8dd   :  { %v6889_v59 = vadd.f32 %v12355_v36, %v6829_v55 }
 0x8de   :  { %v6702_v3 = vpop.f32.mrf.mxu3 }
 0x8df   :  { %v6945_v7 = vmax.f32 %v6889_v59, 0.0  ;;  %v6703_v16 = vadd.f32 %v6702_v3, %v6541_v11 }
 0x8e0   :  { %v6543_v43 = vpop.f32.mrf.mxu1 }
 0x8e1   :  { %7001 = vst [vmem:[#allocation4 + $0x178] sm:$0xff] %v6945_v7  ;;  %v6770_v35 = vadd.f32 %v6703_v16, %v12424_v33 }
 0x8e3   :  { %v6830_v26 = vmul.f32 %v12350_v12, %v6770_v35 }
 0x8e5   :  { %v6890_v50 = vadd.f32 %v12355_v36, %v6830_v26 }
 0x8e6   :  { %v6704_v30 = vpop.f32.mrf.mxu3 }
 0x8e7   :  { %v6946_v41 = vmax.f32 %v6890_v50, 0.0  ;;  %v6705_v57 = vadd.f32 %v6704_v30, %v6543_v43 }
 0x8e8   :  { %v7056_v0 = vld [vmem:[#allocation4 + $0x170] ss:$2 sm:$0xff]  ;;  %v7112_v25 = vld [vmem:[#allocation4 + $0x171] ss:$2 sm:$0xff]  ;;  %v6546_v42 = vpop.f32.mrf.mxu1 }
 0x8e9   :  { %v7144_v45 = vmax.f32 %v7056_v0, %v7112_v25  ;;  %7002 = vst [vmem:[#allocation4 + $0x180] sm:$0xff] %v6946_v41  ;;  %v6771_v27 = vadd.f32 %v6705_v57, %v12432_v4 }
 0x8eb   :  { %v7259_v5 = vmax.f32 %v7143_v31, %v7144_v45  ;;  %v6831_v33 = vmul.f32 %v12350_v12, %v6771_v27 }
 0x8ed   :  { %v7261_v56 = vpack.c.bf16 %v7259_v5, %v7259_v5  ;;  %v6891_v63 = vadd.f32 %v12355_v36, %v6831_v33 }
 0x8ee   :  { %v6707_v34 = vpop.f32.mrf.mxu3 }
 0x8ef   :  { %v7266_v53 = vrot.slane %v7261_v56, 6  ;;  %v6947_v24 = vmax.f32 %v6891_v63, 0.0  ;;  %v6708_v32 = vadd.f32 %v6707_v34, %v6546_v42 }
 0x8f0   :  { %v6548_v10 = vpop.f32.mrf.mxu1 }
 0x8f1   :  { %v7267_v39 = vrot.slane %v7266_v53, 4  ;;  %7279 = vst [vmem:[%s12605_s7 + $0x28] sm:$0xc] %v7266_v53  ;;  %v6772_v4 = vadd.f32 %v6708_v32, %v12443_v8 }
 0x8f2   :  { %7003 = vst [vmem:[#allocation4 + $0x188] sm:$0xff] %v6947_v24 }
 0x8f3   :  { %v7281_v23 = vsel %vm12202_vm11, %v7267_v39, %v7280_v58  ;;  %v6832_v2 = vmul.f32 %v12350_v12, %v6772_v4 }
 0x8f4   :  { %7282 = vst [vmem:[%s12605_s7 + $0x2c] sm:$0x3] %v7281_v23 }
 0x8f5   :  { %v6892_v46 = vadd.f32 %v12355_v36, %v6832_v2 }
 0x8f6   :  { %v6709_v37 = vpop.f32.mrf.mxu3 }
 0x8f7   :  { %v6948_v19 = vmax.f32 %v6892_v46, 0.0  ;;  %v6710_v13 = vadd.f32 %v6709_v37, %v6548_v10  ;;  %v7341_v37 = vld [vmem:[%s12605_s7 + $0x34] sm:$0x1] }
 0x8f8   :  { %v6551_v40 = vpop.f32.mrf.mxu1 }
 0x8f9   :  { %7004 = vst [vmem:[#allocation4 + $0x190] sm:$0xff] %v6948_v19  ;;  %v6773_v61 = vadd.f32 %v6710_v13, %v12451_v21  ;;  %v7058_v44 = vld [vmem:[#allocation4 + $0x180] ss:$2 sm:$0xff]  ;;  %v7114_v62 = vld [vmem:[#allocation4 + $0x181] ss:$2 sm:$0xff] }
 0x8fa   :  { %v7145_v55 = vmax.f32 %v7058_v44, %v7114_v62 }
 0x8fb   :  { %v6833_v8 = vmul.f32 %v12350_v12, %v6773_v61  ;;  %v7316_v42 = vld [vmem:[%s12605_s7 + $0x2c] sm:$0xe] }
 0x8fd   :  { %v6893_v18 = vadd.f32 %v12355_v36, %v6833_v8 }
 0x8fe   :  { %v6712_v52 = vpop.f32.mrf.mxu3 }
 0x8ff   :  { %v6949_v14 = vmax.f32 %v6893_v18, 0.0  ;;  %v6713_v9 = vadd.f32 %v6712_v52, %v6551_v40 }
 0x900   :  { %v6553_v6 = vpop.f32.mrf.mxu1 }
 0x901   :  { %7005 = vst [vmem:[#allocation4 + $0x198] sm:$0xff] %v6949_v14  ;;  %v6774_v29 = vadd.f32 %v6713_v9, %v12465_v48 }
 0x903   :  { %v6834_v49 = vmul.f32 %v12350_v12, %v6774_v29 }
 0x905   :  { %v6894_v54 = vadd.f32 %v12355_v36, %v6834_v49 }
 0x906   :  { %v6714_v51 = vpop.f32.mrf.mxu3 }
 0x907   :  { %v6950_v22 = vmax.f32 %v6894_v54, 0.0  ;;  %v6715_v21 = vadd.f32 %v6714_v51, %v6553_v6 }
 0x908   :  { %v7060_v11 = vld [vmem:[#allocation4 + $0x190] ss:$2 sm:$0xff]  ;;  %v7116_v1 = vld [vmem:[#allocation4 + $0x191] ss:$2 sm:$0xff]  ;;  %v6556_v16 = vpop.f32.mrf.mxu1 }
 0x909   :  { %v7146_v59 = vmax.f32 %v7060_v11, %v7116_v1  ;;  %7006 = vst [vmem:[#allocation4 + $0x1a0] sm:$0xff] %v6950_v22  ;;  %v6775_v3 = vadd.f32 %v6715_v21, %v12481_v17 }
 0x90b   :  { %v7284_v7 = vmax.f32 %v7145_v55, %v7146_v59  ;;  %v6835_v48 = vmul.f32 %v12350_v12, %v6775_v3 }
 0x90d   :  { %v7286_v43 = vpack.c.bf16 %v7284_v7, %v7284_v7  ;;  %v6895_v35 = vadd.f32 %v12355_v36, %v6835_v48 }
 0x90e   :  { %v6717_v26 = vpop.f32.mrf.mxu3 }
 0x90f   :  { %v7297_v50 = vshrl.u32 %v7286_v43, 16  ;;  %v7300_v47 = vshll.u32 %v7286_v43, 16  ;;  %v6951_v28 = vmax.f32 %v6895_v35, 0.0  ;;  %v6718_v30 = vadd.f32 %v6717_v26, %v6556_v16 }
 0x910   :  { %v6558_v5 = vpop.f32.mrf.mxu1 }
 0x911   :  { %v7299_v41 = vrot.slane %v7297_v50, 6  ;;  %v7302_v57 = vrot.slane %v7300_v47, 7  ;;  %7007 = vst [vmem:[#allocation4 + $0x1a8] sm:$0xff] %v6951_v28  ;;  %v6776_v0 = vadd.f32 %v6718_v30, %v12489_v20 }
 0x913   :  { %v7303_v25 = vor.u32 %v7302_v57, %v7299_v41  ;;  %v6836_v17 = vmul.f32 %v12350_v12, %v6776_v0 }
 0x915   :  { %v7304_v31 = vrot.slane %v7303_v25, 4  ;;  %v7317_v45 = vsel %vm12262_vm2, %v7303_v25, %v7316_v42  ;;  %v6896_v27 = vadd.f32 %v12355_v36, %v6836_v17 }
 0x916   :  { %7318 = vst [vmem:[%s12605_s7 + $0x2c] sm:$0xe] %v7317_v45  ;;  %v6719_v33 = vpop.f32.mrf.mxu3 }
 0x917   :  { %7319 = vst [vmem:[%s12605_s7 + $0x30] sm:$0x1] %v7304_v31  ;;  %v6952_v20 = vmax.f32 %v6896_v27, 0.0  ;;  %v6720_v56 = vadd.f32 %v6719_v33, %v6558_v5 }
 0x918   :  { %v7062_v24 = vld [vmem:[#allocation4 + $0x1a0] ss:$2 sm:$0xff]  ;;  %v7118_v32 = vld [vmem:[#allocation4 + $0x1a1] ss:$2 sm:$0xff] }
 0x919   :  { %7008 = vst [vmem:[#allocation4 + $0x1b0] sm:$0xff] %v6952_v20  ;;  %v6777_v63 = vadd.f32 %v6720_v56, %v12497_v38  ;;  %v7147_v39 = vmax.f32 %v7062_v24, %v7118_v32 }
 0x91b   :  { %v6837_v60 = vmul.f32 %v12350_v12, %v6777_v63 }
 0x91d   :  { %v6897_v34 = vadd.f32 %v12355_v36, %v6837_v60 }
 0x91f   :  { %v6953_v53 = vmax.f32 %v6897_v34, 0.0 }
 0x921   :  { %7009 = vst [vmem:[#allocation4 + $0x1b8] sm:$0xff] %v6953_v53 }
 0x928   :  { %v7064_v58 = vld [vmem:[#allocation4 + $0x1b0] ss:$2 sm:$0xff]  ;;  %v7120_v10 = vld [vmem:[#allocation4 + $0x1b1] ss:$2 sm:$0xff] }
 0x929   :  { %v7148_v4 = vmax.f32 %v7064_v58, %v7120_v10 }
 0x92b   :  { %v7321_v23 = vmax.f32 %v7147_v39, %v7148_v4 }
 0x92d   :  { %v7323_v2 = vpack.c.bf16 %v7321_v23, %v7321_v23 }
 0x92f   :  { %v7328_v46 = vrot.slane %v7323_v2, 7 }
 0x931   :  { %v7329_v38 = vrot.slane %v7328_v46, 4  ;;  %7340 = vst [vmem:[%s12605_s7 + $0x30] sm:$0xe] %v7328_v46 }
 0x933   :  { %v7342_v12 = vsel %vm12316_vm9, %v7329_v38, %v7341_v37 }
 0x934   :  { %7343 = vst [vmem:[%s12605_s7 + $0x34] sm:$0x1] %v7342_v12 }
 0x935   :  { %7348 = vsyncpa [#allocation6], 1 }
 0x936   :  { %7349 = vsyncpa [#allocation8], 1 }
 0x937   :  { %7350 = vsyncpa [#allocation11], 1 }
 0x938   :  { %7351 = vsyncpa [#allocation14], 1 }

</bundles_post_ra>
